<compile_context>
chip_gen: v7x
topology: tpu7x:2x2x1
jax: 0.10.0
libtpu: 0.0.40
codegen_flags: <defaults>
</compile_context>

<pallas_src>
import jax
import jax.numpy as jnp
from jax.experimental import pallas as pl
from jax.experimental.pallas import tpu as pltpu

N = 16        # number of graph nodes
F_IN = 32     # input feature dim (lazy `-1` in GATv2Conv(-1, 512))
HID = 512     # hidden / output dim
LANE = 128    # lane-width chunk of HID for the attention reduce
IBLK = 8      # destination-node (i) block: (IBLK, N, LANE) f32 = 16 vregs


def _leaky(z, slope):
    # where-free form: max(z,0) + slope*min(z,0)
    return jnp.maximum(z, 0.0) + slope * jnp.minimum(z, 0.0)


def sdh_kernel(x_ref, mask_ref, vec_ref,
               wg1_ref, wg2_ref, wg3_ref, wlin_ref,
               out_ref,
               wg1_v, wg2_v, wg3_v, wlin_v, sem):
    hbm = (wg1_ref, wg2_ref, wg3_ref, wlin_ref)
    vmem = (wg1_v, wg2_v, wg3_v, wlin_v)

    # Issue all 4 weight DMAs (HBM -> VMEM) up front, in use order; wait on
    # each only right before its stage so later copies overlap earlier compute.
    copies = [pltpu.make_async_copy(h, v, sem.at[i])
              for i, (h, v) in enumerate(zip(hbm, vmem))]
    for cp in copies:
        cp.start()

    # --- non-weight prep BEFORE the first wait (hides the GAT1 weight DMA) ---
    x = x_ref[...]                               # (N, F_IN) f32 activations
    x_bf = x.astype(jnp.bfloat16)
    vecs = vec_ref[...]                          # (16, HID) f32 packed vectors
    # Additive attention mask: 0 where edge j->i exists, -1e30 otherwise.
    mask_bias = jnp.where(mask_ref[...] > 0.0,
                          jnp.float32(0.0), jnp.float32(-1e30))   # (N, N)

    # ---- 3x (GATv2Conv -> Tanh) ----
    for li in range(3):
        copies[li].wait()
        w = vmem[li][...]                        # (Fin, 2*HID) bf16 = [Wl | Wr]
        r = 4 * li
        bl = vecs[r + 0:r + 1, :]
        br = vecs[r + 1:r + 2, :]
        att = vecs[r + 2:r + 3, :]
        bout = vecs[r + 3:r + 4, :]

        # Fused projection: one bf16 GEMM producing [xl | xr], f32 accumulate.
        xcat = jnp.dot(x_bf, w, preferred_element_type=jnp.float32)  # (N,2*HID)
        xl = xcat[:, :HID] + bl
        xr = xcat[:, HID:] + br

        # e[i, j] = att . LeakyReLU(xl[j] + xr[i], 0.2), computed in 8-row
        # i-blocks. Products are accumulated lane-wise (VPU) across the HID
        # chunks; a single cross-lane reduce (XLU) per i-block.
        e_blocks = []
        for ib in range(N // IBLK):
            xr_b = xr[ib * IBLK:(ib + 1) * IBLK, :]          # (IBLK, HID)
            acc = jnp.zeros((IBLK, N, LANE), jnp.float32)
            for c in range(HID // LANE):
                lo = c * LANE
                z = xl[None, :, lo:lo + LANE] + xr_b[:, None, lo:lo + LANE]
                acc = acc + _leaky(z, 0.2) * att[None, :, lo:lo + LANE]
            e_blocks.append(jnp.sum(acc, axis=-1))            # (IBLK, N)
        e = jnp.concatenate(e_blocks, axis=0) + mask_bias     # (N, N)

        # Masked softmax over source nodes j (self-loops guarantee >=1 valid);
        # exact normalization (tiny (N,1) divide).
        e = e - jnp.max(e, axis=1, keepdims=True)
        p = jnp.exp(e)                           # masked entries underflow to 0
        alpha = p / jnp.sum(p, axis=1, keepdims=True)

        # Aggregation matmul in bf16 (single-pass MXU), f32 accumulate.
        agg = jnp.dot(alpha.astype(jnp.bfloat16), xl.astype(jnp.bfloat16),
                      preferred_element_type=jnp.float32)
        x = jnp.tanh(agg + bout)
        x_bf = x.astype(jnp.bfloat16)

    # ---- Linear -> LeakyReLU(0.01) -> Linear -> LeakyReLU(0.01) -> Linear ----
    copies[3].wait()                             # merged (HID, 3*HID) bf16 slab
    for li in range(3):
        w = wlin_v[:, li * HID:(li + 1) * HID]   # static slice of the ref
        b = vecs[12 + li:13 + li, :]
        x = jnp.dot(x_bf, w, preferred_element_type=jnp.float32) + b
        if li < 2:
            x = _leaky(x, 0.01)
            x_bf = x.astype(jnp.bfloat16)

    # ---- Softmax over dim 0 (across nodes, per feature column), exact ----
    x = x - jnp.max(x, axis=0, keepdims=True)
    ex = jnp.exp(x)
    out_ref[...] = ex / jnp.sum(ex, axis=0, keepdims=True)


def init_params(key):
    """Deterministic synthetic parameters (glorot-ish scale), canonical layout:
    per GAT layer [Wl, bl, Wr, br, att, bias_out], then 3x [W, b] for Linear."""
    params = []
    gat_dims = [(F_IN, HID), (HID, HID), (HID, HID)]
    for fin, fout in gat_dims:
        key, *ks = jax.random.split(key, 7)
        sl = 1.0 / jnp.sqrt(jnp.float32(fin))
        params += [
            jax.random.normal(ks[0], (fin, fout), jnp.float32) * sl,      # Wl
            jax.random.normal(ks[1], (1, fout), jnp.float32) * 0.01,      # bl
            jax.random.normal(ks[2], (fin, fout), jnp.float32) * sl,      # Wr
            jax.random.normal(ks[3], (1, fout), jnp.float32) * 0.01,      # br
            jax.random.normal(ks[4], (1, fout), jnp.float32)
            * (1.0 / jnp.sqrt(jnp.float32(fout))),                        # att
            jax.random.normal(ks[5], (1, fout), jnp.float32) * 0.01,      # bias
        ]
    for _ in range(3):
        key, k1, k2 = jax.random.split(key, 3)
        sl = 1.0 / jnp.sqrt(jnp.float32(HID))
        params.append(jax.random.normal(k1, (HID, HID), jnp.float32) * sl)  # W
        params.append(jax.random.normal(k2, (1, HID), jnp.float32) * 0.01)  # b
    return params


def _pack_params(params):
    """Fuse Wl|Wr per GAT layer (bf16), merge the 3 Linear weights into one
    (HID, 3*HID) bf16 slab, and pack all (1, HID) vectors into one (16, HID)
    f32 array."""
    p = list(params)
    vec_rows, w_gat, w_lin = [], [], []
    for li in range(3):
        wl, bl, wr, br, att, bout = p[li * 6:(li + 1) * 6]
        w_gat.append(jnp.concatenate([wl, wr], axis=1).astype(jnp.bfloat16))
        vec_rows += [bl, br, att, bout]
    for li in range(3):
        w, b = p[18 + 2 * li: 20 + 2 * li]
        w_lin.append(w)
        vec_rows.append(b)
    w_lin_merged = jnp.concatenate(w_lin, axis=1).astype(jnp.bfloat16)
    vec_rows.append(jnp.zeros((1, HID), jnp.float32))   # pad to 16 rows
    vecs = jnp.concatenate(vec_rows, axis=0)            # (16, HID) f32
    return vecs, w_gat, w_lin_merged


def super_deep_ham(x, edge_index, params):
    n = x.shape[0]
    src, dst = edge_index[0], edge_index[1]
    # dense adjacency mask[i, j] = 1 iff edge j -> i exists; add self loops.
    mask = jnp.zeros((n, n), jnp.float32).at[dst, src].set(1.0)
    mask = jnp.maximum(mask, jnp.eye(n, dtype=jnp.float32))

    vecs, w_gat, w_lin = _pack_params(params)
    inputs = [x.astype(jnp.float32), mask, vecs] + w_gat + [w_lin]

    vmem_spec = pl.BlockSpec(memory_space=pltpu.MemorySpace.VMEM)
    hbm_spec = pl.BlockSpec(memory_space=pl.ANY)   # weights stay in HBM; DMA'd manually

    return pl.pallas_call(
        sdh_kernel,
        out_shape=jax.ShapeDtypeStruct((n, HID), jnp.float32),
        in_specs=[vmem_spec, vmem_spec, vmem_spec] + [hbm_spec] * 4,
        out_specs=vmem_spec,
        scratch_shapes=[
            pltpu.VMEM((F_IN, 2 * HID), jnp.bfloat16),   # GAT1 fused weight
            pltpu.VMEM((HID, 2 * HID), jnp.bfloat16),    # GAT2 fused weight
            pltpu.VMEM((HID, 2 * HID), jnp.bfloat16),    # GAT3 fused weight
            pltpu.VMEM((HID, 3 * HID), jnp.bfloat16),    # merged Linear weights
            pltpu.SemaphoreType.DMA((4,)),
        ],
        compiler_params=pltpu.CompilerParams(
            vmem_limit_bytes=16 * 1024 * 1024),   # ~3.6 MiB used; fits all gens
    )(*inputs)


if __name__ == "__main__":
    key = jax.random.PRNGKey(0)
    kx, kp = jax.random.split(key)

    x = jax.random.normal(kx, (N, F_IN), jnp.float32)
    # deterministic bidirectional ring graph: edge_index shape (2, 2N)
    idx = jnp.arange(N, dtype=jnp.int32)
    src = jnp.concatenate([idx, (idx + 1) % N])
    dst = jnp.concatenate([(idx + 1) % N, idx])
    edge_index = jnp.stack([src, dst])

    params = init_params(kp)
    out = super_deep_ham(x, edge_index, params)
    out = jax.block_until_ready(out)

    assert out.shape == (N, HID)
    assert bool(jnp.all(jnp.isfinite(out)))
    # each feature column is a softmax over nodes -> columns sum to ~1
    assert bool(jnp.allclose(jnp.sum(out, axis=0), 1.0, atol=1e-3))
    print("KERNEL_OK")
</pallas_src>

<mosaic_0001>
module attributes {stable_mosaic.version = 11 : i64} {
  func.func @sdh_kernel(%arg0: memref<16x32xf32, #tpu.memory_space<vmem>>, %arg1: memref<16x16xf32, #tpu.memory_space<vmem>>, %arg2: memref<16x512xf32, #tpu.memory_space<vmem>>, %arg3: memref<32x1024xbf16, #tpu.memory_space<any>>, %arg4: memref<512x1024xbf16, #tpu.memory_space<any>>, %arg5: memref<512x1024xbf16, #tpu.memory_space<any>>, %arg6: memref<512x1536xbf16, #tpu.memory_space<any>>, %arg7: memref<16x512xf32, #tpu.memory_space<vmem>>, %arg8: memref<32x1024xbf16, #tpu.memory_space<vmem>>, %arg9: memref<512x1024xbf16, #tpu.memory_space<vmem>>, %arg10: memref<512x1024xbf16, #tpu.memory_space<vmem>>, %arg11: memref<512x1536xbf16, #tpu.memory_space<vmem>>, %arg12: memref<4x!tpu.dma_semaphore, #tpu.memory_space<semaphore_mem>>) attributes {dimension_semantics = [], scalar_prefetch = 0 : i64, scratch_operands = 5 : i64, tpu.core_type = #tpu.core_type<tc>} {
    %c0_i32 = arith.constant 0 : i32
    %0 = tpu.memref_slice %arg12[%c0_i32] : memref<4x!tpu.dma_semaphore, #tpu.memory_space<semaphore_mem>> -> memref<1x!tpu.dma_semaphore, #tpu.memory_space<semaphore_mem>>
    %1 = tpu.memref_squeeze %0 : memref<1x!tpu.dma_semaphore, #tpu.memory_space<semaphore_mem>> -> memref<!tpu.dma_semaphore, #tpu.memory_space<semaphore_mem>>
    tpu.enqueue_dma source(%arg3 : memref<32x1024xbf16, #tpu.memory_space<any>>) target(%arg8 : memref<32x1024xbf16, #tpu.memory_space<vmem>>) target_semaphore(%1 : memref<!tpu.dma_semaphore, #tpu.memory_space<semaphore_mem>>)
    %c1_i32 = arith.constant 1 : i32
    %2 = tpu.memref_slice %arg12[%c1_i32] : memref<4x!tpu.dma_semaphore, #tpu.memory_space<semaphore_mem>> -> memref<1x!tpu.dma_semaphore, #tpu.memory_space<semaphore_mem>>
    %3 = tpu.memref_squeeze %2 : memref<1x!tpu.dma_semaphore, #tpu.memory_space<semaphore_mem>> -> memref<!tpu.dma_semaphore, #tpu.memory_space<semaphore_mem>>
    tpu.enqueue_dma source(%arg4 : memref<512x1024xbf16, #tpu.memory_space<any>>) target(%arg9 : memref<512x1024xbf16, #tpu.memory_space<vmem>>) target_semaphore(%3 : memref<!tpu.dma_semaphore, #tpu.memory_space<semaphore_mem>>)
    %c2_i32 = arith.constant 2 : i32
    %4 = tpu.memref_slice %arg12[%c2_i32] : memref<4x!tpu.dma_semaphore, #tpu.memory_space<semaphore_mem>> -> memref<1x!tpu.dma_semaphore, #tpu.memory_space<semaphore_mem>>
    %5 = tpu.memref_squeeze %4 : memref<1x!tpu.dma_semaphore, #tpu.memory_space<semaphore_mem>> -> memref<!tpu.dma_semaphore, #tpu.memory_space<semaphore_mem>>
    tpu.enqueue_dma source(%arg5 : memref<512x1024xbf16, #tpu.memory_space<any>>) target(%arg10 : memref<512x1024xbf16, #tpu.memory_space<vmem>>) target_semaphore(%5 : memref<!tpu.dma_semaphore, #tpu.memory_space<semaphore_mem>>)
    %c3_i32 = arith.constant 3 : i32
    %6 = tpu.memref_slice %arg12[%c3_i32] : memref<4x!tpu.dma_semaphore, #tpu.memory_space<semaphore_mem>> -> memref<1x!tpu.dma_semaphore, #tpu.memory_space<semaphore_mem>>
    %7 = tpu.memref_squeeze %6 : memref<1x!tpu.dma_semaphore, #tpu.memory_space<semaphore_mem>> -> memref<!tpu.dma_semaphore, #tpu.memory_space<semaphore_mem>>
    tpu.enqueue_dma source(%arg6 : memref<512x1536xbf16, #tpu.memory_space<any>>) target(%arg11 : memref<512x1536xbf16, #tpu.memory_space<vmem>>) target_semaphore(%7 : memref<!tpu.dma_semaphore, #tpu.memory_space<semaphore_mem>>)
    %c0 = arith.constant 0 : index
    %c0_0 = arith.constant 0 : index
    %8 = vector.load %arg0[%c0, %c0_0] : memref<16x32xf32, #tpu.memory_space<vmem>>, vector<16x32xf32>
    %9 = arith.truncf %8 : vector<16x32xf32> to vector<16x32xbf16>
    %c0_1 = arith.constant 0 : index
    %c0_2 = arith.constant 0 : index
    %10 = vector.load %arg2[%c0_1, %c0_2] : memref<16x512xf32, #tpu.memory_space<vmem>>, vector<16x512xf32>
    %c0_3 = arith.constant 0 : index
    %c0_4 = arith.constant 0 : index
    %11 = vector.load %arg1[%c0_3, %c0_4] : memref<16x16xf32, #tpu.memory_space<vmem>>, vector<16x16xf32>
    %cst = arith.constant 0.000000e+00 : f32
    %12 = vector.broadcast %cst : f32 to vector<16x16xf32>
    %13 = arith.cmpf ogt, %11, %12 : vector<16x16xf32>
    %cst_5 = arith.constant 0.000000e+00 : f32
    %cst_6 = arith.constant -1.000000e+30 : f32
    %14 = vector.broadcast %cst_5 : f32 to vector<16x16xf32>
    %15 = vector.broadcast %cst_6 : f32 to vector<16x16xf32>
    %16 = arith.select %13, %14, %15 : vector<16x16xi1>, vector<16x16xf32>
    %c0_i32_7 = arith.constant 0 : i32
    %17 = tpu.memref_slice %arg12[%c0_i32_7] : memref<4x!tpu.dma_semaphore, #tpu.memory_space<semaphore_mem>> -> memref<1x!tpu.dma_semaphore, #tpu.memory_space<semaphore_mem>>
    %18 = tpu.memref_squeeze %17 : memref<1x!tpu.dma_semaphore, #tpu.memory_space<semaphore_mem>> -> memref<!tpu.dma_semaphore, #tpu.memory_space<semaphore_mem>>
    tpu.wait_dma2 semaphore(%18 : memref<!tpu.dma_semaphore, #tpu.memory_space<semaphore_mem>>) src(%arg3 : memref<32x1024xbf16, #tpu.memory_space<any>>) dst(%arg8 : memref<32x1024xbf16, #tpu.memory_space<vmem>>)
    %c0_8 = arith.constant 0 : index
    %c0_9 = arith.constant 0 : index
    %19 = vector.load %arg8[%c0_8, %c0_9] : memref<32x1024xbf16, #tpu.memory_space<vmem>>, vector<32x1024xbf16>
    %20 = vector.extract_strided_slice %10 {offsets = [0, 0], sizes = [1, 512], strides = [1, 1]} : vector<16x512xf32> to vector<1x512xf32>
    %21 = vector.extract_strided_slice %10 {offsets = [1, 0], sizes = [1, 512], strides = [1, 1]} : vector<16x512xf32> to vector<1x512xf32>
    %22 = vector.extract_strided_slice %10 {offsets = [2, 0], sizes = [1, 512], strides = [1, 1]} : vector<16x512xf32> to vector<1x512xf32>
    %23 = vector.extract_strided_slice %10 {offsets = [3, 0], sizes = [1, 512], strides = [1, 1]} : vector<16x512xf32> to vector<1x512xf32>
    %cst_10 = arith.constant dense<0.000000e+00> : vector<16x1024xf32>
    %24 = tpu.matmul %9, %19, %cst_10 {dimension_numbers = #tpu.dot_dimension_numbers<[1], [0], [0], [1], [0, 0, 1, 1], [], []>} : vector<16x32xbf16>, vector<32x1024xbf16>, vector<16x1024xf32> -> vector<16x1024xf32>
    %25 = vector.extract_strided_slice %24 {offsets = [0, 0], sizes = [16, 512], strides = [1, 1]} : vector<16x1024xf32> to vector<16x512xf32>
    %26 = vector.broadcast %20 : vector<1x512xf32> to vector<16x512xf32>
    %27 = arith.addf %25, %26 : vector<16x512xf32>
    %28 = vector.extract_strided_slice %24 {offsets = [0, 512], sizes = [16, 512], strides = [1, 1]} : vector<16x1024xf32> to vector<16x512xf32>
    %29 = vector.broadcast %21 : vector<1x512xf32> to vector<16x512xf32>
    %30 = arith.addf %28, %29 : vector<16x512xf32>
    %31 = vector.extract_strided_slice %30 {offsets = [0, 0], sizes = [8, 512], strides = [1, 1]} : vector<16x512xf32> to vector<8x512xf32>
    %cst_11 = arith.constant 0.000000e+00 : f32
    %32 = vector.broadcast %cst_11 : f32 to vector<8x16x128xf32>
    %33 = vector.extract_strided_slice %27 {offsets = [0, 0], sizes = [16, 128], strides = [1, 1]} : vector<16x512xf32> to vector<16x128xf32>
    %34 = vector.shape_cast %33 : vector<16x128xf32> to vector<1x16x128xf32>
    %35 = vector.extract_strided_slice %31 {offsets = [0, 0], sizes = [8, 128], strides = [1, 1]} : vector<8x512xf32> to vector<8x128xf32>
    %36 = vector.shape_cast %35 : vector<8x128xf32> to vector<8x1x128xf32>
    %37 = vector.broadcast %34 : vector<1x16x128xf32> to vector<8x16x128xf32>
    %38 = vector.broadcast %36 : vector<8x1x128xf32> to vector<8x16x128xf32>
    %39 = arith.addf %37, %38 : vector<8x16x128xf32>
    %cst_12 = arith.constant 0.000000e+00 : f32
    %40 = vector.broadcast %cst_12 : f32 to vector<8x16x128xf32>
    %41 = arith.maximumf %39, %40 : vector<8x16x128xf32>
    %cst_13 = arith.constant 0.000000e+00 : f32
    %42 = vector.broadcast %cst_13 : f32 to vector<8x16x128xf32>
    %43 = arith.minimumf %39, %42 : vector<8x16x128xf32>
    %cst_14 = arith.constant 2.000000e-01 : f32
    %44 = vector.broadcast %cst_14 : f32 to vector<8x16x128xf32>
    %45 = arith.mulf %44, %43 : vector<8x16x128xf32>
    %46 = arith.addf %41, %45 : vector<8x16x128xf32>
    %47 = vector.extract_strided_slice %22 {offsets = [0, 0], sizes = [1, 128], strides = [1, 1]} : vector<1x512xf32> to vector<1x128xf32>
    %48 = vector.shape_cast %47 : vector<1x128xf32> to vector<1x1x128xf32>
    %49 = vector.broadcast %48 : vector<1x1x128xf32> to vector<8x16x128xf32>
    %50 = arith.mulf %46, %49 : vector<8x16x128xf32>
    %51 = arith.addf %32, %50 : vector<8x16x128xf32>
    %52 = vector.extract_strided_slice %27 {offsets = [0, 128], sizes = [16, 128], strides = [1, 1]} : vector<16x512xf32> to vector<16x128xf32>
    %53 = vector.shape_cast %52 : vector<16x128xf32> to vector<1x16x128xf32>
    %54 = vector.extract_strided_slice %31 {offsets = [0, 128], sizes = [8, 128], strides = [1, 1]} : vector<8x512xf32> to vector<8x128xf32>
    %55 = vector.shape_cast %54 : vector<8x128xf32> to vector<8x1x128xf32>
    %56 = vector.broadcast %53 : vector<1x16x128xf32> to vector<8x16x128xf32>
    %57 = vector.broadcast %55 : vector<8x1x128xf32> to vector<8x16x128xf32>
    %58 = arith.addf %56, %57 : vector<8x16x128xf32>
    %cst_15 = arith.constant 0.000000e+00 : f32
    %59 = vector.broadcast %cst_15 : f32 to vector<8x16x128xf32>
    %60 = arith.maximumf %58, %59 : vector<8x16x128xf32>
    %cst_16 = arith.constant 0.000000e+00 : f32
    %61 = vector.broadcast %cst_16 : f32 to vector<8x16x128xf32>
    %62 = arith.minimumf %58, %61 : vector<8x16x128xf32>
    %cst_17 = arith.constant 2.000000e-01 : f32
    %63 = vector.broadcast %cst_17 : f32 to vector<8x16x128xf32>
    %64 = arith.mulf %63, %62 : vector<8x16x128xf32>
    %65 = arith.addf %60, %64 : vector<8x16x128xf32>
    %66 = vector.extract_strided_slice %22 {offsets = [0, 128], sizes = [1, 128], strides = [1, 1]} : vector<1x512xf32> to vector<1x128xf32>
    %67 = vector.shape_cast %66 : vector<1x128xf32> to vector<1x1x128xf32>
    %68 = vector.broadcast %67 : vector<1x1x128xf32> to vector<8x16x128xf32>
    %69 = arith.mulf %65, %68 : vector<8x16x128xf32>
    %70 = arith.addf %51, %69 : vector<8x16x128xf32>
    %71 = vector.extract_strided_slice %27 {offsets = [0, 256], sizes = [16, 128], strides = [1, 1]} : vector<16x512xf32> to vector<16x128xf32>
    %72 = vector.shape_cast %71 : vector<16x128xf32> to vector<1x16x128xf32>
    %73 = vector.extract_strided_slice %31 {offsets = [0, 256], sizes = [8, 128], strides = [1, 1]} : vector<8x512xf32> to vector<8x128xf32>
    %74 = vector.shape_cast %73 : vector<8x128xf32> to vector<8x1x128xf32>
    %75 = vector.broadcast %72 : vector<1x16x128xf32> to vector<8x16x128xf32>
    %76 = vector.broadcast %74 : vector<8x1x128xf32> to vector<8x16x128xf32>
    %77 = arith.addf %75, %76 : vector<8x16x128xf32>
    %cst_18 = arith.constant 0.000000e+00 : f32
    %78 = vector.broadcast %cst_18 : f32 to vector<8x16x128xf32>
    %79 = arith.maximumf %77, %78 : vector<8x16x128xf32>
    %cst_19 = arith.constant 0.000000e+00 : f32
    %80 = vector.broadcast %cst_19 : f32 to vector<8x16x128xf32>
    %81 = arith.minimumf %77, %80 : vector<8x16x128xf32>
    %cst_20 = arith.constant 2.000000e-01 : f32
    %82 = vector.broadcast %cst_20 : f32 to vector<8x16x128xf32>
    %83 = arith.mulf %82, %81 : vector<8x16x128xf32>
    %84 = arith.addf %79, %83 : vector<8x16x128xf32>
    %85 = vector.extract_strided_slice %22 {offsets = [0, 256], sizes = [1, 128], strides = [1, 1]} : vector<1x512xf32> to vector<1x128xf32>
    %86 = vector.shape_cast %85 : vector<1x128xf32> to vector<1x1x128xf32>
    %87 = vector.broadcast %86 : vector<1x1x128xf32> to vector<8x16x128xf32>
    %88 = arith.mulf %84, %87 : vector<8x16x128xf32>
    %89 = arith.addf %70, %88 : vector<8x16x128xf32>
    %90 = vector.extract_strided_slice %27 {offsets = [0, 384], sizes = [16, 128], strides = [1, 1]} : vector<16x512xf32> to vector<16x128xf32>
    %91 = vector.shape_cast %90 : vector<16x128xf32> to vector<1x16x128xf32>
    %92 = vector.extract_strided_slice %31 {offsets = [0, 384], sizes = [8, 128], strides = [1, 1]} : vector<8x512xf32> to vector<8x128xf32>
    %93 = vector.shape_cast %92 : vector<8x128xf32> to vector<8x1x128xf32>
    %94 = vector.broadcast %91 : vector<1x16x128xf32> to vector<8x16x128xf32>
    %95 = vector.broadcast %93 : vector<8x1x128xf32> to vector<8x16x128xf32>
    %96 = arith.addf %94, %95 : vector<8x16x128xf32>
    %cst_21 = arith.constant 0.000000e+00 : f32
    %97 = vector.broadcast %cst_21 : f32 to vector<8x16x128xf32>
    %98 = arith.maximumf %96, %97 : vector<8x16x128xf32>
    %cst_22 = arith.constant 0.000000e+00 : f32
    %99 = vector.broadcast %cst_22 : f32 to vector<8x16x128xf32>
    %100 = arith.minimumf %96, %99 : vector<8x16x128xf32>
    %cst_23 = arith.constant 2.000000e-01 : f32
    %101 = vector.broadcast %cst_23 : f32 to vector<8x16x128xf32>
    %102 = arith.mulf %101, %100 : vector<8x16x128xf32>
    %103 = arith.addf %98, %102 : vector<8x16x128xf32>
    %104 = vector.extract_strided_slice %22 {offsets = [0, 384], sizes = [1, 128], strides = [1, 1]} : vector<1x512xf32> to vector<1x128xf32>
    %105 = vector.shape_cast %104 : vector<1x128xf32> to vector<1x1x128xf32>
    %106 = vector.broadcast %105 : vector<1x1x128xf32> to vector<8x16x128xf32>
    %107 = arith.mulf %103, %106 : vector<8x16x128xf32>
    %108 = arith.addf %89, %107 : vector<8x16x128xf32>
    %cst_24 = arith.constant dense<0.000000e+00> : vector<8x16xf32>
    %109 = vector.multi_reduction <add>, %108, %cst_24 [2] : vector<8x16x128xf32> to vector<8x16xf32>
    %110 = vector.extract_strided_slice %30 {offsets = [8, 0], sizes = [8, 512], strides = [1, 1]} : vector<16x512xf32> to vector<8x512xf32>
    %cst_25 = arith.constant 0.000000e+00 : f32
    %111 = vector.broadcast %cst_25 : f32 to vector<8x16x128xf32>
    %112 = vector.extract_strided_slice %27 {offsets = [0, 0], sizes = [16, 128], strides = [1, 1]} : vector<16x512xf32> to vector<16x128xf32>
    %113 = vector.shape_cast %112 : vector<16x128xf32> to vector<1x16x128xf32>
    %114 = vector.extract_strided_slice %110 {offsets = [0, 0], sizes = [8, 128], strides = [1, 1]} : vector<8x512xf32> to vector<8x128xf32>
    %115 = vector.shape_cast %114 : vector<8x128xf32> to vector<8x1x128xf32>
    %116 = vector.broadcast %113 : vector<1x16x128xf32> to vector<8x16x128xf32>
    %117 = vector.broadcast %115 : vector<8x1x128xf32> to vector<8x16x128xf32>
    %118 = arith.addf %116, %117 : vector<8x16x128xf32>
    %cst_26 = arith.constant 0.000000e+00 : f32
    %119 = vector.broadcast %cst_26 : f32 to vector<8x16x128xf32>
    %120 = arith.maximumf %118, %119 : vector<8x16x128xf32>
    %cst_27 = arith.constant 0.000000e+00 : f32
    %121 = vector.broadcast %cst_27 : f32 to vector<8x16x128xf32>
    %122 = arith.minimumf %118, %121 : vector<8x16x128xf32>
    %cst_28 = arith.constant 2.000000e-01 : f32
    %123 = vector.broadcast %cst_28 : f32 to vector<8x16x128xf32>
    %124 = arith.mulf %123, %122 : vector<8x16x128xf32>
    %125 = arith.addf %120, %124 : vector<8x16x128xf32>
    %126 = vector.extract_strided_slice %22 {offsets = [0, 0], sizes = [1, 128], strides = [1, 1]} : vector<1x512xf32> to vector<1x128xf32>
    %127 = vector.shape_cast %126 : vector<1x128xf32> to vector<1x1x128xf32>
    %128 = vector.broadcast %127 : vector<1x1x128xf32> to vector<8x16x128xf32>
    %129 = arith.mulf %125, %128 : vector<8x16x128xf32>
    %130 = arith.addf %111, %129 : vector<8x16x128xf32>
    %131 = vector.extract_strided_slice %27 {offsets = [0, 128], sizes = [16, 128], strides = [1, 1]} : vector<16x512xf32> to vector<16x128xf32>
    %132 = vector.shape_cast %131 : vector<16x128xf32> to vector<1x16x128xf32>
    %133 = vector.extract_strided_slice %110 {offsets = [0, 128], sizes = [8, 128], strides = [1, 1]} : vector<8x512xf32> to vector<8x128xf32>
    %134 = vector.shape_cast %133 : vector<8x128xf32> to vector<8x1x128xf32>
    %135 = vector.broadcast %132 : vector<1x16x128xf32> to vector<8x16x128xf32>
    %136 = vector.broadcast %134 : vector<8x1x128xf32> to vector<8x16x128xf32>
    %137 = arith.addf %135, %136 : vector<8x16x128xf32>
    %cst_29 = arith.constant 0.000000e+00 : f32
    %138 = vector.broadcast %cst_29 : f32 to vector<8x16x128xf32>
    %139 = arith.maximumf %137, %138 : vector<8x16x128xf32>
    %cst_30 = arith.constant 0.000000e+00 : f32
    %140 = vector.broadcast %cst_30 : f32 to vector<8x16x128xf32>
    %141 = arith.minimumf %137, %140 : vector<8x16x128xf32>
    %cst_31 = arith.constant 2.000000e-01 : f32
    %142 = vector.broadcast %cst_31 : f32 to vector<8x16x128xf32>
    %143 = arith.mulf %142, %141 : vector<8x16x128xf32>
    %144 = arith.addf %139, %143 : vector<8x16x128xf32>
    %145 = vector.extract_strided_slice %22 {offsets = [0, 128], sizes = [1, 128], strides = [1, 1]} : vector<1x512xf32> to vector<1x128xf32>
    %146 = vector.shape_cast %145 : vector<1x128xf32> to vector<1x1x128xf32>
    %147 = vector.broadcast %146 : vector<1x1x128xf32> to vector<8x16x128xf32>
    %148 = arith.mulf %144, %147 : vector<8x16x128xf32>
    %149 = arith.addf %130, %148 : vector<8x16x128xf32>
    %150 = vector.extract_strided_slice %27 {offsets = [0, 256], sizes = [16, 128], strides = [1, 1]} : vector<16x512xf32> to vector<16x128xf32>
    %151 = vector.shape_cast %150 : vector<16x128xf32> to vector<1x16x128xf32>
    %152 = vector.extract_strided_slice %110 {offsets = [0, 256], sizes = [8, 128], strides = [1, 1]} : vector<8x512xf32> to vector<8x128xf32>
    %153 = vector.shape_cast %152 : vector<8x128xf32> to vector<8x1x128xf32>
    %154 = vector.broadcast %151 : vector<1x16x128xf32> to vector<8x16x128xf32>
    %155 = vector.broadcast %153 : vector<8x1x128xf32> to vector<8x16x128xf32>
    %156 = arith.addf %154, %155 : vector<8x16x128xf32>
    %cst_32 = arith.constant 0.000000e+00 : f32
    %157 = vector.broadcast %cst_32 : f32 to vector<8x16x128xf32>
    %158 = arith.maximumf %156, %157 : vector<8x16x128xf32>
    %cst_33 = arith.constant 0.000000e+00 : f32
    %159 = vector.broadcast %cst_33 : f32 to vector<8x16x128xf32>
    %160 = arith.minimumf %156, %159 : vector<8x16x128xf32>
    %cst_34 = arith.constant 2.000000e-01 : f32
    %161 = vector.broadcast %cst_34 : f32 to vector<8x16x128xf32>
    %162 = arith.mulf %161, %160 : vector<8x16x128xf32>
    %163 = arith.addf %158, %162 : vector<8x16x128xf32>
    %164 = vector.extract_strided_slice %22 {offsets = [0, 256], sizes = [1, 128], strides = [1, 1]} : vector<1x512xf32> to vector<1x128xf32>
    %165 = vector.shape_cast %164 : vector<1x128xf32> to vector<1x1x128xf32>
    %166 = vector.broadcast %165 : vector<1x1x128xf32> to vector<8x16x128xf32>
    %167 = arith.mulf %163, %166 : vector<8x16x128xf32>
    %168 = arith.addf %149, %167 : vector<8x16x128xf32>
    %169 = vector.extract_strided_slice %27 {offsets = [0, 384], sizes = [16, 128], strides = [1, 1]} : vector<16x512xf32> to vector<16x128xf32>
    %170 = vector.shape_cast %169 : vector<16x128xf32> to vector<1x16x128xf32>
    %171 = vector.extract_strided_slice %110 {offsets = [0, 384], sizes = [8, 128], strides = [1, 1]} : vector<8x512xf32> to vector<8x128xf32>
    %172 = vector.shape_cast %171 : vector<8x128xf32> to vector<8x1x128xf32>
    %173 = vector.broadcast %170 : vector<1x16x128xf32> to vector<8x16x128xf32>
    %174 = vector.broadcast %172 : vector<8x1x128xf32> to vector<8x16x128xf32>
    %175 = arith.addf %173, %174 : vector<8x16x128xf32>
    %cst_35 = arith.constant 0.000000e+00 : f32
    %176 = vector.broadcast %cst_35 : f32 to vector<8x16x128xf32>
    %177 = arith.maximumf %175, %176 : vector<8x16x128xf32>
    %cst_36 = arith.constant 0.000000e+00 : f32
    %178 = vector.broadcast %cst_36 : f32 to vector<8x16x128xf32>
    %179 = arith.minimumf %175, %178 : vector<8x16x128xf32>
    %cst_37 = arith.constant 2.000000e-01 : f32
    %180 = vector.broadcast %cst_37 : f32 to vector<8x16x128xf32>
    %181 = arith.mulf %180, %179 : vector<8x16x128xf32>
    %182 = arith.addf %177, %181 : vector<8x16x128xf32>
    %183 = vector.extract_strided_slice %22 {offsets = [0, 384], sizes = [1, 128], strides = [1, 1]} : vector<1x512xf32> to vector<1x128xf32>
    %184 = vector.shape_cast %183 : vector<1x128xf32> to vector<1x1x128xf32>
    %185 = vector.broadcast %184 : vector<1x1x128xf32> to vector<8x16x128xf32>
    %186 = arith.mulf %182, %185 : vector<8x16x128xf32>
    %187 = arith.addf %168, %186 : vector<8x16x128xf32>
    %cst_38 = arith.constant dense<0.000000e+00> : vector<8x16xf32>
    %188 = vector.multi_reduction <add>, %187, %cst_38 [2] : vector<8x16x128xf32> to vector<8x16xf32>
    %189 = tpu.concatenate %109, %188 in 0 : vector<8x16xf32>, vector<8x16xf32> -> vector<16x16xf32>
    %190 = arith.addf %189, %16 : vector<16x16xf32>
    %cst_39 = arith.constant dense<0xFF800000> : vector<16xf32>
    %191 = vector.multi_reduction <maximumf>, %190, %cst_39 [1] : vector<16x16xf32> to vector<16xf32>
    %192 = vector.shape_cast %191 : vector<16xf32> to vector<16x1xf32>
    %193 = vector.broadcast %192 : vector<16x1xf32> to vector<16x16xf32>
    %194 = arith.subf %190, %193 : vector<16x16xf32>
    %195 = math.exp %194 : vector<16x16xf32>
    %cst_40 = arith.constant dense<0.000000e+00> : vector<16xf32>
    %196 = vector.multi_reduction <add>, %195, %cst_40 [1] : vector<16x16xf32> to vector<16xf32>
    %197 = vector.shape_cast %196 : vector<16xf32> to vector<16x1xf32>
    %198 = vector.broadcast %197 : vector<16x1xf32> to vector<16x16xf32>
    %199 = arith.divf %195, %198 : vector<16x16xf32>
    %200 = arith.truncf %199 : vector<16x16xf32> to vector<16x16xbf16>
    %201 = arith.truncf %27 : vector<16x512xf32> to vector<16x512xbf16>
    %cst_41 = arith.constant dense<0.000000e+00> : vector<16x512xf32>
    %202 = tpu.matmul %200, %201, %cst_41 {dimension_numbers = #tpu.dot_dimension_numbers<[1], [0], [0], [1], [0, 0, 1, 1], [], []>} : vector<16x16xbf16>, vector<16x512xbf16>, vector<16x512xf32> -> vector<16x512xf32>
    %203 = vector.broadcast %23 : vector<1x512xf32> to vector<16x512xf32>
    %204 = arith.addf %202, %203 : vector<16x512xf32>
    %205 = math.tanh %204 : vector<16x512xf32>
    %206 = arith.truncf %205 : vector<16x512xf32> to vector<16x512xbf16>
    %c1_i32_42 = arith.constant 1 : i32
    %207 = tpu.memref_slice %arg12[%c1_i32_42] : memref<4x!tpu.dma_semaphore, #tpu.memory_space<semaphore_mem>> -> memref<1x!tpu.dma_semaphore, #tpu.memory_space<semaphore_mem>>
    %208 = tpu.memref_squeeze %207 : memref<1x!tpu.dma_semaphore, #tpu.memory_space<semaphore_mem>> -> memref<!tpu.dma_semaphore, #tpu.memory_space<semaphore_mem>>
    tpu.wait_dma2 semaphore(%208 : memref<!tpu.dma_semaphore, #tpu.memory_space<semaphore_mem>>) src(%arg4 : memref<512x1024xbf16, #tpu.memory_space<any>>) dst(%arg9 : memref<512x1024xbf16, #tpu.memory_space<vmem>>)
    %c0_43 = arith.constant 0 : index
    %c0_44 = arith.constant 0 : index
    %209 = vector.load %arg9[%c0_43, %c0_44] : memref<512x1024xbf16, #tpu.memory_space<vmem>>, vector<512x1024xbf16>
    %210 = vector.extract_strided_slice %10 {offsets = [4, 0], sizes = [1, 512], strides = [1, 1]} : vector<16x512xf32> to vector<1x512xf32>
    %211 = vector.extract_strided_slice %10 {offsets = [5, 0], sizes = [1, 512], strides = [1, 1]} : vector<16x512xf32> to vector<1x512xf32>
    %212 = vector.extract_strided_slice %10 {offsets = [6, 0], sizes = [1, 512], strides = [1, 1]} : vector<16x512xf32> to vector<1x512xf32>
    %213 = vector.extract_strided_slice %10 {offsets = [7, 0], sizes = [1, 512], strides = [1, 1]} : vector<16x512xf32> to vector<1x512xf32>
    %cst_45 = arith.constant dense<0.000000e+00> : vector<16x1024xf32>
    %214 = tpu.matmul %206, %209, %cst_45 {dimension_numbers = #tpu.dot_dimension_numbers<[1], [0], [0], [1], [0, 0, 1, 1], [], []>} : vector<16x512xbf16>, vector<512x1024xbf16>, vector<16x1024xf32> -> vector<16x1024xf32>
    %215 = vector.extract_strided_slice %214 {offsets = [0, 0], sizes = [16, 512], strides = [1, 1]} : vector<16x1024xf32> to vector<16x512xf32>
    %216 = vector.broadcast %210 : vector<1x512xf32> to vector<16x512xf32>
    %217 = arith.addf %215, %216 : vector<16x512xf32>
    %218 = vector.extract_strided_slice %214 {offsets = [0, 512], sizes = [16, 512], strides = [1, 1]} : vector<16x1024xf32> to vector<16x512xf32>
    %219 = vector.broadcast %211 : vector<1x512xf32> to vector<16x512xf32>
    %220 = arith.addf %218, %219 : vector<16x512xf32>
    %221 = vector.extract_strided_slice %220 {offsets = [0, 0], sizes = [8, 512], strides = [1, 1]} : vector<16x512xf32> to vector<8x512xf32>
    %cst_46 = arith.constant 0.000000e+00 : f32
    %222 = vector.broadcast %cst_46 : f32 to vector<8x16x128xf32>
    %223 = vector.extract_strided_slice %217 {offsets = [0, 0], sizes = [16, 128], strides = [1, 1]} : vector<16x512xf32> to vector<16x128xf32>
    %224 = vector.shape_cast %223 : vector<16x128xf32> to vector<1x16x128xf32>
    %225 = vector.extract_strided_slice %221 {offsets = [0, 0], sizes = [8, 128], strides = [1, 1]} : vector<8x512xf32> to vector<8x128xf32>
    %226 = vector.shape_cast %225 : vector<8x128xf32> to vector<8x1x128xf32>
    %227 = vector.broadcast %224 : vector<1x16x128xf32> to vector<8x16x128xf32>
    %228 = vector.broadcast %226 : vector<8x1x128xf32> to vector<8x16x128xf32>
    %229 = arith.addf %227, %228 : vector<8x16x128xf32>
    %cst_47 = arith.constant 0.000000e+00 : f32
    %230 = vector.broadcast %cst_47 : f32 to vector<8x16x128xf32>
    %231 = arith.maximumf %229, %230 : vector<8x16x128xf32>
    %cst_48 = arith.constant 0.000000e+00 : f32
    %232 = vector.broadcast %cst_48 : f32 to vector<8x16x128xf32>
    %233 = arith.minimumf %229, %232 : vector<8x16x128xf32>
    %cst_49 = arith.constant 2.000000e-01 : f32
    %234 = vector.broadcast %cst_49 : f32 to vector<8x16x128xf32>
    %235 = arith.mulf %234, %233 : vector<8x16x128xf32>
    %236 = arith.addf %231, %235 : vector<8x16x128xf32>
    %237 = vector.extract_strided_slice %212 {offsets = [0, 0], sizes = [1, 128], strides = [1, 1]} : vector<1x512xf32> to vector<1x128xf32>
    %238 = vector.shape_cast %237 : vector<1x128xf32> to vector<1x1x128xf32>
    %239 = vector.broadcast %238 : vector<1x1x128xf32> to vector<8x16x128xf32>
    %240 = arith.mulf %236, %239 : vector<8x16x128xf32>
    %241 = arith.addf %222, %240 : vector<8x16x128xf32>
    %242 = vector.extract_strided_slice %217 {offsets = [0, 128], sizes = [16, 128], strides = [1, 1]} : vector<16x512xf32> to vector<16x128xf32>
    %243 = vector.shape_cast %242 : vector<16x128xf32> to vector<1x16x128xf32>
    %244 = vector.extract_strided_slice %221 {offsets = [0, 128], sizes = [8, 128], strides = [1, 1]} : vector<8x512xf32> to vector<8x128xf32>
    %245 = vector.shape_cast %244 : vector<8x128xf32> to vector<8x1x128xf32>
    %246 = vector.broadcast %243 : vector<1x16x128xf32> to vector<8x16x128xf32>
    %247 = vector.broadcast %245 : vector<8x1x128xf32> to vector<8x16x128xf32>
    %248 = arith.addf %246, %247 : vector<8x16x128xf32>
    %cst_50 = arith.constant 0.000000e+00 : f32
    %249 = vector.broadcast %cst_50 : f32 to vector<8x16x128xf32>
    %250 = arith.maximumf %248, %249 : vector<8x16x128xf32>
    %cst_51 = arith.constant 0.000000e+00 : f32
    %251 = vector.broadcast %cst_51 : f32 to vector<8x16x128xf32>
    %252 = arith.minimumf %248, %251 : vector<8x16x128xf32>
    %cst_52 = arith.constant 2.000000e-01 : f32
    %253 = vector.broadcast %cst_52 : f32 to vector<8x16x128xf32>
    %254 = arith.mulf %253, %252 : vector<8x16x128xf32>
    %255 = arith.addf %250, %254 : vector<8x16x128xf32>
    %256 = vector.extract_strided_slice %212 {offsets = [0, 128], sizes = [1, 128], strides = [1, 1]} : vector<1x512xf32> to vector<1x128xf32>
    %257 = vector.shape_cast %256 : vector<1x128xf32> to vector<1x1x128xf32>
    %258 = vector.broadcast %257 : vector<1x1x128xf32> to vector<8x16x128xf32>
    %259 = arith.mulf %255, %258 : vector<8x16x128xf32>
    %260 = arith.addf %241, %259 : vector<8x16x128xf32>
    %261 = vector.extract_strided_slice %217 {offsets = [0, 256], sizes = [16, 128], strides = [1, 1]} : vector<16x512xf32> to vector<16x128xf32>
    %262 = vector.shape_cast %261 : vector<16x128xf32> to vector<1x16x128xf32>
    %263 = vector.extract_strided_slice %221 {offsets = [0, 256], sizes = [8, 128], strides = [1, 1]} : vector<8x512xf32> to vector<8x128xf32>
    %264 = vector.shape_cast %263 : vector<8x128xf32> to vector<8x1x128xf32>
    %265 = vector.broadcast %262 : vector<1x16x128xf32> to vector<8x16x128xf32>
    %266 = vector.broadcast %264 : vector<8x1x128xf32> to vector<8x16x128xf32>
    %267 = arith.addf %265, %266 : vector<8x16x128xf32>
    %cst_53 = arith.constant 0.000000e+00 : f32
    %268 = vector.broadcast %cst_53 : f32 to vector<8x16x128xf32>
    %269 = arith.maximumf %267, %268 : vector<8x16x128xf32>
    %cst_54 = arith.constant 0.000000e+00 : f32
    %270 = vector.broadcast %cst_54 : f32 to vector<8x16x128xf32>
    %271 = arith.minimumf %267, %270 : vector<8x16x128xf32>
    %cst_55 = arith.constant 2.000000e-01 : f32
    %272 = vector.broadcast %cst_55 : f32 to vector<8x16x128xf32>
    %273 = arith.mulf %272, %271 : vector<8x16x128xf32>
    %274 = arith.addf %269, %273 : vector<8x16x128xf32>
    %275 = vector.extract_strided_slice %212 {offsets = [0, 256], sizes = [1, 128], strides = [1, 1]} : vector<1x512xf32> to vector<1x128xf32>
    %276 = vector.shape_cast %275 : vector<1x128xf32> to vector<1x1x128xf32>
    %277 = vector.broadcast %276 : vector<1x1x128xf32> to vector<8x16x128xf32>
    %278 = arith.mulf %274, %277 : vector<8x16x128xf32>
    %279 = arith.addf %260, %278 : vector<8x16x128xf32>
    %280 = vector.extract_strided_slice %217 {offsets = [0, 384], sizes = [16, 128], strides = [1, 1]} : vector<16x512xf32> to vector<16x128xf32>
    %281 = vector.shape_cast %280 : vector<16x128xf32> to vector<1x16x128xf32>
    %282 = vector.extract_strided_slice %221 {offsets = [0, 384], sizes = [8, 128], strides = [1, 1]} : vector<8x512xf32> to vector<8x128xf32>
    %283 = vector.shape_cast %282 : vector<8x128xf32> to vector<8x1x128xf32>
    %284 = vector.broadcast %281 : vector<1x16x128xf32> to vector<8x16x128xf32>
    %285 = vector.broadcast %283 : vector<8x1x128xf32> to vector<8x16x128xf32>
    %286 = arith.addf %284, %285 : vector<8x16x128xf32>
    %cst_56 = arith.constant 0.000000e+00 : f32
    %287 = vector.broadcast %cst_56 : f32 to vector<8x16x128xf32>
    %288 = arith.maximumf %286, %287 : vector<8x16x128xf32>
    %cst_57 = arith.constant 0.000000e+00 : f32
    %289 = vector.broadcast %cst_57 : f32 to vector<8x16x128xf32>
    %290 = arith.minimumf %286, %289 : vector<8x16x128xf32>
    %cst_58 = arith.constant 2.000000e-01 : f32
    %291 = vector.broadcast %cst_58 : f32 to vector<8x16x128xf32>
    %292 = arith.mulf %291, %290 : vector<8x16x128xf32>
    %293 = arith.addf %288, %292 : vector<8x16x128xf32>
    %294 = vector.extract_strided_slice %212 {offsets = [0, 384], sizes = [1, 128], strides = [1, 1]} : vector<1x512xf32> to vector<1x128xf32>
    %295 = vector.shape_cast %294 : vector<1x128xf32> to vector<1x1x128xf32>
    %296 = vector.broadcast %295 : vector<1x1x128xf32> to vector<8x16x128xf32>
    %297 = arith.mulf %293, %296 : vector<8x16x128xf32>
    %298 = arith.addf %279, %297 : vector<8x16x128xf32>
    %cst_59 = arith.constant dense<0.000000e+00> : vector<8x16xf32>
    %299 = vector.multi_reduction <add>, %298, %cst_59 [2] : vector<8x16x128xf32> to vector<8x16xf32>
    %300 = vector.extract_strided_slice %220 {offsets = [8, 0], sizes = [8, 512], strides = [1, 1]} : vector<16x512xf32> to vector<8x512xf32>
    %cst_60 = arith.constant 0.000000e+00 : f32
    %301 = vector.broadcast %cst_60 : f32 to vector<8x16x128xf32>
    %302 = vector.extract_strided_slice %217 {offsets = [0, 0], sizes = [16, 128], strides = [1, 1]} : vector<16x512xf32> to vector<16x128xf32>
    %303 = vector.shape_cast %302 : vector<16x128xf32> to vector<1x16x128xf32>
    %304 = vector.extract_strided_slice %300 {offsets = [0, 0], sizes = [8, 128], strides = [1, 1]} : vector<8x512xf32> to vector<8x128xf32>
    %305 = vector.shape_cast %304 : vector<8x128xf32> to vector<8x1x128xf32>
    %306 = vector.broadcast %303 : vector<1x16x128xf32> to vector<8x16x128xf32>
    %307 = vector.broadcast %305 : vector<8x1x128xf32> to vector<8x16x128xf32>
    %308 = arith.addf %306, %307 : vector<8x16x128xf32>
    %cst_61 = arith.constant 0.000000e+00 : f32
    %309 = vector.broadcast %cst_61 : f32 to vector<8x16x128xf32>
    %310 = arith.maximumf %308, %309 : vector<8x16x128xf32>
    %cst_62 = arith.constant 0.000000e+00 : f32
    %311 = vector.broadcast %cst_62 : f32 to vector<8x16x128xf32>
    %312 = arith.minimumf %308, %311 : vector<8x16x128xf32>
    %cst_63 = arith.constant 2.000000e-01 : f32
    %313 = vector.broadcast %cst_63 : f32 to vector<8x16x128xf32>
    %314 = arith.mulf %313, %312 : vector<8x16x128xf32>
    %315 = arith.addf %310, %314 : vector<8x16x128xf32>
    %316 = vector.extract_strided_slice %212 {offsets = [0, 0], sizes = [1, 128], strides = [1, 1]} : vector<1x512xf32> to vector<1x128xf32>
    %317 = vector.shape_cast %316 : vector<1x128xf32> to vector<1x1x128xf32>
    %318 = vector.broadcast %317 : vector<1x1x128xf32> to vector<8x16x128xf32>
    %319 = arith.mulf %315, %318 : vector<8x16x128xf32>
    %320 = arith.addf %301, %319 : vector<8x16x128xf32>
    %321 = vector.extract_strided_slice %217 {offsets = [0, 128], sizes = [16, 128], strides = [1, 1]} : vector<16x512xf32> to vector<16x128xf32>
    %322 = vector.shape_cast %321 : vector<16x128xf32> to vector<1x16x128xf32>
    %323 = vector.extract_strided_slice %300 {offsets = [0, 128], sizes = [8, 128], strides = [1, 1]} : vector<8x512xf32> to vector<8x128xf32>
    %324 = vector.shape_cast %323 : vector<8x128xf32> to vector<8x1x128xf32>
    %325 = vector.broadcast %322 : vector<1x16x128xf32> to vector<8x16x128xf32>
    %326 = vector.broadcast %324 : vector<8x1x128xf32> to vector<8x16x128xf32>
    %327 = arith.addf %325, %326 : vector<8x16x128xf32>
    %cst_64 = arith.constant 0.000000e+00 : f32
    %328 = vector.broadcast %cst_64 : f32 to vector<8x16x128xf32>
    %329 = arith.maximumf %327, %328 : vector<8x16x128xf32>
    %cst_65 = arith.constant 0.000000e+00 : f32
    %330 = vector.broadcast %cst_65 : f32 to vector<8x16x128xf32>
    %331 = arith.minimumf %327, %330 : vector<8x16x128xf32>
    %cst_66 = arith.constant 2.000000e-01 : f32
    %332 = vector.broadcast %cst_66 : f32 to vector<8x16x128xf32>
    %333 = arith.mulf %332, %331 : vector<8x16x128xf32>
    %334 = arith.addf %329, %333 : vector<8x16x128xf32>
    %335 = vector.extract_strided_slice %212 {offsets = [0, 128], sizes = [1, 128], strides = [1, 1]} : vector<1x512xf32> to vector<1x128xf32>
    %336 = vector.shape_cast %335 : vector<1x128xf32> to vector<1x1x128xf32>
    %337 = vector.broadcast %336 : vector<1x1x128xf32> to vector<8x16x128xf32>
    %338 = arith.mulf %334, %337 : vector<8x16x128xf32>
    %339 = arith.addf %320, %338 : vector<8x16x128xf32>
    %340 = vector.extract_strided_slice %217 {offsets = [0, 256], sizes = [16, 128], strides = [1, 1]} : vector<16x512xf32> to vector<16x128xf32>
    %341 = vector.shape_cast %340 : vector<16x128xf32> to vector<1x16x128xf32>
    %342 = vector.extract_strided_slice %300 {offsets = [0, 256], sizes = [8, 128], strides = [1, 1]} : vector<8x512xf32> to vector<8x128xf32>
    %343 = vector.shape_cast %342 : vector<8x128xf32> to vector<8x1x128xf32>
    %344 = vector.broadcast %341 : vector<1x16x128xf32> to vector<8x16x128xf32>
    %345 = vector.broadcast %343 : vector<8x1x128xf32> to vector<8x16x128xf32>
    %346 = arith.addf %344, %345 : vector<8x16x128xf32>
    %cst_67 = arith.constant 0.000000e+00 : f32
    %347 = vector.broadcast %cst_67 : f32 to vector<8x16x128xf32>
    %348 = arith.maximumf %346, %347 : vector<8x16x128xf32>
    %cst_68 = arith.constant 0.000000e+00 : f32
    %349 = vector.broadcast %cst_68 : f32 to vector<8x16x128xf32>
    %350 = arith.minimumf %346, %349 : vector<8x16x128xf32>
    %cst_69 = arith.constant 2.000000e-01 : f32
    %351 = vector.broadcast %cst_69 : f32 to vector<8x16x128xf32>
    %352 = arith.mulf %351, %350 : vector<8x16x128xf32>
    %353 = arith.addf %348, %352 : vector<8x16x128xf32>
    %354 = vector.extract_strided_slice %212 {offsets = [0, 256], sizes = [1, 128], strides = [1, 1]} : vector<1x512xf32> to vector<1x128xf32>
    %355 = vector.shape_cast %354 : vector<1x128xf32> to vector<1x1x128xf32>
    %356 = vector.broadcast %355 : vector<1x1x128xf32> to vector<8x16x128xf32>
    %357 = arith.mulf %353, %356 : vector<8x16x128xf32>
    %358 = arith.addf %339, %357 : vector<8x16x128xf32>
    %359 = vector.extract_strided_slice %217 {offsets = [0, 384], sizes = [16, 128], strides = [1, 1]} : vector<16x512xf32> to vector<16x128xf32>
    %360 = vector.shape_cast %359 : vector<16x128xf32> to vector<1x16x128xf32>
    %361 = vector.extract_strided_slice %300 {offsets = [0, 384], sizes = [8, 128], strides = [1, 1]} : vector<8x512xf32> to vector<8x128xf32>
    %362 = vector.shape_cast %361 : vector<8x128xf32> to vector<8x1x128xf32>
    %363 = vector.broadcast %360 : vector<1x16x128xf32> to vector<8x16x128xf32>
    %364 = vector.broadcast %362 : vector<8x1x128xf32> to vector<8x16x128xf32>
    %365 = arith.addf %363, %364 : vector<8x16x128xf32>
    %cst_70 = arith.constant 0.000000e+00 : f32
    %366 = vector.broadcast %cst_70 : f32 to vector<8x16x128xf32>
    %367 = arith.maximumf %365, %366 : vector<8x16x128xf32>
    %cst_71 = arith.constant 0.000000e+00 : f32
    %368 = vector.broadcast %cst_71 : f32 to vector<8x16x128xf32>
    %369 = arith.minimumf %365, %368 : vector<8x16x128xf32>
    %cst_72 = arith.constant 2.000000e-01 : f32
    %370 = vector.broadcast %cst_72 : f32 to vector<8x16x128xf32>
    %371 = arith.mulf %370, %369 : vector<8x16x128xf32>
    %372 = arith.addf %367, %371 : vector<8x16x128xf32>
    %373 = vector.extract_strided_slice %212 {offsets = [0, 384], sizes = [1, 128], strides = [1, 1]} : vector<1x512xf32> to vector<1x128xf32>
    %374 = vector.shape_cast %373 : vector<1x128xf32> to vector<1x1x128xf32>
    %375 = vector.broadcast %374 : vector<1x1x128xf32> to vector<8x16x128xf32>
    %376 = arith.mulf %372, %375 : vector<8x16x128xf32>
    %377 = arith.addf %358, %376 : vector<8x16x128xf32>
    %cst_73 = arith.constant dense<0.000000e+00> : vector<8x16xf32>
    %378 = vector.multi_reduction <add>, %377, %cst_73 [2] : vector<8x16x128xf32> to vector<8x16xf32>
    %379 = tpu.concatenate %299, %378 in 0 : vector<8x16xf32>, vector<8x16xf32> -> vector<16x16xf32>
    %380 = arith.addf %379, %16 : vector<16x16xf32>
    %cst_74 = arith.constant dense<0xFF800000> : vector<16xf32>
    %381 = vector.multi_reduction <maximumf>, %380, %cst_74 [1] : vector<16x16xf32> to vector<16xf32>
    %382 = vector.shape_cast %381 : vector<16xf32> to vector<16x1xf32>
    %383 = vector.broadcast %382 : vector<16x1xf32> to vector<16x16xf32>
    %384 = arith.subf %380, %383 : vector<16x16xf32>
    %385 = math.exp %384 : vector<16x16xf32>
    %cst_75 = arith.constant dense<0.000000e+00> : vector<16xf32>
    %386 = vector.multi_reduction <add>, %385, %cst_75 [1] : vector<16x16xf32> to vector<16xf32>
    %387 = vector.shape_cast %386 : vector<16xf32> to vector<16x1xf32>
    %388 = vector.broadcast %387 : vector<16x1xf32> to vector<16x16xf32>
    %389 = arith.divf %385, %388 : vector<16x16xf32>
    %390 = arith.truncf %389 : vector<16x16xf32> to vector<16x16xbf16>
    %391 = arith.truncf %217 : vector<16x512xf32> to vector<16x512xbf16>
    %cst_76 = arith.constant dense<0.000000e+00> : vector<16x512xf32>
    %392 = tpu.matmul %390, %391, %cst_76 {dimension_numbers = #tpu.dot_dimension_numbers<[1], [0], [0], [1], [0, 0, 1, 1], [], []>} : vector<16x16xbf16>, vector<16x512xbf16>, vector<16x512xf32> -> vector<16x512xf32>
    %393 = vector.broadcast %213 : vector<1x512xf32> to vector<16x512xf32>
    %394 = arith.addf %392, %393 : vector<16x512xf32>
    %395 = math.tanh %394 : vector<16x512xf32>
    %396 = arith.truncf %395 : vector<16x512xf32> to vector<16x512xbf16>
    %c2_i32_77 = arith.constant 2 : i32
    %397 = tpu.memref_slice %arg12[%c2_i32_77] : memref<4x!tpu.dma_semaphore, #tpu.memory_space<semaphore_mem>> -> memref<1x!tpu.dma_semaphore, #tpu.memory_space<semaphore_mem>>
    %398 = tpu.memref_squeeze %397 : memref<1x!tpu.dma_semaphore, #tpu.memory_space<semaphore_mem>> -> memref<!tpu.dma_semaphore, #tpu.memory_space<semaphore_mem>>
    tpu.wait_dma2 semaphore(%398 : memref<!tpu.dma_semaphore, #tpu.memory_space<semaphore_mem>>) src(%arg5 : memref<512x1024xbf16, #tpu.memory_space<any>>) dst(%arg10 : memref<512x1024xbf16, #tpu.memory_space<vmem>>)
    %c0_78 = arith.constant 0 : index
    %c0_79 = arith.constant 0 : index
    %399 = vector.load %arg10[%c0_78, %c0_79] : memref<512x1024xbf16, #tpu.memory_space<vmem>>, vector<512x1024xbf16>
    %400 = vector.extract_strided_slice %10 {offsets = [8, 0], sizes = [1, 512], strides = [1, 1]} : vector<16x512xf32> to vector<1x512xf32>
    %401 = vector.extract_strided_slice %10 {offsets = [9, 0], sizes = [1, 512], strides = [1, 1]} : vector<16x512xf32> to vector<1x512xf32>
    %402 = vector.extract_strided_slice %10 {offsets = [10, 0], sizes = [1, 512], strides = [1, 1]} : vector<16x512xf32> to vector<1x512xf32>
    %403 = vector.extract_strided_slice %10 {offsets = [11, 0], sizes = [1, 512], strides = [1, 1]} : vector<16x512xf32> to vector<1x512xf32>
    %cst_80 = arith.constant dense<0.000000e+00> : vector<16x1024xf32>
    %404 = tpu.matmul %396, %399, %cst_80 {dimension_numbers = #tpu.dot_dimension_numbers<[1], [0], [0], [1], [0, 0, 1, 1], [], []>} : vector<16x512xbf16>, vector<512x1024xbf16>, vector<16x1024xf32> -> vector<16x1024xf32>
    %405 = vector.extract_strided_slice %404 {offsets = [0, 0], sizes = [16, 512], strides = [1, 1]} : vector<16x1024xf32> to vector<16x512xf32>
    %406 = vector.broadcast %400 : vector<1x512xf32> to vector<16x512xf32>
    %407 = arith.addf %405, %406 : vector<16x512xf32>
    %408 = vector.extract_strided_slice %404 {offsets = [0, 512], sizes = [16, 512], strides = [1, 1]} : vector<16x1024xf32> to vector<16x512xf32>
    %409 = vector.broadcast %401 : vector<1x512xf32> to vector<16x512xf32>
    %410 = arith.addf %408, %409 : vector<16x512xf32>
    %411 = vector.extract_strided_slice %410 {offsets = [0, 0], sizes = [8, 512], strides = [1, 1]} : vector<16x512xf32> to vector<8x512xf32>
    %cst_81 = arith.constant 0.000000e+00 : f32
    %412 = vector.broadcast %cst_81 : f32 to vector<8x16x128xf32>
    %413 = vector.extract_strided_slice %407 {offsets = [0, 0], sizes = [16, 128], strides = [1, 1]} : vector<16x512xf32> to vector<16x128xf32>
    %414 = vector.shape_cast %413 : vector<16x128xf32> to vector<1x16x128xf32>
    %415 = vector.extract_strided_slice %411 {offsets = [0, 0], sizes = [8, 128], strides = [1, 1]} : vector<8x512xf32> to vector<8x128xf32>
    %416 = vector.shape_cast %415 : vector<8x128xf32> to vector<8x1x128xf32>
    %417 = vector.broadcast %414 : vector<1x16x128xf32> to vector<8x16x128xf32>
    %418 = vector.broadcast %416 : vector<8x1x128xf32> to vector<8x16x128xf32>
    %419 = arith.addf %417, %418 : vector<8x16x128xf32>
    %cst_82 = arith.constant 0.000000e+00 : f32
    %420 = vector.broadcast %cst_82 : f32 to vector<8x16x128xf32>
    %421 = arith.maximumf %419, %420 : vector<8x16x128xf32>
    %cst_83 = arith.constant 0.000000e+00 : f32
    %422 = vector.broadcast %cst_83 : f32 to vector<8x16x128xf32>
    %423 = arith.minimumf %419, %422 : vector<8x16x128xf32>
    %cst_84 = arith.constant 2.000000e-01 : f32
    %424 = vector.broadcast %cst_84 : f32 to vector<8x16x128xf32>
    %425 = arith.mulf %424, %423 : vector<8x16x128xf32>
    %426 = arith.addf %421, %425 : vector<8x16x128xf32>
    %427 = vector.extract_strided_slice %402 {offsets = [0, 0], sizes = [1, 128], strides = [1, 1]} : vector<1x512xf32> to vector<1x128xf32>
    %428 = vector.shape_cast %427 : vector<1x128xf32> to vector<1x1x128xf32>
    %429 = vector.broadcast %428 : vector<1x1x128xf32> to vector<8x16x128xf32>
    %430 = arith.mulf %426, %429 : vector<8x16x128xf32>
    %431 = arith.addf %412, %430 : vector<8x16x128xf32>
    %432 = vector.extract_strided_slice %407 {offsets = [0, 128], sizes = [16, 128], strides = [1, 1]} : vector<16x512xf32> to vector<16x128xf32>
    %433 = vector.shape_cast %432 : vector<16x128xf32> to vector<1x16x128xf32>
    %434 = vector.extract_strided_slice %411 {offsets = [0, 128], sizes = [8, 128], strides = [1, 1]} : vector<8x512xf32> to vector<8x128xf32>
    %435 = vector.shape_cast %434 : vector<8x128xf32> to vector<8x1x128xf32>
    %436 = vector.broadcast %433 : vector<1x16x128xf32> to vector<8x16x128xf32>
    %437 = vector.broadcast %435 : vector<8x1x128xf32> to vector<8x16x128xf32>
    %438 = arith.addf %436, %437 : vector<8x16x128xf32>
    %cst_85 = arith.constant 0.000000e+00 : f32
    %439 = vector.broadcast %cst_85 : f32 to vector<8x16x128xf32>
    %440 = arith.maximumf %438, %439 : vector<8x16x128xf32>
    %cst_86 = arith.constant 0.000000e+00 : f32
    %441 = vector.broadcast %cst_86 : f32 to vector<8x16x128xf32>
    %442 = arith.minimumf %438, %441 : vector<8x16x128xf32>
    %cst_87 = arith.constant 2.000000e-01 : f32
    %443 = vector.broadcast %cst_87 : f32 to vector<8x16x128xf32>
    %444 = arith.mulf %443, %442 : vector<8x16x128xf32>
    %445 = arith.addf %440, %444 : vector<8x16x128xf32>
    %446 = vector.extract_strided_slice %402 {offsets = [0, 128], sizes = [1, 128], strides = [1, 1]} : vector<1x512xf32> to vector<1x128xf32>
    %447 = vector.shape_cast %446 : vector<1x128xf32> to vector<1x1x128xf32>
    %448 = vector.broadcast %447 : vector<1x1x128xf32> to vector<8x16x128xf32>
    %449 = arith.mulf %445, %448 : vector<8x16x128xf32>
    %450 = arith.addf %431, %449 : vector<8x16x128xf32>
    %451 = vector.extract_strided_slice %407 {offsets = [0, 256], sizes = [16, 128], strides = [1, 1]} : vector<16x512xf32> to vector<16x128xf32>
    %452 = vector.shape_cast %451 : vector<16x128xf32> to vector<1x16x128xf32>
    %453 = vector.extract_strided_slice %411 {offsets = [0, 256], sizes = [8, 128], strides = [1, 1]} : vector<8x512xf32> to vector<8x128xf32>
    %454 = vector.shape_cast %453 : vector<8x128xf32> to vector<8x1x128xf32>
    %455 = vector.broadcast %452 : vector<1x16x128xf32> to vector<8x16x128xf32>
    %456 = vector.broadcast %454 : vector<8x1x128xf32> to vector<8x16x128xf32>
    %457 = arith.addf %455, %456 : vector<8x16x128xf32>
    %cst_88 = arith.constant 0.000000e+00 : f32
    %458 = vector.broadcast %cst_88 : f32 to vector<8x16x128xf32>
    %459 = arith.maximumf %457, %458 : vector<8x16x128xf32>
    %cst_89 = arith.constant 0.000000e+00 : f32
    %460 = vector.broadcast %cst_89 : f32 to vector<8x16x128xf32>
    %461 = arith.minimumf %457, %460 : vector<8x16x128xf32>
    %cst_90 = arith.constant 2.000000e-01 : f32
    %462 = vector.broadcast %cst_90 : f32 to vector<8x16x128xf32>
    %463 = arith.mulf %462, %461 : vector<8x16x128xf32>
    %464 = arith.addf %459, %463 : vector<8x16x128xf32>
    %465 = vector.extract_strided_slice %402 {offsets = [0, 256], sizes = [1, 128], strides = [1, 1]} : vector<1x512xf32> to vector<1x128xf32>
    %466 = vector.shape_cast %465 : vector<1x128xf32> to vector<1x1x128xf32>
    %467 = vector.broadcast %466 : vector<1x1x128xf32> to vector<8x16x128xf32>
    %468 = arith.mulf %464, %467 : vector<8x16x128xf32>
    %469 = arith.addf %450, %468 : vector<8x16x128xf32>
    %470 = vector.extract_strided_slice %407 {offsets = [0, 384], sizes = [16, 128], strides = [1, 1]} : vector<16x512xf32> to vector<16x128xf32>
    %471 = vector.shape_cast %470 : vector<16x128xf32> to vector<1x16x128xf32>
    %472 = vector.extract_strided_slice %411 {offsets = [0, 384], sizes = [8, 128], strides = [1, 1]} : vector<8x512xf32> to vector<8x128xf32>
    %473 = vector.shape_cast %472 : vector<8x128xf32> to vector<8x1x128xf32>
    %474 = vector.broadcast %471 : vector<1x16x128xf32> to vector<8x16x128xf32>
    %475 = vector.broadcast %473 : vector<8x1x128xf32> to vector<8x16x128xf32>
    %476 = arith.addf %474, %475 : vector<8x16x128xf32>
    %cst_91 = arith.constant 0.000000e+00 : f32
    %477 = vector.broadcast %cst_91 : f32 to vector<8x16x128xf32>
    %478 = arith.maximumf %476, %477 : vector<8x16x128xf32>
    %cst_92 = arith.constant 0.000000e+00 : f32
    %479 = vector.broadcast %cst_92 : f32 to vector<8x16x128xf32>
    %480 = arith.minimumf %476, %479 : vector<8x16x128xf32>
    %cst_93 = arith.constant 2.000000e-01 : f32
    %481 = vector.broadcast %cst_93 : f32 to vector<8x16x128xf32>
    %482 = arith.mulf %481, %480 : vector<8x16x128xf32>
    %483 = arith.addf %478, %482 : vector<8x16x128xf32>
    %484 = vector.extract_strided_slice %402 {offsets = [0, 384], sizes = [1, 128], strides = [1, 1]} : vector<1x512xf32> to vector<1x128xf32>
    %485 = vector.shape_cast %484 : vector<1x128xf32> to vector<1x1x128xf32>
    %486 = vector.broadcast %485 : vector<1x1x128xf32> to vector<8x16x128xf32>
    %487 = arith.mulf %483, %486 : vector<8x16x128xf32>
    %488 = arith.addf %469, %487 : vector<8x16x128xf32>
    %cst_94 = arith.constant dense<0.000000e+00> : vector<8x16xf32>
    %489 = vector.multi_reduction <add>, %488, %cst_94 [2] : vector<8x16x128xf32> to vector<8x16xf32>
    %490 = vector.extract_strided_slice %410 {offsets = [8, 0], sizes = [8, 512], strides = [1, 1]} : vector<16x512xf32> to vector<8x512xf32>
    %cst_95 = arith.constant 0.000000e+00 : f32
    %491 = vector.broadcast %cst_95 : f32 to vector<8x16x128xf32>
    %492 = vector.extract_strided_slice %407 {offsets = [0, 0], sizes = [16, 128], strides = [1, 1]} : vector<16x512xf32> to vector<16x128xf32>
    %493 = vector.shape_cast %492 : vector<16x128xf32> to vector<1x16x128xf32>
    %494 = vector.extract_strided_slice %490 {offsets = [0, 0], sizes = [8, 128], strides = [1, 1]} : vector<8x512xf32> to vector<8x128xf32>
    %495 = vector.shape_cast %494 : vector<8x128xf32> to vector<8x1x128xf32>
    %496 = vector.broadcast %493 : vector<1x16x128xf32> to vector<8x16x128xf32>
    %497 = vector.broadcast %495 : vector<8x1x128xf32> to vector<8x16x128xf32>
    %498 = arith.addf %496, %497 : vector<8x16x128xf32>
    %cst_96 = arith.constant 0.000000e+00 : f32
    %499 = vector.broadcast %cst_96 : f32 to vector<8x16x128xf32>
    %500 = arith.maximumf %498, %499 : vector<8x16x128xf32>
    %cst_97 = arith.constant 0.000000e+00 : f32
    %501 = vector.broadcast %cst_97 : f32 to vector<8x16x128xf32>
    %502 = arith.minimumf %498, %501 : vector<8x16x128xf32>
    %cst_98 = arith.constant 2.000000e-01 : f32
    %503 = vector.broadcast %cst_98 : f32 to vector<8x16x128xf32>
    %504 = arith.mulf %503, %502 : vector<8x16x128xf32>
    %505 = arith.addf %500, %504 : vector<8x16x128xf32>
    %506 = vector.extract_strided_slice %402 {offsets = [0, 0], sizes = [1, 128], strides = [1, 1]} : vector<1x512xf32> to vector<1x128xf32>
    %507 = vector.shape_cast %506 : vector<1x128xf32> to vector<1x1x128xf32>
    %508 = vector.broadcast %507 : vector<1x1x128xf32> to vector<8x16x128xf32>
    %509 = arith.mulf %505, %508 : vector<8x16x128xf32>
    %510 = arith.addf %491, %509 : vector<8x16x128xf32>
    %511 = vector.extract_strided_slice %407 {offsets = [0, 128], sizes = [16, 128], strides = [1, 1]} : vector<16x512xf32> to vector<16x128xf32>
    %512 = vector.shape_cast %511 : vector<16x128xf32> to vector<1x16x128xf32>
    %513 = vector.extract_strided_slice %490 {offsets = [0, 128], sizes = [8, 128], strides = [1, 1]} : vector<8x512xf32> to vector<8x128xf32>
    %514 = vector.shape_cast %513 : vector<8x128xf32> to vector<8x1x128xf32>
    %515 = vector.broadcast %512 : vector<1x16x128xf32> to vector<8x16x128xf32>
    %516 = vector.broadcast %514 : vector<8x1x128xf32> to vector<8x16x128xf32>
    %517 = arith.addf %515, %516 : vector<8x16x128xf32>
    %cst_99 = arith.constant 0.000000e+00 : f32
    %518 = vector.broadcast %cst_99 : f32 to vector<8x16x128xf32>
    %519 = arith.maximumf %517, %518 : vector<8x16x128xf32>
    %cst_100 = arith.constant 0.000000e+00 : f32
    %520 = vector.broadcast %cst_100 : f32 to vector<8x16x128xf32>
    %521 = arith.minimumf %517, %520 : vector<8x16x128xf32>
    %cst_101 = arith.constant 2.000000e-01 : f32
    %522 = vector.broadcast %cst_101 : f32 to vector<8x16x128xf32>
    %523 = arith.mulf %522, %521 : vector<8x16x128xf32>
    %524 = arith.addf %519, %523 : vector<8x16x128xf32>
    %525 = vector.extract_strided_slice %402 {offsets = [0, 128], sizes = [1, 128], strides = [1, 1]} : vector<1x512xf32> to vector<1x128xf32>
    %526 = vector.shape_cast %525 : vector<1x128xf32> to vector<1x1x128xf32>
    %527 = vector.broadcast %526 : vector<1x1x128xf32> to vector<8x16x128xf32>
    %528 = arith.mulf %524, %527 : vector<8x16x128xf32>
    %529 = arith.addf %510, %528 : vector<8x16x128xf32>
    %530 = vector.extract_strided_slice %407 {offsets = [0, 256], sizes = [16, 128], strides = [1, 1]} : vector<16x512xf32> to vector<16x128xf32>
    %531 = vector.shape_cast %530 : vector<16x128xf32> to vector<1x16x128xf32>
    %532 = vector.extract_strided_slice %490 {offsets = [0, 256], sizes = [8, 128], strides = [1, 1]} : vector<8x512xf32> to vector<8x128xf32>
    %533 = vector.shape_cast %532 : vector<8x128xf32> to vector<8x1x128xf32>
    %534 = vector.broadcast %531 : vector<1x16x128xf32> to vector<8x16x128xf32>
    %535 = vector.broadcast %533 : vector<8x1x128xf32> to vector<8x16x128xf32>
    %536 = arith.addf %534, %535 : vector<8x16x128xf32>
    %cst_102 = arith.constant 0.000000e+00 : f32
    %537 = vector.broadcast %cst_102 : f32 to vector<8x16x128xf32>
    %538 = arith.maximumf %536, %537 : vector<8x16x128xf32>
    %cst_103 = arith.constant 0.000000e+00 : f32
    %539 = vector.broadcast %cst_103 : f32 to vector<8x16x128xf32>
    %540 = arith.minimumf %536, %539 : vector<8x16x128xf32>
    %cst_104 = arith.constant 2.000000e-01 : f32
    %541 = vector.broadcast %cst_104 : f32 to vector<8x16x128xf32>
    %542 = arith.mulf %541, %540 : vector<8x16x128xf32>
    %543 = arith.addf %538, %542 : vector<8x16x128xf32>
    %544 = vector.extract_strided_slice %402 {offsets = [0, 256], sizes = [1, 128], strides = [1, 1]} : vector<1x512xf32> to vector<1x128xf32>
    %545 = vector.shape_cast %544 : vector<1x128xf32> to vector<1x1x128xf32>
    %546 = vector.broadcast %545 : vector<1x1x128xf32> to vector<8x16x128xf32>
    %547 = arith.mulf %543, %546 : vector<8x16x128xf32>
    %548 = arith.addf %529, %547 : vector<8x16x128xf32>
    %549 = vector.extract_strided_slice %407 {offsets = [0, 384], sizes = [16, 128], strides = [1, 1]} : vector<16x512xf32> to vector<16x128xf32>
    %550 = vector.shape_cast %549 : vector<16x128xf32> to vector<1x16x128xf32>
    %551 = vector.extract_strided_slice %490 {offsets = [0, 384], sizes = [8, 128], strides = [1, 1]} : vector<8x512xf32> to vector<8x128xf32>
    %552 = vector.shape_cast %551 : vector<8x128xf32> to vector<8x1x128xf32>
    %553 = vector.broadcast %550 : vector<1x16x128xf32> to vector<8x16x128xf32>
    %554 = vector.broadcast %552 : vector<8x1x128xf32> to vector<8x16x128xf32>
    %555 = arith.addf %553, %554 : vector<8x16x128xf32>
    %cst_105 = arith.constant 0.000000e+00 : f32
    %556 = vector.broadcast %cst_105 : f32 to vector<8x16x128xf32>
    %557 = arith.maximumf %555, %556 : vector<8x16x128xf32>
    %cst_106 = arith.constant 0.000000e+00 : f32
    %558 = vector.broadcast %cst_106 : f32 to vector<8x16x128xf32>
    %559 = arith.minimumf %555, %558 : vector<8x16x128xf32>
    %cst_107 = arith.constant 2.000000e-01 : f32
    %560 = vector.broadcast %cst_107 : f32 to vector<8x16x128xf32>
    %561 = arith.mulf %560, %559 : vector<8x16x128xf32>
    %562 = arith.addf %557, %561 : vector<8x16x128xf32>
    %563 = vector.extract_strided_slice %402 {offsets = [0, 384], sizes = [1, 128], strides = [1, 1]} : vector<1x512xf32> to vector<1x128xf32>
    %564 = vector.shape_cast %563 : vector<1x128xf32> to vector<1x1x128xf32>
    %565 = vector.broadcast %564 : vector<1x1x128xf32> to vector<8x16x128xf32>
    %566 = arith.mulf %562, %565 : vector<8x16x128xf32>
    %567 = arith.addf %548, %566 : vector<8x16x128xf32>
    %cst_108 = arith.constant dense<0.000000e+00> : vector<8x16xf32>
    %568 = vector.multi_reduction <add>, %567, %cst_108 [2] : vector<8x16x128xf32> to vector<8x16xf32>
    %569 = tpu.concatenate %489, %568 in 0 : vector<8x16xf32>, vector<8x16xf32> -> vector<16x16xf32>
    %570 = arith.addf %569, %16 : vector<16x16xf32>
    %cst_109 = arith.constant dense<0xFF800000> : vector<16xf32>
    %571 = vector.multi_reduction <maximumf>, %570, %cst_109 [1] : vector<16x16xf32> to vector<16xf32>
    %572 = vector.shape_cast %571 : vector<16xf32> to vector<16x1xf32>
    %573 = vector.broadcast %572 : vector<16x1xf32> to vector<16x16xf32>
    %574 = arith.subf %570, %573 : vector<16x16xf32>
    %575 = math.exp %574 : vector<16x16xf32>
    %cst_110 = arith.constant dense<0.000000e+00> : vector<16xf32>
    %576 = vector.multi_reduction <add>, %575, %cst_110 [1] : vector<16x16xf32> to vector<16xf32>
    %577 = vector.shape_cast %576 : vector<16xf32> to vector<16x1xf32>
    %578 = vector.broadcast %577 : vector<16x1xf32> to vector<16x16xf32>
    %579 = arith.divf %575, %578 : vector<16x16xf32>
    %580 = arith.truncf %579 : vector<16x16xf32> to vector<16x16xbf16>
    %581 = arith.truncf %407 : vector<16x512xf32> to vector<16x512xbf16>
    %cst_111 = arith.constant dense<0.000000e+00> : vector<16x512xf32>
    %582 = tpu.matmul %580, %581, %cst_111 {dimension_numbers = #tpu.dot_dimension_numbers<[1], [0], [0], [1], [0, 0, 1, 1], [], []>} : vector<16x16xbf16>, vector<16x512xbf16>, vector<16x512xf32> -> vector<16x512xf32>
    %583 = vector.broadcast %403 : vector<1x512xf32> to vector<16x512xf32>
    %584 = arith.addf %582, %583 : vector<16x512xf32>
    %585 = math.tanh %584 : vector<16x512xf32>
    %586 = arith.truncf %585 : vector<16x512xf32> to vector<16x512xbf16>
    %c3_i32_112 = arith.constant 3 : i32
    %587 = tpu.memref_slice %arg12[%c3_i32_112] : memref<4x!tpu.dma_semaphore, #tpu.memory_space<semaphore_mem>> -> memref<1x!tpu.dma_semaphore, #tpu.memory_space<semaphore_mem>>
    %588 = tpu.memref_squeeze %587 : memref<1x!tpu.dma_semaphore, #tpu.memory_space<semaphore_mem>> -> memref<!tpu.dma_semaphore, #tpu.memory_space<semaphore_mem>>
    tpu.wait_dma2 semaphore(%588 : memref<!tpu.dma_semaphore, #tpu.memory_space<semaphore_mem>>) src(%arg6 : memref<512x1536xbf16, #tpu.memory_space<any>>) dst(%arg11 : memref<512x1536xbf16, #tpu.memory_space<vmem>>)
    %c0_113 = arith.constant 0 : index
    %c0_114 = arith.constant 0 : index
    %589 = vector.load %arg11[%c0_113, %c0_114] : memref<512x1536xbf16, #tpu.memory_space<vmem>>, vector<512x512xbf16>
    %590 = vector.extract_strided_slice %10 {offsets = [12, 0], sizes = [1, 512], strides = [1, 1]} : vector<16x512xf32> to vector<1x512xf32>
    %cst_115 = arith.constant dense<0.000000e+00> : vector<16x512xf32>
    %591 = tpu.matmul %586, %589, %cst_115 {dimension_numbers = #tpu.dot_dimension_numbers<[1], [0], [0], [1], [0, 0, 1, 1], [], []>} : vector<16x512xbf16>, vector<512x512xbf16>, vector<16x512xf32> -> vector<16x512xf32>
    %592 = vector.broadcast %590 : vector<1x512xf32> to vector<16x512xf32>
    %593 = arith.addf %591, %592 : vector<16x512xf32>
    %cst_116 = arith.constant 0.000000e+00 : f32
    %594 = vector.broadcast %cst_116 : f32 to vector<16x512xf32>
    %595 = arith.maximumf %593, %594 : vector<16x512xf32>
    %cst_117 = arith.constant 0.000000e+00 : f32
    %596 = vector.broadcast %cst_117 : f32 to vector<16x512xf32>
    %597 = arith.minimumf %593, %596 : vector<16x512xf32>
    %cst_118 = arith.constant 0.00999999977 : f32
    %598 = vector.broadcast %cst_118 : f32 to vector<16x512xf32>
    %599 = arith.mulf %598, %597 : vector<16x512xf32>
    %600 = arith.addf %595, %599 : vector<16x512xf32>
    %601 = arith.truncf %600 : vector<16x512xf32> to vector<16x512xbf16>
    %c0_119 = arith.constant 0 : index
    %c512 = arith.constant 512 : index
    %602 = vector.load %arg11[%c0_119, %c512] : memref<512x1536xbf16, #tpu.memory_space<vmem>>, vector<512x512xbf16>
    %603 = vector.extract_strided_slice %10 {offsets = [13, 0], sizes = [1, 512], strides = [1, 1]} : vector<16x512xf32> to vector<1x512xf32>
    %cst_120 = arith.constant dense<0.000000e+00> : vector<16x512xf32>
    %604 = tpu.matmul %601, %602, %cst_120 {dimension_numbers = #tpu.dot_dimension_numbers<[1], [0], [0], [1], [0, 0, 1, 1], [], []>} : vector<16x512xbf16>, vector<512x512xbf16>, vector<16x512xf32> -> vector<16x512xf32>
    %605 = vector.broadcast %603 : vector<1x512xf32> to vector<16x512xf32>
    %606 = arith.addf %604, %605 : vector<16x512xf32>
    %cst_121 = arith.constant 0.000000e+00 : f32
    %607 = vector.broadcast %cst_121 : f32 to vector<16x512xf32>
    %608 = arith.maximumf %606, %607 : vector<16x512xf32>
    %cst_122 = arith.constant 0.000000e+00 : f32
    %609 = vector.broadcast %cst_122 : f32 to vector<16x512xf32>
    %610 = arith.minimumf %606, %609 : vector<16x512xf32>
    %cst_123 = arith.constant 0.00999999977 : f32
    %611 = vector.broadcast %cst_123 : f32 to vector<16x512xf32>
    %612 = arith.mulf %611, %610 : vector<16x512xf32>
    %613 = arith.addf %608, %612 : vector<16x512xf32>
    %614 = arith.truncf %613 : vector<16x512xf32> to vector<16x512xbf16>
    %c0_124 = arith.constant 0 : index
    %c1024 = arith.constant 1024 : index
    %615 = vector.load %arg11[%c0_124, %c1024] : memref<512x1536xbf16, #tpu.memory_space<vmem>>, vector<512x512xbf16>
    %616 = vector.extract_strided_slice %10 {offsets = [14, 0], sizes = [1, 512], strides = [1, 1]} : vector<16x512xf32> to vector<1x512xf32>
    %cst_125 = arith.constant dense<0.000000e+00> : vector<16x512xf32>
    %617 = tpu.matmul %614, %615, %cst_125 {dimension_numbers = #tpu.dot_dimension_numbers<[1], [0], [0], [1], [0, 0, 1, 1], [], []>} : vector<16x512xbf16>, vector<512x512xbf16>, vector<16x512xf32> -> vector<16x512xf32>
    %618 = vector.broadcast %616 : vector<1x512xf32> to vector<16x512xf32>
    %619 = arith.addf %617, %618 : vector<16x512xf32>
    %cst_126 = arith.constant dense<0xFF800000> : vector<512xf32>
    %620 = vector.multi_reduction <maximumf>, %619, %cst_126 [0] : vector<16x512xf32> to vector<512xf32>
    %621 = vector.shape_cast %620 : vector<512xf32> to vector<1x512xf32>
    %622 = vector.broadcast %621 : vector<1x512xf32> to vector<16x512xf32>
    %623 = arith.subf %619, %622 : vector<16x512xf32>
    %624 = math.exp %623 : vector<16x512xf32>
    %cst_127 = arith.constant dense<0.000000e+00> : vector<512xf32>
    %625 = vector.multi_reduction <add>, %624, %cst_127 [0] : vector<16x512xf32> to vector<512xf32>
    %626 = vector.shape_cast %625 : vector<512xf32> to vector<1x512xf32>
    %627 = vector.broadcast %626 : vector<1x512xf32> to vector<16x512xf32>
    %628 = arith.divf %624, %627 : vector<16x512xf32>
    %c0_128 = arith.constant 0 : index
    %c0_129 = arith.constant 0 : index
    %629 = vector.load %arg7[%c0_128, %c0_129] : memref<16x512xf32, #tpu.memory_space<vmem>>, vector<16x512xf32>
    tpu.vector_store %arg7[%c0_128, %c0_129], %628 {strides = array<i32>} : memref<16x512xf32, #tpu.memory_space<vmem>>, vector<16x512xf32>,
    return
  }
}

</mosaic_0001>

<bundles_post_ra>
// kernel: tpu_custom_call.1
= control target key start
LH: loop header
LB: loop body
LE: loop exit
PB: predicated region body
PF: predicated region fallthrough
CT: control target
= control target key end

     0   :  { %12 = vsyncpa [#allocation8], 0  ;;  %s13293_s0 = inlined_call_operand.hbm [shape: f32[16,32], index: 0, kind: input, shape index: {}]   ;;  %s13294_s1 = inlined_call_operand.hbm [shape: f32[16,16], index: 1, kind: input, shape index: {}]   ;;  %s13295_s2 = inlined_call_operand.hbm [shape: f32[16,512], index: 2, kind: input, shape index: {}]   ;;  %s13296_s3 = inlined_call_operand.hbm [shape: bf16[32,1024], index: 3, kind: input, shape index: {}]   ;;  %s13297_s4 = inlined_call_operand.hbm [shape: bf16[512,1024], index: 4, kind: input, shape index: {}]   ;;  %s13298_s5 = inlined_call_operand.hbm [shape: bf16[512,1024], index: 5, kind: input, shape index: {}]   ;;  %s13299_s6 = inlined_call_operand.hbm [shape: bf16[512,1536], index: 6, kind: input, shape index: {}]   ;;  %s13300_s7 = inlined_call_operand.hbm [shape: f32[16,512], index: 7, kind: output, shape index: {}]  }
   0x1   :  { %13 = vsyncpa [#allocation11], 0 }
   0x2   :  { %14 = vsyncpa [#allocation9], 0  ;;  %s9376_s24 = smov [#allocation10]   ;;  %s9377_s26 = smov [#allocation7]  }
   0x3   :  { %s32_s25 = sshll.u32 %s9376_s24, 4  ;;  %s20_s27 = sshll.u32 %s9377_s26, 4  ;;  %s33_s25 = int_to_ptr.vmem [resolvable:$true] %s32_s25  ;;  %s9446_s27 = int_to_ptr.vmem [resolvable:$true] %s20_s27 }
   0x4   :  { %s9274_s30 = scalar_lea.hbm %s13294_s1, 256 }
   0x5   :  { %p9275_p0 = scmp.ne.s32.totalorder %s13294_s1, %s9274_s30  ;;  %p9278_p1 = scmp.lt.u32.totalorder %s9274_s30, %s13294_s1 }
   0x7   :  { %p9280_p2 = pnand %p9278_p1, %p9275_p0 }
   0x9   :  { %9283 = shalt.err (!%p9280_p2)
}
   0xa   :  { %s9284_s12 = scalar_lea.vmem %s33_s25, 256  ;;  %p9289_p4 = scmp.lt.s32.totalorder %s33_s25, %s33_s25 }
   0xb   :  { %p9285_p3 = scmp.ne.s32.totalorder %s33_s25, %s9284_s12  ;;  %p9290_p5 = scmp.lt.s32.totalorder %s9284_s12, %s9284_s12 }
   0xd   :  { %p9291_p6 = por %p9290_p5, %p9289_p4 }
   0xf   :  { %p9292_p7 = pnand %p9291_p6, %p9285_p3 }
  0x11   :  { %9295 = shalt.err (!%p9292_p7)
}
  0x12   :  { %s9378_s13 = smov 128   ;;  %s9379_s14 = smov 8  }
  0x13   :  { %38 = dma.hbm_to_vmem [thread:$0]  %s13294_s1, 256, %s33_s25, [#allocation11], %s9378_s13, %s9378_s13, %s9379_s14  }
  0x14   :  { %s9296_s19 = scalar_lea.hbm %s13293_s0, 256 }
  0x15   :  { %p9297_p8 = scmp.ne.s32.totalorder %s13293_s0, %s9296_s19  ;;  %p9300_p9 = scmp.lt.u32.totalorder %s9296_s19, %s13293_s0 }
  0x17   :  { %p9302_p10 = pnand %p9300_p9, %p9297_p8 }
  0x19   :  { %9305 = shalt.err (!%p9302_p10)
}
  0x1a   :  { %s9306_s24 = scalar_lea.vmem %s9446_s27, 256  ;;  %p9311_p12 = scmp.lt.s32.totalorder %s9446_s27, %s9446_s27 }
  0x1b   :  { %p9307_p11 = scmp.ne.s32.totalorder %s9446_s27, %s9306_s24  ;;  %p9312_p13 = scmp.lt.s32.totalorder %s9306_s24, %s9306_s24 }
  0x1d   :  { %p9313_p0 = por %p9312_p13, %p9311_p12 }
  0x1f   :  { %p9314_p1 = pnand %p9313_p0, %p9307_p11 }
  0x21   :  { %9317 = shalt.err (!%p9314_p1)
}
  0x22   :  { %26 = dma.hbm_to_vmem [thread:$0]  %s13293_s0, 256, %s9446_s27, [#allocation8], %s9378_s13, %s9378_s13, %s9379_s14  }
  0x23   :  { %s9380_s26 = smov [#allocation12]   ;;  %s9318_s8 = scalar_lea.hbm %s13295_s2, 1024 }
  0x24   :  { %s44_s28 = sshll.u32 %s9380_s26, 4  ;;  %p9319_p2 = scmp.ne.s32.totalorder %s13295_s2, %s9318_s8  ;;  %s45_s28 = int_to_ptr.vmem [resolvable:$true] %s44_s28 }
  0x25   :  { %p9322_p3 = scmp.lt.u32.totalorder %s9318_s8, %s13295_s2 }
  0x27   :  { %p9324_p4 = pnand %p9322_p3, %p9319_p2 }
  0x29   :  { %9327 = shalt.err (!%p9324_p4)
}
  0x2a   :  { %s9328_s15 = scalar_lea.vmem %s45_s28, 1024  ;;  %p9333_p6 = scmp.lt.s32.totalorder %s45_s28, %s45_s28 }
  0x2b   :  { %p9329_p5 = scmp.ne.s32.totalorder %s45_s28, %s9328_s15  ;;  %p9334_p7 = scmp.lt.s32.totalorder %s9328_s15, %s9328_s15 }
  0x2d   :  { %p9335_p8 = por %p9334_p7, %p9333_p6 }
  0x2f   :  { %p9336_p9 = pnand %p9335_p8, %p9329_p5 }
  0x31   :  { %9339 = shalt.err (!%p9336_p9)
}
  0x32   :  { %s9381_s0 = smov 512   ;;  %s9382_s27 = smov 32  }
  0x33   :  { %50 = dma.hbm_to_vmem [thread:$0]  %s13295_s2, 1024, %s45_s28, [#allocation11], %s9381_s0, %s9381_s0, %s9382_s27  }
  0x34   :  { %9362 = dma.done.wait [#allocation8], 256  }
  0x35   :  { %9363 = vsyncadd [#allocation8], 4294967040 }
  0x36   :  { %9364 = dma.done.wait [#allocation11], 1280  }
  0x37   :  { %9365 = vsyncadd [#allocation11], 4294966016  ;;  %s65_s18 = sld [smem:[#allocation0]]   ;;  %s9383_s19 = smov 1024   ;;  %v9402_v13 = vmov -1e+30  }
  0x38   :  { %77 = sst [smem:[#allocation15]] %s9383_s19  ;;  %s9384_s20 = smov [#allocation2]  }
  0x39   :  { %79 = sst [smem:[#allocation15 + $0x1]] %s9383_s19  ;;  %s73_s21 = sshll.u32 %s9384_s20, 4  ;;  %s74_s21 = int_to_ptr.vmem [resolvable:$true] %s73_s21 }
  0x3a   :  { %81 = sst [smem:[#allocation15 + $0x2]] %s9379_s14  ;;  %s9385_s22 = smov 64  }
  0x3b   :  { %83 = sst [smem:[#allocation15 + $0x3]] %s9385_s22  ;;  %s9386_s24 = smov 2  }
  0x3c   :  { %85 = sst [smem:[#allocation15 + $0x4]] %s9378_s13  ;;  %s9387_s1 = smov 4  }
  0x3d   :  { %89 = sst [smem:[#allocation15 + $0x6]] %s9381_s0  ;;  %s9046_s2 = sshll.u32 %s65_s18, 26 }
  0x3e   :  { %91 = sst [smem:[#allocation15 + $0x7]] %s9385_s22  ;;  %s9505_s23 = sadd.s32 134217728, %s9046_s2 }
  0x3f   :  { %87 = sst [smem:[#allocation15 + $0x5]] %s9386_s24  ;;  %s9388_s25 = smov [#allocation6]  }
  0x40   :  { %93 = sst [smem:[#allocation15 + $0x8]] %s9387_s1  ;;  %s9389_s26 = smov [#allocation14]  }
  0x41   :  { %95 = dma.general %s13296_s3, 2048, %s74_s21, %s9388_s25, %s9389_s26, [#allocation15], %s9505_s23, 0  }
  0x42   :  { %112 = sst [smem:[#allocation17]] %s9383_s19  ;;  %s9390_s30 = smov [#allocation3]  }
  0x43   :  { %114 = sst [smem:[#allocation17 + $0x1]] %s9383_s19  ;;  %s108_s8 = sshll.u32 %s9390_s30, 4  ;;  %s109_s8 = int_to_ptr.vmem [resolvable:$true] %s108_s8 }
  0x44   :  { %116 = sst [smem:[#allocation17 + $0x2]] %s9379_s14  ;;  %s9391_s3 = smov [#allocation6 + $0x1]  }
  0x45   :  { %118 = sst [smem:[#allocation17 + $0x3]] %s9385_s22  ;;  %s9392_s9 = smov [#allocation16]  }
  0x46   :  { %120 = sst [smem:[#allocation17 + $0x4]] %s9378_s13  ;;  %s9393_s12 = smov [#allocation4]  }
  0x47   :  { %122 = sst [smem:[#allocation17 + $0x5]] %s9386_s24  ;;  %s143_s15 = sshll.u32 %s9393_s12, 4  ;;  %s144_s15 = int_to_ptr.vmem [resolvable:$true] %s143_s15 }
  0x48   :  { %124 = sst [smem:[#allocation17 + $0x6]] %s9381_s0  ;;  %s9395_s16 = smov [#allocation18]  }
  0x49   :  { %126 = sst [smem:[#allocation17 + $0x7]] %s9385_s22  ;;  %s9398_s21 = smov 12  }
  0x4a   :  { %128 = sst [smem:[#allocation17 + $0x8]] %s9387_s1  ;;  %s9399_s2 = smov 768  }
  0x4b   :  { %130 = dma.general %s13297_s4, 32768, %s109_s8, %s9391_s3, %s9392_s9, [#allocation17], %s9505_s23, 0  }
  0x4c   :  { %147 = sst [smem:[#allocation19]] %s9383_s19  ;;  %s9394_s4 = smov [#allocation6 + $0x2]  }
  0x4d   :  { %149 = sst [smem:[#allocation19 + $0x1]] %s9383_s19  ;;  %s9397_s19 = smov [#allocation5]  }
  0x4e   :  { %151 = sst [smem:[#allocation19 + $0x2]] %s9379_s14  ;;  %s9396_s14 = smov 1536  }
  0x4f   :  { %153 = sst [smem:[#allocation19 + $0x3]] %s9385_s22  ;;  %s178_s20 = sshll.u32 %s9397_s19, 4  ;;  %s179_s20 = int_to_ptr.vmem [resolvable:$true] %s178_s20 }
  0x50   :  { %155 = sst [smem:[#allocation19 + $0x4]] %s9378_s13  ;;  %s9401_s25 = smov [#allocation20]  }
  0x51   :  { %157 = sst [smem:[#allocation19 + $0x5]] %s9386_s24 }
  0x52   :  { %159 = sst [smem:[#allocation19 + $0x6]] %s9381_s0 }
  0x53   :  { %161 = sst [smem:[#allocation19 + $0x7]] %s9385_s22 }
  0x54   :  { %163 = sst [smem:[#allocation19 + $0x8]] %s9387_s1 }
  0x55   :  { %165 = dma.general %s13298_s5, 32768, %s144_s15, %s9394_s4, %s9395_s16, [#allocation19], %s9505_s23, 0  }
  0x56   :  { %182 = sst [smem:[#allocation21]] %s9396_s14  ;;  %s9400_s5 = smov [#allocation6 + $0x3]  }
  0x57   :  { %184 = sst [smem:[#allocation21 + $0x1]] %s9396_s14 }
  0x58   :  { %186 = sst [smem:[#allocation21 + $0x2]] %s9398_s21 }
  0x59   :  { %188 = sst [smem:[#allocation21 + $0x3]] %s9385_s22 }
  0x5a   :  { %190 = sst [smem:[#allocation21 + $0x4]] %s9378_s13 }
  0x5b   :  { %192 = sst [smem:[#allocation21 + $0x5]] %s9386_s24 }
  0x5c   :  { %194 = sst [smem:[#allocation21 + $0x6]] %s9399_s2 }
  0x5d   :  { %196 = sst [smem:[#allocation21 + $0x7]] %s9385_s22 }
  0x5e   :  { %198 = sst [smem:[#allocation21 + $0x8]] %s9387_s1 }
  0x5f   :  { %200 = dma.general %s13299_s6, 49152, %s179_s20, %s9400_s5, %s9401_s25, [#allocation21], %s9505_s23, 0  }
  0x60   :  { %v201_v0 = vld [vmem:[#allocation7] sm:$0xff]  ;;  %v202_v1 = vld [vmem:[#allocation7 + $0x8] sm:$0xff]  ;;  %v9552_v5 = vld [vmem:[#allocation12 + $0x10] sm:$0xff] }
  0x61   :  { %v9548_v2 = vld [vmem:[#allocation12] sm:$0xff]  ;;  %v203_v3 = vpack.c.bf16 %v202_v1, %v201_v0  ;;  %v9550_v4 = vld [vmem:[#allocation12 + $0x8] sm:$0xff]  ;;  %13698 = vst [vmem:[#allocation31_spill] sm:$0xff] %v9552_v5  ;;  %v9554_v6 = vld [vmem:[#allocation12 + $0x18] sm:$0xff] }
  0x62   :  { %13696 = vst [vmem:[#allocation29_spill] sm:$0xff] %v9548_v2  ;;  %13697 = vst [vmem:[#allocation30_spill] sm:$0xff] %v9550_v4  ;;  %v9556_v7 = vld [vmem:[#allocation12 + $0x20] sm:$0xff]  ;;  %v9558_v8 = vld [vmem:[#allocation12 + $0x28] sm:$0xff] }
  0x63   :  { %13699 = vst [vmem:[#allocation32_spill] sm:$0xff] %v9554_v6  ;;  %13700 = vst [vmem:[#allocation33_spill] sm:$0xff] %v9556_v7  ;;  %v9560_v9 = vld [vmem:[#allocation12 + $0x30] sm:$0xff]  ;;  %v9562_v10 = vld [vmem:[#allocation12 + $0x38] sm:$0xff] }
  0x64   :  { %13701 = vst [vmem:[#allocation34_spill] sm:$0xff] %v9558_v8  ;;  %13702 = vst [vmem:[#allocation35_spill] sm:$0xff] %v9560_v9  ;;  %v212_v11 = vld [vmem:[#allocation10] sm:$0xff]  ;;  %v213_v12 = vld [vmem:[#allocation10 + $0x8] sm:$0xff] }
  0x65   :  { %13703 = vst [vmem:[#allocation36_spill] sm:$0xff] %v9562_v10  ;;  %vm214_vm0 = vcmp.gt.f32.partialorder %v212_v11, 0.0  ;;  %vm215_vm1 = vcmp.gt.f32.partialorder %v213_v12, 0.0 }
  0x66   :  { %v9564_v14 = vsel %vm214_vm0, 0.0, %v9402_v13  ;;  %v9566_v15 = vsel %vm215_vm1, 0.0, %v9402_v13 }
  0x67   :  { %13704 = vst [vmem:[#allocation37_spill] sm:$0xff] %v9564_v14  ;;  %13705 = vst [vmem:[#allocation38_spill] sm:$0xff] %v9566_v15 }
  0x68   :  { %9366 = dma.done.wait [#allocation6], 2048 }
  0x69   :  { %9367 = vsyncadd [#allocation6], 4294965248  ;;  %v13301_v16 = vmov 0   ;;  %v223_v17 = vld [vmem:[#allocation2 + $0x8] sm:$0xff]  ;;  %v225_v18 = vld [vmem:[#allocation2 + $0x18] sm:$0xff]  ;;  %vm238_vm2 = vcmask 261120   ;;  %v13303_v33 = vlaneseq }
  0x6a   :  { %274 = vmatprep.mubr.bf16.mxu0 %v13301_v16  ;;  %317 = vmatprep.mubr.bf16.mxu1 %v13301_v16  ;;  %v222_v19 = vld [vmem:[#allocation2] sm:$0xff]  ;;  %v224_v20 = vld [vmem:[#allocation2 + $0x10] sm:$0xff]  ;;  %v231_v21 = vld [vmem:[#allocation2 + $0x48] sm:$0xff]  ;;  %v9404_v38 = vmov 1966171168   ;;  %vm2185_vm3 = vcmask 130112  }
  0x6b   :  { %242 = vmatprep.subr.bf16.mxu0 %v223_v17  ;;  %285 = vmatprep.subr.bf16.mxu1 %v225_v18  ;;  %v233_v22 = vld [vmem:[#allocation2 + $0x58] sm:$0xff]  ;;  %v230_v23 = vld [vmem:[#allocation2 + $0x40] sm:$0xff]  ;;  %v232_v24 = vld [vmem:[#allocation2 + $0x50] sm:$0xff]  ;;  %v9579_v34 = vshrl.u32 %v13303_v33, 7  ;;  %v465_v39 = vunpack.c.l.s4 %v9404_v38  ;;  %vm2250_vm4 = vcmask 1041409   ;;  %vm2252_vm5 = vcmask 1042434  }
  0x6c   :  { %243 = vmatpush1.bf16.msra.mxu0 %v222_v19  ;;  %286 = vmatpush1.bf16.msra.mxu1 %v224_v20  ;;  %v227_v25 = vld [vmem:[#allocation2 + $0x28] sm:$0xff]  ;;  %v229_v26 = vld [vmem:[#allocation2 + $0x38] sm:$0xff]  ;;  %v226_v27 = vld [vmem:[#allocation2 + $0x20] sm:$0xff]  ;;  %vm2254_vm6 = vcmask 1043459   ;;  %vm2256_vm7 = vcmask 1044484   ;;  %vm2258_vm8 = vcmask 1045509  }
  0x6d   :  { %244 = vmatprep.subr.bf16.mxu0 %v231_v21  ;;  %287 = vmatprep.subr.bf16.mxu1 %v233_v22  ;;  %v228_v28 = vld [vmem:[#allocation2 + $0x30] sm:$0xff]  ;;  %v235_v29 = vld [vmem:[#allocation2 + $0x68] sm:$0xff]  ;;  %v237_v30 = vld [vmem:[#allocation2 + $0x78] sm:$0xff]  ;;  %13706 = vst [vmem:[#allocation39_spill] sm:$0xff] %v9579_v34  ;;  %v9582_v35 = vsub.s32 0, %v9579_v34  ;;  %v9595_v47 = vsub.s32 1, %v9579_v34  ;;  %v466_v55 = vunpack.c.0.s8 %v465_v39 }
  0x6e   :  { %v234_v31 = vld [vmem:[#allocation2 + $0x60] sm:$0xff]  ;;  %v236_v32 = vld [vmem:[#allocation2 + $0x70] sm:$0xff]  ;;  %v9610_v59 = vsub.s32 2, %v9579_v34  ;;  %vm2260_vm9 = vcmask 1046534   ;;  %vm2262_vm10 = vcmask 1047559   ;;  %vm2363_vm11 = vcmask 130048  }
  0x6f   :  { %13707 = vst [vmem:[#allocation40_spill] sm:$0xff] %v9582_v35  ;;  %v425_v36 = vrot.slane %v9552_v5, %v9582_v35  ;;  %v429_v37 = vrot.slane %v9554_v6, %v9582_v35  ;;  %v421_v42 = vrot.slane %v9550_v4, %v9582_v35  ;;  %v417_v43 = vrot.slane %v9548_v2, %v9582_v35 }
  0x70   :  { %245 = vmatpush1.bf16.msra.mxu0 %v230_v23  ;;  %288 = vmatpush1.bf16.msra.mxu1 %v232_v24  ;;  %13709 = vst [vmem:[#allocation42_spill] sm:$0xff] %v9595_v47  ;;  %13714 = vst [vmem:[#allocation47_spill] sm:$0xff] %v9610_v59  ;;  %v9616_v61 = vrot.slane %v9548_v2, %v9595_v47  ;;  %v9620_v62 = vrot.slane %v9552_v5, %v9595_v47 }
  0x71   :  { %328 = vmatprep.subr.bf16.mxu0 %v227_v25  ;;  %371 = vmatprep.subr.bf16.mxu1 %v229_v26  ;;  %v9634_v11 = vrot.slane %v9554_v6, %v9595_v47  ;;  %v9637_v12 = vsub.s32 %v466_v55, %v9579_v34  ;;  %v9643_v19 = vrot.slane %v9548_v2, %v9610_v59 }
  0x72   :  { %v9649_v24 = vrot.slane %v9550_v4, %v9610_v59 }
  0x73   :  { %9054 = vmatmul.mubr.msk.bf16.vlgmr.msra.gmra.mrb[0].mxu0 %vm238_vm2, %v203_v3  ;;  %9055 = vmatmul.mubr.msk.bf16.vlgmr.msra.gmra.mrb[0].mxu1 %vm238_vm2, %v203_v3  ;;  %13716 = vst [vmem:[#allocation49_spill] sm:$0xff] %v9637_v12 }
  0x74   :  { %329 = vmatpush1.bf16.msra.mxu0 %v226_v27  ;;  %372 = vmatpush1.bf16.msra.mxu1 %v228_v28 }
  0x75   :  { %330 = vmatprep.subr.bf16.mxu0 %v235_v29  ;;  %373 = vmatprep.subr.bf16.mxu1 %v237_v30  ;;  %v9661_v29 = vrot.slane %v9552_v5, %v9610_v59  ;;  %v9665_v30 = vrot.slane %v9554_v6, %v9610_v59 }
  0x76   :  { %360 = vmatprep.mubr.bf16.mxu0 %v13301_v16  ;;  %403 = vmatprep.mubr.bf16.mxu1 %v13301_v16 }
  0x78   :  { %331 = vmatpush1.bf16.msra.mxu0 %v234_v31  ;;  %374 = vmatpush1.bf16.msra.mxu1 %v236_v32 }
  0x7b   :  { %9056 = vmatmul.mubr.msk.bf16.vlgmr.msra.gmra.mrb[4].mxu0 %vm238_vm2, %v203_v3  ;;  %9057 = vmatmul.mubr.msk.bf16.vlgmr.msra.gmra.mrb[4].mxu1 %vm238_vm2, %v203_v3  ;;  %v9630_v3 = vrot.slane %v9550_v4, %v9595_v47 }
  0x7c   :  { %2442 = vmatprep.mubr.bf16.mxu0 %v13301_v16  ;;  %2485 = vmatprep.mubr.bf16.mxu1 %v13301_v16 }
 0x146   :  { %v276_v40 = vpop.f32.mrb[0].mxu0  ;;  %v319_v41 = vpop.f32.mrb[0].mxu1 }
 0x147   :  { %v9592_v44 = vadd.f32 %v425_v36, %v319_v41  ;;  %v278_v45 = vpop.f32.mrb[1].mxu0  ;;  %v321_v46 = vpop.f32.mrb[1].mxu1  ;;  %v9612_v60 = vadd.f32 %v417_v43, %v276_v40 }
 0x148   :  { %v9597_v48 = vadd.f32 %v429_v37, %v321_v46  ;;  %v280_v49 = vpop.f32.mrb[2].mxu0  ;;  %v323_v50 = vpop.f32.mrb[2].mxu1  ;;  %v9603_v56 = vadd.f32 %v421_v42, %v278_v45 }
 0x149   :  { %13708 = vst [vmem:[#allocation41_spill] sm:$0xff] %v9592_v44  ;;  %v9599_v51 = vadd.f32 %v417_v43, %v280_v49  ;;  %v9601_v52 = vadd.f32 %v425_v36, %v323_v50  ;;  %v282_v53 = vpop.f32.mrb[3].mxu0  ;;  %v325_v54 = vpop.f32.mrb[3].mxu1  ;;  %13715 = vst [vmem:[#allocation48_spill] sm:$0xff] %v9612_v60 }
 0x14a   :  { %13712 = vst [vmem:[#allocation45_spill] sm:$0xff] %v9603_v56  ;;  %v9605_v57 = vadd.f32 %v421_v42, %v282_v53  ;;  %v9607_v58 = vadd.f32 %v429_v37, %v325_v54 }
 0x14b   :  { %13710 = vst [vmem:[#allocation43_spill] sm:$0xff] %v9599_v51  ;;  %13711 = vst [vmem:[#allocation44_spill] sm:$0xff] %v9601_v52  ;;  %v2389_v63 = vpack.c.bf16 %v9601_v52, %v9592_v44  ;;  %v2387_v13 = vpack.c.bf16 %v9599_v51, %v9612_v60 }
 0x14c   :  { %13713 = vst [vmem:[#allocation46_spill] sm:$0xff] %v9605_v57  ;;  %v2388_v0 = vpack.c.bf16 %v9605_v57, %v9603_v56  ;;  %v2390_v1 = vpack.c.bf16 %v9607_v58, %v9597_v48 }
 0x14e   :  { %v362_v17 = vpop.f32.mrb[4].mxu0  ;;  %v405_v18 = vpop.f32.mrb[4].mxu1  ;;  %2410 = vmatprep.subr.bf16.mxu0 %v2388_v0  ;;  %2453 = vmatprep.subr.bf16.mxu1 %v2390_v1 }
 0x14f   :  { %v454_v20 = vadd.f32 %v9616_v61, %v362_v17  ;;  %v456_v21 = vadd.f32 %v9620_v62, %v405_v18  ;;  %v364_v22 = vpop.f32.mrb[5].mxu0  ;;  %v407_v23 = vpop.f32.mrb[5].mxu1  ;;  %2411 = vmatpush1.bf16.msra.mxu0 %v2387_v13  ;;  %2454 = vmatpush1.bf16.msra.mxu1 %v2389_v63 }
 0x150   :  { %v455_v25 = vadd.f32 %v9630_v3, %v364_v22  ;;  %v9653_v26 = vadd.f32 %v9634_v11, %v407_v23  ;;  %v9655_v27 = vpop.f32.mrb[6].mxu0  ;;  %v9657_v28 = vpop.f32.mrb[6].mxu1 }
 0x151   :  { %v463_v31 = vcombine.high %v454_v20, %v454_v20  ;;  %v470_v32 = vrot.slane %v454_v20, %v9637_v12  ;;  %v875_v36 = vcombine.high %v456_v21, %v456_v21  ;;  %v882_v37 = vrot.slane %v456_v21, %v9637_v12  ;;  %v9669_v38 = vpop.f32.mrb[7].mxu0  ;;  %v9671_v39 = vpop.f32.mrb[7].mxu1 }
 0x152   :  { %v669_v40 = vcombine.high %v455_v25, %v455_v25  ;;  %v9674_v41 = vrot.slane %v455_v25, %v9637_v12  ;;  %v9680_v43 = vrot.slane %v9653_v26, %v9637_v12  ;;  %v458_v34 = vadd.f32 %v9616_v61, %v9655_v27 }
 0x153   :  { %v477_v45 = vrot.slane %v463_v31, %v9637_v12  ;;  %v478_v46 = vcombine.high %v470_v32, %v470_v32  ;;  %v486_v49 = vrot.slane %v470_v32, %v9637_v12  ;;  %v889_v50 = vrot.slane %v875_v36, %v9637_v12 }
 0x154   :  { %v890_v53 = vcombine.high %v882_v37, %v882_v37  ;;  %v898_v54 = vrot.slane %v882_v37, %v9637_v12  ;;  %v9687_v55 = vrot.slane %v669_v40, %v9637_v12  ;;  %v684_v63 = vcombine.high %v9674_v41, %v9674_v41 }
 0x155   :  { %v479_v0 = vcombine.high %v477_v45, %v477_v45  ;;  %v493_v1 = vrot.slane %v477_v45, %v9637_v12  ;;  %v500_v13 = vrot.slane %v478_v46, %v9637_v12  ;;  %v508_v17 = vcombine.high %v486_v49, %v486_v49 }
 0x156   :  { %v515_v18 = vrot.slane %v486_v49, %v9582_v35  ;;  %v891_v20 = vcombine.high %v889_v50, %v889_v50  ;;  %v905_v21 = vrot.slane %v889_v50, %v9637_v12  ;;  %v912_v22 = vrot.slane %v890_v53, %v9637_v12 }
 0x157   :  { %v507_v23 = vrot.slane %v479_v0, %v9637_v12  ;;  %v509_v25 = vcombine.high %v493_v1, %v493_v1  ;;  %v510_v31 = vcombine.high %v500_v13, %v500_v13  ;;  %v519_v32 = vrot.slane %v500_v13, %v9582_v35 }
 0x158   :  { %v523_v36 = vrot.slane %v508_v17, %v9582_v35  ;;  %v531_v37 = vrot.slane %v493_v1, %v9582_v35  ;;  %v9701_v40 = vadd.f32 %v515_v18, %v9612_v60  ;;  %v9704_v45 = vadd.f32 %v515_v18, %v9599_v51 }
 0x159   :  { %v511_v46 = vcombine.high %v507_v23, %v507_v23  ;;  %v527_v49 = vrot.slane %v510_v31, %v9582_v35  ;;  %v535_v50 = vrot.slane %v507_v23, %v9582_v35  ;;  %v539_v53 = vrot.slane %v509_v25, %v9582_v35 }
 0x15a   :  { %v9710_v0 = vadd.f32 %v519_v32, %v9612_v60  ;;  %v9713_v13 = vadd.f32 %v519_v32, %v9599_v51  ;;  %v9716_v1 = vadd.f32 %v523_v36, %v9612_v60  ;;  %v9719_v17 = vadd.f32 %v523_v36, %v9599_v51 }
 0x15b   :  { %v9722_v18 = vrot.slane %v511_v46, %v9582_v35  ;;  %v9725_v31 = vadd.f32 %v527_v49, %v9612_v60  ;;  %v9728_v23 = vadd.f32 %v527_v49, %v9599_v51  ;;  %v9731_v25 = vadd.f32 %v531_v37, %v9612_v60 }
 0x15c   :  { %v9734_v32 = vadd.f32 %v531_v37, %v9599_v51  ;;  %v9737_v16 = vadd.f32 %v535_v50, %v9612_v60  ;;  %v9740_v36 = vadd.f32 %v535_v50, %v9599_v51  ;;  %v9743_v46 = vadd.f32 %v539_v53, %v9612_v60 }
 0x15d   :  { %13717 = vst [vmem:[#allocation50_spill] sm:$0xff] %v9722_v18  ;;  %13718 = vst [vmem:[#allocation51_spill] sm:$0xff] %v9725_v31  ;;  %v9746_v33 = vadd.f32 %v539_v53, %v9599_v51  ;;  %v585_v42 = vmin.f32 %v9704_v45, 0.0  ;;  %v919_v59 = vrot.slane %v891_v20, %v9637_v12  ;;  %v920_v37 = vcombine.high %v898_v54, %v898_v54 }
 0x15e   :  { %13719 = vst [vmem:[#allocation52_spill] sm:$0xff] %v9728_v23  ;;  %13720 = vst [vmem:[#allocation53_spill] sm:$0xff] %v9734_v32  ;;  %v921_v47 = vcombine.high %v905_v21, %v905_v21  ;;  %v922_v9 = vcombine.high %v912_v22, %v912_v22  ;;  %v927_v7 = vrot.slane %v898_v54, %v9582_v35 }
 0x15f   :  { %13721 = vst [vmem:[#allocation54_spill] sm:$0xff] %v9737_v16  ;;  %13722 = vst [vmem:[#allocation55_spill] sm:$0xff] %v9740_v36  ;;  %v9752_v10 = vmul.f32 0.2, %v585_v42  ;;  %v923_v50 = vcombine.high %v919_v59, %v919_v59  ;;  %v9755_v8 = vrot.slane %v912_v22, %v9582_v35  ;;  %v943_v53 = vrot.slane %v905_v21, %v9582_v35 }
 0x160   :  { %13723 = vst [vmem:[#allocation56_spill] sm:$0xff] %v9743_v46  ;;  %13724 = vst [vmem:[#allocation57_spill] sm:$0xff] %v9746_v33  ;;  %v935_v6 = vrot.slane %v920_v37, %v9582_v35  ;;  %v9760_v49 = vrot.slane %v922_v9, %v9582_v35  ;;  %v9763_v20 = vrot.slane %v919_v59, %v9582_v35 }
 0x161   :  { %v9766_v4 = vrot.slane %v921_v47, %v9582_v35  ;;  %v9769_v42 = vrot.slane %v923_v50, %v9582_v35  ;;  %v9772_v54 = vadd.f32 %v927_v7, %v9592_v44  ;;  %v9775_v22 = vadd.f32 %v927_v7, %v9601_v52 }
 0x162   :  { %13725 = vst [vmem:[#allocation58_spill] sm:$0xff] %v9760_v49  ;;  %13726 = vst [vmem:[#allocation59_spill] sm:$0xff] %v9763_v20  ;;  %v9779_v21 = vadd.f32 %v9755_v8, %v9601_v52  ;;  %v9782_v9 = vadd.f32 %v935_v6, %v9592_v44  ;;  %v9785_v59 = vadd.f32 %v935_v6, %v9601_v52 }
 0x163   :  { %13727 = vst [vmem:[#allocation60_spill] sm:$0xff] %v9766_v4  ;;  %13728 = vst [vmem:[#allocation61_spill] sm:$0xff] %v9769_v42  ;;  %v9788_v47 = vadd.f32 %v943_v53, %v9592_v44  ;;  %v9791_v37 = vadd.f32 %v943_v53, %v9601_v52  ;;  %v685_v7 = vcombine.high %v9687_v55, %v9687_v55 }
 0x164   :  { %v692_v50 = vrot.slane %v9674_v41, %v9637_v12  ;;  %v699_v5 = vrot.slane %v9687_v55, %v9637_v12  ;;  %v706_v2 = vrot.slane %v684_v63, %v9637_v12  ;;  %v13731_v6 = vcombine.high %v9653_v26, %v9653_v26 }
 0x165   :  { %13729 = vst [vmem:[#allocation62_spill] sm:$0xff] %v9788_v47  ;;  %13730 = vst [vmem:[#allocation63_spill] sm:$0xff] %v9791_v37  ;;  %v1096_v53 = vcombine.high %v9680_v43, %v9680_v43  ;;  %v1104_v14 = vrot.slane %v9680_v43, %v9637_v12  ;;  %v713_v41 = vrot.slane %v685_v7, %v9637_v12 }
 0x166   :  { %v1095_v15 = vrot.slane %v13731_v6, %v9637_v12  ;;  %v714_v42 = vcombine.high %v692_v50, %v692_v50  ;;  %v715_v55 = vcombine.high %v699_v5, %v699_v5  ;;  %v716_v18 = vcombine.high %v706_v2, %v706_v2 }
 0x167   :  { %v721_v63 = vrot.slane %v692_v50, %v9582_v35  ;;  %v725_v33 = vrot.slane %v706_v2, %v9582_v35  ;;  %v737_v26 = vrot.slane %v699_v5, %v9582_v35  ;;  %v717_v4 = vcombine.high %v713_v41, %v713_v41 }
 0x168   :  { %v1097_v6 = vcombine.high %v1095_v15, %v1095_v15  ;;  %v729_v46 = vrot.slane %v714_v42, %v9582_v35  ;;  %v733_v43 = vrot.slane %v716_v18, %v9582_v35  ;;  %v741_v36 = vrot.slane %v713_v41, %v9582_v35 }
 0x169   :  { %v745_v61 = vrot.slane %v715_v55, %v9582_v35  ;;  %v9819_v27 = vadd.f32 %v721_v63, %v9603_v56  ;;  %v9822_v7 = vadd.f32 %v721_v63, %v9605_v57  ;;  %v9825_v2 = vadd.f32 %v725_v33, %v9603_v56 }
 0x16a   :  { %v9828_v5 = vrot.slane %v717_v4, %v9582_v35  ;;  %v9831_v42 = vadd.f32 %v725_v33, %v9605_v57  ;;  %v9834_v18 = vadd.f32 %v729_v46, %v9603_v56  ;;  %v9837_v50 = vadd.f32 %v729_v46, %v9605_v57 }
 0x16b   :  { %v9840_v41 = vadd.f32 %v733_v43, %v9603_v56  ;;  %v9843_v55 = vadd.f32 %v733_v43, %v9605_v57  ;;  %v9846_v63 = vadd.f32 %v737_v26, %v9603_v56  ;;  %v9849_v4 = vadd.f32 %v737_v26, %v9605_v57 }
 0x16c   :  { %13732 = vst [vmem:[#allocation64_spill] sm:$0xff] %v9828_v5  ;;  %v9852_v33 = vadd.f32 %v741_v36, %v9603_v56  ;;  %v9855_v5 = vadd.f32 %v741_v36, %v9605_v57  ;;  %v9858_v46 = vadd.f32 %v745_v61, %v9603_v56  ;;  %v9861_v20 = vadd.f32 %v745_v61, %v9605_v57 }
 0x16d   :  { %13733 = vst [vmem:[#allocation65_spill] sm:$0xff] %v9840_v41  ;;  %13734 = vst [vmem:[#allocation66_spill] sm:$0xff] %v9843_v55  ;;  %v791_v16 = vmin.f32 %v9822_v7, 0.0  ;;  %v1111_v55 = vrot.slane %v1095_v15, %v9637_v12  ;;  %v1118_v26 = vrot.slane %v1096_v53, %v9637_v12  ;;  %v9868_v23 = vrot.slane %v1097_v6, %v9637_v12 }
 0x16e   :  { %13735 = vst [vmem:[#allocation67_spill] sm:$0xff] %v9846_v63  ;;  %13736 = vst [vmem:[#allocation68_spill] sm:$0xff] %v9849_v4  ;;  %v9871_v36 = vrot.slane %v1104_v14, %v9582_v35  ;;  %v13792_v63 = vmax.f32 %v9704_v45, 0.0 }
 0x16f   :  { %13737 = vst [vmem:[#allocation69_spill] sm:$0xff] %v9852_v33  ;;  %13738 = vst [vmem:[#allocation70_spill] sm:$0xff] %v9855_v5  ;;  %v1126_v33 = vcombine.high %v1104_v14, %v1104_v14  ;;  %v1319_v5 = vcombine.high %v458_v34, %v458_v34  ;;  %v1127_v61 = vcombine.high %v1111_v55, %v1111_v55 }
 0x170   :  { %13739 = vst [vmem:[#allocation71_spill] sm:$0xff] %v9858_v46  ;;  %13740 = vst [vmem:[#allocation72_spill] sm:$0xff] %v9861_v20  ;;  %v9873_v46 = vmul.f32 0.2, %v791_v16  ;;  %v1128_v20 = vcombine.high %v1118_v26, %v1118_v26  ;;  %v9876_v43 = vrot.slane %v1118_v26, %v9582_v35  ;;  %v9884_v6 = vrot.slane %v1111_v55, %v9582_v35 }
 0x171   :  { %13741 = vst [vmem:[#allocation73_spill] sm:$0xff] %v9868_v23  ;;  %v9881_v53 = vrot.slane %v1126_v33, %v9582_v35  ;;  %v9888_v14 = vrot.slane %v9868_v23, %v9582_v35  ;;  %v9894_v49 = vrot.slane %v1127_v61, %v9582_v35  ;;  %v9898_v26 = vadd.f32 %v9871_v36, %v9607_v58 }
 0x172   :  { %13742 = vst [vmem:[#allocation74_spill] sm:$0xff] %v9884_v6  ;;  %v9891_v16 = vrot.slane %v1128_v20, %v9582_v35  ;;  %v1326_v33 = vrot.slane %v458_v34, %v9637_v12  ;;  %v1333_v15 = vrot.slane %v1319_v5, %v9637_v12  ;;  %v460_v55 = vadd.f32 %v9620_v62, %v9657_v28 }
 0x173   :  { %13743 = vst [vmem:[#allocation75_spill] sm:$0xff] %v9888_v14  ;;  %13745 = vst [vmem:[#allocation77_spill] sm:$0xff] %v9894_v49  ;;  %v459_v23 = vadd.f32 %v9630_v3, %v9669_v38  ;;  %v9908_v20 = vadd.f32 %v9634_v11, %v9671_v39 }
 0x174   :  { %13744 = vst [vmem:[#allocation76_spill] sm:$0xff] %v9891_v16  ;;  %v1334_v61 = vcombine.high %v1326_v33, %v1326_v33  ;;  %v1342_v49 = vrot.slane %v1326_v33, %v9637_v12  ;;  %v1335_v34 = vcombine.high %v1333_v15, %v1333_v15  ;;  %v1349_v5 = vrot.slane %v1333_v15, %v9637_v12 }
 0x175   :  { %v1723_v41 = vcombine.high %v460_v55, %v460_v55  ;;  %v1730_v62 = vrot.slane %v460_v55, %v9637_v12  ;;  %v1521_v11 = vcombine.high %v459_v23, %v459_v23 }
 0x176   :  { %v1356_v28 = vrot.slane %v1334_v61, %v9637_v12  ;;  %v1364_v3 = vcombine.high %v1342_v49, %v1342_v49  ;;  %v1371_v38 = vrot.slane %v1342_v49, %v9582_v35  ;;  %v1363_v39 = vrot.slane %v1335_v34, %v9637_v12 }
 0x177   :  { %v1365_v31 = vcombine.high %v1349_v5, %v1349_v5  ;;  %v1387_v33 = vrot.slane %v1349_v5, %v9582_v35  ;;  %v1737_v14 = vrot.slane %v1723_v41, %v9637_v12 }
 0x178   :  { %v1366_v16 = vcombine.high %v1356_v28, %v1356_v28  ;;  %v1375_v37 = vrot.slane %v1356_v28, %v9582_v35  ;;  %v1379_v15 = vrot.slane %v1364_v3, %v9582_v35  ;;  %v9923_v55 = vadd.f32 %v1371_v38, %v9612_v60 }
 0x179   :  { %v1367_v61 = vcombine.high %v1363_v39, %v1363_v39  ;;  %v1391_v4 = vrot.slane %v1363_v39, %v9582_v35  ;;  %v1395_v49 = vrot.slane %v1365_v31, %v9582_v35  ;;  %v9928_v34 = vadd.f32 %v1371_v38, %v9599_v51 }
 0x17a   :  { %v1383_v5 = vrot.slane %v1366_v16, %v9582_v35  ;;  %v9932_v41 = vadd.f32 %v1375_v37, %v9612_v60  ;;  %v9935_v28 = vadd.f32 %v1375_v37, %v9599_v51  ;;  %v9938_v3 = vadd.f32 %v1379_v15, %v9612_v60 }
 0x17b   :  { %v9941_v32 = vrot.slane %v1367_v61, %v9582_v35  ;;  %v9944_v39 = vadd.f32 %v1379_v15, %v9599_v51  ;;  %v9947_v31 = vadd.f32 %v1387_v33, %v9612_v60  ;;  %v9950_v16 = vadd.f32 %v1387_v33, %v9599_v51 }
 0x17c   :  { %13746 = vst [vmem:[#allocation78_spill] sm:$0xff] %v9932_v41  ;;  %13747 = vst [vmem:[#allocation79_spill] sm:$0xff] %v9935_v28  ;;  %v9953_v38 = vadd.f32 %v1383_v5, %v9612_v60  ;;  %v9956_v37 = vadd.f32 %v1383_v5, %v9599_v51  ;;  %v9962_v61 = vadd.f32 %v1391_v4, %v9599_v51  ;;  %v1441_v5 = vmin.f32 %v9928_v34, 0.0 }
 0x17d   :  { %13748 = vst [vmem:[#allocation80_spill] sm:$0xff] %v9938_v3  ;;  %13749 = vst [vmem:[#allocation81_spill] sm:$0xff] %v9941_v32  ;;  %v9959_v3 = vadd.f32 %v1391_v4, %v9612_v60  ;;  %v9965_v15 = vadd.f32 %v1395_v49, %v9612_v60  ;;  %v9968_v32 = vadd.f32 %v1395_v49, %v9599_v51 }
 0x17e   :  { %13750 = vst [vmem:[#allocation82_spill] sm:$0xff] %v9944_v39  ;;  %13751 = vst [vmem:[#allocation83_spill] sm:$0xff] %v9947_v31  ;;  %v1739_v31 = vcombine.high %v1737_v14, %v1737_v14  ;;  %v1753_v4 = vrot.slane %v1737_v14, %v9637_v12  ;;  %v1528_v60 = vrot.slane %v459_v23, %v9637_v12  ;;  %v9980_v51 = vmul.f32 0.2, %v1441_v5 }
 0x17f   :  { %13752 = vst [vmem:[#allocation84_spill] sm:$0xff] %v9950_v16  ;;  %13753 = vst [vmem:[#allocation85_spill] sm:$0xff] %v9953_v38  ;;  %v1440_v38 = vmin.f32 %v9923_v55, 0.0 }
 0x180   :  { %13754 = vst [vmem:[#allocation86_spill] sm:$0xff] %v9956_v37  ;;  %13755 = vst [vmem:[#allocation87_spill] sm:$0xff] %v9959_v3  ;;  %v1738_v37 = vcombine.high %v1730_v62, %v1730_v62  ;;  %v1746_v3 = vrot.slane %v1730_v62, %v9637_v12  ;;  %v1767_v33 = vrot.slane %v1739_v31, %v9637_v12 }
 0x181   :  { %13756 = vst [vmem:[#allocation88_spill] sm:$0xff] %v9962_v61  ;;  %13757 = vst [vmem:[#allocation89_spill] sm:$0xff] %v9965_v15  ;;  %v1535_v15 = vrot.slane %v1521_v11, %v9637_v12  ;;  %v9978_v49 = vmul.f32 0.2, %v1440_v38  ;;  %v1769_v61 = vcombine.high %v1753_v4, %v1753_v4  ;;  %v1791_v62 = vrot.slane %v1753_v4, %v9582_v35 }
 0x182   :  { %13758 = vst [vmem:[#allocation90_spill] sm:$0xff] %v9968_v32  ;;  %v1760_v16 = vrot.slane %v1738_v37, %v9637_v12  ;;  %v1768_v32 = vcombine.high %v1746_v3, %v1746_v3  ;;  %v1775_v39 = vrot.slane %v1746_v3, %v9582_v35  ;;  %v1771_v14 = vcombine.high %v1767_v33, %v1767_v33 }
 0x183   :  { %v9988_v11 = vrot.slane %v1767_v33, %v9582_v35  ;;  %v9992_v5 = vrot.slane %v1769_v61, %v9582_v35 }
 0x184   :  { %v1770_v28 = vcombine.high %v1760_v16, %v1760_v16  ;;  %v1779_v23 = vrot.slane %v1760_v16, %v9582_v35  ;;  %v1783_v38 = vrot.slane %v1768_v32, %v9582_v35  ;;  %v9995_v31 = vadd.f32 %v1775_v39, %v9592_v44 }
 0x185   :  { %13759 = vst [vmem:[#allocation91_spill] sm:$0xff] %v9988_v11  ;;  %13760 = vst [vmem:[#allocation92_spill] sm:$0xff] %v9992_v5  ;;  %v9998_v37 = vadd.f32 %v1775_v39, %v9601_v52  ;;  %v10004_v4 = vrot.slane %v1771_v14, %v9582_v35  ;;  %v10019_v39 = vadd.f32 %v1791_v62, %v9592_v44 }
 0x186   :  { %v10001_v3 = vrot.slane %v1770_v28, %v9582_v35  ;;  %v10007_v16 = vadd.f32 %v1779_v23, %v9592_v44  ;;  %v10010_v32 = vadd.f32 %v1779_v23, %v9601_v52  ;;  %v10013_v61 = vadd.f32 %v1783_v38, %v9592_v44 }
 0x187   :  { %13762 = vst [vmem:[#allocation94_spill] sm:$0xff] %v10004_v4  ;;  %v10016_v33 = vadd.f32 %v1783_v38, %v9601_v52  ;;  %13767 = vst [vmem:[#allocation99_spill] sm:$0xff] %v10019_v39  ;;  %v10022_v28 = vadd.f32 %v1791_v62, %v9601_v52  ;;  %v1536_v14 = vcombine.high %v1528_v60, %v1528_v60  ;;  %v13769_v38 = vmin.f32 %v9701_v40, 0.0 }
 0x188   :  { %13761 = vst [vmem:[#allocation93_spill] sm:$0xff] %v10001_v3  ;;  %13763 = vst [vmem:[#allocation95_spill] sm:$0xff] %v10007_v16  ;;  %v1537_v4 = vcombine.high %v1535_v15, %v1535_v15  ;;  %v1544_v5 = vrot.slane %v1528_v60, %v9637_v12  ;;  %v1551_v11 = vrot.slane %v1535_v15, %v9637_v12 }
 0x189   :  { %13764 = vst [vmem:[#allocation96_spill] sm:$0xff] %v10010_v32  ;;  %13765 = vst [vmem:[#allocation97_spill] sm:$0xff] %v10013_v61  ;;  %v1925_v23 = vcombine.high %v9908_v20, %v9908_v20  ;;  %v1932_v3 = vrot.slane %v9908_v20, %v9637_v12  ;;  %v1558_v62 = vrot.slane %v1536_v14, %v9637_v12 }
 0x18a   :  { %13766 = vst [vmem:[#allocation98_spill] sm:$0xff] %v10016_v33  ;;  %13768 = vst [vmem:[#allocation100_spill] sm:$0xff] %v10022_v28  ;;  %v600_v33 = vmul.f32 0.2, %v13769_v38  ;;  %v1565_v28 = vrot.slane %v1537_v4, %v9637_v12  ;;  %v1566_v52 = vcombine.high %v1544_v5, %v1544_v5  ;;  %v1567_v61 = vcombine.high %v1551_v11, %v1551_v11 }
 0x18b   :  { %v1573_v60 = vrot.slane %v1544_v5, %v9582_v35  ;;  %v1589_v15 = vrot.slane %v1551_v11, %v9582_v35  ;;  %v1939_v32 = vrot.slane %v1925_v23, %v9637_v12  ;;  %v1940_v16 = vcombine.high %v1932_v3, %v1932_v3 }
 0x18c   :  { %v1568_v41 = vcombine.high %v1558_v62, %v1558_v62  ;;  %v1569_v20 = vcombine.high %v1565_v28, %v1565_v28  ;;  %v1577_v6 = vrot.slane %v1558_v62, %v9582_v35  ;;  %v1581_v38 = vrot.slane %v1566_v52, %v9582_v35 }
 0x18d   :  { %v1593_v39 = vrot.slane %v1565_v28, %v9582_v35  ;;  %v1597_v14 = vrot.slane %v1567_v61, %v9582_v35  ;;  %v10043_v4 = vadd.f32 %v1573_v60, %v9603_v56  ;;  %v10046_v5 = vadd.f32 %v1573_v60, %v9605_v57 }
 0x18e   :  { %v1585_v11 = vrot.slane %v1568_v41, %v9582_v35  ;;  %v10050_v23 = vrot.slane %v1569_v20, %v9582_v35  ;;  %v10053_v47 = vadd.f32 %v1577_v6, %v9603_v56  ;;  %v10056_v52 = vadd.f32 %v1577_v6, %v9605_v57 }
 0x18f   :  { %v10059_v28 = vadd.f32 %v1581_v38, %v9603_v56  ;;  %v10062_v61 = vadd.f32 %v1581_v38, %v9605_v57  ;;  %v10065_v62 = vadd.f32 %v1589_v15, %v9603_v56  ;;  %v10068_v41 = vadd.f32 %v1589_v15, %v9605_v57 }
 0x190   :  { %13770 = vst [vmem:[#allocation101_spill] sm:$0xff] %v10050_v23  ;;  %13771 = vst [vmem:[#allocation102_spill] sm:$0xff] %v10053_v47  ;;  %v10071_v60 = vadd.f32 %v1585_v11, %v9603_v56  ;;  %v10074_v20 = vadd.f32 %v1585_v11, %v9605_v57  ;;  %v10077_v6 = vadd.f32 %v1593_v39, %v9603_v56  ;;  %v1643_v11 = vmin.f32 %v10046_v5, 0.0 }
 0x191   :  { %13772 = vst [vmem:[#allocation103_spill] sm:$0xff] %v10056_v52  ;;  %13773 = vst [vmem:[#allocation104_spill] sm:$0xff] %v10059_v28  ;;  %v10080_v23 = vadd.f32 %v1593_v39, %v9605_v57  ;;  %v10083_v38 = vadd.f32 %v1597_v14, %v9603_v56  ;;  %v1955_v39 = vrot.slane %v1939_v32, %v9637_v12  ;;  %v13783_v56 = vmax.f32 %v9701_v40, 0.0 }
 0x192   :  { %13774 = vst [vmem:[#allocation105_spill] sm:$0xff] %v10062_v61  ;;  %13775 = vst [vmem:[#allocation106_spill] sm:$0xff] %v10065_v62  ;;  %v10086_v62 = vadd.f32 %v1597_v14, %v9605_v57  ;;  %v790_v14 = vmin.f32 %v9819_v27, 0.0  ;;  %v10100_v15 = vmul.f32 0.2, %v1643_v11 }
 0x193   :  { %13776 = vst [vmem:[#allocation107_spill] sm:$0xff] %v10068_v41  ;;  %13777 = vst [vmem:[#allocation108_spill] sm:$0xff] %v10071_v60  ;;  %v1642_v60 = vmin.f32 %v10043_v4, 0.0  ;;  %v1971_v61 = vcombine.high %v1955_v39, %v1955_v39 }
 0x194   :  { %13778 = vst [vmem:[#allocation109_spill] sm:$0xff] %v10074_v20  ;;  %13779 = vst [vmem:[#allocation110_spill] sm:$0xff] %v10077_v6  ;;  %v1941_v20 = vcombine.high %v1939_v32, %v1939_v32  ;;  %v1948_v6 = vrot.slane %v1932_v3, %v9637_v12  ;;  %v806_v11 = vmul.f32 0.2, %v790_v14  ;;  %v966_v14 = vadd.f32 %v9755_v8, %v9592_v44 }
 0x195   :  { %13780 = vst [vmem:[#allocation111_spill] sm:$0xff] %v10080_v23  ;;  %13781 = vst [vmem:[#allocation112_spill] sm:$0xff] %v10083_v38  ;;  %v1962_v23 = vrot.slane %v1940_v16, %v9637_v12  ;;  %v616_v38 = vadd.f32 %v600_v33, %v13783_v56  ;;  %v10098_v57 = vmul.f32 0.2, %v1642_v60  ;;  %v10115_v16 = vrot.slane %v1955_v39, %v9582_v35 }
 0x196   :  { %13782 = vst [vmem:[#allocation113_spill] sm:$0xff] %v10086_v62  ;;  %v10103_v41 = vrot.slane %v1941_v20, %v9637_v12  ;;  %v1970_v62 = vcombine.high %v1948_v6, %v1948_v6  ;;  %v1977_v3 = vrot.slane %v1948_v6, %v9582_v35  ;;  %v10125_v20 = vrot.slane %v1971_v61, %v9582_v35 }
 0x197   :  { %v1972_v28 = vcombine.high %v1962_v23, %v1962_v23  ;;  %v10107_v32 = vrot.slane %v1962_v23, %v9582_v35  ;;  %13787 = vst [vmem:[#allocation117_spill] sm:$0xff] %v10115_v16  ;;  %v980_v39 = vmax.f32 %v9772_v54, 0.0  ;;  %v996_v56 = vmin.f32 %v9772_v54, 0.0 }
 0x198   :  { %13784 = vst [vmem:[#allocation114_spill] sm:$0xff] %v10103_v41  ;;  %v10112_v40 = vrot.slane %v1970_v62, %v9582_v35  ;;  %v10119_v33 = vrot.slane %v10103_v41, %v9582_v35  ;;  %13790 = vst [vmem:[#allocation120_spill] sm:$0xff] %v10125_v20  ;;  %v10128_v23 = vadd.f32 %v1977_v3, %v9597_v48  ;;  %v570_v12 = vmax.f32 %v9710_v0, 0.0 }
 0x199   :  { %13785 = vst [vmem:[#allocation115_spill] sm:$0xff] %v10107_v32  ;;  %v10122_v60 = vrot.slane %v1972_v28, %v9582_v35  ;;  %v10131_v6 = vadd.f32 %v1977_v3, %v9607_v58  ;;  %v636_v62 = vmul.f32 %v9643_v19, %v616_v38  ;;  %v1170_v28 = vadd.f32 %v9871_v36, %v9597_v48 }
 0x19a   :  { %13786 = vst [vmem:[#allocation116_spill] sm:$0xff] %v10112_v40  ;;  %13788 = vst [vmem:[#allocation118_spill] sm:$0xff] %v10119_v33  ;;  %v586_v61 = vmin.f32 %v9710_v0, 0.0  ;;  %v776_v41 = vmax.f32 %v9825_v2, 0.0  ;;  %v13791_v35 = vmax.f32 %v9819_v27, 0.0  ;;  %v792_v38 = vmin.f32 %v9825_v2, 0.0 }
 0x19b   :  { %13789 = vst [vmem:[#allocation119_spill] sm:$0xff] %v10122_v60  ;;  %v1012_v20 = vmul.f32 0.2, %v996_v56  ;;  %v1186_v33 = vmax.f32 %v1170_v28, 0.0  ;;  %v1202_v54 = vmin.f32 %v1170_v28, 0.0  ;;  %v1172_v36 = vadd.f32 %v9876_v43, %v9597_v48 }
 0x19c   :  { %v822_v3 = vadd.f32 %v806_v11, %v13791_v35  ;;  %v602_v60 = vmul.f32 0.2, %v586_v61  ;;  %v808_v40 = vmul.f32 0.2, %v792_v38  ;;  %v982_v52 = vmax.f32 %v966_v14, 0.0 }
 0x19d   :  { %v1028_v0 = vadd.f32 %v1012_v20, %v980_v39  ;;  %v1218_v32 = vmul.f32 0.2, %v1202_v54  ;;  %v998_v35 = vmin.f32 %v966_v14, 0.0  ;;  %v1188_v56 = vmax.f32 %v1172_v36, 0.0 }
 0x19e   :  { %v842_v16 = vmul.f32 %v9649_v24, %v822_v3  ;;  %v618_v27 = vadd.f32 %v602_v60, %v570_v12  ;;  %v824_v47 = vadd.f32 %v808_v40, %v776_v41  ;;  %v1204_v8 = vmin.f32 %v1172_v36, 0.0 }
 0x19f   :  { %v1048_v2 = vmul.f32 %v9661_v29, %v1028_v0  ;;  %v1234_v44 = vadd.f32 %v1218_v32, %v1186_v33  ;;  %v1014_v61 = vmul.f32 0.2, %v998_v35  ;;  %v617_v3 = vadd.f32 %v9752_v10, %v13792_v63 }
 0x1a0   :  { %v858_v11 = vadd.f32 %v842_v16, %v636_v62  ;;  %v638_v28 = vmul.f32 %v9643_v19, %v618_v27  ;;  %v844_v39 = vmul.f32 %v9649_v24, %v824_v47  ;;  %v1220_v38 = vmul.f32 0.2, %v1204_v8 }
 0x1a1   :  { %v13793_v12 = vmax.f32 %v9822_v7, 0.0  ;;  %v1254_v60 = vmul.f32 %v9665_v30, %v1234_v44  ;;  %v1030_v41 = vadd.f32 %v1014_v61, %v982_v52  ;;  %v637_v32 = vmul.f32 %v9643_v19, %v617_v3 }
 0x1a2   :  { %v1064_v20 = vadd.f32 %v1048_v2, %v858_v11  ;;  %v981_v40 = vmax.f32 %v9775_v22, 0.0  ;;  %v860_v33 = vadd.f32 %v844_v39, %v638_v28  ;;  %v1236_v62 = vadd.f32 %v1220_v38, %v1188_v56 }
 0x1a3   :  { %v823_v16 = vadd.f32 %v9873_v46, %v13793_v12  ;;  %v997_v10 = vmin.f32 %v9775_v22, 0.0  ;;  %v1050_v47 = vmul.f32 %v9661_v29, %v1030_v41  ;;  %v1187_v7 = vmax.f32 %v9898_v26, 0.0 }
 0x1a4   :  { %v1270_v63 = vadd.f32 %v1254_v60, %v1064_v20  ;;  %v1203_v46 = vmin.f32 %v9898_v26, 0.0  ;;  %v1256_v44 = vmul.f32 %v9665_v30, %v1236_v62  ;;  %v571_v54 = vmax.f32 %v9713_v13, 0.0 }
 0x1a5   :  { %v843_v45 = vmul.f32 %v9649_v24, %v823_v16  ;;  %v1013_v14 = vmul.f32 0.2, %v997_v10  ;;  %v1066_v36 = vadd.f32 %v1050_v47, %v860_v33  ;;  %v587_v27 = vmin.f32 %v9713_v13, 0.0 }
 0x1a6   :  { %1286 = vadd.xlane.f32.xlu0 %v1270_v63  ;;  %v1219_v0 = vmul.f32 0.2, %v1203_v46  ;;  %v777_v22 = vmax.f32 %v9831_v42, 0.0  ;;  %v793_v56 = vmin.f32 %v9831_v42, 0.0  ;;  %v983_v11 = vmax.f32 %v9779_v21, 0.0 }
 0x1a7   :  { %v859_v52 = vadd.f32 %v843_v45, %v637_v32  ;;  %v1029_v35 = vadd.f32 %v1013_v14, %v981_v40  ;;  %v999_v26 = vmin.f32 %v9779_v21, 0.0  ;;  %v1272_v2 = vadd.f32 %v1256_v44, %v1066_v36 }
 0x1a8   :  { %v1235_v8 = vadd.f32 %v1219_v0, %v1187_v7  ;;  %v603_v28 = vmul.f32 0.2, %v587_v27  ;;  %v1173_v61 = vadd.f32 %v9876_v43, %v9607_v58  ;;  %v809_v20 = vmul.f32 0.2, %v793_v56 }
 0x1a9   :  { %v1049_v3 = vmul.f32 %v9661_v29, %v1029_v35  ;;  %v1015_v39 = vmul.f32 0.2, %v999_v26  ;;  %v13794_v13 = vmax.f32 %v9923_v55, 0.0  ;;  %1290 = vadd.xlane.f32.xlu1 %v1272_v2  ;;  %v13795_v62 = vmax.f32 %v10043_v4, 0.0 }
 0x1aa   :  { %v1255_v42 = vmul.f32 %v9665_v30, %v1235_v8  ;;  %v619_v12 = vadd.f32 %v603_v28, %v571_v54  ;;  %v1189_v16 = vmax.f32 %v1173_v61, 0.0  ;;  %v1205_v21 = vmin.f32 %v1173_v61, 0.0 }
 0x1ab   :  { %v1472_v38 = vadd.f32 %v9978_v49, %v13794_v13  ;;  %v1065_v60 = vadd.f32 %v1049_v3, %v859_v52  ;;  %v825_v41 = vadd.f32 %v809_v20, %v777_v22  ;;  %v1031_v32 = vadd.f32 %v1015_v39, %v983_v11 }
 0x1ac   :  { %v639_v43 = vmul.f32 %v9643_v19, %v619_v12  ;;  %v1221_v33 = vmul.f32 0.2, %v1205_v21  ;;  %v1674_v55 = vadd.f32 %v10098_v57, %v13795_v62  ;;  %v1828_v49 = vmax.f32 %v9995_v31, 0.0 }
 0x1ad   :  { %v1488_v40 = vmul.f32 %v1472_v38, %v9643_v19  ;;  %v1271_v45 = vadd.f32 %v1255_v42, %v1065_v60  ;;  %v845_v10 = vmul.f32 %v9649_v24, %v825_v41  ;;  %v1051_v63 = vmul.f32 %v9661_v29, %v1031_v32 }
 0x1ae   :  { %v1844_v47 = vmin.f32 %v9995_v31, 0.0  ;;  %v1237_v7 = vadd.f32 %v1221_v33, %v1189_v16  ;;  %v1690_v46 = vmul.f32 %v1674_v55, %v9649_v24  ;;  %v2030_v44 = vmax.f32 %v10128_v23, 0.0 }
 0x1af   :  { %v2046_v52 = vmin.f32 %v10128_v23, 0.0  ;;  %1288 = vadd.xlane.f32.xlu0 %v1271_v45  ;;  %v861_v4 = vadd.f32 %v845_v10, %v639_v43  ;;  %v13796_v57 = vmax.f32 %v9928_v34, 0.0  ;;  %v13797_v36 = vmax.f32 %v10046_v5, 0.0 }
 0x1b0   :  { %v1860_v14 = vmul.f32 0.2, %v1844_v47  ;;  %v1257_v31 = vmul.f32 %v9665_v30, %v1237_v7  ;;  %v1706_v27 = vadd.f32 %v1690_v46, %v1488_v40  ;;  %v1829_v35 = vmax.f32 %v9998_v37, 0.0 }
 0x1b1   :  { %v1473_v54 = vadd.f32 %v9980_v51, %v13796_v57  ;;  %v1675_v0 = vadd.f32 %v10100_v15, %v13797_v36  ;;  %v2062_v22 = vmul.f32 0.2, %v2046_v52  ;;  %v1067_v56 = vadd.f32 %v1051_v63, %v861_v4 }
 0x1b2   :  { %v1876_v11 = vadd.f32 %v1860_v14, %v1828_v49  ;;  %v1845_v34 = vmin.f32 %v9998_v37, 0.0  ;;  %v2031_v51 = vmax.f32 %v10131_v6, 0.0  ;;  %v2047_v5 = vmin.f32 %v10131_v6, 0.0 }
 0x1b3   :  { %v1489_v23 = vmul.f32 %v1473_v54, %v9643_v19  ;;  %v1691_v26 = vmul.f32 %v1675_v0, %v9649_v24  ;;  %v2078_v2 = vadd.f32 %v2062_v22, %v2030_v44  ;;  %v1273_v15 = vadd.f32 %v1257_v31, %v1067_v56 }
 0x1b4   :  { %v1892_v8 = vmul.f32 %v1876_v11, %v9661_v29  ;;  %v572_v61 = vmax.f32 %v9716_v1, 0.0  ;;  %v1861_v20 = vmul.f32 0.2, %v1845_v34  ;;  %v2063_v39 = vmul.f32 0.2, %v2047_v5 }
 0x1b5   :  { %v1707_v28 = vadd.f32 %v1691_v26, %v1489_v23  ;;  %v2094_v3 = vmul.f32 %v2078_v2, %v9665_v30  ;;  %v588_v13 = vmin.f32 %v9716_v1, 0.0  ;;  %1292 = vadd.xlane.f32.xlu1 %v1273_v15  ;;  %v778_v37 = vmax.f32 %v9834_v18, 0.0 }
 0x1b6   :  { %v1908_v38 = vadd.f32 %v1892_v8, %v1706_v27  ;;  %v794_v42 = vmin.f32 %v9834_v18, 0.0  ;;  %v984_v6 = vmax.f32 %v9782_v9, 0.0  ;;  %v1877_v12 = vadd.f32 %v1861_v20, %v1829_v35 }
 0x1b7   :  { %v2079_v16 = vadd.f32 %v2063_v39, %v2031_v51  ;;  %v604_v21 = vmul.f32 0.2, %v588_v13  ;;  %v1000_v60 = vmin.f32 %v9782_v9, 0.0  ;;  %v1174_v40 = vadd.f32 %v9881_v53, %v9597_v48  ;;  %v13799_v39 = vld [vmem:[#allocation62_spill] sm:$0xff] }
 0x1b8   :  { %v2110_v41 = vadd.f32 %v2094_v3, %v1908_v38  ;;  %v810_v32 = vmul.f32 0.2, %v794_v42  ;;  %v573_v1 = vmax.f32 %v9719_v17, 0.0  ;;  %v1893_v43 = vmul.f32 %v1877_v12, %v9661_v29 }
 0x1b9   :  { %v2095_v33 = vmul.f32 %v2079_v16, %v9665_v30  ;;  %v620_v62 = vadd.f32 %v604_v21, %v572_v61  ;;  %v1016_v18 = vmul.f32 0.2, %v1000_v60  ;;  %v1190_v49 = vmax.f32 %v1174_v40, 0.0  ;;  %v13801_v60 = vld [vmem:[#allocation53_spill] sm:$0xff] }
 0x1ba   :  { %2126 = vadd.xlane.f32.xlu0 %v2110_v41  ;;  %v826_v55 = vadd.f32 %v810_v32, %v778_v37  ;;  %v1206_v45 = vmin.f32 %v1174_v40, 0.0  ;;  %v589_v10 = vmin.f32 %v9719_v17, 0.0  ;;  %v1909_v9 = vadd.f32 %v1893_v43, %v1707_v28  ;;  %v13798_v28 = vld [vmem:[#allocation67_spill] sm:$0xff] }
 0x1bb   :  { %v640_v63 = vmul.f32 %v9643_v19, %v620_v62  ;;  %v1032_v47 = vadd.f32 %v1016_v18, %v984_v6  ;;  %v779_v7 = vmax.f32 %v9837_v50, 0.0  ;;  %v795_v4 = vmin.f32 %v9837_v50, 0.0  ;;  %v13800_v6 = vld [vmem:[#allocation74_spill] sm:$0xff] }
 0x1bc   :  { %v846_v46 = vmul.f32 %v9649_v24, %v826_v55  ;;  %v1222_v44 = vmul.f32 0.2, %v1206_v45  ;;  %v605_v52 = vmul.f32 0.2, %v589_v10  ;;  %v2111_v14 = vadd.f32 %v2095_v33, %v1909_v9 }
 0x1bd   :  { %v1052_v57 = vmul.f32 %v9661_v29, %v1032_v47  ;;  %v985_v54 = vmax.f32 %v9785_v59, 0.0  ;;  %v1001_v36 = vmin.f32 %v9785_v59, 0.0  ;;  %v811_v27 = vmul.f32 0.2, %v795_v4  ;;  %v13803_v47 = vld [vmem:[#allocation63_spill] sm:$0xff] }
 0x1be   :  { %v862_v17 = vadd.f32 %v846_v46, %v640_v63  ;;  %v1238_v0 = vadd.f32 %v1222_v44, %v1190_v49  ;;  %v621_v31 = vadd.f32 %v605_v52, %v573_v1  ;;  %2128 = vadd.xlane.f32.xlu1 %v2111_v14  ;;  %v1175_v35 = vadd.f32 %v9881_v53, %v9607_v58  ;;  %v13802_v49 = vld [vmem:[#allocation68_spill] sm:$0xff] }
 0x1bf   :  { %v1017_v22 = vmul.f32 0.2, %v1001_v36  ;;  %v576_v56 = vmax.f32 %v9731_v25, 0.0  ;;  %v592_v50 = vmin.f32 %v9731_v25, 0.0  ;;  %v827_v2 = vadd.f32 %v811_v27, %v779_v7  ;;  %v13804_v27 = vld [vmem:[#allocation78_spill] sm:$0xff] }
 0x1c0   :  { %v1068_v11 = vadd.f32 %v1052_v57, %v862_v17  ;;  %v1258_v23 = vmul.f32 %v9665_v30, %v1238_v0  ;;  %v641_v26 = vmul.f32 %v9643_v19, %v621_v31  ;;  %v1191_v34 = vmax.f32 %v1175_v35, 0.0 }
 0x1c1   :  { %v1033_v59 = vadd.f32 %v1017_v22, %v985_v54  ;;  %v1207_v51 = vmin.f32 %v1175_v35, 0.0  ;;  %v608_v5 = vmul.f32 0.2, %v592_v50  ;;  %v847_v8 = vmul.f32 %v9649_v24, %v827_v2 }
 0x1c2   :  { %v1274_v15 = vadd.f32 %v1258_v23, %v1068_v11  ;;  %v782_v61 = vmax.f32 %v13798_v28, 0.0  ;;  %v798_v53 = vmin.f32 %v13798_v28, 0.0  ;;  %v988_v13 = vmax.f32 %v13799_v39, 0.0 }
 0x1c3   :  { %v1053_v3 = vmul.f32 %v9661_v29, %v1033_v59  ;;  %v1223_v25 = vmul.f32 0.2, %v1207_v51  ;;  %v624_v20 = vadd.f32 %v608_v5, %v576_v56  ;;  %v863_v38 = vadd.f32 %v847_v8, %v641_v26  ;;  %v13805_v59 = vld [vmem:[#allocation102_spill] sm:$0xff]  ;;  %v13806_v8 = vld [vmem:[#allocation95_spill] sm:$0xff] }
 0x1c4   :  { %1294 = vadd.xlane.f32.xlu0 %v1274_v15  ;;  %v814_v37 = vmul.f32 0.2, %v798_v53  ;;  %v1004_v42 = vmin.f32 %v13799_v39, 0.0  ;;  %v1178_v12 = vadd.f32 %v13800_v6, %v9597_v48  ;;  %v577_v41 = vmax.f32 %v13801_v60, 0.0 }
 0x1c5   :  { %v1239_v16 = vadd.f32 %v1223_v25, %v1191_v34  ;;  %v644_v21 = vmul.f32 %v9643_v19, %v624_v20  ;;  %v593_v32 = vmin.f32 %v13801_v60, 0.0  ;;  %v1069_v40 = vadd.f32 %v1053_v3, %v863_v38  ;;  %v13807_v38 = vld [vmem:[#allocation115_spill] sm:$0xff] }
 0x1c6   :  { %v830_v1 = vadd.f32 %v814_v37, %v782_v61  ;;  %v1020_v43 = vmul.f32 0.2, %v1004_v42  ;;  %v1194_v33 = vmax.f32 %v1178_v12, 0.0  ;;  %v1210_v18 = vmin.f32 %v1178_v12, 0.0  ;;  %v13808_v12 = vld [vmem:[#allocation79_spill] sm:$0xff] }
 0x1c7   :  { %v1259_v62 = vmul.f32 %v9665_v30, %v1239_v16  ;;  %v609_v55 = vmul.f32 0.2, %v593_v32  ;;  %v783_v45 = vmax.f32 %v13802_v49, 0.0  ;;  %v799_v63 = vmin.f32 %v13802_v49, 0.0  ;;  %v13809_v49 = vld [vmem:[#allocation103_spill] sm:$0xff] }
 0x1c8   :  { %v850_v10 = vmul.f32 %v9649_v24, %v830_v1  ;;  %v1036_v9 = vadd.f32 %v1020_v43, %v988_v13  ;;  %v989_v7 = vmax.f32 %v13803_v47, 0.0  ;;  %v1226_v44 = vmul.f32 0.2, %v1210_v18 }
 0x1c9   :  { %v1275_v46 = vadd.f32 %v1259_v62, %v1069_v40  ;;  %v625_v52 = vadd.f32 %v609_v55, %v577_v41  ;;  %v1005_v4 = vmin.f32 %v13803_v47, 0.0  ;;  %v815_v54 = vmul.f32 0.2, %v799_v63 }
 0x1ca   :  { %v866_v14 = vadd.f32 %v850_v10, %v644_v21  ;;  %v1056_v57 = vmul.f32 %v9661_v29, %v1036_v9  ;;  %v1179_v36 = vadd.f32 %v13800_v6, %v9607_v58  ;;  %v1242_v17 = vadd.f32 %v1226_v44, %v1194_v33 }
 0x1cb   :  { %1296 = vadd.xlane.f32.xlu1 %v1275_v46  ;;  %v645_v0 = vmul.f32 %v9643_v19, %v625_v52  ;;  %v1021_v31 = vmul.f32 0.2, %v1005_v4  ;;  %v1426_v22 = vmax.f32 %v13804_v27, 0.0  ;;  %v831_v56 = vadd.f32 %v815_v54, %v783_v45 }
 0x1cc   :  { %v1072_v35 = vadd.f32 %v1056_v57, %v866_v14  ;;  %v1195_v50 = vmax.f32 %v1179_v36, 0.0  ;;  %v1211_v11 = vmin.f32 %v1179_v36, 0.0  ;;  %v1262_v23 = vmul.f32 %v9665_v30, %v1242_v17  ;;  %v13811_v36 = vld [vmem:[#allocation80_spill] sm:$0xff] }
 0x1cd   :  { %v1037_v26 = vadd.f32 %v1021_v31, %v989_v7  ;;  %v1442_v2 = vmin.f32 %v13804_v27, 0.0  ;;  %v1628_v34 = vmax.f32 %v13805_v59, 0.0  ;;  %v851_v51 = vmul.f32 %v9649_v24, %v831_v56  ;;  %v13810_v7 = vld [vmem:[#allocation96_spill] sm:$0xff] }
 0x1ce   :  { %v1227_v5 = vmul.f32 0.2, %v1211_v11  ;;  %v1644_v15 = vmin.f32 %v13805_v59, 0.0  ;;  %v1830_v28 = vmax.f32 %v13806_v8, 0.0  ;;  %v1278_v61 = vadd.f32 %v1262_v23, %v1072_v35  ;;  %v13812_v23 = vld [vmem:[#allocation104_spill] sm:$0xff] }
 0x1cf   :  { %v1057_v53 = vmul.f32 %v9661_v29, %v1037_v26  ;;  %v1458_v3 = vmul.f32 0.2, %v1442_v2  ;;  %v1846_v25 = vmin.f32 %v13806_v8, 0.0  ;;  %v867_v20 = vadd.f32 %v851_v51, %v645_v0  ;;  %v13813_v51 = vld [vmem:[#allocation97_spill] sm:$0xff] }
 0x1d0   :  { %v1243_v39 = vadd.f32 %v1227_v5, %v1195_v50  ;;  %v1660_v13 = vmul.f32 0.2, %v1644_v15  ;;  %v2016_v37 = vadd.f32 %v13807_v38, %v9597_v48  ;;  %1302 = vadd.xlane.f32.xlu0 %v1278_v61  ;;  %v1427_v16 = vmax.f32 %v13808_v12, 0.0 }
 0x1d1   :  { %v1474_v42 = vadd.f32 %v1458_v3, %v1426_v22  ;;  %v1862_v6 = vmul.f32 0.2, %v1846_v25  ;;  %v1443_v21 = vmin.f32 %v13808_v12, 0.0  ;;  %v1073_v60 = vadd.f32 %v1057_v53, %v867_v20  ;;  %v13814_v20 = vld [vmem:[#allocation116_spill] sm:$0xff] }
 0x1d2   :  { %v1263_v41 = vmul.f32 %v9665_v30, %v1243_v39  ;;  %v1676_v32 = vadd.f32 %v1660_v13, %v1628_v34  ;;  %v2032_v40 = vmax.f32 %v2016_v37, 0.0  ;;  %v2048_v33 = vmin.f32 %v2016_v37, 0.0 }
 0x1d3   :  { %v1490_v1 = vmul.f32 %v1474_v42, %v9643_v19  ;;  %v1878_v43 = vadd.f32 %v1862_v6, %v1830_v28  ;;  %v1459_v62 = vmul.f32 0.2, %v1443_v21  ;;  %v1629_v45 = vmax.f32 %v13809_v49, 0.0  ;;  %v13815_v42 = vld [vmem:[#allocation82_spill] sm:$0xff] }
 0x1d4   :  { %v1279_v18 = vadd.f32 %v1263_v41, %v1073_v60  ;;  %v1692_v55 = vmul.f32 %v1676_v32, %v9649_v24  ;;  %v1645_v10 = vmin.f32 %v13809_v49, 0.0  ;;  %v2064_v63 = vmul.f32 0.2, %v2048_v33 }
 0x1d5   :  { %v1894_v9 = vmul.f32 %v1878_v43, %v9661_v29  ;;  %v1475_v47 = vadd.f32 %v1459_v62, %v1427_v16  ;;  %v1831_v46 = vmax.f32 %v13810_v7, 0.0  ;;  %v1847_v4 = vmin.f32 %v13810_v7, 0.0 }
 0x1d6   :  { %1304 = vadd.xlane.f32.xlu1 %v1279_v18  ;;  %v1708_v44 = vadd.f32 %v1692_v55, %v1490_v1  ;;  %v1661_v52 = vmul.f32 0.2, %v1645_v10  ;;  %v2017_v14 = vadd.f32 %v13807_v38, %v9607_v58  ;;  %v2080_v57 = vadd.f32 %v2064_v63, %v2032_v40  ;;  %v13816_v1 = vld [vmem:[#allocation105_spill] sm:$0xff]  ;;  %v13817_v55 = vld [vmem:[#allocation98_spill] sm:$0xff] }
 0x1d7   :  { %v1491_v54 = vmul.f32 %v1475_v47, %v9643_v19  ;;  %v1428_v17 = vmax.f32 %v13811_v36, 0.0  ;;  %v1444_v0 = vmin.f32 %v13811_v36, 0.0  ;;  %v1863_v22 = vmul.f32 0.2, %v1847_v4 }
 0x1d8   :  { %v1910_v31 = vadd.f32 %v1894_v9, %v1708_v44  ;;  %v1677_v27 = vadd.f32 %v1661_v52, %v1629_v45  ;;  %v2033_v35 = vmax.f32 %v2017_v14, 0.0  ;;  %v2096_v56 = vmul.f32 %v2080_v57, %v9665_v30 }
 0x1d9   :  { %v2049_v50 = vmin.f32 %v2017_v14, 0.0  ;;  %v1460_v11 = vmul.f32 0.2, %v1444_v0  ;;  %v1630_v26 = vmax.f32 %v13812_v23, 0.0  ;;  %v1879_v59 = vadd.f32 %v1863_v22, %v1831_v46  ;;  %v13818_v14 = vld [vmem:[#allocation51_spill] sm:$0xff] }
 0x1da   :  { %v1693_v2 = vmul.f32 %v1677_v27, %v9649_v24  ;;  %v1646_v34 = vmin.f32 %v13812_v23, 0.0  ;;  %v1832_v5 = vmax.f32 %v13813_v51, 0.0  ;;  %v2112_v15 = vadd.f32 %v2096_v56, %v1910_v31  ;;  %v13819_v23 = vld [vmem:[#allocation65_spill] sm:$0xff] }
 0x1db   :  { %v2065_v8 = vmul.f32 0.2, %v2049_v50  ;;  %v1476_v28 = vadd.f32 %v1460_v11, %v1428_v17  ;;  %v1848_v61 = vmin.f32 %v13813_v51, 0.0  ;;  %v1895_v3 = vmul.f32 %v1879_v59, %v9661_v29 }
 0x1dc   :  { %v1709_v53 = vadd.f32 %v1693_v2, %v1491_v54  ;;  %v1662_v25 = vmul.f32 0.2, %v1646_v34  ;;  %v2018_v39 = vadd.f32 %v13814_v20, %v9597_v48  ;;  %2130 = vadd.xlane.f32.xlu0 %v2112_v15  ;;  %v1429_v6 = vmax.f32 %v13815_v42, 0.0  ;;  %v13821_v15 = vld [vmem:[#allocation58_spill] sm:$0xff] }
 0x1dd   :  { %v2081_v13 = vadd.f32 %v2065_v8, %v2033_v35  ;;  %v1492_v38 = vmul.f32 %v1476_v28, %v9643_v19  ;;  %v1864_v37 = vmul.f32 0.2, %v1848_v61  ;;  %v1445_v40 = vmin.f32 %v13815_v42, 0.0 }
 0x1de   :  { %v1911_v12 = vadd.f32 %v1895_v3, %v1709_v53  ;;  %v1678_v16 = vadd.f32 %v1662_v25, %v1630_v26  ;;  %v2034_v21 = vmax.f32 %v2018_v39, 0.0  ;;  %v2050_v60 = vmin.f32 %v2018_v39, 0.0  ;;  %v13822_v53 = vld [vmem:[#allocation76_spill] sm:$0xff] }
 0x1df   :  { %v2097_v41 = vmul.f32 %v2081_v13, %v9665_v30  ;;  %v1880_v32 = vadd.f32 %v1864_v37, %v1832_v5  ;;  %v1631_v43 = vmax.f32 %v13816_v1, 0.0  ;;  %v1647_v18 = vmin.f32 %v13816_v1, 0.0  ;;  %v13820_v5 = vld [vmem:[#allocation41_spill] sm:$0xff]  ;;  %v13823_v25 = vld [vmem:[#allocation52_spill] sm:$0xff] }
 0x1e0   :  { %v1694_v33 = vmul.f32 %v1678_v16, %v9649_v24  ;;  %v2066_v62 = vmul.f32 0.2, %v2050_v60  ;;  %v1833_v49 = vmax.f32 %v13817_v55, 0.0  ;;  %v1461_v9 = vmul.f32 0.2, %v1445_v40 }
 0x1e1   :  { %v2113_v45 = vadd.f32 %v2097_v41, %v1911_v12  ;;  %v1896_v10 = vmul.f32 %v1880_v32, %v9661_v29  ;;  %v1849_v63 = vmin.f32 %v13817_v55, 0.0  ;;  %v1663_v46 = vmul.f32 0.2, %v1647_v18  ;;  %v13824_v32 = vld [vmem:[#allocation66_spill] sm:$0xff] }
 0x1e2   :  { %v1710_v47 = vadd.f32 %v1694_v33, %v1492_v38  ;;  %v2082_v7 = vadd.f32 %v2066_v62, %v2034_v21  ;;  %v2019_v44 = vadd.f32 %v13814_v20, %v9607_v58  ;;  %v1477_v52 = vadd.f32 %v1461_v9, %v1429_v6  ;;  %v13825_v62 = vld [vmem:[#allocation44_spill] sm:$0xff] }
 0x1e3   :  { %2132 = vadd.xlane.f32.xlu1 %v2113_v45  ;;  %v1865_v4 = vmul.f32 0.2, %v1849_v63  ;;  %v574_v57 = vmax.f32 %v13818_v14, 0.0  ;;  %v590_v54 = vmin.f32 %v13818_v14, 0.0  ;;  %v1679_v0 = vadd.f32 %v1663_v46, %v1631_v43 }
 0x1e4   :  { %v1912_v36 = vadd.f32 %v1896_v10, %v1710_v47  ;;  %v2098_v17 = vmul.f32 %v2082_v7, %v9665_v30  ;;  %v2035_v31 = vmax.f32 %v2019_v44, 0.0  ;;  %v1493_v27 = vmul.f32 %v1477_v52, %v9643_v19 }
 0x1e5   :  { %v1881_v22 = vadd.f32 %v1865_v4, %v1833_v49  ;;  %v2051_v35 = vmin.f32 %v2019_v44, 0.0  ;;  %v606_v56 = vmul.f32 0.2, %v590_v54  ;;  %v1695_v11 = vmul.f32 %v1679_v0, %v9649_v24 }
 0x1e6   :  { %v2114_v50 = vadd.f32 %v2098_v17, %v1912_v36  ;;  %v780_v26 = vmax.f32 %v13819_v23, 0.0  ;;  %v796_v2 = vmin.f32 %v13819_v23, 0.0  ;;  %v970_v8 = vadd.f32 %v13821_v15, %v13820_v5  ;;  %v13826_v36 = vld [vmem:[#allocation83_spill] sm:$0xff] }
 0x1e7   :  { %v1897_v59 = vmul.f32 %v1881_v22, %v9661_v29  ;;  %v2067_v34 = vmul.f32 0.2, %v2051_v35  ;;  %v622_v51 = vadd.f32 %v606_v56, %v574_v57  ;;  %v1711_v28 = vadd.f32 %v1695_v11, %v1493_v27 }
 0x1e8   :  { %2134 = vadd.xlane.f32.xlu0 %v2114_v50  ;;  %v812_v61 = vmul.f32 0.2, %v796_v2  ;;  %v1176_v3 = vadd.f32 %v13822_v53, %v9597_v48  ;;  %v575_v20 = vmax.f32 %v13823_v25, 0.0  ;;  %v986_v38 = vmax.f32 %v970_v8, 0.0  ;;  %v13827_v50 = vld [vmem:[#allocation106_spill] sm:$0xff] }
 0x1e9   :  { %v2083_v39 = vadd.f32 %v2067_v34, %v2035_v31  ;;  %v642_v13 = vmul.f32 %v9643_v19, %v622_v51  ;;  %v1002_v37 = vmin.f32 %v970_v8, 0.0  ;;  %v1913_v42 = vadd.f32 %v1897_v59, %v1711_v28  ;;  %v13828_v34 = vld [vmem:[#allocation99_spill] sm:$0xff] }
 0x1ea   :  { %v828_v6 = vadd.f32 %v812_v61, %v780_v26  ;;  %v1192_v12 = vmax.f32 %v1176_v3, 0.0  ;;  %v1208_v16 = vmin.f32 %v1176_v3, 0.0  ;;  %v591_v41 = vmin.f32 %v13823_v25, 0.0  ;;  %v13829_v25 = vld [vmem:[#allocation117_spill] sm:$0xff] }
 0x1eb   :  { %v2099_v21 = vmul.f32 %v2083_v39, %v9665_v30  ;;  %v1018_v60 = vmul.f32 0.2, %v1002_v37  ;;  %v781_v40 = vmax.f32 %v13824_v32, 0.0  ;;  %v797_v33 = vmin.f32 %v13824_v32, 0.0  ;;  %v13830_v39 = vld [vmem:[#allocation84_spill] sm:$0xff] }
 0x1ec   :  { %v848_v1 = vmul.f32 %v9649_v24, %v828_v6  ;;  %v1224_v43 = vmul.f32 0.2, %v1208_v16  ;;  %v971_v18 = vadd.f32 %v13821_v15, %v13825_v62  ;;  %v607_v45 = vmul.f32 0.2, %v591_v41 }
 0x1ed   :  { %v2115_v55 = vadd.f32 %v2099_v21, %v1913_v42  ;;  %v1034_v49 = vadd.f32 %v1018_v60, %v986_v38  ;;  %v1177_v10 = vadd.f32 %v13822_v53, %v9607_v58  ;;  %v813_v47 = vmul.f32 0.2, %v797_v33 }
 0x1ee   :  { %v864_v9 = vadd.f32 %v848_v1, %v642_v13  ;;  %v1240_v63 = vadd.f32 %v1224_v43, %v1192_v12  ;;  %v987_v7 = vmax.f32 %v971_v18, 0.0  ;;  %v623_v44 = vadd.f32 %v607_v45, %v575_v20  ;;  %v13831_v1 = vld [vmem:[#allocation107_spill] sm:$0xff] }
 0x1ef   :  { %2136 = vadd.xlane.f32.xlu1 %v2115_v55  ;;  %v1054_v46 = vmul.f32 %v9661_v29, %v1034_v49  ;;  %v1003_v52 = vmin.f32 %v971_v18, 0.0  ;;  %v1193_v4 = vmax.f32 %v1177_v10, 0.0  ;;  %v829_v57 = vadd.f32 %v813_v47, %v781_v40  ;;  %v13832_v49 = vld [vmem:[#allocation100_spill] sm:$0xff] }
 0x1f0   :  { %v1260_v14 = vmul.f32 %v9665_v30, %v1240_v63  ;;  %v1209_v54 = vmin.f32 %v1177_v10, 0.0  ;;  %v1432_v17 = vmax.f32 %v13826_v36, 0.0  ;;  %v643_v31 = vmul.f32 %v9643_v19, %v623_v44 }
 0x1f1   :  { %v1070_v0 = vadd.f32 %v1054_v46, %v864_v9  ;;  %v1019_v27 = vmul.f32 0.2, %v1003_v52  ;;  %v1448_v22 = vmin.f32 %v13826_v36, 0.0  ;;  %v849_v35 = vmul.f32 %v9649_v24, %v829_v57  ;;  %v13833_v52 = vld [vmem:[#allocation54_spill] sm:$0xff] }
 0x1f2   :  { %v1225_v56 = vmul.f32 0.2, %v1209_v54  ;;  %v1634_v11 = vmax.f32 %v13827_v50, 0.0  ;;  %v1650_v23 = vmin.f32 %v13827_v50, 0.0  ;;  %v1836_v51 = vmax.f32 %v13828_v34, 0.0 }
 0x1f3   :  { %v1276_v26 = vadd.f32 %v1260_v14, %v1070_v0  ;;  %v1035_v2 = vadd.f32 %v1019_v27, %v987_v7  ;;  %v1464_v59 = vmul.f32 0.2, %v1448_v22  ;;  %v865_v15 = vadd.f32 %v849_v35, %v643_v31 }
 0x1f4   :  { %v1241_v8 = vadd.f32 %v1225_v56, %v1193_v4  ;;  %v1666_v28 = vmul.f32 0.2, %v1650_v23  ;;  %v1852_v61 = vmin.f32 %v13828_v34, 0.0  ;;  %v2022_v20 = vadd.f32 %v13829_v25, %v9597_v48  ;;  %v13834_v56 = vld [vmem:[#allocation69_spill] sm:$0xff] }
 0x1f5   :  { %1298 = vadd.xlane.f32.xlu0 %v1276_v26  ;;  %v1055_v53 = vmul.f32 %v9661_v29, %v1035_v2  ;;  %v1480_v3 = vadd.f32 %v1464_v59, %v1432_v17  ;;  %v1433_v13 = vmax.f32 %v13830_v39, 0.0  ;;  %v1449_v6 = vmin.f32 %v13830_v39, 0.0  ;;  %v13835_v59 = vld [vmem:[#allocation59_spill] sm:$0xff] }
 0x1f6   :  { %v1261_v38 = vmul.f32 %v9665_v30, %v1241_v8  ;;  %v1682_v37 = vadd.f32 %v1666_v28, %v1634_v11  ;;  %v1868_v42 = vmul.f32 0.2, %v1852_v61  ;;  %v2038_v21 = vmax.f32 %v2022_v20, 0.0  ;;  %v13836_v28 = vld [vmem:[#allocation75_spill] sm:$0xff] }
 0x1f7   :  { %v1071_v12 = vadd.f32 %v1055_v53, %v865_v15  ;;  %v1496_v16 = vmul.f32 %v1480_v3, %v9643_v19  ;;  %v2054_v60 = vmin.f32 %v2022_v20, 0.0  ;;  %v1465_v40 = vmul.f32 0.2, %v1449_v6 }
 0x1f8   :  { %v1698_v41 = vmul.f32 %v1682_v37, %v9649_v24  ;;  %v1884_v32 = vadd.f32 %v1868_v42, %v1836_v51  ;;  %v1635_v43 = vmax.f32 %v13831_v1, 0.0  ;;  %v1651_v55 = vmin.f32 %v13831_v1, 0.0 }
 0x1f9   :  { %v1277_v33 = vadd.f32 %v1261_v38, %v1071_v12  ;;  %v2070_v18 = vmul.f32 0.2, %v2054_v60  ;;  %v1837_v45 = vmax.f32 %v13832_v49, 0.0  ;;  %v1481_v63 = vadd.f32 %v1465_v40, %v1433_v13  ;;  %v13838_v40 = vld [vmem:[#allocation70_spill] sm:$0xff] }
 0x1fa   :  { %v1714_v10 = vadd.f32 %v1698_v41, %v1496_v16  ;;  %v1900_v9 = vmul.f32 %v1884_v32, %v9661_v29  ;;  %v1853_v47 = vmin.f32 %v13832_v49, 0.0  ;;  %v1667_v46 = vmul.f32 0.2, %v1651_v55  ;;  %v13837_v16 = vld [vmem:[#allocation55_spill] sm:$0xff] }
 0x1fb   :  { %1300 = vadd.xlane.f32.xlu1 %v1277_v33  ;;  %v2086_v7 = vadd.f32 %v2070_v18, %v2038_v21  ;;  %v2023_v44 = vadd.f32 %v13829_v25, %v9607_v58  ;;  %v578_v4 = vmax.f32 %v13833_v52, 0.0  ;;  %v1497_v57 = vmul.f32 %v1481_v63, %v9643_v19 }
 0x1fc   :  { %v1916_v14 = vadd.f32 %v1900_v9, %v1714_v10  ;;  %v1869_v54 = vmul.f32 0.2, %v1853_v47  ;;  %v594_v36 = vmin.f32 %v13833_v52, 0.0  ;;  %v1683_v0 = vadd.f32 %v1667_v46, %v1635_v43 }
 0x1fd   :  { %v2102_v17 = vmul.f32 %v2086_v7, %v9665_v30  ;;  %v2039_v31 = vmax.f32 %v2023_v44, 0.0  ;;  %v2055_v27 = vmin.f32 %v2023_v44, 0.0  ;;  %v784_v50 = vmax.f32 %v13834_v56, 0.0 }
 0x1fe   :  { %v1885_v22 = vadd.f32 %v1869_v54, %v1837_v45  ;;  %v610_v35 = vmul.f32 0.2, %v594_v36  ;;  %v800_v11 = vmin.f32 %v13834_v56, 0.0  ;;  %v1699_v26 = vmul.f32 %v1683_v0, %v9649_v24 }
 0x1ff   :  { %v2118_v23 = vadd.f32 %v2102_v17, %v1916_v14  ;;  %v2071_v2 = vmul.f32 0.2, %v2055_v27  ;;  %v974_v34 = vadd.f32 %v13835_v59, %v13820_v5  ;;  %v1180_v61 = vadd.f32 %v13836_v28, %v9597_v48  ;;  %v13839_v17 = vld [vmem:[#allocation56_spill] sm:$0xff] }
 0x200   :  { %v1901_v51 = vmul.f32 %v1885_v22, %v9661_v29  ;;  %v626_v15 = vadd.f32 %v610_v35, %v578_v4  ;;  %v816_v8 = vmul.f32 0.2, %v800_v11  ;;  %v1715_v53 = vadd.f32 %v1699_v26, %v1497_v57  ;;  %v13840_v35 = vld [vmem:[#allocation71_spill] sm:$0xff] }
 0x201   :  { %2142 = vadd.xlane.f32.xlu0 %v2118_v23  ;;  %v2087_v3 = vadd.f32 %v2071_v2, %v2039_v31  ;;  %v990_v25 = vmax.f32 %v974_v34, 0.0  ;;  %v1006_v20 = vmin.f32 %v974_v34, 0.0  ;;  %v1196_v38 = vmax.f32 %v1180_v61, 0.0  ;;  %v13841_v34 = vld [vmem:[#allocation60_spill] sm:$0xff] }
 0x202   :  { %v646_v39 = vmul.f32 %v9643_v19, %v626_v15  ;;  %v832_v13 = vadd.f32 %v816_v8, %v784_v50  ;;  %v1212_v37 = vmin.f32 %v1180_v61, 0.0  ;;  %v1917_v42 = vadd.f32 %v1901_v51, %v1715_v53  ;;  %v13842_v15 = vld [vmem:[#allocation77_spill] sm:$0xff] }
 0x203   :  { %v2103_v6 = vmul.f32 %v2087_v3, %v9665_v30  ;;  %v1022_v12 = vmul.f32 0.2, %v1006_v20  ;;  %v579_v21 = vmax.f32 %v13837_v16, 0.0  ;;  %v595_v32 = vmin.f32 %v13837_v16, 0.0  ;;  %v13843_v3 = vld [vmem:[#allocation57_spill] sm:$0xff] }
 0x204   :  { %v852_v60 = vmul.f32 %v9649_v24, %v832_v13  ;;  %v1228_v41 = vmul.f32 0.2, %v1212_v37  ;;  %v785_v1 = vmax.f32 %v13838_v40, 0.0  ;;  %v801_v18 = vmin.f32 %v13838_v40, 0.0 }
 0x205   :  { %v2119_v43 = vadd.f32 %v2103_v6, %v1917_v42  ;;  %v1038_v33 = vadd.f32 %v1022_v12, %v990_v25  ;;  %v975_v55 = vadd.f32 %v13835_v59, %v13825_v62  ;;  %v611_v10 = vmul.f32 0.2, %v595_v32 }
 0x206   :  { %v868_v49 = vadd.f32 %v852_v60, %v646_v39  ;;  %v1244_v45 = vadd.f32 %v1228_v41, %v1196_v38  ;;  %v1181_v9 = vadd.f32 %v13836_v28, %v9607_v58  ;;  %v817_v47 = vmul.f32 0.2, %v801_v18  ;;  %v13844_v41 = vld [vmem:[#allocation72_spill] sm:$0xff] }
 0x207   :  { %2144 = vadd.xlane.f32.xlu1 %v2119_v43  ;;  %v1058_v63 = vmul.f32 %v9661_v29, %v1038_v33  ;;  %v991_v7 = vmax.f32 %v975_v55, 0.0  ;;  %v1007_v46 = vmin.f32 %v975_v55, 0.0  ;;  %v627_v52 = vadd.f32 %v611_v10, %v579_v21 }
 0x208   :  { %v1264_v44 = vmul.f32 %v9665_v30, %v1244_v45  ;;  %v1197_v4 = vmax.f32 %v1181_v9, 0.0  ;;  %v1213_v14 = vmin.f32 %v1181_v9, 0.0  ;;  %v833_v54 = vadd.f32 %v817_v47, %v785_v1  ;;  %v13845_v47 = vld [vmem:[#allocation85_spill] sm:$0xff] }
 0x209   :  { %v1074_v57 = vadd.f32 %v1058_v63, %v868_v49  ;;  %v1023_v36 = vmul.f32 0.2, %v1007_v46  ;;  %v580_v0 = vmax.f32 %v13839_v17, 0.0  ;;  %v647_v31 = vmul.f32 %v9643_v19, %v627_v52 }
 0x20a   :  { %v1229_v27 = vmul.f32 0.2, %v1213_v14  ;;  %v596_v22 = vmin.f32 %v13839_v17, 0.0  ;;  %v786_v56 = vmax.f32 %v13840_v35, 0.0  ;;  %v853_v11 = vmul.f32 %v9649_v24, %v833_v54 }
 0x20b   :  { %v1280_v50 = vadd.f32 %v1264_v44, %v1074_v57  ;;  %v1039_v23 = vadd.f32 %v1023_v36, %v991_v7  ;;  %v802_v26 = vmin.f32 %v13840_v35, 0.0  ;;  %v976_v51 = vadd.f32 %v13841_v34, %v13820_v5 }
 0x20c   :  { %v1245_v2 = vadd.f32 %v1229_v27, %v1197_v4  ;;  %v612_v59 = vmul.f32 0.2, %v596_v22  ;;  %v1182_v8 = vadd.f32 %v13842_v15, %v9597_v48  ;;  %v869_v28 = vadd.f32 %v853_v11, %v647_v31 }
 0x20d   :  { %1306 = vadd.xlane.f32.xlu0 %v1280_v50  ;;  %v1059_v61 = vmul.f32 %v9661_v29, %v1039_v23  ;;  %v818_v53 = vmul.f32 0.2, %v802_v26  ;;  %v581_v25 = vmax.f32 %v13843_v3, 0.0  ;;  %v992_v13 = vmax.f32 %v976_v51, 0.0 }
 0x20e   :  { %v1265_v20 = vmul.f32 %v9665_v30, %v1245_v2  ;;  %v628_v39 = vadd.f32 %v612_v59, %v580_v0  ;;  %v1008_v38 = vmin.f32 %v976_v51, 0.0  ;;  %v1198_v6 = vmax.f32 %v1182_v8, 0.0  ;;  %v13847_v59 = vld [vmem:[#allocation93_spill] sm:$0xff] }
 0x20f   :  { %v1075_v37 = vadd.f32 %v1059_v61, %v869_v28  ;;  %v834_v42 = vadd.f32 %v818_v53, %v786_v56  ;;  %v1214_v12 = vmin.f32 %v1182_v8, 0.0  ;;  %v597_v60 = vmin.f32 %v13843_v3, 0.0  ;;  %v13846_v56 = vld [vmem:[#allocation108_spill] sm:$0xff]  ;;  %v13848_v28 = vld [vmem:[#allocation119_spill] sm:$0xff] }
 0x210   :  { %v648_v16 = vmul.f32 %v9643_v19, %v628_v39  ;;  %v1024_v21 = vmul.f32 0.2, %v1008_v38  ;;  %v787_v32 = vmax.f32 %v13844_v41, 0.0  ;;  %v803_v33 = vmin.f32 %v13844_v41, 0.0 }
 0x211   :  { %v1281_v40 = vadd.f32 %v1265_v20, %v1075_v37  ;;  %v854_v1 = vmul.f32 %v9649_v24, %v834_v42  ;;  %v1230_v43 = vmul.f32 0.2, %v1214_v12  ;;  %v613_v55 = vmul.f32 0.2, %v597_v60 }
 0x212   :  { %v1040_v18 = vadd.f32 %v1024_v21, %v992_v13  ;;  %v977_v49 = vadd.f32 %v13841_v34, %v13825_v62  ;;  %v1183_v45 = vadd.f32 %v13842_v15, %v9607_v58  ;;  %v819_v63 = vmul.f32 0.2, %v803_v33 }
 0x213   :  { %1308 = vadd.xlane.f32.xlu1 %v1281_v40  ;;  %v870_v10 = vadd.f32 %v854_v1, %v648_v16  ;;  %v1246_v9 = vadd.f32 %v1230_v43, %v1198_v6  ;;  %v1430_v7 = vmax.f32 %v13845_v47, 0.0  ;;  %v629_v44 = vadd.f32 %v613_v55, %v581_v25  ;;  %v13849_v16 = vld [vmem:[#allocation86_spill] sm:$0xff]  ;;  %v13850_v40 = vld [vmem:[#allocation109_spill] sm:$0xff] }
 0x214   :  { %v1060_v46 = vmul.f32 %v9661_v29, %v1040_v18  ;;  %v993_v52 = vmax.f32 %v977_v49, 0.0  ;;  %v1009_v4 = vmin.f32 %v977_v49, 0.0  ;;  %v835_v57 = vadd.f32 %v819_v63, %v787_v32 }
 0x215   :  { %v1266_v14 = vmul.f32 %v9665_v30, %v1246_v9  ;;  %v1199_v54 = vmax.f32 %v1183_v45, 0.0  ;;  %v1215_v36 = vmin.f32 %v1183_v45, 0.0  ;;  %v649_v0 = vmul.f32 %v9643_v19, %v629_v44 }
 0x216   :  { %v1076_v17 = vadd.f32 %v1060_v46, %v870_v10  ;;  %v1025_v31 = vmul.f32 0.2, %v1009_v4  ;;  %v1446_v27 = vmin.f32 %v13845_v47, 0.0  ;;  %v855_v22 = vmul.f32 %v9649_v24, %v835_v57 }
 0x217   :  { %v1231_v35 = vmul.f32 0.2, %v1215_v36  ;;  %v1632_v50 = vmax.f32 %v13846_v56, 0.0  ;;  %v1648_v11 = vmin.f32 %v13846_v56, 0.0  ;;  %v1818_v34 = vadd.f32 %v13847_v59, %v13820_v5 }
 0x218   :  { %v1282_v23 = vadd.f32 %v1266_v14, %v1076_v17  ;;  %v1041_v26 = vadd.f32 %v1025_v31, %v993_v52  ;;  %v1462_v2 = vmul.f32 0.2, %v1446_v27  ;;  %v871_v51 = vadd.f32 %v855_v22, %v649_v0  ;;  %v13851_v17 = vld [vmem:[#allocation87_spill] sm:$0xff] }
 0x219   :  { %v1247_v15 = vadd.f32 %v1231_v35, %v1199_v54  ;;  %v1664_v8 = vmul.f32 0.2, %v1648_v11  ;;  %v2020_v61 = vadd.f32 %v13848_v28, %v9597_v48  ;;  %v1834_v25 = vmax.f32 %v1818_v34, 0.0  ;;  %v13852_v35 = vld [vmem:[#allocation110_spill] sm:$0xff] }
 0x21a   :  { %1310 = vadd.xlane.f32.xlu0 %v1282_v23  ;;  %v1061_v53 = vmul.f32 %v9661_v29, %v1041_v26  ;;  %v1478_v3 = vadd.f32 %v1462_v2, %v1430_v7  ;;  %v1850_v20 = vmin.f32 %v1818_v34, 0.0  ;;  %v1431_v21 = vmax.f32 %v13849_v16, 0.0  ;;  %v13853_v34 = vld [vmem:[#allocation91_spill] sm:$0xff] }
 0x21b   :  { %v1267_v39 = vmul.f32 %v9665_v30, %v1247_v15  ;;  %v1680_v13 = vadd.f32 %v1664_v8, %v1632_v50  ;;  %v2036_v38 = vmax.f32 %v2020_v61, 0.0  ;;  %v2052_v37 = vmin.f32 %v2020_v61, 0.0  ;;  %v13854_v15 = vld [vmem:[#allocation118_spill] sm:$0xff] }
 0x21c   :  { %v1077_v42 = vadd.f32 %v1061_v53, %v871_v51  ;;  %v1494_v6 = vmul.f32 %v1478_v3, %v9643_v19  ;;  %v1866_v12 = vmul.f32 0.2, %v1850_v20  ;;  %v1447_v32 = vmin.f32 %v13849_v16, 0.0  ;;  %v13855_v3 = vld [vmem:[#allocation88_spill] sm:$0xff] }
 0x21d   :  { %v1696_v60 = vmul.f32 %v1680_v13, %v9649_v24  ;;  %v2068_v41 = vmul.f32 0.2, %v2052_v37  ;;  %v1633_v1 = vmax.f32 %v13850_v40, 0.0  ;;  %v1649_v18 = vmin.f32 %v13850_v40, 0.0 }
 0x21e   :  { %v1283_v43 = vadd.f32 %v1267_v39, %v1077_v42  ;;  %v1882_v33 = vadd.f32 %v1866_v12, %v1834_v25  ;;  %v1819_v55 = vadd.f32 %v13847_v59, %v13825_v62  ;;  %v1463_v10 = vmul.f32 0.2, %v1447_v32 }
 0x21f   :  { %v1712_v49 = vadd.f32 %v1696_v60, %v1494_v6  ;;  %v2084_v45 = vadd.f32 %v2068_v41, %v2036_v38  ;;  %v2021_v9 = vadd.f32 %v13848_v28, %v9607_v58  ;;  %v1665_v47 = vmul.f32 0.2, %v1649_v18  ;;  %v13856_v41 = vld [vmem:[#allocation111_spill] sm:$0xff] }
 0x220   :  { %1312 = vadd.xlane.f32.xlu1 %v1283_v43  ;;  %v1898_v63 = vmul.f32 %v1882_v33, %v9661_v29  ;;  %v1835_v7 = vmax.f32 %v1819_v55, 0.0  ;;  %v1851_v46 = vmin.f32 %v1819_v55, 0.0  ;;  %v1479_v52 = vadd.f32 %v1463_v10, %v1431_v21 }
 0x221   :  { %v2100_v44 = vmul.f32 %v2084_v45, %v9665_v30  ;;  %v2037_v4 = vmax.f32 %v2021_v9, 0.0  ;;  %v2053_v14 = vmin.f32 %v2021_v9, 0.0  ;;  %v1681_v54 = vadd.f32 %v1665_v47, %v1633_v1  ;;  %v13857_v47 = vld [vmem:[#allocation89_spill] sm:$0xff] }
 0x222   :  { %v1914_v57 = vadd.f32 %v1898_v63, %v1712_v49  ;;  %v1867_v36 = vmul.f32 0.2, %v1851_v46  ;;  %v1434_v0 = vmax.f32 %v13851_v17, 0.0  ;;  %v1495_v31 = vmul.f32 %v1479_v52, %v9643_v19 }
 0x223   :  { %v2069_v27 = vmul.f32 0.2, %v2053_v14  ;;  %v1450_v22 = vmin.f32 %v13851_v17, 0.0  ;;  %v1636_v56 = vmax.f32 %v13852_v35, 0.0  ;;  %v1697_v11 = vmul.f32 %v1681_v54, %v9649_v24 }
 0x224   :  { %v2116_v50 = vadd.f32 %v2100_v44, %v1914_v57  ;;  %v1883_v23 = vadd.f32 %v1867_v36, %v1835_v7  ;;  %v1652_v26 = vmin.f32 %v13852_v35, 0.0  ;;  %v1822_v51 = vadd.f32 %v13853_v34, %v13820_v5 }
 0x225   :  { %v2085_v2 = vadd.f32 %v2069_v27, %v2037_v4  ;;  %v1466_v59 = vmul.f32 0.2, %v1450_v22  ;;  %v2024_v8 = vadd.f32 %v13854_v15, %v9597_v48  ;;  %v1713_v28 = vadd.f32 %v1697_v11, %v1495_v31 }
 0x226   :  { %2138 = vadd.xlane.f32.xlu0 %v2116_v50  ;;  %v1899_v61 = vmul.f32 %v1883_v23, %v9661_v29  ;;  %v1668_v53 = vmul.f32 0.2, %v1652_v26  ;;  %v1435_v25 = vmax.f32 %v13855_v3, 0.0  ;;  %v1838_v13 = vmax.f32 %v1822_v51, 0.0 }
 0x227   :  { %v2101_v20 = vmul.f32 %v2085_v2, %v9665_v30  ;;  %v1482_v39 = vadd.f32 %v1466_v59, %v1434_v0  ;;  %v1854_v38 = vmin.f32 %v1822_v51, 0.0  ;;  %v2040_v6 = vmax.f32 %v2024_v8, 0.0  ;;  %v13859_v59 = vld [vmem:[#allocation92_spill] sm:$0xff] }
 0x228   :  { %v1915_v37 = vadd.f32 %v1899_v61, %v1713_v28  ;;  %v1684_v42 = vadd.f32 %v1668_v53, %v1636_v56  ;;  %v2056_v12 = vmin.f32 %v2024_v8, 0.0  ;;  %v1451_v60 = vmin.f32 %v13855_v3, 0.0  ;;  %v13858_v56 = vld [vmem:[#allocation112_spill] sm:$0xff] }
 0x229   :  { %v1498_v16 = vmul.f32 %v1482_v39, %v9643_v19  ;;  %v1870_v21 = vmul.f32 0.2, %v1854_v38  ;;  %v1637_v32 = vmax.f32 %v13856_v41, 0.0  ;;  %v1653_v33 = vmin.f32 %v13856_v41, 0.0  ;;  %v13860_v28 = vld [vmem:[#allocation120_spill] sm:$0xff] }
 0x22a   :  { %v2117_v40 = vadd.f32 %v2101_v20, %v1915_v37  ;;  %v1700_v1 = vmul.f32 %v1684_v42, %v9649_v24  ;;  %v2072_v43 = vmul.f32 0.2, %v2056_v12  ;;  %v1467_v55 = vmul.f32 0.2, %v1451_v60 }
 0x22b   :  { %v1886_v18 = vadd.f32 %v1870_v21, %v1838_v13  ;;  %v1823_v49 = vadd.f32 %v13853_v34, %v13825_v62  ;;  %v2025_v45 = vadd.f32 %v13854_v15, %v9607_v58  ;;  %v1669_v63 = vmul.f32 0.2, %v1653_v33 }
 0x22c   :  { %2140 = vadd.xlane.f32.xlu1 %v2117_v40  ;;  %v1716_v10 = vadd.f32 %v1700_v1, %v1498_v16  ;;  %v2088_v9 = vadd.f32 %v2072_v43, %v2040_v6  ;;  %v1436_v7 = vmax.f32 %v13857_v47, 0.0  ;;  %v1483_v44 = vadd.f32 %v1467_v55, %v1435_v25  ;;  %v13861_v16 = vld [vmem:[#allocation90_spill] sm:$0xff]  ;;  %v13862_v40 = vld [vmem:[#allocation113_spill] sm:$0xff] }
 0x22d   :  { %v1902_v46 = vmul.f32 %v1886_v18, %v9661_v29  ;;  %v1839_v52 = vmax.f32 %v1823_v49, 0.0  ;;  %v1855_v4 = vmin.f32 %v1823_v49, 0.0  ;;  %v1685_v57 = vadd.f32 %v1669_v63, %v1637_v32 }
 0x22e   :  { %v2104_v14 = vmul.f32 %v2088_v9, %v9665_v30  ;;  %v2041_v54 = vmax.f32 %v2025_v45, 0.0  ;;  %v2057_v36 = vmin.f32 %v2025_v45, 0.0  ;;  %v1499_v0 = vmul.f32 %v1483_v44, %v9643_v19 }
 0x22f   :  { %v1918_v17 = vadd.f32 %v1902_v46, %v1716_v10  ;;  %v1871_v31 = vmul.f32 0.2, %v1855_v4  ;;  %v1452_v27 = vmin.f32 %v13857_v47, 0.0  ;;  %v1701_v22 = vmul.f32 %v1685_v57, %v9649_v24 }
 0x230   :  { %v2073_v35 = vmul.f32 0.2, %v2057_v36  ;;  %v1638_v50 = vmax.f32 %v13858_v56, 0.0  ;;  %v1654_v11 = vmin.f32 %v13858_v56, 0.0  ;;  %v1824_v34 = vadd.f32 %v13859_v59, %v13820_v5  ;;  %v13866_v56 = vld [vmem:[#allocation64_spill] sm:$0xff] }
 0x231   :  { %v2120_v23 = vadd.f32 %v2104_v14, %v1918_v17  ;;  %v1887_v26 = vadd.f32 %v1871_v31, %v1839_v52  ;;  %v1468_v2 = vmul.f32 0.2, %v1452_v27  ;;  %v1717_v51 = vadd.f32 %v1701_v22, %v1499_v0  ;;  %v13863_v17 = vld [vmem:[#allocation48_spill] sm:$0xff]  ;;  %v13864_v0 = vld [vmem:[#allocation50_spill] sm:$0xff] }
 0x232   :  { %v2089_v15 = vadd.f32 %v2073_v35, %v2041_v54  ;;  %v1670_v8 = vmul.f32 0.2, %v1654_v11  ;;  %v2026_v61 = vadd.f32 %v13860_v28, %v9597_v48  ;;  %v1840_v25 = vmax.f32 %v1824_v34, 0.0  ;;  %v13865_v35 = vld [vmem:[#allocation45_spill] sm:$0xff] }
 0x233   :  { %2146 = vadd.xlane.f32.xlu0 %v2120_v23  ;;  %v1903_v53 = vmul.f32 %v1887_v26, %v9661_v29  ;;  %v1484_v3 = vadd.f32 %v1468_v2, %v1436_v7  ;;  %v1856_v20 = vmin.f32 %v1824_v34, 0.0  ;;  %v1437_v21 = vmax.f32 %v13861_v16, 0.0  ;;  %v13867_v11 = vld [vmem:[#allocation61_spill] sm:$0xff] }
 0x234   :  { %v2105_v39 = vmul.f32 %v2089_v15, %v9665_v30  ;;  %v1686_v13 = vadd.f32 %v1670_v8, %v1638_v50  ;;  %v2042_v38 = vmax.f32 %v2026_v61, 0.0  ;;  %v2058_v37 = vmin.f32 %v2026_v61, 0.0 }
 0x235   :  { %v1919_v42 = vadd.f32 %v1903_v53, %v1717_v51  ;;  %v1500_v6 = vmul.f32 %v1484_v3, %v9643_v19  ;;  %v1872_v12 = vmul.f32 0.2, %v1856_v20  ;;  %v1453_v32 = vmin.f32 %v13861_v16, 0.0 }
 0x236   :  { %v1702_v60 = vmul.f32 %v1686_v13, %v9649_v24  ;;  %v2074_v41 = vmul.f32 0.2, %v2058_v37  ;;  %v1639_v1 = vmax.f32 %v13862_v40, 0.0  ;;  %v1655_v18 = vmin.f32 %v13862_v40, 0.0  ;;  %v13869_v37 = vld [vmem:[#allocation73_spill] sm:$0xff] }
 0x237   :  { %v2121_v43 = vadd.f32 %v2105_v39, %v1919_v42  ;;  %v1888_v33 = vadd.f32 %v1872_v12, %v1840_v25  ;;  %v1825_v55 = vadd.f32 %v13859_v59, %v13825_v62  ;;  %v1469_v10 = vmul.f32 0.2, %v1453_v32 }
 0x238   :  { %v1718_v49 = vadd.f32 %v1702_v60, %v1500_v6  ;;  %v2090_v45 = vadd.f32 %v2074_v41, %v2042_v38  ;;  %v2027_v9 = vadd.f32 %v13860_v28, %v9607_v58  ;;  %v1671_v47 = vmul.f32 0.2, %v1655_v18  ;;  %v13868_v38 = vld [vmem:[#allocation40_spill] sm:$0xff]  ;;  %v13872_v41 = vld [vmem:[#allocation46_spill] sm:$0xff] }
 0x239   :  { %2148 = vadd.xlane.f32.xlu1 %v2121_v43  ;;  %v1904_v63 = vmul.f32 %v1888_v33, %v9661_v29  ;;  %v1841_v7 = vmax.f32 %v1825_v55, 0.0  ;;  %v1857_v46 = vmin.f32 %v1825_v55, 0.0  ;;  %v1485_v52 = vadd.f32 %v1469_v10, %v1437_v21  ;;  %v13871_v21 = vld [vmem:[#allocation43_spill] sm:$0xff] }
 0x23a   :  { %v2106_v44 = vmul.f32 %v2090_v45, %v9665_v30  ;;  %v2043_v4 = vmax.f32 %v2027_v9, 0.0  ;;  %v2059_v14 = vmin.f32 %v2027_v9, 0.0  ;;  %v1687_v54 = vadd.f32 %v1671_v47, %v1639_v1 }
 0x23b   :  { %v1920_v57 = vadd.f32 %v1904_v63, %v1718_v49  ;;  %v1873_v36 = vmul.f32 0.2, %v1857_v46  ;;  %v566_v31 = vadd.f32 %v13864_v0, %v13863_v17  ;;  %v1501_v27 = vmul.f32 %v1485_v52, %v9643_v19 }
 0x23c   :  { %v2075_v22 = vmul.f32 0.2, %v2059_v14  ;;  %v772_v50 = vadd.f32 %v13866_v56, %v13865_v35  ;;  %v978_v23 = vadd.f32 %v13867_v11, %v13820_v5  ;;  %v1703_v2 = vmul.f32 %v1687_v54, %v9649_v24 }
 0x23d   :  { %v2122_v26 = vadd.f32 %v2106_v44, %v1920_v57  ;;  %v1889_v59 = vadd.f32 %v1873_v36, %v1841_v7  ;;  %v582_v34 = vmax.f32 %v566_v31, 0.0  ;;  %v598_v15 = vmin.f32 %v566_v31, 0.0 }
 0x23e   :  { %v2091_v51 = vadd.f32 %v2075_v22, %v2043_v4  ;;  %v788_v8 = vmax.f32 %v772_v50, 0.0  ;;  %v804_v28 = vmin.f32 %v772_v50, 0.0  ;;  %v1719_v61 = vadd.f32 %v1703_v2, %v1501_v27  ;;  %v13873_v27 = vld [vmem:[#allocation81_spill] sm:$0xff] }
 0x23f   :  { %2150 = vadd.xlane.f32.xlu0 %v2122_v26  ;;  %v1905_v53 = vmul.f32 %v1889_v59, %v9661_v29  ;;  %v994_v3 = vmax.f32 %v978_v23, 0.0  ;;  %v1010_v25 = vmin.f32 %v978_v23, 0.0  ;;  %v614_v39 = vmul.f32 0.2, %v598_v15  ;;  %v13874_v23 = vld [vmem:[#allocation101_spill] sm:$0xff] }
 0x240   :  { %v2107_v20 = vmul.f32 %v2091_v51, %v9665_v30  ;;  %v820_v13 = vmul.f32 0.2, %v804_v28  ;;  %v13870_v42 = vcombine.high %v13869_v37, %v13869_v37  ;;  %v567_v60 = vadd.f32 %v13864_v0, %v13871_v21 }
 0x241   :  { %v1921_v12 = vadd.f32 %v1905_v53, %v1719_v61  ;;  %v1026_v16 = vmul.f32 0.2, %v1010_v25  ;;  %v773_v32 = vadd.f32 %v13866_v56, %v13872_v41  ;;  %v630_v40 = vadd.f32 %v614_v39, %v582_v34 }
 0x242   :  { %v1161_v6 = vrot.slane %v13870_v42, %v13868_v38  ;;  %v836_v1 = vadd.f32 %v820_v13, %v788_v8  ;;  %v979_v33 = vadd.f32 %v13867_v11, %v13825_v62  ;;  %v583_v49 = vmax.f32 %v567_v60, 0.0 }
 0x243   :  { %v2123_v18 = vadd.f32 %v2107_v20, %v1921_v12  ;;  %v1042_v55 = vadd.f32 %v1026_v16, %v994_v3  ;;  %v599_v45 = vmin.f32 %v567_v60, 0.0  ;;  %v650_v10 = vmul.f32 %v9643_v19, %v630_v40  ;;  %v13876_v16 = vld [vmem:[#allocation114_spill] sm:$0xff] }
 0x244   :  { %v1184_v43 = vadd.f32 %v1161_v6, %v9597_v48  ;;  %v856_v9 = vmul.f32 %v9649_v24, %v836_v1  ;;  %v789_v44 = vmax.f32 %v773_v32, 0.0  ;;  %v805_v52 = vmin.f32 %v773_v32, 0.0 }
 0x245   :  { %2152 = vadd.xlane.f32.xlu1 %v2123_v18  ;;  %v1062_v7 = vmul.f32 %v9661_v29, %v1042_v55  ;;  %v615_v46 = vmul.f32 0.2, %v599_v45  ;;  %v995_v57 = vmax.f32 %v979_v33, 0.0  ;;  %v1011_v54 = vmin.f32 %v979_v33, 0.0 }
 0x246   :  { %v1200_v63 = vmax.f32 %v1184_v43, 0.0  ;;  %v1216_v47 = vmin.f32 %v1184_v43, 0.0  ;;  %v872_v4 = vadd.f32 %v856_v9, %v650_v10  ;;  %v821_v0 = vmul.f32 0.2, %v805_v52 }
 0x247   :  { %v631_v36 = vadd.f32 %v615_v46, %v583_v49  ;;  %v1185_v31 = vadd.f32 %v1161_v6, %v9607_v58  ;;  %v1422_v22 = vadd.f32 %v13873_v27, %v13863_v17  ;;  %v1027_v11 = vmul.f32 0.2, %v1011_v54 }
 0x248   :  { %v1232_v14 = vmul.f32 0.2, %v1216_v47  ;;  %v1078_v56 = vadd.f32 %v1062_v7, %v872_v4  ;;  %v1624_v26 = vadd.f32 %v13874_v23, %v13865_v35  ;;  %v837_v59 = vadd.f32 %v821_v0, %v789_v44  ;;  %v13875_v35 = vld [vmem:[#allocation94_spill] sm:$0xff] }
 0x249   :  { %v651_v2 = vmul.f32 %v9643_v19, %v631_v36  ;;  %v1201_v34 = vmax.f32 %v1185_v31, 0.0  ;;  %v1217_v51 = vmin.f32 %v1185_v31, 0.0  ;;  %v1043_v8 = vadd.f32 %v1027_v11, %v995_v57 }
 0x24a   :  { %v1248_v50 = vadd.f32 %v1232_v14, %v1200_v63  ;;  %v1438_v28 = vmax.f32 %v1422_v22, 0.0  ;;  %v1454_v61 = vmin.f32 %v1422_v22, 0.0  ;;  %v857_v53 = vmul.f32 %v9649_v24, %v837_v59 }
 0x24b   :  { %v1233_v3 = vmul.f32 0.2, %v1217_v51  ;;  %v1640_v17 = vmax.f32 %v1624_v26, 0.0  ;;  %v1656_v25 = vmin.f32 %v1624_v26, 0.0  ;;  %v1063_v39 = vmul.f32 %v9661_v29, %v1043_v8 }
 0x24c   :  { %v1268_v15 = vmul.f32 %v9665_v30, %v1248_v50  ;;  %v1470_v13 = vmul.f32 0.2, %v1454_v61  ;;  %v1826_v37 = vadd.f32 %v13875_v35, %v13820_v5  ;;  %v873_v42 = vadd.f32 %v857_v53, %v651_v2 }
 0x24d   :  { %v1249_v6 = vadd.f32 %v1233_v3, %v1201_v34  ;;  %v1672_v12 = vmul.f32 0.2, %v1656_v25  ;;  %v13877_v60 = vcombine.high %v13876_v16, %v13876_v16  ;;  %v1423_v43 = vadd.f32 %v13873_v27, %v13871_v21 }
 0x24e   :  { %v1284_v20 = vadd.f32 %v1268_v15, %v1078_v56  ;;  %v1486_v40 = vadd.f32 %v1470_v13, %v1438_v28  ;;  %v1858_v1 = vmin.f32 %v1826_v37, 0.0  ;;  %v1079_v33 = vadd.f32 %v1063_v39, %v873_v42  ;;  %v1291_v39 = vpop.xlane.xlu1 %1290 }
 0x24f   :  { %v2005_v32 = vrot.slane %v13877_v60, %v13868_v38  ;;  %v1269_v18 = vmul.f32 %v9665_v30, %v1249_v6  ;;  %v1688_v55 = vadd.f32 %v1672_v12, %v1640_v17  ;;  %v1842_v45 = vmax.f32 %v1826_v37, 0.0 }
 0x250   :  { %1314 = vadd.xlane.f32.xlu0 %v1284_v20  ;;  %v1502_v49 = vmul.f32 %v1486_v40, %v9643_v19  ;;  %v1874_v10 = vmul.f32 0.2, %v1858_v1  ;;  %v1455_v9 = vmin.f32 %v1423_v43, 0.0  ;;  %v1439_v46 = vmax.f32 %v1423_v43, 0.0  ;;  %v1287_v20 = vpop.xlane.xlu0 %1286 }
 0x251   :  { %v2028_v5 = vadd.f32 %v2005_v32, %v9597_v48  ;;  %v1285_v63 = vadd.f32 %v1269_v18, %v1079_v33  ;;  %v1704_v47 = vmul.f32 %v1688_v55, %v9649_v24  ;;  %v1625_v21 = vadd.f32 %v13874_v23, %v13872_v41 }
 0x252   :  { %v1890_v44 = vadd.f32 %v1874_v10, %v1842_v45  ;;  %v1471_v52 = vmul.f32 0.2, %v1455_v9  ;;  %v1827_v4 = vadd.f32 %v13875_v35, %v13825_v62  ;;  %v2029_v54 = vadd.f32 %v2005_v32, %v9607_v58  ;;  %v1293_v13 = vpop.xlane.xlu1 %1292 }
 0x253   :  { %v2060_v7 = vmin.f32 %v2028_v5, 0.0  ;;  %1316 = vadd.xlane.f32.xlu1 %v1285_v63  ;;  %v1720_v48 = vadd.f32 %v1704_v47, %v1502_v49  ;;  %v2044_v14 = vmax.f32 %v2028_v5, 0.0  ;;  %v1657_v31 = vmin.f32 %v1625_v21, 0.0 }
 0x254   :  { %v1906_v36 = vmul.f32 %v1890_v44, %v9661_v29  ;;  %v1487_v0 = vadd.f32 %v1471_v52, %v1439_v46  ;;  %v1859_v22 = vmin.f32 %v1827_v4, 0.0  ;;  %v1641_v50 = vmax.f32 %v1625_v21, 0.0 }
 0x255   :  { %v2076_v57 = vmul.f32 0.2, %v2060_v7  ;;  %v1673_v11 = vmul.f32 0.2, %v1657_v31  ;;  %v2061_v26 = vmin.f32 %v2029_v54, 0.0  ;;  %v1843_v23 = vmax.f32 %v1827_v4, 0.0 }
 0x256   :  { %v1922_v56 = vadd.f32 %v1906_v36, %v1720_v48  ;;  %v1875_v62 = vmul.f32 0.2, %v1859_v22  ;;  %v1503_v2 = vmul.f32 %v1487_v0, %v9643_v19  ;;  %v2045_v34 = vmax.f32 %v2029_v54, 0.0  ;;  %v1289_v19 = vpop.xlane.xlu0 %1288  ;;  %v10527_v37 = vpop.xlane.xlu1 %2128  ;;  %v13879_v7 = vld [vmem:[#allocation39_spill] sm:$0xff] }
 0x257   :  { %v2092_v27 = vadd.f32 %v2076_v57, %v2044_v14  ;;  %v1689_v59 = vadd.f32 %v1673_v11, %v1641_v50  ;;  %v2077_v51 = vmul.f32 0.2, %v2061_v26  ;;  %v13878_v45 = vlaneseq }
 0x258   :  { %v1891_v15 = vadd.f32 %v1875_v62, %v1843_v23 }
 0x259   :  { %v2108_v41 = vmul.f32 %v2092_v27, %v9665_v30  ;;  %v1705_v8 = vmul.f32 %v1689_v59, %v9649_v24  ;;  %v2093_v28 = vadd.f32 %v2077_v51, %v2045_v34  ;;  %v2175_v10 = vand.u32 127, %v13878_v45 }
 0x25a   :  { %v1907_v53 = vmul.f32 %v1891_v15, %v9661_v29  ;;  %v10525_v35 = vpop.xlane.xlu0 %2126  ;;  %v1297_v24 = vpop.xlane.xlu1 %1296 }
 0x25b   :  { %v2124_v58 = vadd.f32 %v2108_v41, %v1922_v56  ;;  %v1721_v61 = vadd.f32 %v1705_v8, %v1503_v2  ;;  %v2109_v17 = vmul.f32 %v2093_v28, %v9665_v30  ;;  %v2180_v63 = vadd.s32 4294967288, %v2175_v10 }
 0x25c   :  { %v10554_v52 = vsub.s32 %v2175_v10, %v13879_v7 }
 0x25d   :  { %2154 = vadd.xlane.f32.xlu0 %v2124_v58  ;;  %v1923_v3 = vadd.f32 %v1907_v53, %v1721_v61  ;;  %v10549_v46 = vsub.s32 %v2180_v63, %v13879_v7 }
 0x25e   :  { %v1295_v42 = vpop.xlane.xlu0 %1294  ;;  %13881 = vst [vmem:[#allocation62_spill] sm:$0xff] %v10554_v52  ;;  %v2190_v48 = vrot.slane %v1291_v39, %v10554_v52  ;;  %v2179_v0 = vrot.slane %v1287_v20, %v10554_v52 }
 0x25f   :  { %v2125_v25 = vadd.f32 %v2109_v17, %v1923_v3  ;;  %13880 = vst [vmem:[#allocation67_spill] sm:$0xff] %v10549_v46  ;;  %v2194_v21 = vrot.slane %v1293_v13, %v10549_v46  ;;  %v2203_v4 = vrot.slane %v1297_v24, %v10549_v46  ;;  %v2184_v14 = vrot.slane %v1289_v19, %v10549_v46 }
 0x260   :  { %v2199_v54 = vrot.slane %v1295_v42, %v10554_v52 }
 0x261   :  { %2156 = vadd.xlane.f32.xlu1 %v2125_v25  ;;  %v2195_v31 = vsel %vm2185_vm3, %v2194_v21, %v2190_v48  ;;  %v2186_v50 = vsel %vm2185_vm3, %v2184_v14, %v2179_v0 }
 0x262   :  { %v1303_v6 = vpop.xlane.xlu0 %1302  ;;  %v2204_v22 = vsel %vm2185_vm3, %v2203_v4, %v2199_v54  ;;  %v2251_v41 = vsel %vm2250_vm4, %v2195_v31, %v2186_v50 }
 0x263   :  { %v1305_v12 = vpop.xlane.xlu1 %1304  ;;  %v2253_v2 = vsel %vm2252_vm5, %v2204_v22, %v2251_v41  ;;  %v2217_v34 = vrot.slane %v1303_v6, %v10554_v52  ;;  %v13882_v6 = vld [vmem:[#allocation37_spill] sm:$0xff] }
 0x264   :  { %v2221_v23 = vrot.slane %v1305_v12, %v10549_v46 }
 0x266   :  { %v2222_v28 = vsel %vm2185_vm3, %v2221_v23, %v2217_v34 }
 0x269   :  { %v10529_v16 = vpop.xlane.xlu0 %2130 }
 0x270   :  { %v10531_v29 = vpop.xlane.xlu1 %2132 }
 0x271   :  { %v2297_v13 = vrot.slane %v10531_v29, %v10549_v46 }
 0x275   :  { %v10533_v60 = vpop.xlane.xlu0 %2134 }
 0x276   :  { %v2302_v29 = vrot.slane %v10533_v60, %v10554_v52 }
 0x27c   :  { %v10535_v30 = vpop.xlane.xlu1 %2136 }
 0x27d   :  { %v2306_v24 = vrot.slane %v10535_v30, %v10549_v46 }
 0x282   :  { %v1299_v32 = vpop.xlane.xlu0 %1298 }
 0x283   :  { %v2208_v27 = vrot.slane %v1299_v32, %v10554_v52  ;;  %v2288_v32 = vrot.slane %v10527_v37, %v10549_v46  ;;  %v2307_v37 = vsel %vm2185_vm3, %v2306_v24, %v2302_v29  ;;  %v13887_v24 = vld [vmem:[#allocation30_spill] sm:$0xff] }
 0x288   :  { %v1301_v40 = vpop.xlane.xlu1 %1300 }
 0x289   :  { %v2212_v57 = vrot.slane %v1301_v40, %v10549_v46  ;;  %v2293_v40 = vrot.slane %v10529_v16, %v10554_v52 }
 0x28b   :  { %v2213_v11 = vsel %vm2185_vm3, %v2212_v57, %v2208_v27  ;;  %v2298_v30 = vsel %vm2185_vm3, %v2297_v13, %v2293_v40  ;;  %v13886_v13 = vld [vmem:[#allocation31_spill] sm:$0xff] }
 0x28c   :  { %v2255_v51 = vsel %vm2254_vm6, %v2213_v11, %v2253_v2 }
 0x28d   :  { %v2257_v25 = vsel %vm2256_vm7, %v2222_v28, %v2255_v51 }
 0x28e   :  { %v10537_v1 = vpop.xlane.xlu0 %2142 }
 0x28f   :  { %v2320_v21 = vrot.slane %v10537_v1, %v10554_v52 }
 0x294   :  { %v10539_v43 = vpop.xlane.xlu1 %2144 }
 0x29a   :  { %v1307_v33 = vpop.xlane.xlu0 %1306 }
 0x29b   :  { %v2226_v59 = vrot.slane %v1307_v33, %v10554_v52 }
 0x2a0   :  { %v1309_v18 = vpop.xlane.xlu1 %1308 }
 0x2a1   :  { %v2230_v26 = vrot.slane %v1309_v18, %v10549_v46 }
 0x2a3   :  { %v2231_v8 = vsel %vm2185_vm3, %v2230_v26, %v2226_v59 }
 0x2a4   :  { %v2259_v20 = vsel %vm2258_vm8, %v2231_v8, %v2257_v25 }
 0x2a7   :  { %v1311_v55 = vpop.xlane.xlu0 %1310 }
 0x2a8   :  { %v2235_v58 = vrot.slane %v1311_v55, %v10554_v52  ;;  %v2284_v55 = vrot.slane %v10525_v35, %v10554_v52  ;;  %v2324_v35 = vrot.slane %v10539_v43, %v10549_v46 }
 0x2aa   :  { %v2289_v16 = vsel %vm2185_vm3, %v2288_v32, %v2284_v55  ;;  %v2325_v43 = vsel %vm2185_vm3, %v2324_v35, %v2320_v21  ;;  %v13888_v32 = vld [vmem:[#allocation32_spill] sm:$0xff] }
 0x2ab   :  { %v2353_v10 = vsel %vm2250_vm4, %v2298_v30, %v2289_v16 }
 0x2ac   :  { %v2354_v63 = vsel %vm2252_vm5, %v2307_v37, %v2353_v10 }
 0x2ad   :  { %v1313_v5 = vpop.xlane.xlu1 %1312 }
 0x2ae   :  { %v2239_v62 = vrot.slane %v1313_v5, %v10549_v46 }
 0x2b0   :  { %v2240_v61 = vsel %vm2185_vm3, %v2239_v62, %v2235_v58 }
 0x2b1   :  { %v2261_v19 = vsel %vm2260_vm9, %v2240_v61, %v2259_v20  ;;  %v10642_v20 = vsub.s32 3, %v13879_v7 }
 0x2b3   :  { %v10541_v49 = vpop.xlane.xlu0 %2138  ;;  %13884 = vst [vmem:[#allocation74_spill] sm:$0xff] %v10642_v20  ;;  %v2406_v40 = vrot.slane %v13888_v32, %v10642_v20 }
 0x2b4   :  { %v2311_v5 = vrot.slane %v10541_v49, %v10554_v52 }
 0x2b9   :  { %v10544_v9 = vpop.xlane.xlu1 %2140 }
 0x2ba   :  { %v2315_v33 = vrot.slane %v10544_v9, %v10549_v46 }
 0x2bc   :  { %v2316_v45 = vsel %vm2185_vm3, %v2315_v33, %v2311_v5 }
 0x2bd   :  { %v2355_v4 = vsel %vm2254_vm6, %v2316_v45, %v2354_v63 }
 0x2be   :  { %v2356_v31 = vsel %vm2256_vm7, %v2325_v43, %v2355_v4 }
 0x2c0   :  { %v10546_v47 = vpop.xlane.xlu0 %2146 }
 0x2c1   :  { %v2329_v49 = vrot.slane %v10546_v47, %v10554_v52 }
 0x2c6   :  { %v10551_v44 = vpop.xlane.xlu1 %2148 }
 0x2c7   :  { %v2333_v60 = vrot.slane %v10551_v44, %v10549_v46 }
 0x2c9   :  { %v2334_v14 = vsel %vm2185_vm3, %v2333_v60, %v2329_v49 }
 0x2ca   :  { %v2357_v1 = vsel %vm2258_vm8, %v2334_v14, %v2356_v31 }
 0x2cc   :  { %v10562_v36 = vpop.xlane.xlu0 %2150 }
 0x2cd   :  { %v2338_v44 = vrot.slane %v10562_v36, %v10554_v52 }
 0x2d2   :  { %v2153_v56 = vpop.xlane.xlu1 %2152 }
 0x2d3   :  { %v2342_v9 = vrot.slane %v2153_v56, %v10549_v46  ;;  %v13883_v56 = vld [vmem:[#allocation38_spill] sm:$0xff] }
 0x2d5   :  { %v2343_v57 = vsel %vm2185_vm3, %v2342_v9, %v2338_v44 }
 0x2d6   :  { %v2358_v36 = vsel %vm2260_vm9, %v2343_v57, %v2357_v1 }
 0x2dd   :  { %v1315_v15 = vpop.xlane.xlu0 %1314 }
 0x2de   :  { %v2244_v3 = vrot.slane %v1315_v15, %v10554_v52 }
 0x2e0   :  { %v1317_v53 = vpop.xlane.xlu1 %1316 }
 0x2e1   :  { %v2248_v17 = vrot.slane %v1317_v53, %v10549_v46 }
 0x2e3   :  { %v2249_v39 = vsel %vm2185_vm3, %v2248_v17, %v2244_v3 }
 0x2e4   :  { %v2263_v42 = vsel %vm2262_vm10, %v2249_v39, %v2261_v19  ;;  %v13885_v39 = vld [vmem:[#allocation29_spill] sm:$0xff] }
 0x2e5   :  { %v2361_v12 = vadd.f32 %v2263_v42, %v13882_v6  ;;  %v2394_v19 = vrot.slane %v13885_v39, %v10642_v20  ;;  %v2402_v42 = vrot.slane %v13886_v13, %v10642_v20 }
 0x2e7   :  { %v2364_v18 = vsel %vm2363_vm11, %v2361_v12, -inf }
 0x2e8   :  { %2365 = vmax.xlane.f32.xlu0 %v2364_v18 }
 0x2ea   :  { %v2155_v48 = vpop.xlane.xlu0 %2154 }
 0x2eb   :  { %v2347_v0 = vrot.slane %v2155_v48, %v10554_v52 }
 0x2ee   :  { %v2157_v54 = vpop.xlane.xlu1 %2156 }
 0x2ef   :  { %v2351_v47 = vrot.slane %v2157_v54, %v10549_v46 }
 0x2f1   :  { %v2352_v27 = vsel %vm2185_vm3, %v2351_v47, %v2347_v0 }
 0x2f2   :  { %v2359_v22 = vsel %vm2262_vm10, %v2352_v27, %v2358_v36 }
 0x2f3   :  { %v2362_v50 = vadd.f32 %v2359_v22, %v13883_v56 }
 0x2f5   :  { %v2367_v11 = vsel %vm2363_vm11, %v2362_v50, -inf }
 0x2f6   :  { %2368 = vmax.xlane.f32.xlu1 %v2367_v11 }
 0x375   :  { %v2366_v26 = vpop.xlane.xlu0 %2365 }
 0x376   :  { %v2370_v41 = vsub.f32 %v2361_v12, %v2366_v26  ;;  %v2398_v12 = vrot.slane %v13887_v24, %v10642_v20 }
 0x378   :  { %v2372_v23 = vmul.f32 1.442695, %v2370_v41 }
 0x37a   :  { %9178 = vpow2.f32 %v2372_v23 }
 0x383   :  { %v2369_v2 = vpop.xlane.xlu1 %2368 }
 0x384   :  { %v9179_v62 = vpop.eup %9178  ;;  %v2371_v59 = vsub.f32 %v2362_v50, %v2369_v2 }
 0x385   :  { %v2376_v34 = vsel %vm2363_vm11, %v9179_v62, 0.0 }
 0x386   :  { %2377 = vadd.xlane.f32.xlu0 %v2376_v34  ;;  %v2374_v51 = vmul.f32 1.442695, %v2371_v59 }
 0x388   :  { %9180 = vpow2.f32 %v2374_v51 }
 0x392   :  { %v9181_v58 = vpop.eup %9180 }
 0x393   :  { %v2379_v15 = vsel %vm2363_vm11, %v9181_v58, 0.0 }
 0x394   :  { %2380 = vadd.xlane.f32.xlu1 %v2379_v15 }
 0x413   :  { %v2378_v8 = vpop.xlane.xlu0 %2377 }
 0x414   :  { %9182 = vrcp.f32 %v2378_v8 }
 0x41e   :  { %v9183_v61 = vpop.eup %9182 }
 0x41f   :  { %v2383_v3 = vmul.f32 %v9183_v61, %v9179_v62 }
 0x421   :  { %v2381_v28 = vpop.xlane.xlu1 %2380 }
 0x422   :  { %9184 = vrcp.f32 %v2381_v28 }
 0x42c   :  { %v9185_v53 = vpop.eup %9184 }
 0x42d   :  { %v2385_v17 = vmul.f32 %v9185_v53, %v9181_v58 }
 0x42f   :  { %v2386_v25 = vpack.c.bf16 %v2385_v17, %v2383_v3 }
 0x431   :  { %9058 = vmatmul.mubr.msk.bf16.vlgmr.msra.gmra.mrb[8].mxu0 %vm2363_vm11, %v2386_v25  ;;  %9059 = vmatmul.mubr.msk.bf16.vlgmr.msra.gmra.mrb[8].mxu1 %vm2363_vm11, %v2386_v25 }
 0x504   :  { %v2444_v33 = vpop.f32.mrb[8].mxu0  ;;  %v2487_v29 = vpop.f32.mrb[8].mxu1 }
 0x505   :  { %v2445_v18 = vadd.f32 %v2444_v33, %v2394_v19  ;;  %v2488_v55 = vadd.f32 %v2487_v29, %v2402_v42  ;;  %v2446_v30 = vpop.f32.mrb[9].mxu0  ;;  %v2489_v5 = vpop.f32.mrb[9].mxu1 }
 0x506   :  { %v2447_v37 = vadd.f32 %v2446_v30, %v2398_v12  ;;  %v2490_v16 = vadd.f32 %v2489_v5, %v2406_v40  ;;  %v2448_v45 = vpop.f32.mrb[10].mxu0  ;;  %v2491_v60 = vpop.f32.mrb[10].mxu1 }
 0x507   :  { %9186 = vtanh.f32 %v2445_v18  ;;  %v2449_v10 = vadd.f32 %v2448_v45, %v2394_v19  ;;  %v2450_v35 = vpop.f32.mrb[11].mxu0  ;;  %v2493_v9 = vpop.f32.mrb[11].mxu1  ;;  %v2492_v63 = vadd.f32 %v2491_v60, %v2402_v42 }
 0x508   :  { %9188 = vtanh.f32 %v2488_v55  ;;  %v2451_v49 = vadd.f32 %v2450_v35, %v2398_v12  ;;  %v2494_v21 = vadd.f32 %v2493_v9, %v2406_v40 }
 0x509   :  { %9190 = vtanh.f32 %v2447_v37 }
 0x50a   :  { %9192 = vtanh.f32 %v2490_v16 }
 0x50b   :  { %9194 = vtanh.f32 %v2449_v10 }
 0x50c   :  { %9196 = vtanh.f32 %v2492_v63 }
 0x50d   :  { %9198 = vtanh.f32 %v2451_v49 }
 0x50e   :  { %9200 = vtanh.f32 %v2494_v21 }
 0x511   :  { %v9187_v4 = vpop.eup %9186 }
 0x512   :  { %v9189_v44 = vpop.eup %9188 }
 0x513   :  { %v9191_v48 = vpop.eup %9190 }
 0x514   :  { %v9193_v14 = vpop.eup %9192 }
 0x515   :  { %v9195_v43 = vpop.eup %9194 }
 0x516   :  { %v9197_v57 = vpop.eup %9196  ;;  %v10652_v54 = vpack.c.bf16 %v9195_v43, %v9187_v4 }
 0x517   :  { %v9199_v0 = vpop.eup %9198  ;;  %v10654_v47 = vpack.c.bf16 %v9197_v57, %v9189_v44 }
 0x518   :  { %v9201_v31 = vpop.eup %9200  ;;  %v10656_v1 = vpack.c.bf16 %v9199_v0, %v9191_v48 }
 0x519   :  { %v10658_v27 = vpack.c.bf16 %v9201_v31, %v9193_v14 }
 0x51a   :  { %9368 = dma.done.wait [#allocation6 + $0x1], 32768 }
 0x51b   :  { %9369 = vsyncadd [#allocation6 + $0x1], 4294934528  ;;  %2800 = vmatprep.mubr.bf16.mxu0 %v10656_v1  ;;  %2886 = vmatprep.mubr.bf16.mxu1 %v10656_v1  ;;  %v2513_v36 = vld [vmem:[#allocation3 + $0x8] sm:$0xff]  ;;  %v2515_v22 = vld [vmem:[#allocation3 + $0x18] sm:$0xff] }
 0x51c   :  { %v2512_v50 = vld [vmem:[#allocation3] sm:$0xff]  ;;  %2768 = vmatprep.subr.bf16.mxu0 %v2513_v36  ;;  %2854 = vmatprep.subr.bf16.mxu1 %v2515_v22  ;;  %v2514_v11 = vld [vmem:[#allocation3 + $0x10] sm:$0xff]  ;;  %v2521_v26 = vld [vmem:[#allocation3 + $0x48] sm:$0xff] }
 0x51d   :  { %v2523_v41 = vld [vmem:[#allocation3 + $0x58] sm:$0xff]  ;;  %2769 = vmatpush1.bf16.msra.mxu0 %v2512_v50  ;;  %2855 = vmatpush1.bf16.msra.mxu1 %v2514_v11  ;;  %v2520_v23 = vld [vmem:[#allocation3 + $0x40] sm:$0xff]  ;;  %v2522_v62 = vld [vmem:[#allocation3 + $0x50] sm:$0xff] }
 0x51e   :  { %2770 = vmatprep.subr.bf16.mxu0 %v2521_v26  ;;  %2856 = vmatprep.subr.bf16.mxu1 %v2523_v41  ;;  %v2529_v2 = vld [vmem:[#allocation3 + $0x88] sm:$0xff]  ;;  %v2531_v59 = vld [vmem:[#allocation3 + $0x98] sm:$0xff]  ;;  %v2528_v34 = vld [vmem:[#allocation3 + $0x80] sm:$0xff] }
 0x51f   :  { %v2530_v51 = vld [vmem:[#allocation3 + $0x90] sm:$0xff]  ;;  %v2537_v58 = vld [vmem:[#allocation3 + $0xc8] sm:$0xff]  ;;  %v2539_v15 = vld [vmem:[#allocation3 + $0xd8] sm:$0xff] }
 0x520   :  { %v2536_v8 = vld [vmem:[#allocation3 + $0xc0] sm:$0xff]  ;;  %v2538_v28 = vld [vmem:[#allocation3 + $0xd0] sm:$0xff]  ;;  %v2545_v61 = vld [vmem:[#allocation3 + $0x108] sm:$0xff] }
 0x521   :  { %2771 = vmatpush1.bf16.msra.mxu0 %v2520_v23  ;;  %2857 = vmatpush1.bf16.msra.mxu1 %v2522_v62  ;;  %v2547_v53 = vld [vmem:[#allocation3 + $0x118] sm:$0xff]  ;;  %v2544_v3 = vld [vmem:[#allocation3 + $0x100] sm:$0xff]  ;;  %v2546_v17 = vld [vmem:[#allocation3 + $0x110] sm:$0xff] }
 0x522   :  { %2772 = vmatprep.subr.bf16.mxu0 %v2529_v2  ;;  %2858 = vmatprep.subr.bf16.mxu1 %v2531_v59  ;;  %v2553_v25 = vld [vmem:[#allocation3 + $0x148] sm:$0xff]  ;;  %v2555_v19 = vld [vmem:[#allocation3 + $0x158] sm:$0xff]  ;;  %v2552_v42 = vld [vmem:[#allocation3 + $0x140] sm:$0xff] }
 0x523   :  { %v2554_v12 = vld [vmem:[#allocation3 + $0x150] sm:$0xff]  ;;  %v2561_v40 = vld [vmem:[#allocation3 + $0x188] sm:$0xff]  ;;  %v2563_v33 = vld [vmem:[#allocation3 + $0x198] sm:$0xff] }
 0x524   :  { %v2560_v29 = vld [vmem:[#allocation3 + $0x180] sm:$0xff]  ;;  %v2562_v18 = vld [vmem:[#allocation3 + $0x190] sm:$0xff]  ;;  %v2569_v55 = vld [vmem:[#allocation3 + $0x1c8] sm:$0xff] }
 0x525   :  { %2773 = vmatpush1.bf16.msra.mxu0 %v2528_v34  ;;  %2859 = vmatpush1.bf16.msra.mxu1 %v2530_v51  ;;  %v2571_v30 = vld [vmem:[#allocation3 + $0x1d8] sm:$0xff]  ;;  %v2568_v5 = vld [vmem:[#allocation3 + $0x1c0] sm:$0xff]  ;;  %v2570_v37 = vld [vmem:[#allocation3 + $0x1d0] sm:$0xff] }
 0x526   :  { %2774 = vmatprep.subr.bf16.mxu0 %v2537_v58  ;;  %2860 = vmatprep.subr.bf16.mxu1 %v2539_v15  ;;  %v2577_v16 = vld [vmem:[#allocation3 + $0x208] sm:$0xff]  ;;  %v2579_v45 = vld [vmem:[#allocation3 + $0x218] sm:$0xff]  ;;  %v2576_v60 = vld [vmem:[#allocation3 + $0x200] sm:$0xff] }
 0x527   :  { %v2578_v10 = vld [vmem:[#allocation3 + $0x210] sm:$0xff]  ;;  %v2585_v35 = vld [vmem:[#allocation3 + $0x248] sm:$0xff]  ;;  %v2587_v9 = vld [vmem:[#allocation3 + $0x258] sm:$0xff] }
 0x528   :  { %v2584_v63 = vld [vmem:[#allocation3 + $0x240] sm:$0xff]  ;;  %v2586_v49 = vld [vmem:[#allocation3 + $0x250] sm:$0xff]  ;;  %v2593_v21 = vld [vmem:[#allocation3 + $0x288] sm:$0xff] }
 0x529   :  { %2775 = vmatpush1.bf16.msra.mxu0 %v2536_v8  ;;  %2861 = vmatpush1.bf16.msra.mxu1 %v2538_v28  ;;  %v2595_v4 = vld [vmem:[#allocation3 + $0x298] sm:$0xff]  ;;  %v2592_v44 = vld [vmem:[#allocation3 + $0x280] sm:$0xff]  ;;  %v2594_v48 = vld [vmem:[#allocation3 + $0x290] sm:$0xff] }
 0x52a   :  { %2776 = vmatprep.subr.bf16.mxu0 %v2545_v61  ;;  %2862 = vmatprep.subr.bf16.mxu1 %v2547_v53  ;;  %v2601_v14 = vld [vmem:[#allocation3 + $0x2c8] sm:$0xff]  ;;  %v2603_v43 = vld [vmem:[#allocation3 + $0x2d8] sm:$0xff]  ;;  %v2600_v57 = vld [vmem:[#allocation3 + $0x2c0] sm:$0xff] }
 0x52b   :  { %v2602_v0 = vld [vmem:[#allocation3 + $0x2d0] sm:$0xff]  ;;  %v2609_v31 = vld [vmem:[#allocation3 + $0x308] sm:$0xff]  ;;  %v2611_v36 = vld [vmem:[#allocation3 + $0x318] sm:$0xff] }
 0x52c   :  { %v2608_v22 = vld [vmem:[#allocation3 + $0x300] sm:$0xff]  ;;  %v2610_v50 = vld [vmem:[#allocation3 + $0x310] sm:$0xff]  ;;  %v2617_v11 = vld [vmem:[#allocation3 + $0x348] sm:$0xff] }
 0x52d   :  { %2777 = vmatpush1.bf16.msra.mxu0 %v2544_v3  ;;  %2863 = vmatpush1.bf16.msra.mxu1 %v2546_v17  ;;  %v2619_v26 = vld [vmem:[#allocation3 + $0x358] sm:$0xff]  ;;  %v2616_v41 = vld [vmem:[#allocation3 + $0x340] sm:$0xff]  ;;  %v2618_v23 = vld [vmem:[#allocation3 + $0x350] sm:$0xff] }
 0x52e   :  { %2778 = vmatprep.subr.bf16.mxu0 %v2553_v25  ;;  %2864 = vmatprep.subr.bf16.mxu1 %v2555_v19  ;;  %v2625_v62 = vld [vmem:[#allocation3 + $0x388] sm:$0xff]  ;;  %v2627_v2 = vld [vmem:[#allocation3 + $0x398] sm:$0xff]  ;;  %v2624_v59 = vld [vmem:[#allocation3 + $0x380] sm:$0xff] }
 0x52f   :  { %v2626_v34 = vld [vmem:[#allocation3 + $0x390] sm:$0xff]  ;;  %v2633_v51 = vld [vmem:[#allocation3 + $0x3c8] sm:$0xff]  ;;  %v2635_v58 = vld [vmem:[#allocation3 + $0x3d8] sm:$0xff] }
 0x530   :  { %v2632_v15 = vld [vmem:[#allocation3 + $0x3c0] sm:$0xff]  ;;  %v2634_v8 = vld [vmem:[#allocation3 + $0x3d0] sm:$0xff]  ;;  %v2641_v28 = vld [vmem:[#allocation3 + $0x408] sm:$0xff] }
 0x531   :  { %2779 = vmatpush1.bf16.msra.mxu0 %v2552_v42  ;;  %2865 = vmatpush1.bf16.msra.mxu1 %v2554_v12  ;;  %v2643_v61 = vld [vmem:[#allocation3 + $0x418] sm:$0xff]  ;;  %v2640_v53 = vld [vmem:[#allocation3 + $0x400] sm:$0xff]  ;;  %v2642_v3 = vld [vmem:[#allocation3 + $0x410] sm:$0xff] }
 0x532   :  { %2780 = vmatprep.subr.bf16.mxu0 %v2561_v40  ;;  %2866 = vmatprep.subr.bf16.mxu1 %v2563_v33  ;;  %v2649_v17 = vld [vmem:[#allocation3 + $0x448] sm:$0xff]  ;;  %v2651_v25 = vld [vmem:[#allocation3 + $0x458] sm:$0xff]  ;;  %v2648_v19 = vld [vmem:[#allocation3 + $0x440] sm:$0xff] }
 0x533   :  { %v2650_v42 = vld [vmem:[#allocation3 + $0x450] sm:$0xff]  ;;  %v2657_v12 = vld [vmem:[#allocation3 + $0x488] sm:$0xff]  ;;  %v2659_v40 = vld [vmem:[#allocation3 + $0x498] sm:$0xff] }
 0x534   :  { %v2656_v33 = vld [vmem:[#allocation3 + $0x480] sm:$0xff] }
 0x535   :  { %2781 = vmatpush1.bf16.msra.mxu0 %v2560_v29  ;;  %2867 = vmatpush1.bf16.msra.mxu1 %v2562_v18  ;;  %v2658_v29 = vld [vmem:[#allocation3 + $0x490] sm:$0xff]  ;;  %v2665_v18 = vld [vmem:[#allocation3 + $0x4c8] sm:$0xff] }
 0x536   :  { %2782 = vmatprep.subr.bf16.mxu0 %v2569_v55  ;;  %2868 = vmatprep.subr.bf16.mxu1 %v2571_v30  ;;  %v2667_v55 = vld [vmem:[#allocation3 + $0x4d8] sm:$0xff]  ;;  %v2664_v30 = vld [vmem:[#allocation3 + $0x4c0] sm:$0xff] }
 0x539   :  { %2783 = vmatpush1.bf16.msra.mxu0 %v2568_v5  ;;  %2869 = vmatpush1.bf16.msra.mxu1 %v2570_v37  ;;  %v2666_v5 = vld [vmem:[#allocation3 + $0x4d0] sm:$0xff]  ;;  %v2673_v37 = vld [vmem:[#allocation3 + $0x508] sm:$0xff] }
 0x53a   :  { %2784 = vmatprep.subr.bf16.mxu0 %v2577_v16  ;;  %2870 = vmatprep.subr.bf16.mxu1 %v2579_v45  ;;  %v2675_v16 = vld [vmem:[#allocation3 + $0x518] sm:$0xff]  ;;  %v2672_v45 = vld [vmem:[#allocation3 + $0x500] sm:$0xff] }
 0x53d   :  { %2785 = vmatpush1.bf16.msra.mxu0 %v2576_v60  ;;  %2871 = vmatpush1.bf16.msra.mxu1 %v2578_v10  ;;  %v2674_v60 = vld [vmem:[#allocation3 + $0x510] sm:$0xff]  ;;  %v2681_v10 = vld [vmem:[#allocation3 + $0x548] sm:$0xff] }
 0x53e   :  { %2786 = vmatprep.subr.bf16.mxu0 %v2585_v35  ;;  %2872 = vmatprep.subr.bf16.mxu1 %v2587_v9  ;;  %v2683_v35 = vld [vmem:[#allocation3 + $0x558] sm:$0xff]  ;;  %v2680_v9 = vld [vmem:[#allocation3 + $0x540] sm:$0xff] }
 0x541   :  { %2787 = vmatpush1.bf16.msra.mxu0 %v2584_v63  ;;  %2873 = vmatpush1.bf16.msra.mxu1 %v2586_v49  ;;  %v2682_v63 = vld [vmem:[#allocation3 + $0x550] sm:$0xff]  ;;  %v2689_v49 = vld [vmem:[#allocation3 + $0x588] sm:$0xff] }
 0x542   :  { %2788 = vmatprep.subr.bf16.mxu0 %v2593_v21  ;;  %2874 = vmatprep.subr.bf16.mxu1 %v2595_v4  ;;  %v2691_v21 = vld [vmem:[#allocation3 + $0x598] sm:$0xff]  ;;  %v2688_v4 = vld [vmem:[#allocation3 + $0x580] sm:$0xff] }
 0x545   :  { %2789 = vmatpush1.bf16.msra.mxu0 %v2592_v44  ;;  %2875 = vmatpush1.bf16.msra.mxu1 %v2594_v48  ;;  %v2690_v44 = vld [vmem:[#allocation3 + $0x590] sm:$0xff]  ;;  %v2697_v48 = vld [vmem:[#allocation3 + $0x5c8] sm:$0xff] }
 0x546   :  { %2790 = vmatprep.subr.bf16.mxu0 %v2601_v14  ;;  %2876 = vmatprep.subr.bf16.mxu1 %v2603_v43  ;;  %v2699_v14 = vld [vmem:[#allocation3 + $0x5d8] sm:$0xff]  ;;  %v2696_v43 = vld [vmem:[#allocation3 + $0x5c0] sm:$0xff] }
 0x549   :  { %2791 = vmatpush1.bf16.msra.mxu0 %v2600_v57  ;;  %2877 = vmatpush1.bf16.msra.mxu1 %v2602_v0  ;;  %v2698_v57 = vld [vmem:[#allocation3 + $0x5d0] sm:$0xff]  ;;  %v2705_v0 = vld [vmem:[#allocation3 + $0x608] sm:$0xff] }
 0x54a   :  { %2792 = vmatprep.subr.bf16.mxu0 %v2609_v31  ;;  %2878 = vmatprep.subr.bf16.mxu1 %v2611_v36  ;;  %v2707_v31 = vld [vmem:[#allocation3 + $0x618] sm:$0xff]  ;;  %v2704_v36 = vld [vmem:[#allocation3 + $0x600] sm:$0xff] }
 0x54d   :  { %2793 = vmatpush1.bf16.msra.mxu0 %v2608_v22  ;;  %2879 = vmatpush1.bf16.msra.mxu1 %v2610_v50  ;;  %v2706_v22 = vld [vmem:[#allocation3 + $0x610] sm:$0xff]  ;;  %v2713_v50 = vld [vmem:[#allocation3 + $0x648] sm:$0xff] }
 0x54e   :  { %2794 = vmatprep.subr.bf16.mxu0 %v2617_v11  ;;  %2880 = vmatprep.subr.bf16.mxu1 %v2619_v26  ;;  %v2715_v11 = vld [vmem:[#allocation3 + $0x658] sm:$0xff]  ;;  %v2712_v26 = vld [vmem:[#allocation3 + $0x640] sm:$0xff] }
 0x551   :  { %2795 = vmatpush1.bf16.msra.mxu0 %v2616_v41  ;;  %2881 = vmatpush1.bf16.msra.mxu1 %v2618_v23  ;;  %v2714_v41 = vld [vmem:[#allocation3 + $0x650] sm:$0xff]  ;;  %v2721_v23 = vld [vmem:[#allocation3 + $0x688] sm:$0xff] }
 0x552   :  { %2796 = vmatprep.subr.bf16.mxu0 %v2625_v62  ;;  %2882 = vmatprep.subr.bf16.mxu1 %v2627_v2  ;;  %v2723_v62 = vld [vmem:[#allocation3 + $0x698] sm:$0xff]  ;;  %v2720_v2 = vld [vmem:[#allocation3 + $0x680] sm:$0xff] }
 0x555   :  { %2797 = vmatpush1.bf16.msra.mxu0 %v2624_v59  ;;  %2883 = vmatpush1.bf16.msra.mxu1 %v2626_v34  ;;  %v2722_v59 = vld [vmem:[#allocation3 + $0x690] sm:$0xff]  ;;  %v2729_v34 = vld [vmem:[#allocation3 + $0x6c8] sm:$0xff] }
 0x556   :  { %2798 = vmatprep.subr.bf16.mxu0 %v2633_v51  ;;  %2884 = vmatprep.subr.bf16.mxu1 %v2635_v58  ;;  %v2731_v51 = vld [vmem:[#allocation3 + $0x6d8] sm:$0xff]  ;;  %v2728_v58 = vld [vmem:[#allocation3 + $0x6c0] sm:$0xff] }
 0x559   :  { %2799 = vmatpush1.bf16.msra.mxu0 %v2632_v15  ;;  %2885 = vmatpush1.bf16.msra.mxu1 %v2634_v8  ;;  %v2730_v15 = vld [vmem:[#allocation3 + $0x6d0] sm:$0xff]  ;;  %v2737_v8 = vld [vmem:[#allocation3 + $0x708] sm:$0xff] }
 0x55a   :  { %2811 = vmatprep.subr.bf16.mxu0 %v2641_v28  ;;  %2897 = vmatprep.subr.bf16.mxu1 %v2643_v61  ;;  %v2739_v28 = vld [vmem:[#allocation3 + $0x718] sm:$0xff]  ;;  %v2736_v61 = vld [vmem:[#allocation3 + $0x700] sm:$0xff] }
 0x55c   :  { %2801 = vmatmul.mubr.bf16.vlgmr.msra.gmra.mrb[12].mxu0 %v10652_v54  ;;  %2887 = vmatmul.mubr.bf16.vlgmr.msra.gmra.mrb[12].mxu1 %v10652_v54 }
 0x55d   :  { %2812 = vmatpush1.bf16.msra.mxu0 %v2640_v53  ;;  %2898 = vmatpush1.bf16.msra.mxu1 %v2642_v3  ;;  %v2738_v53 = vld [vmem:[#allocation3 + $0x710] sm:$0xff]  ;;  %v2745_v3 = vld [vmem:[#allocation3 + $0x748] sm:$0xff] }
 0x55e   :  { %2813 = vmatprep.subr.bf16.mxu0 %v2649_v17  ;;  %2899 = vmatprep.subr.bf16.mxu1 %v2651_v25  ;;  %v2747_v17 = vld [vmem:[#allocation3 + $0x758] sm:$0xff]  ;;  %v2744_v25 = vld [vmem:[#allocation3 + $0x740] sm:$0xff] }
 0x55f   :  { %2843 = vmatprep.mubr.bf16.mxu0 %v10658_v27  ;;  %2929 = vmatprep.mubr.bf16.mxu1 %v10658_v27 }
 0x561   :  { %2814 = vmatpush1.bf16.msra.mxu0 %v2648_v19  ;;  %2900 = vmatpush1.bf16.msra.mxu1 %v2650_v42  ;;  %v2746_v19 = vld [vmem:[#allocation3 + $0x750] sm:$0xff]  ;;  %v2753_v42 = vld [vmem:[#allocation3 + $0x788] sm:$0xff] }
 0x562   :  { %2815 = vmatprep.subr.bf16.mxu0 %v2657_v12  ;;  %2901 = vmatprep.subr.bf16.mxu1 %v2659_v40  ;;  %v2755_v12 = vld [vmem:[#allocation3 + $0x798] sm:$0xff]  ;;  %v2752_v40 = vld [vmem:[#allocation3 + $0x780] sm:$0xff] }
 0x565   :  { %2816 = vmatpush1.bf16.msra.mxu0 %v2656_v33  ;;  %2902 = vmatpush1.bf16.msra.mxu1 %v2658_v29  ;;  %v2754_v33 = vld [vmem:[#allocation3 + $0x790] sm:$0xff]  ;;  %v2761_v29 = vld [vmem:[#allocation3 + $0x7c8] sm:$0xff] }
 0x566   :  { %2817 = vmatprep.subr.bf16.mxu0 %v2665_v18  ;;  %2903 = vmatprep.subr.bf16.mxu1 %v2667_v55  ;;  %v2763_v18 = vld [vmem:[#allocation3 + $0x7d8] sm:$0xff]  ;;  %v2760_v55 = vld [vmem:[#allocation3 + $0x7c0] sm:$0xff] }
 0x569   :  { %2818 = vmatpush1.bf16.msra.mxu0 %v2664_v30  ;;  %2904 = vmatpush1.bf16.msra.mxu1 %v2666_v5  ;;  %v2762_v30 = vld [vmem:[#allocation3 + $0x7d0] sm:$0xff]  ;;  %v2517_v5 = vld [vmem:[#allocation3 + $0x28] sm:$0xff] }
 0x56a   :  { %2819 = vmatprep.subr.bf16.mxu0 %v2673_v37  ;;  %2905 = vmatprep.subr.bf16.mxu1 %v2675_v16  ;;  %v2519_v37 = vld [vmem:[#allocation3 + $0x38] sm:$0xff]  ;;  %v2516_v16 = vld [vmem:[#allocation3 + $0x20] sm:$0xff] }
 0x56d   :  { %2820 = vmatpush1.bf16.msra.mxu0 %v2672_v45  ;;  %2906 = vmatpush1.bf16.msra.mxu1 %v2674_v60  ;;  %v2518_v45 = vld [vmem:[#allocation3 + $0x30] sm:$0xff]  ;;  %v2525_v60 = vld [vmem:[#allocation3 + $0x68] sm:$0xff] }
 0x56e   :  { %2821 = vmatprep.subr.bf16.mxu0 %v2681_v10  ;;  %2907 = vmatprep.subr.bf16.mxu1 %v2683_v35  ;;  %v2527_v10 = vld [vmem:[#allocation3 + $0x78] sm:$0xff]  ;;  %v2524_v35 = vld [vmem:[#allocation3 + $0x60] sm:$0xff] }
 0x571   :  { %2822 = vmatpush1.bf16.msra.mxu0 %v2680_v9  ;;  %2908 = vmatpush1.bf16.msra.mxu1 %v2682_v63  ;;  %v2526_v9 = vld [vmem:[#allocation3 + $0x70] sm:$0xff]  ;;  %v2533_v63 = vld [vmem:[#allocation3 + $0xa8] sm:$0xff] }
 0x572   :  { %2823 = vmatprep.subr.bf16.mxu0 %v2689_v49  ;;  %2909 = vmatprep.subr.bf16.mxu1 %v2691_v21  ;;  %v2535_v49 = vld [vmem:[#allocation3 + $0xb8] sm:$0xff]  ;;  %v2532_v21 = vld [vmem:[#allocation3 + $0xa0] sm:$0xff] }
 0x575   :  { %2824 = vmatpush1.bf16.msra.mxu0 %v2688_v4  ;;  %2910 = vmatpush1.bf16.msra.mxu1 %v2690_v44  ;;  %v2534_v4 = vld [vmem:[#allocation3 + $0xb0] sm:$0xff]  ;;  %v2541_v44 = vld [vmem:[#allocation3 + $0xe8] sm:$0xff] }
 0x576   :  { %2825 = vmatprep.subr.bf16.mxu0 %v2697_v48  ;;  %2911 = vmatprep.subr.bf16.mxu1 %v2699_v14  ;;  %v2543_v48 = vld [vmem:[#allocation3 + $0xf8] sm:$0xff]  ;;  %v2540_v14 = vld [vmem:[#allocation3 + $0xe0] sm:$0xff] }
 0x579   :  { %2826 = vmatpush1.bf16.msra.mxu0 %v2696_v43  ;;  %2912 = vmatpush1.bf16.msra.mxu1 %v2698_v57  ;;  %v2542_v43 = vld [vmem:[#allocation3 + $0xf0] sm:$0xff]  ;;  %v2549_v57 = vld [vmem:[#allocation3 + $0x128] sm:$0xff] }
 0x57a   :  { %2827 = vmatprep.subr.bf16.mxu0 %v2705_v0  ;;  %2913 = vmatprep.subr.bf16.mxu1 %v2707_v31  ;;  %v2551_v0 = vld [vmem:[#allocation3 + $0x138] sm:$0xff]  ;;  %v2550_v31 = vld [vmem:[#allocation3 + $0x130] sm:$0xff] }
 0x57d   :  { %2828 = vmatpush1.bf16.msra.mxu0 %v2704_v36  ;;  %2914 = vmatpush1.bf16.msra.mxu1 %v2706_v22  ;;  %v2557_v36 = vld [vmem:[#allocation3 + $0x168] sm:$0xff]  ;;  %v2559_v22 = vld [vmem:[#allocation3 + $0x178] sm:$0xff] }
 0x57e   :  { %2829 = vmatprep.subr.bf16.mxu0 %v2713_v50  ;;  %2915 = vmatprep.subr.bf16.mxu1 %v2715_v11  ;;  %v2556_v50 = vld [vmem:[#allocation3 + $0x160] sm:$0xff]  ;;  %v2558_v11 = vld [vmem:[#allocation3 + $0x170] sm:$0xff] }
 0x581   :  { %2830 = vmatpush1.bf16.msra.mxu0 %v2712_v26  ;;  %2916 = vmatpush1.bf16.msra.mxu1 %v2714_v41  ;;  %v2565_v26 = vld [vmem:[#allocation3 + $0x1a8] sm:$0xff]  ;;  %v2567_v41 = vld [vmem:[#allocation3 + $0x1b8] sm:$0xff] }
 0x582   :  { %2831 = vmatprep.subr.bf16.mxu0 %v2721_v23  ;;  %2917 = vmatprep.subr.bf16.mxu1 %v2723_v62  ;;  %v2564_v23 = vld [vmem:[#allocation3 + $0x1a0] sm:$0xff]  ;;  %v2566_v62 = vld [vmem:[#allocation3 + $0x1b0] sm:$0xff] }
 0x585   :  { %2832 = vmatpush1.bf16.msra.mxu0 %v2720_v2  ;;  %2918 = vmatpush1.bf16.msra.mxu1 %v2722_v59  ;;  %v2573_v2 = vld [vmem:[#allocation3 + $0x1e8] sm:$0xff]  ;;  %v2575_v59 = vld [vmem:[#allocation3 + $0x1f8] sm:$0xff] }
 0x586   :  { %2833 = vmatprep.subr.bf16.mxu0 %v2729_v34  ;;  %2919 = vmatprep.subr.bf16.mxu1 %v2731_v51  ;;  %v2572_v34 = vld [vmem:[#allocation3 + $0x1e0] sm:$0xff]  ;;  %v2574_v51 = vld [vmem:[#allocation3 + $0x1f0] sm:$0xff] }
 0x589   :  { %2834 = vmatpush1.bf16.msra.mxu0 %v2728_v58  ;;  %2920 = vmatpush1.bf16.msra.mxu1 %v2730_v15  ;;  %v2581_v58 = vld [vmem:[#allocation3 + $0x228] sm:$0xff]  ;;  %v2583_v15 = vld [vmem:[#allocation3 + $0x238] sm:$0xff] }
 0x58a   :  { %2835 = vmatprep.subr.bf16.mxu0 %v2737_v8  ;;  %2921 = vmatprep.subr.bf16.mxu1 %v2739_v28  ;;  %v2580_v8 = vld [vmem:[#allocation3 + $0x220] sm:$0xff]  ;;  %v2582_v28 = vld [vmem:[#allocation3 + $0x230] sm:$0xff] }
 0x58d   :  { %2836 = vmatpush1.bf16.msra.mxu0 %v2736_v61  ;;  %2922 = vmatpush1.bf16.msra.mxu1 %v2738_v53  ;;  %v2589_v61 = vld [vmem:[#allocation3 + $0x268] sm:$0xff]  ;;  %v2591_v53 = vld [vmem:[#allocation3 + $0x278] sm:$0xff] }
 0x58e   :  { %2837 = vmatprep.subr.bf16.mxu0 %v2745_v3  ;;  %2923 = vmatprep.subr.bf16.mxu1 %v2747_v17  ;;  %v2588_v3 = vld [vmem:[#allocation3 + $0x260] sm:$0xff]  ;;  %v2590_v17 = vld [vmem:[#allocation3 + $0x270] sm:$0xff] }
 0x591   :  { %2838 = vmatpush1.bf16.msra.mxu0 %v2744_v25  ;;  %2924 = vmatpush1.bf16.msra.mxu1 %v2746_v19  ;;  %v2597_v25 = vld [vmem:[#allocation3 + $0x2a8] sm:$0xff]  ;;  %v2599_v19 = vld [vmem:[#allocation3 + $0x2b8] sm:$0xff] }
 0x592   :  { %2839 = vmatprep.subr.bf16.mxu0 %v2753_v42  ;;  %2925 = vmatprep.subr.bf16.mxu1 %v2755_v12  ;;  %v2596_v42 = vld [vmem:[#allocation3 + $0x2a0] sm:$0xff]  ;;  %v2598_v12 = vld [vmem:[#allocation3 + $0x2b0] sm:$0xff] }
 0x595   :  { %2840 = vmatpush1.bf16.msra.mxu0 %v2752_v40  ;;  %2926 = vmatpush1.bf16.msra.mxu1 %v2754_v33  ;;  %v2605_v40 = vld [vmem:[#allocation3 + $0x2e8] sm:$0xff]  ;;  %v2607_v33 = vld [vmem:[#allocation3 + $0x2f8] sm:$0xff] }
 0x596   :  { %2841 = vmatprep.subr.bf16.mxu0 %v2761_v29  ;;  %2927 = vmatprep.subr.bf16.mxu1 %v2763_v18  ;;  %v2604_v29 = vld [vmem:[#allocation3 + $0x2e0] sm:$0xff]  ;;  %v2606_v18 = vld [vmem:[#allocation3 + $0x2f0] sm:$0xff] }
 0x599   :  { %2842 = vmatpush1.bf16.msra.mxu0 %v2760_v55  ;;  %2928 = vmatpush1.bf16.msra.mxu1 %v2762_v30  ;;  %v2613_v55 = vld [vmem:[#allocation3 + $0x328] sm:$0xff]  ;;  %v2615_v30 = vld [vmem:[#allocation3 + $0x338] sm:$0xff] }
 0x59a   :  { %2940 = vmatprep.subr.bf16.mxu0 %v2517_v5  ;;  %3026 = vmatprep.subr.bf16.mxu1 %v2519_v37  ;;  %v2612_v5 = vld [vmem:[#allocation3 + $0x320] sm:$0xff]  ;;  %v2614_v37 = vld [vmem:[#allocation3 + $0x330] sm:$0xff] }
 0x59c   :  { %2844 = vmatmul.mubr.bf16.vlgmr.msra.gmra.mrb[12].mxu0 %v10654_v47  ;;  %2930 = vmatmul.mubr.bf16.vlgmr.msra.gmra.mrb[12].mxu1 %v10654_v47 }
 0x59d   :  { %2941 = vmatpush1.bf16.msra.mxu0 %v2516_v16  ;;  %3027 = vmatpush1.bf16.msra.mxu1 %v2518_v45  ;;  %v2621_v16 = vld [vmem:[#allocation3 + $0x368] sm:$0xff]  ;;  %v2623_v45 = vld [vmem:[#allocation3 + $0x378] sm:$0xff] }
 0x59e   :  { %2942 = vmatprep.subr.bf16.mxu0 %v2525_v60  ;;  %3028 = vmatprep.subr.bf16.mxu1 %v2527_v10  ;;  %v2620_v60 = vld [vmem:[#allocation3 + $0x360] sm:$0xff]  ;;  %v2622_v10 = vld [vmem:[#allocation3 + $0x370] sm:$0xff] }
 0x59f   :  { %2972 = vmatprep.mubr.bf16.mxu0 %v10656_v1  ;;  %3058 = vmatprep.mubr.bf16.mxu1 %v10656_v1  ;;  %v2548_v1 = vld [vmem:[#allocation3 + $0x120] sm:$0xff] }
 0x5a1   :  { %2943 = vmatpush1.bf16.msra.mxu0 %v2524_v35  ;;  %3029 = vmatpush1.bf16.msra.mxu1 %v2526_v9  ;;  %v2629_v35 = vld [vmem:[#allocation3 + $0x3a8] sm:$0xff]  ;;  %v2631_v9 = vld [vmem:[#allocation3 + $0x3b8] sm:$0xff] }
 0x5a2   :  { %2944 = vmatprep.subr.bf16.mxu0 %v2533_v63  ;;  %3030 = vmatprep.subr.bf16.mxu1 %v2535_v49  ;;  %v2628_v63 = vld [vmem:[#allocation3 + $0x3a0] sm:$0xff]  ;;  %v2630_v49 = vld [vmem:[#allocation3 + $0x3b0] sm:$0xff] }
 0x5a5   :  { %2945 = vmatpush1.bf16.msra.mxu0 %v2532_v21  ;;  %3031 = vmatpush1.bf16.msra.mxu1 %v2534_v4  ;;  %v2637_v21 = vld [vmem:[#allocation3 + $0x3e8] sm:$0xff]  ;;  %v2639_v4 = vld [vmem:[#allocation3 + $0x3f8] sm:$0xff] }
 0x5a6   :  { %2946 = vmatprep.subr.bf16.mxu0 %v2541_v44  ;;  %3032 = vmatprep.subr.bf16.mxu1 %v2543_v48  ;;  %v2636_v44 = vld [vmem:[#allocation3 + $0x3e0] sm:$0xff]  ;;  %v2638_v48 = vld [vmem:[#allocation3 + $0x3f0] sm:$0xff] }
 0x5a9   :  { %2947 = vmatpush1.bf16.msra.mxu0 %v2540_v14  ;;  %3033 = vmatpush1.bf16.msra.mxu1 %v2542_v43  ;;  %v2645_v14 = vld [vmem:[#allocation3 + $0x428] sm:$0xff]  ;;  %v2647_v43 = vld [vmem:[#allocation3 + $0x438] sm:$0xff] }
 0x5aa   :  { %2948 = vmatprep.subr.bf16.mxu0 %v2549_v57  ;;  %3034 = vmatprep.subr.bf16.mxu1 %v2551_v0  ;;  %v2644_v57 = vld [vmem:[#allocation3 + $0x420] sm:$0xff]  ;;  %v2646_v0 = vld [vmem:[#allocation3 + $0x430] sm:$0xff] }
 0x5ad   :  { %2949 = vmatpush1.bf16.msra.mxu0 %v2548_v1  ;;  %3035 = vmatpush1.bf16.msra.mxu1 %v2550_v31  ;;  %v2653_v1 = vld [vmem:[#allocation3 + $0x468] sm:$0xff]  ;;  %v2655_v31 = vld [vmem:[#allocation3 + $0x478] sm:$0xff] }
 0x5ae   :  { %2950 = vmatprep.subr.bf16.mxu0 %v2557_v36  ;;  %3036 = vmatprep.subr.bf16.mxu1 %v2559_v22  ;;  %v2652_v36 = vld [vmem:[#allocation3 + $0x460] sm:$0xff]  ;;  %v2654_v22 = vld [vmem:[#allocation3 + $0x470] sm:$0xff] }
 0x5b1   :  { %2951 = vmatpush1.bf16.msra.mxu0 %v2556_v50  ;;  %3037 = vmatpush1.bf16.msra.mxu1 %v2558_v11  ;;  %v2661_v50 = vld [vmem:[#allocation3 + $0x4a8] sm:$0xff]  ;;  %v2663_v11 = vld [vmem:[#allocation3 + $0x4b8] sm:$0xff] }
 0x5b2   :  { %2952 = vmatprep.subr.bf16.mxu0 %v2565_v26  ;;  %3038 = vmatprep.subr.bf16.mxu1 %v2567_v41  ;;  %v2660_v26 = vld [vmem:[#allocation3 + $0x4a0] sm:$0xff]  ;;  %v2662_v41 = vld [vmem:[#allocation3 + $0x4b0] sm:$0xff] }
 0x5b5   :  { %2953 = vmatpush1.bf16.msra.mxu0 %v2564_v23  ;;  %3039 = vmatpush1.bf16.msra.mxu1 %v2566_v62  ;;  %v2669_v23 = vld [vmem:[#allocation3 + $0x4e8] sm:$0xff]  ;;  %v2668_v62 = vld [vmem:[#allocation3 + $0x4e0] sm:$0xff] }
 0x5b6   :  { %2954 = vmatprep.subr.bf16.mxu0 %v2573_v2  ;;  %3040 = vmatprep.subr.bf16.mxu1 %v2575_v59  ;;  %v2670_v2 = vld [vmem:[#allocation3 + $0x4f0] sm:$0xff]  ;;  %v2677_v59 = vld [vmem:[#allocation3 + $0x528] sm:$0xff] }
 0x5b9   :  { %2955 = vmatpush1.bf16.msra.mxu0 %v2572_v34  ;;  %3041 = vmatpush1.bf16.msra.mxu1 %v2574_v51  ;;  %v2679_v34 = vld [vmem:[#allocation3 + $0x538] sm:$0xff]  ;;  %v2678_v51 = vld [vmem:[#allocation3 + $0x530] sm:$0xff] }
 0x5ba   :  { %2956 = vmatprep.subr.bf16.mxu0 %v2581_v58  ;;  %3042 = vmatprep.subr.bf16.mxu1 %v2583_v15  ;;  %v2685_v58 = vld [vmem:[#allocation3 + $0x568] sm:$0xff]  ;;  %v2687_v15 = vld [vmem:[#allocation3 + $0x578] sm:$0xff] }
 0x5bd   :  { %2957 = vmatpush1.bf16.msra.mxu0 %v2580_v8  ;;  %3043 = vmatpush1.bf16.msra.mxu1 %v2582_v28  ;;  %v2684_v8 = vld [vmem:[#allocation3 + $0x560] sm:$0xff]  ;;  %v2686_v28 = vld [vmem:[#allocation3 + $0x570] sm:$0xff] }
 0x5be   :  { %2958 = vmatprep.subr.bf16.mxu0 %v2589_v61  ;;  %3044 = vmatprep.subr.bf16.mxu1 %v2591_v53  ;;  %v2693_v61 = vld [vmem:[#allocation3 + $0x5a8] sm:$0xff]  ;;  %v2695_v53 = vld [vmem:[#allocation3 + $0x5b8] sm:$0xff] }
 0x5c1   :  { %2959 = vmatpush1.bf16.msra.mxu0 %v2588_v3  ;;  %3045 = vmatpush1.bf16.msra.mxu1 %v2590_v17  ;;  %v2692_v3 = vld [vmem:[#allocation3 + $0x5a0] sm:$0xff]  ;;  %v2694_v17 = vld [vmem:[#allocation3 + $0x5b0] sm:$0xff] }
 0x5c2   :  { %2960 = vmatprep.subr.bf16.mxu0 %v2597_v25  ;;  %3046 = vmatprep.subr.bf16.mxu1 %v2599_v19  ;;  %v2701_v25 = vld [vmem:[#allocation3 + $0x5e8] sm:$0xff]  ;;  %v2703_v19 = vld [vmem:[#allocation3 + $0x5f8] sm:$0xff] }
 0x5c5   :  { %2961 = vmatpush1.bf16.msra.mxu0 %v2596_v42  ;;  %3047 = vmatpush1.bf16.msra.mxu1 %v2598_v12  ;;  %v2700_v42 = vld [vmem:[#allocation3 + $0x5e0] sm:$0xff]  ;;  %v2702_v12 = vld [vmem:[#allocation3 + $0x5f0] sm:$0xff] }
 0x5c6   :  { %2962 = vmatprep.subr.bf16.mxu0 %v2605_v40  ;;  %3048 = vmatprep.subr.bf16.mxu1 %v2607_v33  ;;  %v2709_v40 = vld [vmem:[#allocation3 + $0x628] sm:$0xff]  ;;  %v2711_v33 = vld [vmem:[#allocation3 + $0x638] sm:$0xff] }
 0x5c9   :  { %2963 = vmatpush1.bf16.msra.mxu0 %v2604_v29  ;;  %3049 = vmatpush1.bf16.msra.mxu1 %v2606_v18  ;;  %v2708_v29 = vld [vmem:[#allocation3 + $0x620] sm:$0xff]  ;;  %v2710_v18 = vld [vmem:[#allocation3 + $0x630] sm:$0xff] }
 0x5ca   :  { %2964 = vmatprep.subr.bf16.mxu0 %v2613_v55  ;;  %3050 = vmatprep.subr.bf16.mxu1 %v2615_v30  ;;  %v2717_v55 = vld [vmem:[#allocation3 + $0x668] sm:$0xff]  ;;  %v2719_v30 = vld [vmem:[#allocation3 + $0x678] sm:$0xff] }
 0x5cd   :  { %2965 = vmatpush1.bf16.msra.mxu0 %v2612_v5  ;;  %3051 = vmatpush1.bf16.msra.mxu1 %v2614_v37  ;;  %v2716_v5 = vld [vmem:[#allocation3 + $0x660] sm:$0xff]  ;;  %v2718_v37 = vld [vmem:[#allocation3 + $0x670] sm:$0xff] }
 0x5ce   :  { %2966 = vmatprep.subr.bf16.mxu0 %v2621_v16  ;;  %3052 = vmatprep.subr.bf16.mxu1 %v2623_v45  ;;  %v2725_v16 = vld [vmem:[#allocation3 + $0x6a8] sm:$0xff]  ;;  %v2727_v45 = vld [vmem:[#allocation3 + $0x6b8] sm:$0xff] }
 0x5d1   :  { %2967 = vmatpush1.bf16.msra.mxu0 %v2620_v60  ;;  %3053 = vmatpush1.bf16.msra.mxu1 %v2622_v10  ;;  %v2724_v60 = vld [vmem:[#allocation3 + $0x6a0] sm:$0xff]  ;;  %v2726_v10 = vld [vmem:[#allocation3 + $0x6b0] sm:$0xff] }
 0x5d2   :  { %2968 = vmatprep.subr.bf16.mxu0 %v2629_v35  ;;  %3054 = vmatprep.subr.bf16.mxu1 %v2631_v9  ;;  %v2733_v35 = vld [vmem:[#allocation3 + $0x6e8] sm:$0xff]  ;;  %v2735_v9 = vld [vmem:[#allocation3 + $0x6f8] sm:$0xff] }
 0x5d5   :  { %2969 = vmatpush1.bf16.msra.mxu0 %v2628_v63  ;;  %3055 = vmatpush1.bf16.msra.mxu1 %v2630_v49  ;;  %v2732_v63 = vld [vmem:[#allocation3 + $0x6e0] sm:$0xff]  ;;  %v2734_v49 = vld [vmem:[#allocation3 + $0x6f0] sm:$0xff] }
 0x5d6   :  { %2970 = vmatprep.subr.bf16.mxu0 %v2637_v21  ;;  %3056 = vmatprep.subr.bf16.mxu1 %v2639_v4  ;;  %v2741_v21 = vld [vmem:[#allocation3 + $0x728] sm:$0xff]  ;;  %v2743_v4 = vld [vmem:[#allocation3 + $0x738] sm:$0xff] }
 0x5d9   :  { %2971 = vmatpush1.bf16.msra.mxu0 %v2636_v44  ;;  %3057 = vmatpush1.bf16.msra.mxu1 %v2638_v48  ;;  %v2740_v44 = vld [vmem:[#allocation3 + $0x720] sm:$0xff]  ;;  %v2742_v48 = vld [vmem:[#allocation3 + $0x730] sm:$0xff] }
 0x5da   :  { %2983 = vmatprep.subr.bf16.mxu0 %v2645_v14  ;;  %3069 = vmatprep.subr.bf16.mxu1 %v2647_v43  ;;  %v2749_v14 = vld [vmem:[#allocation3 + $0x768] sm:$0xff]  ;;  %v2751_v43 = vld [vmem:[#allocation3 + $0x778] sm:$0xff] }
 0x5dc   :  { %2973 = vmatmul.mubr.bf16.vlgmr.msra.gmra.mrb[16].mxu0 %v10652_v54  ;;  %3059 = vmatmul.mubr.bf16.vlgmr.msra.gmra.mrb[16].mxu1 %v10652_v54  ;;  %v2671_v54 = vld [vmem:[#allocation3 + $0x4f8] sm:$0xff] }
 0x5dd   :  { %2984 = vmatpush1.bf16.msra.mxu0 %v2644_v57  ;;  %3070 = vmatpush1.bf16.msra.mxu1 %v2646_v0  ;;  %v2748_v57 = vld [vmem:[#allocation3 + $0x760] sm:$0xff]  ;;  %v2750_v0 = vld [vmem:[#allocation3 + $0x770] sm:$0xff] }
 0x5de   :  { %2985 = vmatprep.subr.bf16.mxu0 %v2653_v1  ;;  %3071 = vmatprep.subr.bf16.mxu1 %v2655_v31  ;;  %v2757_v1 = vld [vmem:[#allocation3 + $0x7a8] sm:$0xff]  ;;  %v2759_v31 = vld [vmem:[#allocation3 + $0x7b8] sm:$0xff] }
 0x5df   :  { %3015 = vmatprep.mubr.bf16.mxu0 %v10658_v27  ;;  %3101 = vmatprep.mubr.bf16.mxu1 %v10658_v27  ;;  %v2676_v27 = vld [vmem:[#allocation3 + $0x520] sm:$0xff] }
 0x5e1   :  { %2986 = vmatpush1.bf16.msra.mxu0 %v2652_v36  ;;  %3072 = vmatpush1.bf16.msra.mxu1 %v2654_v22  ;;  %v2756_v36 = vld [vmem:[#allocation3 + $0x7a0] sm:$0xff]  ;;  %v2758_v22 = vld [vmem:[#allocation3 + $0x7b0] sm:$0xff] }
 0x5e2   :  { %2987 = vmatprep.subr.bf16.mxu0 %v2661_v50  ;;  %3073 = vmatprep.subr.bf16.mxu1 %v2663_v11  ;;  %v2765_v50 = vld [vmem:[#allocation3 + $0x7e8] sm:$0xff]  ;;  %v2767_v11 = vld [vmem:[#allocation3 + $0x7f8] sm:$0xff] }
 0x5e5   :  { %2988 = vmatpush1.bf16.msra.mxu0 %v2660_v26  ;;  %3074 = vmatpush1.bf16.msra.mxu1 %v2662_v41  ;;  %v2764_v26 = vld [vmem:[#allocation3 + $0x7e0] sm:$0xff]  ;;  %v2766_v41 = vld [vmem:[#allocation3 + $0x7f0] sm:$0xff] }
 0x5e6   :  { %2989 = vmatprep.subr.bf16.mxu0 %v2669_v23  ;;  %3075 = vmatprep.subr.bf16.mxu1 %v2671_v54  ;;  %v13889_v23 = vmov 0   ;;  %v10679_v54 = vsub.s32 4, %v13879_v7 }
 0x5e8   :  { %13890 = vst [vmem:[#allocation53_spill] sm:$0xff] %v10679_v54 }
 0x5e9   :  { %2990 = vmatpush1.bf16.msra.mxu0 %v2668_v62  ;;  %3076 = vmatpush1.bf16.msra.mxu1 %v2670_v2 }
 0x5ea   :  { %2991 = vmatprep.subr.bf16.mxu0 %v2677_v59  ;;  %3077 = vmatprep.subr.bf16.mxu1 %v2679_v34  ;;  %v3119_v59 = vrot.slane %v13887_v24, %v10679_v54  ;;  %v3127_v34 = vrot.slane %v13888_v32, %v10679_v54 }
 0x5ed   :  { %2992 = vmatpush1.bf16.msra.mxu0 %v2676_v27  ;;  %3078 = vmatpush1.bf16.msra.mxu1 %v2678_v51  ;;  %v3115_v27 = vrot.slane %v13885_v39, %v10679_v54 }
 0x5ee   :  { %2993 = vmatprep.subr.bf16.mxu0 %v2685_v58  ;;  %3079 = vmatprep.subr.bf16.mxu1 %v2687_v15 }
 0x5f1   :  { %2994 = vmatpush1.bf16.msra.mxu0 %v2684_v8  ;;  %3080 = vmatpush1.bf16.msra.mxu1 %v2686_v28 }
 0x5f2   :  { %2995 = vmatprep.subr.bf16.mxu0 %v2693_v61  ;;  %3081 = vmatprep.subr.bf16.mxu1 %v2695_v53 }
 0x5f5   :  { %2996 = vmatpush1.bf16.msra.mxu0 %v2692_v3  ;;  %3082 = vmatpush1.bf16.msra.mxu1 %v2694_v17 }
 0x5f6   :  { %2997 = vmatprep.subr.bf16.mxu0 %v2701_v25  ;;  %3083 = vmatprep.subr.bf16.mxu1 %v2703_v19 }
 0x5f9   :  { %2998 = vmatpush1.bf16.msra.mxu0 %v2700_v42  ;;  %3084 = vmatpush1.bf16.msra.mxu1 %v2702_v12 }
 0x5fa   :  { %2999 = vmatprep.subr.bf16.mxu0 %v2709_v40  ;;  %3085 = vmatprep.subr.bf16.mxu1 %v2711_v33 }
 0x5fd   :  { %3000 = vmatpush1.bf16.msra.mxu0 %v2708_v29  ;;  %3086 = vmatpush1.bf16.msra.mxu1 %v2710_v18 }
 0x5fe   :  { %3001 = vmatprep.subr.bf16.mxu0 %v2717_v55  ;;  %3087 = vmatprep.subr.bf16.mxu1 %v2719_v30  ;;  %v10714_v30 = vsub.s32 5, %v13879_v7 }
 0x600   :  { %13891 = vst [vmem:[#allocation68_spill] sm:$0xff] %v10714_v30 }
 0x601   :  { %3002 = vmatpush1.bf16.msra.mxu0 %v2716_v5  ;;  %3088 = vmatpush1.bf16.msra.mxu1 %v2718_v37  ;;  %v10718_v5 = vrot.slane %v13885_v39, %v10714_v30  ;;  %v10722_v37 = vrot.slane %v13886_v13, %v10714_v30 }
 0x602   :  { %3003 = vmatprep.subr.bf16.mxu0 %v2725_v16  ;;  %3089 = vmatprep.subr.bf16.mxu1 %v2727_v45  ;;  %v10726_v16 = vrot.slane %v13887_v24, %v10714_v30  ;;  %v10730_v45 = vrot.slane %v13888_v32, %v10714_v30 }
 0x605   :  { %3004 = vmatpush1.bf16.msra.mxu0 %v2724_v60  ;;  %3090 = vmatpush1.bf16.msra.mxu1 %v2726_v10  ;;  %v10733_v60 = vsub.s32 6, %v13879_v7 }
 0x606   :  { %3005 = vmatprep.subr.bf16.mxu0 %v2733_v35  ;;  %3091 = vmatprep.subr.bf16.mxu1 %v2735_v9 }
 0x607   :  { %13892 = vst [vmem:[#allocation63_spill] sm:$0xff] %v10733_v60 }
 0x609   :  { %3006 = vmatpush1.bf16.msra.mxu0 %v2732_v63  ;;  %3092 = vmatpush1.bf16.msra.mxu1 %v2734_v49 }
 0x60a   :  { %3007 = vmatprep.subr.bf16.mxu0 %v2741_v21  ;;  %3093 = vmatprep.subr.bf16.mxu1 %v2743_v4 }
 0x60d   :  { %3008 = vmatpush1.bf16.msra.mxu0 %v2740_v44  ;;  %3094 = vmatpush1.bf16.msra.mxu1 %v2742_v48 }
 0x60e   :  { %3009 = vmatprep.subr.bf16.mxu0 %v2749_v14  ;;  %3095 = vmatprep.subr.bf16.mxu1 %v2751_v43  ;;  %v10747_v43 = vrot.slane %v13885_v39, %v10733_v60 }
 0x611   :  { %3010 = vmatpush1.bf16.msra.mxu0 %v2748_v57  ;;  %3096 = vmatpush1.bf16.msra.mxu1 %v2750_v0  ;;  %v10751_v57 = vrot.slane %v13887_v24, %v10733_v60 }
 0x612   :  { %3011 = vmatprep.subr.bf16.mxu0 %v2757_v1  ;;  %3097 = vmatprep.subr.bf16.mxu1 %v2759_v31  ;;  %v13893_v1 = vld [vmem:[#allocation49_spill] sm:$0xff] }
 0x615   :  { %3012 = vmatpush1.bf16.msra.mxu0 %v2756_v36  ;;  %3098 = vmatpush1.bf16.msra.mxu1 %v2758_v22 }
 0x616   :  { %3013 = vmatprep.subr.bf16.mxu0 %v2765_v50  ;;  %3099 = vmatprep.subr.bf16.mxu1 %v2767_v11 }
 0x619   :  { %3014 = vmatpush1.bf16.msra.mxu0 %v2764_v26  ;;  %3100 = vmatpush1.bf16.msra.mxu1 %v2766_v41 }
 0x61c   :  { %3016 = vmatmul.mubr.bf16.vlgmr.msra.gmra.mrb[16].mxu0 %v10654_v47  ;;  %3102 = vmatmul.mubr.bf16.vlgmr.msra.gmra.mrb[16].mxu1 %v10654_v47  ;;  %v3123_v47 = vrot.slane %v13886_v13, %v10679_v54 }
 0x61d   :  { %5128 = vmatprep.mubr.bf16.mxu0 %v13889_v23  ;;  %5171 = vmatprep.mubr.bf16.mxu1 %v13889_v23 }
 0x66f   :  { %v2845_v62 = vpop.f32.mrb[12].mxu0  ;;  %v2931_v2 = vpop.f32.mrb[12].mxu1 }
 0x670   :  { %v2847_v51 = vpop.f32.mrb[13].mxu0  ;;  %v2933_v58 = vpop.f32.mrb[13].mxu1  ;;  %v10701_v12 = vadd.f32 %v3115_v27, %v2845_v62  ;;  %v10703_v40 = vadd.f32 %v3123_v47, %v2931_v2  ;;  %v10764_v62 = vrot.slane %v13886_v13, %v10733_v60  ;;  %v10768_v2 = vrot.slane %v13888_v32, %v10733_v60 }
 0x671   :  { %v2849_v15 = vpop.f32.mrb[14].mxu0  ;;  %v2935_v8 = vpop.f32.mrb[14].mxu1  ;;  %v10693_v17 = vadd.f32 %v3119_v59, %v2847_v51  ;;  %v10695_v25 = vadd.f32 %v3127_v34, %v2933_v58 }
 0x672   :  { %v10689_v28 = vadd.f32 %v3115_v27, %v2849_v15  ;;  %v10691_v61 = vadd.f32 %v3123_v47, %v2935_v8  ;;  %v2851_v53 = vpop.f32.mrb[15].mxu0  ;;  %v2937_v3 = vpop.f32.mrb[15].mxu1 }
 0x673   :  { %v10697_v19 = vadd.f32 %v3119_v59, %v2851_v53  ;;  %v10699_v42 = vadd.f32 %v3127_v34, %v2937_v3 }
 0x674   :  { %v5073_v18 = vpack.c.bf16 %v10689_v28, %v10701_v12  ;;  %v5075_v55 = vpack.c.bf16 %v10691_v61, %v10703_v40 }
 0x675   :  { %v5074_v33 = vpack.c.bf16 %v10697_v19, %v10693_v17  ;;  %v5076_v29 = vpack.c.bf16 %v10699_v42, %v10695_v25 }
 0x677   :  { %5096 = vmatprep.subr.bf16.mxu0 %v5074_v33  ;;  %5139 = vmatprep.subr.bf16.mxu1 %v5076_v29 }
 0x678   :  { %5097 = vmatpush1.bf16.msra.mxu0 %v5073_v18  ;;  %5140 = vmatpush1.bf16.msra.mxu1 %v5075_v55 }
 0x6ef   :  { %v3017_v10 = vpop.f32.mrb[16].mxu0  ;;  %v3103_v35 = vpop.f32.mrb[16].mxu1 }
 0x6f0   :  { %v3152_v9 = vadd.f32 %v10718_v5, %v3017_v10  ;;  %v3154_v63 = vadd.f32 %v10722_v37, %v3103_v35  ;;  %v3019_v49 = vpop.f32.mrb[17].mxu0  ;;  %v3105_v21 = vpop.f32.mrb[17].mxu1 }
 0x6f1   :  { %v3153_v4 = vadd.f32 %v10726_v16, %v3019_v49  ;;  %v10739_v44 = vadd.f32 %v10730_v45, %v3105_v21  ;;  %v10741_v48 = vpop.f32.mrb[18].mxu0  ;;  %v10743_v14 = vpop.f32.mrb[18].mxu1 }
 0x6f2   :  { %v3161_v0 = vcombine.high %v3152_v9, %v3152_v9  ;;  %v3168_v31 = vrot.slane %v3152_v9, %v13893_v1  ;;  %v3573_v36 = vcombine.high %v3154_v63, %v3154_v63  ;;  %v3580_v22 = vrot.slane %v3154_v63, %v13893_v1  ;;  %v10755_v50 = vpop.f32.mrb[19].mxu0  ;;  %v10757_v11 = vpop.f32.mrb[19].mxu1 }
 0x6f3   :  { %v3367_v26 = vcombine.high %v3153_v4, %v3153_v4  ;;  %v10760_v41 = vrot.slane %v3153_v4, %v13893_v1  ;;  %v10780_v8 = vrot.slane %v10739_v44, %v13893_v1 }
 0x6f4   :  { %v3175_v59 = vrot.slane %v3161_v0, %v13893_v1  ;;  %v3176_v34 = vcombine.high %v3168_v31, %v3168_v31  ;;  %v3184_v27 = vrot.slane %v3168_v31, %v13893_v1  ;;  %v3587_v47 = vrot.slane %v3573_v36, %v13893_v1 }
 0x6f5   :  { %v3588_v51 = vcombine.high %v3580_v22, %v3580_v22  ;;  %v10774_v58 = vrot.slane %v3580_v22, %v13893_v1  ;;  %v10786_v10 = vrot.slane %v3367_v26, %v13893_v1 }
 0x6f6   :  { %v3177_v53 = vcombine.high %v3175_v59, %v3175_v59  ;;  %v3191_v3 = vrot.slane %v3175_v59, %v13893_v1  ;;  %v3198_v33 = vrot.slane %v3176_v34, %v13893_v1  ;;  %v3206_v29 = vcombine.high %v3184_v27, %v3184_v27 }
 0x6f7   :  { %v3213_v18 = vrot.slane %v3184_v27, %v13868_v38  ;;  %v3589_v55 = vcombine.high %v3587_v47, %v3587_v47  ;;  %v3603_v31 = vrot.slane %v3587_v47, %v13893_v1  ;;  %v3610_v36 = vrot.slane %v3588_v51, %v13893_v1 }
 0x6f8   :  { %v3205_v9 = vrot.slane %v3177_v53, %v13893_v1  ;;  %v3207_v63 = vcombine.high %v3191_v3, %v3191_v3  ;;  %v3208_v49 = vcombine.high %v3198_v33, %v3198_v33  ;;  %v3217_v21 = vrot.slane %v3198_v33, %v13868_v38 }
 0x6f9   :  { %v3221_v4 = vrot.slane %v3206_v29, %v13868_v38  ;;  %v3229_v0 = vrot.slane %v3191_v3, %v13868_v38  ;;  %v10800_v27 = vadd.f32 %v3213_v18, %v10701_v12  ;;  %v10803_v53 = vadd.f32 %v3213_v18, %v10689_v28 }
 0x6fa   :  { %v3209_v22 = vcombine.high %v3205_v9, %v3205_v9  ;;  %v3225_v26 = vrot.slane %v3208_v49, %v13868_v38  ;;  %v3233_v59 = vrot.slane %v3205_v9, %v13868_v38  ;;  %v3237_v34 = vrot.slane %v3207_v63, %v13868_v38 }
 0x6fb   :  { %v10806_v33 = vadd.f32 %v3217_v21, %v10689_v28  ;;  %v10809_v47 = vadd.f32 %v3221_v4, %v10701_v12  ;;  %v10813_v3 = vadd.f32 %v3217_v21, %v10701_v12  ;;  %v10816_v29 = vadd.f32 %v3221_v4, %v10689_v28 }
 0x6fc   :  { %v3241_v51 = vrot.slane %v3209_v22, %v13868_v38  ;;  %v10819_v9 = vadd.f32 %v3229_v0, %v10701_v12  ;;  %v10822_v18 = vadd.f32 %v3225_v26, %v10701_v12  ;;  %v10825_v63 = vadd.f32 %v3225_v26, %v10689_v28 }
 0x6fd   :  { %13894 = vst [vmem:[#allocation78_spill] sm:$0xff] %v10816_v29  ;;  %v10828_v49 = vadd.f32 %v3229_v0, %v10689_v28  ;;  %v10831_v22 = vadd.f32 %v3233_v59, %v10701_v12  ;;  %v10834_v21 = vadd.f32 %v3233_v59, %v10689_v28  ;;  %v10837_v4 = vadd.f32 %v3237_v34, %v10701_v12 }
 0x6fe   :  { %13895 = vst [vmem:[#allocation102_spill] sm:$0xff] %v10819_v9  ;;  %13896 = vst [vmem:[#allocation95_spill] sm:$0xff] %v10822_v18  ;;  %v10840_v15 = vadd.f32 %v3237_v34, %v10689_v28  ;;  %v10843_v35 = vadd.f32 %v3241_v51, %v10701_v12  ;;  %v10846_v26 = vadd.f32 %v3241_v51, %v10689_v28  ;;  %v3283_v34 = vmin.f32 %v10803_v53, 0.0 }
 0x6ff   :  { %13897 = vst [vmem:[#allocation115_spill] sm:$0xff] %v10825_v63  ;;  %13898 = vst [vmem:[#allocation79_spill] sm:$0xff] %v10828_v49  ;;  %v3617_v23 = vrot.slane %v3589_v55, %v13893_v1  ;;  %v3618_v32 = vcombine.high %v10774_v58, %v10774_v58  ;;  %v3619_v51 = vcombine.high %v3603_v31, %v3603_v31 }
 0x700   :  { %13899 = vst [vmem:[#allocation103_spill] sm:$0xff] %v10831_v22  ;;  %13900 = vst [vmem:[#allocation96_spill] sm:$0xff] %v10834_v21  ;;  %v3620_v13 = vcombine.high %v3610_v36, %v3610_v36  ;;  %v3625_v60 = vrot.slane %v10774_v58, %v13868_v38  ;;  %v3629_v0 = vrot.slane %v3610_v36, %v13868_v38  ;;  %v10875_v55 = vmul.f32 0.2, %v3283_v34 }
 0x701   :  { %13901 = vst [vmem:[#allocation80_spill] sm:$0xff] %v10837_v4  ;;  %13902 = vst [vmem:[#allocation104_spill] sm:$0xff] %v10840_v15  ;;  %v3621_v30 = vcombine.high %v3617_v23, %v3617_v23  ;;  %v3633_v59 = vrot.slane %v3618_v32, %v13868_v38  ;;  %v3641_v54 = vrot.slane %v3603_v31, %v13868_v38 }
 0x702   :  { %13903 = vst [vmem:[#allocation97_spill] sm:$0xff] %v10843_v35  ;;  %13904 = vst [vmem:[#allocation116_spill] sm:$0xff] %v10846_v26  ;;  %v3645_v20 = vrot.slane %v3617_v23, %v13868_v38  ;;  %v3637_v39 = vrot.slane %v3620_v13, %v13868_v38  ;;  %v3649_v7 = vrot.slane %v3619_v51, %v13868_v38 }
 0x703   :  { %v3653_v56 = vrot.slane %v3621_v30, %v13868_v38  ;;  %v10881_v58 = vadd.f32 %v3625_v60, %v10703_v40  ;;  %v10884_v36 = vadd.f32 %v3625_v60, %v10691_v61  ;;  %v10887_v32 = vadd.f32 %v3629_v0, %v10703_v40 }
 0x704   :  { %v10890_v23 = vadd.f32 %v3629_v0, %v10691_v61  ;;  %v10893_v31 = vadd.f32 %v3633_v59, %v10703_v40  ;;  %v10896_v13 = vadd.f32 %v3633_v59, %v10691_v61  ;;  %v10899_v30 = vadd.f32 %v3637_v39, %v10703_v40 }
 0x705   :  { %v10902_v34 = vadd.f32 %v3637_v39, %v10691_v61  ;;  %v10905_v60 = vadd.f32 %v3641_v54, %v10703_v40  ;;  %v10908_v51 = vadd.f32 %v3641_v54, %v10691_v61  ;;  %v10911_v0 = vadd.f32 %v3645_v20, %v10703_v40 }
 0x706   :  { %13905 = vst [vmem:[#allocation82_spill] sm:$0xff] %v10893_v31  ;;  %13906 = vst [vmem:[#allocation105_spill] sm:$0xff] %v10896_v13  ;;  %v10914_v24 = vadd.f32 %v3645_v20, %v10691_v61  ;;  %v10917_v59 = vadd.f32 %v3649_v7, %v10703_v40  ;;  %v10920_v6 = vadd.f32 %v3649_v7, %v10691_v61 }
 0x707   :  { %13907 = vst [vmem:[#allocation98_spill] sm:$0xff] %v10899_v30  ;;  %13908 = vst [vmem:[#allocation51_spill] sm:$0xff] %v10902_v34  ;;  %v3383_v39 = vcombine.high %v10786_v10, %v10786_v10  ;;  %v10925_v52 = vadd.f32 %v3653_v56, %v10703_v40  ;;  %v3390_v54 = vrot.slane %v10760_v41, %v13893_v1 }
 0x708   :  { %13909 = vst [vmem:[#allocation65_spill] sm:$0xff] %v10905_v60  ;;  %13910 = vst [vmem:[#allocation41_spill] sm:$0xff] %v10908_v51  ;;  %v3397_v46 = vrot.slane %v10786_v10, %v13893_v1  ;;  %v13916_v20 = vcombine.high %v10760_v41, %v10760_v41  ;;  %v10936_v7 = vadd.f32 %v3653_v56, %v10691_v61 }
 0x709   :  { %13911 = vst [vmem:[#allocation58_spill] sm:$0xff] %v10911_v0  ;;  %13912 = vst [vmem:[#allocation76_spill] sm:$0xff] %v10914_v24  ;;  %v3411_v35 = vrot.slane %v3383_v39, %v13893_v1  ;;  %v3794_v15 = vcombine.high %v10780_v8, %v10780_v8  ;;  %v3419_v24 = vrot.slane %v3390_v54, %v13868_v38 }
 0x70a   :  { %13913 = vst [vmem:[#allocation52_spill] sm:$0xff] %v10917_v59  ;;  %13914 = vst [vmem:[#allocation66_spill] sm:$0xff] %v10920_v6  ;;  %v3404_v26 = vrot.slane %v13916_v20, %v13893_v1  ;;  %v3412_v59 = vcombine.high %v3390_v54, %v3390_v54  ;;  %v3413_v10 = vcombine.high %v3397_v46, %v3397_v46 }
 0x70b   :  { %13915 = vst [vmem:[#allocation44_spill] sm:$0xff] %v10925_v52  ;;  %13917 = vst [vmem:[#allocation83_spill] sm:$0xff] %v10936_v7  ;;  %v13918_v52 = vcombine.high %v10739_v44, %v10739_v44  ;;  %v3415_v41 = vcombine.high %v3411_v35, %v3411_v35  ;;  %v3435_v56 = vrot.slane %v3397_v46, %v13868_v38 }
 0x70c   :  { %v3414_v4 = vcombine.high %v3404_v26, %v3404_v26  ;;  %v3423_v20 = vrot.slane %v3404_v26, %v13868_v38  ;;  %v3802_v39 = vrot.slane %v10780_v8, %v13893_v1  ;;  %v3427_v7 = vrot.slane %v3412_v59, %v13868_v38 }
 0x70d   :  { %v3793_v6 = vrot.slane %v13918_v52, %v13893_v1  ;;  %v3439_v44 = vrot.slane %v3411_v35, %v13868_v38  ;;  %v3443_v21 = vrot.slane %v3413_v10, %v13868_v38  ;;  %v3447_v0 = vrot.slane %v3415_v41, %v13868_v38 }
 0x70e   :  { %v3431_v52 = vrot.slane %v3414_v4, %v13868_v38  ;;  %v10956_v54 = vadd.f32 %v3419_v24, %v10697_v19  ;;  %v10959_v26 = vadd.f32 %v3423_v20, %v10697_v19  ;;  %v3156_v46 = vadd.f32 %v10718_v5, %v10741_v48 }
 0x70f   :  { %v10964_v8 = vadd.f32 %v3419_v24, %v10693_v17  ;;  %v10967_v4 = vadd.f32 %v3423_v20, %v10693_v17  ;;  %v10970_v35 = vadd.f32 %v3427_v7, %v10693_v17  ;;  %v10973_v59 = vadd.f32 %v3427_v7, %v10697_v19 }
 0x710   :  { %v10976_v10 = vadd.f32 %v3431_v52, %v10693_v17  ;;  %v10979_v41 = vadd.f32 %v3431_v52, %v10697_v19  ;;  %v10982_v5 = vadd.f32 %v3435_v56, %v10693_v17  ;;  %v10985_v24 = vadd.f32 %v3435_v56, %v10697_v19 }
 0x711   :  { %13919 = vst [vmem:[#allocation106_spill] sm:$0xff] %v10970_v35  ;;  %13920 = vst [vmem:[#allocation99_spill] sm:$0xff] %v10973_v59  ;;  %v10988_v48 = vadd.f32 %v3439_v44, %v10693_v17  ;;  %v10991_v20 = vadd.f32 %v3439_v44, %v10697_v19  ;;  %v10994_v7 = vadd.f32 %v3443_v21, %v10693_v17 }
 0x712   :  { %13921 = vst [vmem:[#allocation117_spill] sm:$0xff] %v10976_v10  ;;  %13922 = vst [vmem:[#allocation84_spill] sm:$0xff] %v10979_v41  ;;  %v10997_v22 = vadd.f32 %v3443_v21, %v10697_v19  ;;  %v11000_v52 = vadd.f32 %v3447_v0, %v10693_v17  ;;  %v11003_v34 = vadd.f32 %v3447_v0, %v10697_v19  ;;  %v3489_v21 = vmin.f32 %v10956_v54, 0.0 }
 0x713   :  { %13923 = vst [vmem:[#allocation107_spill] sm:$0xff] %v10982_v5  ;;  %13924 = vst [vmem:[#allocation100_spill] sm:$0xff] %v10985_v24  ;;  %v3795_v60 = vcombine.high %v3793_v6, %v3793_v6  ;;  %v3809_v49 = vrot.slane %v3793_v6, %v13893_v1  ;;  %v3824_v0 = vcombine.high %v3802_v39, %v3802_v39 }
 0x714   :  { %13925 = vst [vmem:[#allocation54_spill] sm:$0xff] %v10988_v48  ;;  %13926 = vst [vmem:[#allocation69_spill] sm:$0xff] %v10991_v20  ;;  %v11025_v56 = vrot.slane %v3802_v39, %v13868_v38  ;;  %v4017_v30 = vcombine.high %v3156_v46, %v3156_v46  ;;  %v4024_v44 = vrot.slane %v3156_v46, %v13893_v1 }
 0x715   :  { %13927 = vst [vmem:[#allocation59_spill] sm:$0xff] %v10994_v7  ;;  %13928 = vst [vmem:[#allocation75_spill] sm:$0xff] %v10997_v22  ;;  %v3823_v63 = vrot.slane %v3795_v60, %v13893_v1  ;;  %v3158_v18 = vadd.f32 %v10722_v37, %v10743_v14  ;;  %v3825_v51 = vcombine.high %v3809_v49, %v3809_v49  ;;  %v11036_v7 = vmul.f32 0.2, %v3489_v21 }
 0x716   :  { %13929 = vst [vmem:[#allocation55_spill] sm:$0xff] %v11000_v52  ;;  %13930 = vst [vmem:[#allocation70_spill] sm:$0xff] %v11003_v34  ;;  %v3816_v52 = vrot.slane %v3794_v15, %v13893_v1  ;;  %v3839_v6 = vrot.slane %v3824_v0, %v13868_v38  ;;  %v3847_v60 = vrot.slane %v3809_v49, %v13868_v38 }
 0x717   :  { %v3827_v39 = vcombine.high %v3823_v63, %v3823_v63  ;;  %v11043_v46 = vrot.slane %v3823_v63, %v13868_v38  ;;  %v11046_v37 = vrot.slane %v3825_v51, %v13868_v38  ;;  %v11050_v14 = vadd.f32 %v11025_v56, %v10699_v42 }
 0x718   :  { %v3826_v20 = vcombine.high %v3816_v52, %v3816_v52  ;;  %v11032_v34 = vrot.slane %v3816_v52, %v13868_v38  ;;  %v11060_v49 = vadd.f32 %v3839_v6, %v10695_v25  ;;  %v11063_v63 = vadd.f32 %v3839_v6, %v10699_v42 }
 0x719   :  { %13932 = vst [vmem:[#allocation71_spill] sm:$0xff] %v11043_v46  ;;  %13933 = vst [vmem:[#allocation60_spill] sm:$0xff] %v11046_v37  ;;  %v11053_v52 = vrot.slane %v3827_v39, %v13868_v38  ;;  %v4031_v51 = vrot.slane %v4017_v30, %v13893_v1  ;;  %v4040_v0 = vrot.slane %v4024_v44, %v13893_v1 }
 0x71a   :  { %v11040_v48 = vrot.slane %v3826_v20, %v13868_v38  ;;  %v11057_v21 = vadd.f32 %v11032_v34, %v10699_v42  ;;  %13935 = vst [vmem:[#allocation57_spill] sm:$0xff] %v11060_v49  ;;  %13936 = vst [vmem:[#allocation72_spill] sm:$0xff] %v11063_v63  ;;  %v4032_v20 = vcombine.high %v4024_v44, %v4024_v44 }
 0x71b   :  { %13934 = vst [vmem:[#allocation77_spill] sm:$0xff] %v11053_v52  ;;  %v4421_v15 = vcombine.high %v3158_v18, %v3158_v18  ;;  %v11068_v22 = vadd.f32 %v3847_v60, %v10695_v25  ;;  %v11071_v39 = vadd.f32 %v3847_v60, %v10699_v42  ;;  %v11074_v52 = vrot.slane %v3158_v18, %v13893_v1 }
 0x71c   :  { %13931 = vst [vmem:[#allocation56_spill] sm:$0xff] %v11040_v48  ;;  %v11078_v37 = vadd.f32 %v10726_v16, %v10755_v50  ;;  %v4033_v6 = vcombine.high %v4031_v51, %v4031_v51  ;;  %v4047_v30 = vrot.slane %v4031_v51, %v13893_v1  ;;  %v4054_v46 = vrot.slane %v4032_v20, %v13893_v1 }
 0x71d   :  { %13937 = vst [vmem:[#allocation85_spill] sm:$0xff] %v11068_v22  ;;  %13938 = vst [vmem:[#allocation108_spill] sm:$0xff] %v11071_v39  ;;  %v4062_v44 = vcombine.high %v4040_v0, %v4040_v0  ;;  %v4069_v41 = vrot.slane %v4040_v0, %v13868_v38  ;;  %v4435_v48 = vrot.slane %v4421_v15, %v13893_v1 }
 0x71e   :  { %v11086_v60 = vadd.f32 %v10730_v45, %v10757_v11  ;;  %v4061_v10 = vrot.slane %v4033_v6, %v13893_v1  ;;  %v4063_v16 = vcombine.high %v4047_v30, %v4047_v30  ;;  %v4064_v50 = vcombine.high %v4054_v46, %v4054_v46 }
 0x71f   :  { %v4073_v39 = vrot.slane %v4054_v46, %v13868_v38  ;;  %v4077_v51 = vrot.slane %v4062_v44, %v13868_v38  ;;  %v4085_v20 = vrot.slane %v4047_v30, %v13868_v38  ;;  %v4436_v0 = vcombine.high %v11074_v52, %v11074_v52 }
 0x720   :  { %v4444_v15 = vrot.slane %v11074_v52, %v13893_v1  ;;  %v4065_v45 = vcombine.high %v4061_v10, %v4061_v10  ;;  %v4081_v11 = vrot.slane %v4064_v50, %v13868_v38  ;;  %v4089_v18 = vrot.slane %v4061_v10, %v13868_v38 }
 0x721   :  { %v4093_v6 = vrot.slane %v4063_v16, %v13868_v38  ;;  %v11101_v24 = vadd.f32 %v4069_v41, %v10701_v12  ;;  %v11104_v46 = vadd.f32 %v4069_v41, %v10689_v28  ;;  %v11107_v30 = vadd.f32 %v4073_v39, %v10701_v12 }
 0x722   :  { %v11110_v44 = vadd.f32 %v4073_v39, %v10689_v28  ;;  %v4097_v52 = vrot.slane %v4065_v45, %v13868_v38  ;;  %v11114_v50 = vadd.f32 %v4077_v51, %v10701_v12  ;;  %v11117_v10 = vadd.f32 %v4077_v51, %v10689_v28 }
 0x723   :  { %13939 = vst [vmem:[#allocation93_spill] sm:$0xff] %v11107_v30  ;;  %v11120_v16 = vadd.f32 %v4085_v20, %v10701_v12  ;;  %v11123_v41 = vadd.f32 %v4081_v11, %v10701_v12  ;;  %v11126_v22 = vadd.f32 %v4081_v11, %v10689_v28  ;;  %v11129_v39 = vadd.f32 %v4085_v20, %v10689_v28 }
 0x724   :  { %13940 = vst [vmem:[#allocation119_spill] sm:$0xff] %v11110_v44  ;;  %13941 = vst [vmem:[#allocation86_spill] sm:$0xff] %v11114_v50  ;;  %v11132_v45 = vadd.f32 %v4089_v18, %v10701_v12  ;;  %v11135_v5 = vadd.f32 %v4089_v18, %v10689_v28  ;;  %v11138_v51 = vadd.f32 %v4093_v6, %v10701_v12 }
 0x725   :  { %13942 = vst [vmem:[#allocation109_spill] sm:$0xff] %v11117_v10  ;;  %13943 = vst [vmem:[#allocation87_spill] sm:$0xff] %v11120_v16  ;;  %v11141_v9 = vadd.f32 %v4093_v6, %v10689_v28  ;;  %v11144_v63 = vadd.f32 %v4097_v52, %v10701_v12  ;;  %v11147_v11 = vadd.f32 %v4097_v52, %v10689_v28  ;;  %v4139_v28 = vmin.f32 %v11104_v46, 0.0 }
 0x726   :  { %13944 = vst [vmem:[#allocation110_spill] sm:$0xff] %v11123_v41  ;;  %13945 = vst [vmem:[#allocation91_spill] sm:$0xff] %v11126_v22  ;;  %v4437_v44 = vcombine.high %v4435_v48, %v4435_v48  ;;  %v4451_v59 = vrot.slane %v4435_v48, %v13893_v1  ;;  %v4458_v18 = vrot.slane %v4436_v0, %v13893_v1 }
 0x727   :  { %13946 = vst [vmem:[#allocation118_spill] sm:$0xff] %v11129_v39  ;;  %13947 = vst [vmem:[#allocation88_spill] sm:$0xff] %v11132_v45  ;;  %v4466_v29 = vcombine.high %v4444_v15, %v4444_v15  ;;  %v4473_v49 = vrot.slane %v4444_v15, %v13868_v38  ;;  %v11176_v6 = vmul.f32 0.2, %v4139_v28 }
 0x728   :  { %13948 = vst [vmem:[#allocation111_spill] sm:$0xff] %v11135_v5  ;;  %13949 = vst [vmem:[#allocation89_spill] sm:$0xff] %v11138_v51  ;;  %v4465_v20 = vrot.slane %v4437_v44, %v13893_v1  ;;  %v4467_v52 = vcombine.high %v4451_v59, %v4451_v59  ;;  %v4468_v12 = vcombine.high %v4458_v18, %v4458_v18 }
 0x729   :  { %13950 = vst [vmem:[#allocation112_spill] sm:$0xff] %v11141_v9  ;;  %13951 = vst [vmem:[#allocation92_spill] sm:$0xff] %v11144_v63  ;;  %v4138_v63 = vmin.f32 %v11101_v24, 0.0  ;;  %v4477_v13 = vrot.slane %v4458_v18, %v13868_v38  ;;  %v4481_v48 = vrot.slane %v4466_v29, %v13868_v38  ;;  %v4489_v0 = vrot.slane %v4451_v59, %v13868_v38 }
 0x72a   :  { %13952 = vst [vmem:[#allocation120_spill] sm:$0xff] %v11147_v11  ;;  %v4219_v11 = vcombine.high %v11078_v37, %v11078_v37  ;;  %v4469_v9 = vcombine.high %v4465_v20, %v4465_v20  ;;  %v4493_v15 = vrot.slane %v4465_v20, %v13868_v38  ;;  %v4485_v28 = vrot.slane %v4468_v12, %v13868_v38 }
 0x72b   :  { %v11174_v22 = vmul.f32 0.2, %v4138_v63  ;;  %v4226_v63 = vrot.slane %v11078_v37, %v13893_v1  ;;  %v4497_v44 = vrot.slane %v4467_v52, %v13868_v38  ;;  %v11190_v51 = vadd.f32 %v4473_v49, %v10703_v40 }
 0x72c   :  { %v4623_v18 = vcombine.high %v11086_v60, %v11086_v60  ;;  %v4501_v29 = vrot.slane %v4469_v9, %v13868_v38  ;;  %v11196_v5 = vadd.f32 %v4473_v49, %v10691_v61  ;;  %v11199_v59 = vadd.f32 %v4477_v13, %v10703_v40 }
 0x72d   :  { %v11202_v37 = vadd.f32 %v4477_v13, %v10691_v61  ;;  %v11205_v20 = vadd.f32 %v4481_v48, %v10703_v40  ;;  %v11208_v12 = vadd.f32 %v4481_v48, %v10691_v61  ;;  %v11211_v52 = vadd.f32 %v4485_v28, %v10703_v40 }
 0x72e   :  { %13953 = vst [vmem:[#allocation90_spill] sm:$0xff] %v11199_v59  ;;  %v11214_v9 = vadd.f32 %v4485_v28, %v10691_v61  ;;  %v11217_v49 = vadd.f32 %v4489_v0, %v10703_v40  ;;  %v11220_v45 = vadd.f32 %v4489_v0, %v10691_v61  ;;  %v11223_v13 = vadd.f32 %v4493_v15, %v10703_v40 }
 0x72f   :  { %13954 = vst [vmem:[#allocation113_spill] sm:$0xff] %v11202_v37  ;;  %13955 = vst [vmem:[#allocation48_spill] sm:$0xff] %v11205_v20  ;;  %v11226_v41 = vadd.f32 %v4493_v15, %v10691_v61  ;;  %v11229_v48 = vadd.f32 %v4497_v44, %v10703_v40  ;;  %v4233_v28 = vrot.slane %v4219_v11, %v13893_v1 }
 0x730   :  { %13956 = vst [vmem:[#allocation50_spill] sm:$0xff] %v11208_v12  ;;  %13957 = vst [vmem:[#allocation45_spill] sm:$0xff] %v11211_v52  ;;  %v11232_v52 = vadd.f32 %v4497_v44, %v10691_v61  ;;  %v11236_v39 = vadd.f32 %v4501_v29, %v10703_v40  ;;  %v4242_v0 = vrot.slane %v4226_v63, %v13893_v1 }
 0x731   :  { %13958 = vst [vmem:[#allocation64_spill] sm:$0xff] %v11214_v9  ;;  %13959 = vst [vmem:[#allocation61_spill] sm:$0xff] %v11217_v49  ;;  %v4234_v9 = vcombine.high %v4226_v63, %v4226_v63  ;;  %v11244_v15 = vrot.slane %v4623_v18, %v13893_v1  ;;  %v4235_v44 = vcombine.high %v4233_v28, %v4233_v28  ;;  %v3282_v63 = vmin.f32 %v10800_v27, 0.0 }
 0x732   :  { %13960 = vst [vmem:[#allocation73_spill] sm:$0xff] %v11220_v45  ;;  %13961 = vst [vmem:[#allocation43_spill] sm:$0xff] %v11223_v13  ;;  %v11241_v13 = vrot.slane %v11086_v60, %v13893_v1  ;;  %v4271_v40 = vrot.slane %v4242_v0, %v13868_v38 }
 0x733   :  { %13962 = vst [vmem:[#allocation46_spill] sm:$0xff] %v11226_v41  ;;  %13963 = vst [vmem:[#allocation81_spill] sm:$0xff] %v11229_v48  ;;  %v11247_v48 = vadd.f32 %v4501_v29, %v10691_v61  ;;  %v4256_v11 = vrot.slane %v4234_v9, %v13893_v1  ;;  %v4264_v41 = vcombine.high %v4242_v0, %v4242_v0  ;;  %v3298_v59 = vmul.f32 0.2, %v3282_v63 }
 0x734   :  { %13964 = vst [vmem:[#allocation101_spill] sm:$0xff] %v11232_v52  ;;  %13965 = vst [vmem:[#allocation94_spill] sm:$0xff] %v11236_v39  ;;  %v4249_v52 = vrot.slane %v4233_v28, %v13893_v1  ;;  %v4263_v60 = vrot.slane %v4235_v44, %v13893_v1  ;;  %v4638_v9 = vcombine.high %v11241_v13, %v11241_v13 }
 0x735   :  { %13966 = vst [vmem:[#allocation114_spill] sm:$0xff] %v11247_v48  ;;  %v4266_v18 = vcombine.high %v4256_v11, %v4256_v11  ;;  %v4275_v49 = vrot.slane %v4256_v11, %v13868_v38  ;;  %v4279_v61 = vrot.slane %v4264_v41, %v13868_v38  ;;  %v4639_v28 = vcombine.high %v11244_v15, %v11244_v15 }
 0x736   :  { %v4265_v45 = vcombine.high %v4249_v52, %v4249_v52  ;;  %v4287_v29 = vrot.slane %v4249_v52, %v13868_v38  ;;  %v4267_v0 = vcombine.high %v4263_v60, %v4263_v60  ;;  %v4291_v39 = vrot.slane %v4263_v60, %v13868_v38 }
 0x737   :  { %v4283_v48 = vrot.slane %v4266_v18, %v13868_v38  ;;  %v11266_v16 = vadd.f32 %v4271_v40, %v10693_v17  ;;  %v11269_v41 = vadd.f32 %v4271_v40, %v10697_v19  ;;  %v11272_v52 = vadd.f32 %v4275_v49, %v10693_v17 }
 0x738   :  { %v4295_v44 = vrot.slane %v4265_v45, %v13868_v38  ;;  %v11275_v11 = vadd.f32 %v4275_v49, %v10697_v19  ;;  %v4299_v12 = vrot.slane %v4267_v0, %v13868_v38  ;;  %v11279_v18 = vadd.f32 %v4279_v61, %v10693_v17 }
 0x739   :  { %v11282_v60 = vadd.f32 %v4279_v61, %v10697_v19  ;;  %v11285_v45 = vadd.f32 %v4287_v29, %v10693_v17  ;;  %v11288_v40 = vadd.f32 %v4283_v48, %v10693_v17  ;;  %v11291_v10 = vadd.f32 %v4283_v48, %v10697_v19 }
 0x73a   :  { %v11294_v49 = vadd.f32 %v4287_v29, %v10697_v19  ;;  %v11297_v0 = vadd.f32 %v4291_v39, %v10693_v17  ;;  %v11300_v20 = vadd.f32 %v4291_v39, %v10697_v19  ;;  %v11303_v61 = vadd.f32 %v4295_v44, %v10693_v17 }
 0x73b   :  { %13967 = vst [vmem:[#allocation121_spill] sm:$0xff] %v11285_v45  ;;  %13968 = vst [vmem:[#allocation122_spill] sm:$0xff] %v11288_v40  ;;  %v11306_v50 = vadd.f32 %v4295_v44, %v10697_v19  ;;  %v11309_v37 = vadd.f32 %v4299_v12, %v10693_v17  ;;  %v11312_v48 = vadd.f32 %v4299_v12, %v10697_v19  ;;  %v4341_v19 = vmin.f32 %v11269_v41, 0.0 }
 0x73c   :  { %13969 = vst [vmem:[#allocation123_spill] sm:$0xff] %v11291_v10  ;;  %13970 = vst [vmem:[#allocation124_spill] sm:$0xff] %v11294_v49  ;;  %v4646_v30 = vrot.slane %v11241_v13, %v13893_v1  ;;  %v11342_v35 = vrot.slane %v11244_v15, %v13893_v1  ;;  %v4660_v31 = vrot.slane %v4638_v9, %v13893_v1  ;;  %v13984_v10 = vmax.f32 %v10964_v8, 0.0 }
 0x73d   :  { %13971 = vst [vmem:[#allocation125_spill] sm:$0xff] %v11297_v0  ;;  %13972 = vst [vmem:[#allocation126_spill] sm:$0xff] %v11300_v20  ;;  %v11346_v17 = vrot.slane %v4639_v28, %v13893_v1  ;;  %v11348_v29 = vmul.f32 0.2, %v4341_v19  ;;  %v3694_v20 = vmin.f32 %v10881_v58, 0.0 }
 0x73e   :  { %13973 = vst [vmem:[#allocation127_spill] sm:$0xff] %v11303_v61  ;;  %13974 = vst [vmem:[#allocation128_spill] sm:$0xff] %v11306_v50  ;;  %v4675_v12 = vrot.slane %v4646_v30, %v13868_v38  ;;  %v4670_v44 = vcombine.high %v4660_v31, %v4660_v31  ;;  %v4679_v13 = vrot.slane %v4660_v31, %v13868_v38  ;;  %v3678_v50 = vmax.f32 %v10881_v58, 0.0 }
 0x73f   :  { %13975 = vst [vmem:[#allocation129_spill] sm:$0xff] %v11309_v37  ;;  %13976 = vst [vmem:[#allocation130_spill] sm:$0xff] %v11312_v48  ;;  %v4340_v37 = vmin.f32 %v11266_v16, 0.0  ;;  %v4668_v48 = vcombine.high %v4646_v30, %v4646_v30  ;;  %v4691_v19 = vrot.slane %v11342_v35, %v13868_v38  ;;  %v11366_v31 = vrot.slane %v11346_v17, %v13868_v38 }
 0x740   :  { %13977 = vst [vmem:[#allocation131_spill] sm:$0xff] %v11342_v35  ;;  %13978 = vst [vmem:[#allocation132_spill] sm:$0xff] %v11346_v17  ;;  %v11362_v30 = vrot.slane %v4670_v44, %v13868_v38  ;;  %v11369_v63 = vadd.f32 %v4675_v12, %v10695_v25  ;;  %v11372_v15 = vadd.f32 %v4675_v12, %v10699_v42  ;;  %v13983_v12 = vmax.f32 %v10800_v27, 0.0 }
 0x741   :  { %v11338_v39 = vmul.f32 0.2, %v4340_v37  ;;  %v3488_v37 = vmin.f32 %v10964_v8, 0.0  ;;  %v4683_v28 = vrot.slane %v4668_v48, %v13868_v38  ;;  %13980 = vst [vmem:[#allocation134_spill] sm:$0xff] %v11366_v31  ;;  %v11375_v9 = vadd.f32 %v4679_v13, %v10695_v25 }
 0x742   :  { %13979 = vst [vmem:[#allocation133_spill] sm:$0xff] %v11362_v30  ;;  %v11378_v48 = vadd.f32 %v4679_v13, %v10699_v42  ;;  %v11387_v17 = vadd.f32 %v4691_v19, %v10695_v25  ;;  %v11390_v61 = vadd.f32 %v4691_v19, %v10699_v42  ;;  %v3314_v35 = vadd.f32 %v3298_v59, %v13983_v12 }
 0x743   :  { %v11381_v1 = vadd.f32 %v4683_v28, %v10695_v25  ;;  %v11384_v44 = vadd.f32 %v4683_v28, %v10699_v42  ;;  %v3504_v38 = vmul.f32 0.2, %v3488_v37  ;;  %v3868_v13 = vadd.f32 %v11025_v56, %v10695_v25 }
 0x744   :  { %13981 = vst [vmem:[#allocation135_spill] sm:$0xff] %v11387_v17  ;;  %13982 = vst [vmem:[#allocation136_spill] sm:$0xff] %v11390_v61  ;;  %v3268_v31 = vmax.f32 %v10813_v3, 0.0  ;;  %v3284_v28 = vmin.f32 %v10813_v3, 0.0  ;;  %v3334_v0 = vmul.f32 %v10747_v43, %v3314_v35  ;;  %v3474_v19 = vmax.f32 %v10967_v4, 0.0 }
 0x745   :  { %v3520_v30 = vadd.f32 %v3504_v38, %v13984_v10  ;;  %v3490_v27 = vmin.f32 %v10967_v4, 0.0  ;;  %v3710_v59 = vmul.f32 0.2, %v3694_v20  ;;  %v3884_v37 = vmax.f32 %v3868_v13, 0.0 }
 0x746   :  { %v3900_v12 = vmin.f32 %v3868_v13, 0.0  ;;  %v3300_v58 = vmul.f32 0.2, %v3284_v28  ;;  %v3680_v61 = vmax.f32 %v10887_v32, 0.0  ;;  %v3696_v3 = vmin.f32 %v10887_v32, 0.0 }
 0x747   :  { %v3540_v40 = vmul.f32 %v10751_v57, %v3520_v30  ;;  %v3506_v56 = vmul.f32 0.2, %v3490_v27  ;;  %v3726_v49 = vadd.f32 %v3710_v59, %v3678_v50  ;;  %v3870_v38 = vadd.f32 %v11032_v34, %v10695_v25 }
 0x748   :  { %v3916_v35 = vmul.f32 0.2, %v3900_v12  ;;  %v3316_v17 = vadd.f32 %v3300_v58, %v3268_v31  ;;  %v3712_v4 = vmul.f32 0.2, %v3696_v3  ;;  %v13985_v20 = vmax.f32 %v10803_v53, 0.0 }
 0x749   :  { %v3556_v8 = vadd.f32 %v3540_v40, %v3334_v0  ;;  %v3522_v10 = vadd.f32 %v3506_v56, %v3474_v19  ;;  %v3746_v30 = vmul.f32 %v10764_v62, %v3726_v49  ;;  %v3886_v45 = vmax.f32 %v3870_v38, 0.0 }
 0x74a   :  { %v3315_v13 = vadd.f32 %v10875_v55, %v13985_v20  ;;  %v3932_v28 = vadd.f32 %v3916_v35, %v3884_v37  ;;  %v3336_v27 = vmul.f32 %v10747_v43, %v3316_v17  ;;  %v3728_v50 = vadd.f32 %v3712_v4, %v3680_v61 }
 0x74b   :  { %v3542_v32 = vmul.f32 %v10751_v57, %v3522_v10  ;;  %v3902_v31 = vmin.f32 %v3870_v38, 0.0  ;;  %v3762_v34 = vadd.f32 %v3746_v30, %v3556_v8  ;;  %v13986_v0 = vmax.f32 %v10956_v54, 0.0 }
 0x74c   :  { %v3335_v59 = vmul.f32 %v10747_v43, %v3315_v13  ;;  %v3952_v40 = vmul.f32 %v10768_v2, %v3932_v28  ;;  %v3679_v55 = vmax.f32 %v10884_v36, 0.0  ;;  %v3748_v19 = vmul.f32 %v10764_v62, %v3728_v50 }
 0x74d   :  { %v3521_v53 = vadd.f32 %v11036_v7, %v13986_v0  ;;  %v3558_v49 = vadd.f32 %v3542_v32, %v3336_v27  ;;  %v3918_v17 = vmul.f32 0.2, %v3902_v31  ;;  %v3695_v37 = vmin.f32 %v10884_v36, 0.0 }
 0x74e   :  { %v3968_v12 = vadd.f32 %v3952_v40, %v3762_v34  ;;  %v3885_v58 = vmax.f32 %v11050_v14, 0.0  ;;  %v3901_v56 = vmin.f32 %v11050_v14, 0.0  ;;  %v13987_v7 = vmin.f32 %v10806_v33, 0.0 }
 0x74f   :  { %v3541_v61 = vmul.f32 %v10751_v57, %v3521_v53  ;;  %v3764_v3 = vadd.f32 %v3748_v19, %v3558_v49  ;;  %v3934_v35 = vadd.f32 %v3918_v17, %v3886_v45  ;;  %v3711_v54 = vmul.f32 0.2, %v3695_v37 }
 0x750   :  { %v3301_v38 = vmul.f32 0.2, %v13987_v7  ;;  %3984 = vadd.xlane.f32.xlu0 %v3968_v12  ;;  %v3917_v10 = vmul.f32 0.2, %v3901_v56  ;;  %v13988_v4 = vmin.f32 %v10959_v26, 0.0  ;;  %v3681_v36 = vmax.f32 %v10890_v23, 0.0 }
 0x751   :  { %v3557_v8 = vadd.f32 %v3541_v61, %v3335_v59  ;;  %v3954_v13 = vmul.f32 %v10768_v2, %v3934_v35  ;;  %v3727_v30 = vadd.f32 %v3711_v54, %v3679_v55  ;;  %v13989_v28 = vmax.f32 %v10806_v33, 0.0 }
 0x752   :  { %v3507_v20 = vmul.f32 0.2, %v13988_v4  ;;  %v3697_v45 = vmin.f32 %v10890_v23, 0.0  ;;  %v3933_v27 = vadd.f32 %v3917_v10, %v3885_v58  ;;  %v13990_v32 = vmax.f32 %v10959_v26, 0.0 }
 0x753   :  { %v3317_v14 = vadd.f32 %v3301_v38, %v13989_v28  ;;  %v3887_v31 = vmax.f32 %v11057_v21, 0.0  ;;  %v3903_v59 = vmin.f32 %v11057_v21, 0.0  ;;  %v3970_v34 = vadd.f32 %v3954_v13, %v3764_v3 }
 0x754   :  { %v3523_v50 = vadd.f32 %v3507_v20, %v13990_v32  ;;  %v3747_v40 = vmul.f32 %v10764_v62, %v3727_v30  ;;  %v3713_v53 = vmul.f32 0.2, %v3697_v45  ;;  %v3953_v55 = vmul.f32 %v10768_v2, %v3933_v27 }
 0x755   :  { %v3337_v0 = vmul.f32 %v10747_v43, %v3317_v14  ;;  %v3919_v49 = vmul.f32 0.2, %v3903_v59  ;;  %v13991_v23 = vmax.f32 %v11101_v24, 0.0  ;;  %3988 = vadd.xlane.f32.xlu1 %v3970_v34  ;;  %v13992_v21 = vmax.f32 %v11266_v16, 0.0  ;;  %v13996_v34 = vld [vmem:[#allocation106_spill] sm:$0xff] }
 0x756   :  { %v3543_v33 = vmul.f32 %v10751_v57, %v3523_v50  ;;  %v3763_v19 = vadd.f32 %v3747_v40, %v3557_v8  ;;  %v3729_v17 = vadd.f32 %v3713_v53, %v3681_v36  ;;  %v4526_v12 = vmax.f32 %v11190_v51, 0.0 }
 0x757   :  { %v4170_v26 = vadd.f32 %v11174_v22, %v13991_v23  ;;  %v4372_v37 = vadd.f32 %v11338_v39, %v13992_v21  ;;  %v3935_v58 = vadd.f32 %v3919_v49, %v3887_v31  ;;  %v4542_v3 = vmin.f32 %v11190_v51, 0.0 }
 0x758   :  { %v3559_v61 = vadd.f32 %v3543_v33, %v3337_v0  ;;  %v3969_v35 = vadd.f32 %v3953_v55, %v3763_v19  ;;  %v3749_v24 = vmul.f32 %v10764_v62, %v3729_v17  ;;  %v4728_v54 = vmax.f32 %v11369_v63, 0.0  ;;  %v13998_v0 = vld [vmem:[#allocation82_spill] sm:$0xff] }
 0x759   :  { %v4186_v56 = vmul.f32 %v4170_v26, %v10747_v43  ;;  %v4388_v22 = vmul.f32 %v4372_v37, %v10751_v57  ;;  %v3955_v7 = vmul.f32 %v10768_v2, %v3935_v58  ;;  %v4558_v16 = vmul.f32 0.2, %v4542_v3  ;;  %v14001_v37 = vld [vmem:[#allocation57_spill] sm:$0xff] }
 0x75a   :  { %v4744_v39 = vmin.f32 %v11369_v63, 0.0  ;;  %v13993_v38 = vmax.f32 %v11104_v46, 0.0  ;;  %3986 = vadd.xlane.f32.xlu0 %v3969_v35  ;;  %v3765_v10 = vadd.f32 %v3749_v24, %v3559_v61  ;;  %v13994_v51 = vmax.f32 %v11269_v41, 0.0 }
 0x75b   :  { %v4404_v4 = vadd.f32 %v4388_v22, %v4186_v56  ;;  %v4527_v36 = vmax.f32 %v11196_v5, 0.0  ;;  %v4574_v13 = vadd.f32 %v4558_v16, %v4526_v12  ;;  %v4543_v14 = vmin.f32 %v11196_v5, 0.0  ;;  %v14002_v22 = vld [vmem:[#allocation78_spill] sm:$0xff] }
 0x75c   :  { %v4171_v8 = vadd.f32 %v11176_v6, %v13993_v38  ;;  %v4373_v20 = vadd.f32 %v11348_v29, %v13994_v51  ;;  %v4760_v30 = vmul.f32 0.2, %v4744_v39  ;;  %v3971_v63 = vadd.f32 %v3955_v7, %v3765_v10  ;;  %v14004_v38 = vld [vmem:[#allocation99_spill] sm:$0xff] }
 0x75d   :  { %v4729_v6 = vmax.f32 %v11372_v15, 0.0  ;;  %v4745_v45 = vmin.f32 %v11372_v15, 0.0  ;;  %v4590_v27 = vmul.f32 %v4574_v13, %v10764_v62  ;;  %v4559_v32 = vmul.f32 0.2, %v4543_v14 }
 0x75e   :  { %v4187_v28 = vmul.f32 %v4171_v8, %v10747_v43  ;;  %v4389_v46 = vmul.f32 %v4373_v20, %v10751_v57  ;;  %v4776_v41 = vadd.f32 %v4760_v30, %v4728_v54  ;;  %v13995_v29 = vmin.f32 %v10809_v47, 0.0  ;;  %3990 = vadd.xlane.f32.xlu1 %v3971_v63 }
 0x75f   :  { %v4761_v59 = vmul.f32 0.2, %v4745_v45  ;;  %v13997_v40 = vmin.f32 %v13996_v34, 0.0  ;;  %v3682_v53 = vmax.f32 %v13998_v0, 0.0  ;;  %v4606_v55 = vadd.f32 %v4590_v27, %v4404_v4  ;;  %v14006_v4 = vld [vmem:[#allocation105_spill] sm:$0xff]  ;;  %v14009_v45 = vld [vmem:[#allocation72_spill] sm:$0xff] }
 0x760   :  { %v3302_v50 = vmul.f32 0.2, %v13995_v29  ;;  %v4405_v31 = vadd.f32 %v4389_v46, %v4187_v28  ;;  %v4792_v33 = vmul.f32 %v4776_v41, %v10768_v2  ;;  %v4575_v49 = vadd.f32 %v4559_v32, %v4527_v36 }
 0x761   :  { %v3508_v5 = vmul.f32 0.2, %v13997_v40  ;;  %v13999_v15 = vmax.f32 %v10809_v47, 0.0  ;;  %v4777_v26 = vadd.f32 %v4761_v59, %v4729_v6  ;;  %v14000_v19 = vmax.f32 %v13996_v34, 0.0  ;;  %v14010_v34 = vld [vmem:[#allocation102_spill] sm:$0xff] }
 0x762   :  { %v3698_v21 = vmin.f32 %v13998_v0, 0.0  ;;  %v3888_v12 = vmax.f32 %v14001_v37, 0.0  ;;  %v4808_v61 = vadd.f32 %v4792_v33, %v4606_v55  ;;  %v4591_v58 = vmul.f32 %v4575_v49, %v10764_v62  ;;  %v14012_v0 = vld [vmem:[#allocation107_spill] sm:$0xff] }
 0x763   :  { %v3318_v23 = vadd.f32 %v3302_v50, %v13999_v15  ;;  %v3524_v17 = vadd.f32 %v3508_v5, %v14000_v19  ;;  %v3904_v3 = vmin.f32 %v14001_v37, 0.0  ;;  %v4793_v35 = vmul.f32 %v4777_v26, %v10768_v2 }
 0x764   :  { %v3714_v24 = vmul.f32 0.2, %v3698_v21  ;;  %v14003_v54 = vmin.f32 %v14002_v22, 0.0  ;;  %4824 = vadd.xlane.f32.xlu0 %v4808_v61  ;;  %v4607_v16 = vadd.f32 %v4591_v58, %v4405_v31  ;;  %v14005_v8 = vmin.f32 %v14004_v38, 0.0 }
 0x765   :  { %v3338_v56 = vmul.f32 %v10747_v43, %v3318_v23  ;;  %v3544_v47 = vmul.f32 %v10751_v57, %v3524_v17  ;;  %v3920_v39 = vmul.f32 0.2, %v3904_v3  ;;  %v3683_v51 = vmax.f32 %v14006_v4, 0.0  ;;  %v14014_v23 = vld [vmem:[#allocation65_spill] sm:$0xff] }
 0x766   :  { %v3303_v7 = vmul.f32 0.2, %v14003_v54  ;;  %v3509_v10 = vmul.f32 0.2, %v14005_v8  ;;  %v3730_v36 = vadd.f32 %v3714_v24, %v3682_v53  ;;  %v14007_v13 = vmax.f32 %v14002_v22, 0.0 }
 0x767   :  { %v3560_v20 = vadd.f32 %v3544_v47, %v3338_v56  ;;  %v3699_v28 = vmin.f32 %v14006_v4, 0.0  ;;  %v4809_v14 = vadd.f32 %v4793_v35, %v4607_v16  ;;  %v3936_v63 = vadd.f32 %v3920_v39, %v3888_v12  ;;  %v14017_v35 = vld [vmem:[#allocation85_spill] sm:$0xff]  ;;  %v14020_v4 = vld [vmem:[#allocation100_spill] sm:$0xff] }
 0x768   :  { %v3319_v30 = vadd.f32 %v3303_v7, %v14007_v13  ;;  %v14008_v46 = vmax.f32 %v14004_v38, 0.0  ;;  %v3889_v27 = vmax.f32 %v14009_v45, 0.0  ;;  %v3750_v41 = vmul.f32 %v10764_v62, %v3730_v36  ;;  %v14018_v38 = vld [vmem:[#allocation79_spill] sm:$0xff] }
 0x769   :  { %v3715_v29 = vmul.f32 0.2, %v3699_v28  ;;  %v3905_v50 = vmin.f32 %v14009_v45, 0.0  ;;  %4826 = vadd.xlane.f32.xlu1 %v4809_v14  ;;  %v3956_v31 = vmul.f32 %v10768_v2, %v3936_v63  ;;  %v14011_v40 = vmin.f32 %v14010_v34, 0.0  ;;  %v14022_v28 = vld [vmem:[#allocation41_spill] sm:$0xff] }
 0x76a   :  { %v3525_v6 = vadd.f32 %v3509_v10, %v14008_v46  ;;  %v3339_v32 = vmul.f32 %v10747_v43, %v3319_v30  ;;  %v14013_v53 = vmin.f32 %v14012_v0, 0.0  ;;  %v3766_v33 = vadd.f32 %v3750_v41, %v3560_v20 }
 0x76b   :  { %v3306_v5 = vmul.f32 0.2, %v14011_v40  ;;  %v3731_v49 = vadd.f32 %v3715_v29, %v3683_v51  ;;  %v3921_v15 = vmul.f32 0.2, %v3905_v50  ;;  %v3686_v26 = vmax.f32 %v14014_v23, 0.0  ;;  %v14025_v50 = vld [vmem:[#allocation108_spill] sm:$0xff] }
 0x76c   :  { %v3545_v59 = vmul.f32 %v10751_v57, %v3525_v6  ;;  %v3512_v55 = vmul.f32 0.2, %v14013_v53  ;;  %v14015_v17 = vmax.f32 %v14010_v34, 0.0  ;;  %v14016_v37 = vmax.f32 %v14012_v0, 0.0  ;;  %v14026_v0 = vld [vmem:[#allocation93_spill] sm:$0xff] }
 0x76d   :  { %v3702_v61 = vmin.f32 %v14014_v23, 0.0  ;;  %v3972_v58 = vadd.f32 %v3956_v31, %v3766_v33  ;;  %v3751_v56 = vmul.f32 %v10764_v62, %v3731_v49  ;;  %v3937_v3 = vadd.f32 %v3921_v15, %v3889_v27 }
 0x76e   :  { %v3561_v19 = vadd.f32 %v3545_v59, %v3339_v32  ;;  %v3322_v21 = vadd.f32 %v3306_v5, %v14015_v17  ;;  %v3528_v12 = vadd.f32 %v3512_v55, %v14016_v37  ;;  %v3892_v47 = vmax.f32 %v14017_v35, 0.0 }
 0x76f   :  { %v3718_v54 = vmul.f32 0.2, %v3702_v61  ;;  %v3908_v7 = vmin.f32 %v14017_v35, 0.0  ;;  %3992 = vadd.xlane.f32.xlu0 %v3972_v58  ;;  %v3957_v39 = vmul.f32 %v10768_v2, %v3937_v3  ;;  %v14019_v8 = vmin.f32 %v14018_v38, 0.0 }
 0x770   :  { %v3342_v24 = vmul.f32 %v10747_v43, %v3322_v21  ;;  %v3548_v22 = vmul.f32 %v10751_v57, %v3528_v12  ;;  %v3767_v16 = vadd.f32 %v3751_v56, %v3561_v19  ;;  %v14021_v51 = vmin.f32 %v14020_v4, 0.0  ;;  %v14030_v12 = vld [vmem:[#allocation90_spill] sm:$0xff] }
 0x771   :  { %v3307_v10 = vmul.f32 0.2, %v14019_v8  ;;  %v3734_v13 = vadd.f32 %v3718_v54, %v3686_v26  ;;  %v3924_v30 = vmul.f32 0.2, %v3908_v7  ;;  %v3687_v14 = vmax.f32 %v14022_v28, 0.0  ;;  %v14032_v8 = vld [vmem:[#allocation119_spill] sm:$0xff] }
 0x772   :  { %v3513_v20 = vmul.f32 0.2, %v14021_v51  ;;  %v3564_v36 = vadd.f32 %v3548_v22, %v3342_v24  ;;  %v3973_v63 = vadd.f32 %v3957_v39, %v3767_v16  ;;  %v14023_v46 = vmax.f32 %v14018_v38, 0.0 }
 0x773   :  { %v14024_v45 = vmax.f32 %v14020_v4, 0.0  ;;  %v3703_v41 = vmin.f32 %v14022_v28, 0.0  ;;  %v3754_v32 = vmul.f32 %v10764_v62, %v3734_v13  ;;  %v3940_v29 = vadd.f32 %v3924_v30, %v3892_v47  ;;  %v14035_v13 = vld [vmem:[#allocation113_spill] sm:$0xff] }
 0x774   :  { %v3323_v6 = vadd.f32 %v3307_v10, %v14023_v46  ;;  %v3893_v31 = vmax.f32 %v14025_v50, 0.0  ;;  %v3909_v59 = vmin.f32 %v14025_v50, 0.0  ;;  %3994 = vadd.xlane.f32.xlu1 %v3973_v63  ;;  %v14027_v53 = vmin.f32 %v14026_v0, 0.0 }
 0x775   :  { %v3529_v27 = vadd.f32 %v3513_v20, %v14024_v45  ;;  %v3719_v5 = vmul.f32 0.2, %v3703_v41  ;;  %v3770_v33 = vadd.f32 %v3754_v32, %v3564_v36  ;;  %v3960_v49 = vmul.f32 %v10768_v2, %v3940_v29 }
 0x776   :  { %v3343_v34 = vmul.f32 %v10747_v43, %v3323_v6  ;;  %v4156_v55 = vmul.f32 0.2, %v14027_v53  ;;  %v3925_v15 = vmul.f32 0.2, %v3909_v59  ;;  %v14028_v23 = vmin.f32 %v11272_v52, 0.0 }
 0x777   :  { %v3549_v40 = vmul.f32 %v10751_v57, %v3529_v27  ;;  %v3735_v17 = vadd.f32 %v3719_v5, %v3687_v14  ;;  %v14029_v21 = vmax.f32 %v14026_v0, 0.0  ;;  %v4528_v61 = vmax.f32 %v14030_v12, 0.0  ;;  %v14038_v5 = vld [vmem:[#allocation86_spill] sm:$0xff] }
 0x778   :  { %v4358_v26 = vmul.f32 0.2, %v14028_v23  ;;  %v3976_v58 = vadd.f32 %v3960_v49, %v3770_v33  ;;  %v3941_v56 = vadd.f32 %v3925_v15, %v3893_v31  ;;  %v14031_v3 = vmax.f32 %v11272_v52, 0.0  ;;  %v14041_v23 = vld [vmem:[#allocation48_spill] sm:$0xff] }
 0x779   :  { %v3565_v19 = vadd.f32 %v3549_v40, %v3343_v34  ;;  %v4172_v37 = vadd.f32 %v4156_v55, %v14029_v21  ;;  %v4544_v47 = vmin.f32 %v14030_v12, 0.0  ;;  %v3755_v24 = vmul.f32 %v10764_v62, %v3735_v17 }
 0x77a   :  { %v4374_v35 = vadd.f32 %v4358_v26, %v14031_v3  ;;  %v4730_v54 = vmax.f32 %v11375_v9, 0.0  ;;  %v4746_v7 = vmin.f32 %v11375_v9, 0.0  ;;  %4000 = vadd.xlane.f32.xlu0 %v3976_v58  ;;  %v3961_v16 = vmul.f32 %v10768_v2, %v3941_v56 }
 0x77b   :  { %v4188_v22 = vmul.f32 %v4172_v37, %v10747_v43  ;;  %v4560_v38 = vmul.f32 0.2, %v4544_v47  ;;  %v14033_v10 = vmin.f32 %v14032_v8, 0.0  ;;  %v3771_v4 = vadd.f32 %v3755_v24, %v3565_v19 }
 0x77c   :  { %v4390_v39 = vmul.f32 %v4374_v35, %v10751_v57  ;;  %v4762_v51 = vmul.f32 0.2, %v4746_v7  ;;  %v14034_v20 = vmin.f32 %v11275_v11, 0.0  ;;  %v4529_v30 = vmax.f32 %v14035_v13, 0.0  ;;  %v14044_v7 = vld [vmem:[#allocation109_spill] sm:$0xff] }
 0x77d   :  { %v4157_v52 = vmul.f32 0.2, %v14033_v10  ;;  %v4576_v14 = vadd.f32 %v4560_v38, %v4528_v61  ;;  %v14036_v9 = vmax.f32 %v14032_v8, 0.0  ;;  %v4545_v46 = vmin.f32 %v14035_v13, 0.0 }
 0x77e   :  { %v4359_v36 = vmul.f32 0.2, %v14034_v20  ;;  %v4406_v28 = vadd.f32 %v4390_v39, %v4188_v22  ;;  %v3977_v6 = vadd.f32 %v3961_v16, %v3771_v4  ;;  %v4778_v45 = vadd.f32 %v4762_v51, %v4730_v54  ;;  %v14047_v51 = vld [vmem:[#allocation50_spill] sm:$0xff] }
 0x77f   :  { %v4173_v63 = vadd.f32 %v4157_v52, %v14036_v9  ;;  %v14037_v27 = vmax.f32 %v11275_v11, 0.0  ;;  %v4731_v32 = vmax.f32 %v11378_v48, 0.0  ;;  %v4592_v29 = vmul.f32 %v4576_v14, %v10764_v62 }
 0x780   :  { %v4561_v31 = vmul.f32 0.2, %v4545_v46  ;;  %v4747_v59 = vmin.f32 %v11378_v48, 0.0  ;;  %4002 = vadd.xlane.f32.xlu1 %v3977_v6  ;;  %v4794_v34 = vmul.f32 %v4778_v45, %v10768_v2  ;;  %v14039_v0 = vmin.f32 %v14038_v5, 0.0 }
 0x781   :  { %v4375_v41 = vadd.f32 %v4359_v36, %v14037_v27  ;;  %v4189_v50 = vmul.f32 %v4173_v63, %v10747_v43  ;;  %v14040_v11 = vmin.f32 %v11279_v18, 0.0  ;;  %v4608_v33 = vadd.f32 %v4592_v29, %v4406_v28 }
 0x782   :  { %v4158_v53 = vmul.f32 0.2, %v14039_v0  ;;  %v4577_v49 = vadd.f32 %v4561_v31, %v4529_v30  ;;  %v4763_v15 = vmul.f32 0.2, %v4747_v59  ;;  %v4530_v26 = vmax.f32 %v14041_v23, 0.0  ;;  %v14052_v0 = vld [vmem:[#allocation117_spill] sm:$0xff] }
 0x783   :  { %v4391_v40 = vmul.f32 %v4375_v41, %v10751_v57  ;;  %v4360_v55 = vmul.f32 0.2, %v14040_v11  ;;  %v14042_v17 = vmax.f32 %v14038_v5, 0.0  ;;  %v14043_v21 = vmax.f32 %v11279_v18, 0.0 }
 0x784   :  { %v4546_v12 = vmin.f32 %v14041_v23, 0.0  ;;  %v4810_v61 = vadd.f32 %v4794_v34, %v4608_v33  ;;  %v4593_v58 = vmul.f32 %v4577_v49, %v10764_v62  ;;  %v4779_v56 = vadd.f32 %v4763_v15, %v4731_v32  ;;  %v14050_v32 = vld [vmem:[#allocation95_spill] sm:$0xff]  ;;  %v14054_v15 = vld [vmem:[#allocation98_spill] sm:$0xff] }
 0x785   :  { %v4407_v19 = vadd.f32 %v4391_v40, %v4189_v50  ;;  %v4174_v48 = vadd.f32 %v4158_v53, %v14042_v17  ;;  %v4376_v37 = vadd.f32 %v4360_v55, %v14043_v21  ;;  %v4732_v3 = vmax.f32 %v11381_v1, 0.0 }
 0x786   :  { %v4562_v24 = vmul.f32 0.2, %v4546_v12  ;;  %v4748_v22 = vmin.f32 %v11381_v1, 0.0  ;;  %4828 = vadd.xlane.f32.xlu0 %v4810_v61  ;;  %v4795_v18 = vmul.f32 %v4779_v56, %v10768_v2  ;;  %v14045_v16 = vmin.f32 %v14044_v7, 0.0  ;;  %v14056_v61 = vld [vmem:[#allocation115_spill] sm:$0xff] }
 0x787   :  { %v4190_v35 = vmul.f32 %v4174_v48, %v10747_v43  ;;  %v4392_v47 = vmul.f32 %v4376_v37, %v10751_v57  ;;  %v4609_v54 = vadd.f32 %v4593_v58, %v4407_v19  ;;  %v14046_v38 = vmin.f32 %v11282_v60, 0.0  ;;  %v14055_v48 = vld [vmem:[#allocation56_spill] sm:$0xff] }
 0x788   :  { %v4159_v39 = vmul.f32 0.2, %v14045_v16  ;;  %v4578_v52 = vadd.f32 %v4562_v24, %v4530_v26  ;;  %v4764_v4 = vmul.f32 0.2, %v4748_v22  ;;  %v4531_v20 = vmax.f32 %v14047_v51, 0.0 }
 0x789   :  { %v4361_v8 = vmul.f32 0.2, %v14046_v38  ;;  %v4408_v10 = vadd.f32 %v4392_v47, %v4190_v35  ;;  %v4811_v36 = vadd.f32 %v4795_v18, %v4609_v54  ;;  %v14048_v13 = vmax.f32 %v14044_v7, 0.0  ;;  %v14058_v7 = vld [vmem:[#allocation84_spill] sm:$0xff] }
 0x78a   :  { %v14049_v1 = vmax.f32 %v11282_v60, 0.0  ;;  %v4547_v14 = vmin.f32 %v14047_v51, 0.0  ;;  %v4594_v9 = vmul.f32 %v4578_v52, %v10764_v62  ;;  %v4780_v63 = vadd.f32 %v4764_v4, %v4732_v3  ;;  %v14060_v4 = vld [vmem:[#allocation51_spill] sm:$0xff] }
 0x78b   :  { %v4175_v30 = vadd.f32 %v4159_v39, %v14048_v13  ;;  %v4733_v46 = vmax.f32 %v11384_v44, 0.0  ;;  %v4749_v6 = vmin.f32 %v11384_v44, 0.0  ;;  %4830 = vadd.xlane.f32.xlu1 %v4811_v36  ;;  %v3272_v29 = vmax.f32 %v14050_v32, 0.0 }
 0x78c   :  { %v4377_v28 = vadd.f32 %v4361_v8, %v14049_v1  ;;  %v4563_v41 = vmul.f32 0.2, %v4547_v14  ;;  %v4610_v50 = vadd.f32 %v4594_v9, %v4408_v10  ;;  %v4796_v60 = vmul.f32 %v4780_v63, %v10768_v2  ;;  %v14061_v14 = vld [vmem:[#allocation87_spill] sm:$0xff] }
 0x78d   :  { %v4191_v45 = vmul.f32 %v4175_v30, %v10747_v43  ;;  %v4765_v31 = vmul.f32 0.2, %v4749_v6  ;;  %v14051_v59 = vmin.f32 %v14050_v32, 0.0  ;;  %v3478_v53 = vmax.f32 %v14052_v0, 0.0 }
 0x78e   :  { %v4393_v27 = vmul.f32 %v4377_v28, %v10751_v57  ;;  %v4579_v5 = vadd.f32 %v4563_v41, %v4531_v20  ;;  %v14053_v44 = vmin.f32 %v14052_v0, 0.0  ;;  %v4812_v55 = vadd.f32 %v4796_v60, %v4610_v50 }
 0x78f   :  { %v3304_v34 = vmul.f32 0.2, %v14051_v59  ;;  %v4781_v33 = vadd.f32 %v4765_v31, %v4733_v46  ;;  %v3684_v23 = vmax.f32 %v14054_v15, 0.0  ;;  %v3700_v17 = vmin.f32 %v14054_v15, 0.0  ;;  %v14063_v46 = vld [vmem:[#allocation121_spill] sm:$0xff]  ;;  %v14068_v15 = vld [vmem:[#allocation135_spill] sm:$0xff] }
 0x790   :  { %v4409_v40 = vadd.f32 %v4393_v27, %v4191_v45  ;;  %v3510_v11 = vmul.f32 0.2, %v14053_v44  ;;  %v4595_v26 = vmul.f32 %v4579_v5, %v10764_v62  ;;  %v3874_v21 = vadd.f32 %v14055_v48, %v10695_v25  ;;  %4832 = vadd.xlane.f32.xlu0 %v4812_v55 }
 0x791   :  { %v3320_v49 = vadd.f32 %v3304_v34, %v3272_v29  ;;  %v4797_v37 = vmul.f32 %v4781_v33, %v10768_v2  ;;  %v3273_v58 = vmax.f32 %v14056_v61, 0.0  ;;  %v14057_v56 = vmin.f32 %v14056_v61, 0.0  ;;  %v14065_v29 = vld [vmem:[#allocation61_spill] sm:$0xff] }
 0x792   :  { %v3526_v19 = vadd.f32 %v3510_v11, %v3478_v53  ;;  %v4611_v35 = vadd.f32 %v4595_v26, %v4409_v40  ;;  %v3716_v24 = vmul.f32 0.2, %v3700_v17  ;;  %v3890_v22 = vmax.f32 %v3874_v21, 0.0 }
 0x793   :  { %v3340_v12 = vmul.f32 %v10747_v43, %v3320_v49  ;;  %v3305_v3 = vmul.f32 0.2, %v14057_v56  ;;  %v3906_v54 = vmin.f32 %v3874_v21, 0.0  ;;  %v3479_v16 = vmax.f32 %v14058_v7, 0.0  ;;  %v14071_v56 = vld [vmem:[#allocation124_spill] sm:$0xff] }
 0x794   :  { %v3546_v47 = vmul.f32 %v10751_v57, %v3526_v19  ;;  %v14059_v39 = vmin.f32 %v14058_v7, 0.0  ;;  %v4813_v8 = vadd.f32 %v4797_v37, %v4611_v35  ;;  %v3732_v52 = vadd.f32 %v3716_v24, %v3684_v23 }
 0x795   :  { %v3321_v18 = vadd.f32 %v3305_v3, %v3273_v58  ;;  %v3685_v51 = vmax.f32 %v14060_v4, 0.0  ;;  %v3922_v20 = vmul.f32 0.2, %v3906_v54  ;;  %v3701_v30 = vmin.f32 %v14060_v4, 0.0  ;;  %v14073_v54 = vld [vmem:[#allocation73_spill] sm:$0xff] }
 0x796   :  { %v3511_v38 = vmul.f32 0.2, %v14059_v39  ;;  %v3562_v10 = vadd.f32 %v3546_v47, %v3340_v12  ;;  %4834 = vadd.xlane.f32.xlu1 %v4813_v8  ;;  %v3752_v1 = vmul.f32 %v10764_v62, %v3732_v52  ;;  %v3875_v28 = vadd.f32 %v14055_v48, %v10699_v42  ;;  %v14069_v12 = vld [vmem:[#allocation118_spill] sm:$0xff] }
 0x797   :  { %v3341_v36 = vmul.f32 %v10747_v43, %v3321_v18  ;;  %v14062_v9 = vmin.f32 %v14061_v14, 0.0  ;;  %v14064_v6 = vmin.f32 %v14063_v46, 0.0  ;;  %v3938_v27 = vadd.f32 %v3922_v20, %v3890_v22 }
 0x798   :  { %v3527_v13 = vadd.f32 %v3511_v38, %v3479_v16  ;;  %v3717_v32 = vmul.f32 0.2, %v3701_v30  ;;  %v4534_v50 = vmax.f32 %v14065_v29, 0.0  ;;  %v3768_v60 = vadd.f32 %v3752_v1, %v3562_v10 }
 0x799   :  { %v4162_v63 = vmul.f32 0.2, %v14062_v9  ;;  %v4364_v45 = vmul.f32 0.2, %v14064_v6  ;;  %v3891_v31 = vmax.f32 %v3875_v28, 0.0  ;;  %v3907_v59 = vmin.f32 %v3875_v28, 0.0 }
 0x79a   :  { %v3547_v41 = vmul.f32 %v10751_v57, %v3527_v13  ;;  %v14066_v34 = vmax.f32 %v14061_v14, 0.0  ;;  %v3958_v5 = vmul.f32 %v10768_v2, %v3938_v27  ;;  %v3733_v53 = vadd.f32 %v3717_v32, %v3685_v51  ;;  %v14076_v51 = vld [vmem:[#allocation136_spill] sm:$0xff] }
 0x79b   :  { %v14067_v44 = vmax.f32 %v14063_v46, 0.0  ;;  %v3923_v55 = vmul.f32 0.2, %v3907_v59  ;;  %v4550_v49 = vmin.f32 %v14065_v29, 0.0  ;;  %v4736_v23 = vmax.f32 %v14068_v15, 0.0  ;;  %v14077_v46 = vld [vmem:[#allocation103_spill] sm:$0xff] }
 0x79c   :  { %v4178_v40 = vadd.f32 %v4162_v63, %v14066_v34  ;;  %v3563_v0 = vadd.f32 %v3547_v41, %v3341_v36  ;;  %v3974_v26 = vadd.f32 %v3958_v5, %v3768_v60  ;;  %v3753_v19 = vmul.f32 %v10764_v62, %v3733_v53  ;;  %v14079_v29 = vld [vmem:[#allocation54_spill] sm:$0xff] }
 0x79d   :  { %v4380_v11 = vadd.f32 %v4364_v45, %v14067_v44  ;;  %v4752_v48 = vmin.f32 %v14068_v15, 0.0  ;;  %v3939_v21 = vadd.f32 %v3923_v55, %v3891_v31  ;;  %v4566_v37 = vmul.f32 0.2, %v4550_v49 }
 0x79e   :  { %v4194_v33 = vmul.f32 %v4178_v40, %v10747_v43  ;;  %v14070_v61 = vmin.f32 %v14069_v12, 0.0  ;;  %v14072_v3 = vmin.f32 %v14071_v56, 0.0  ;;  %3996 = vadd.xlane.f32.xlu0 %v3974_v26  ;;  %v3769_v47 = vadd.f32 %v3753_v19, %v3563_v0  ;;  %v14081_v40 = vld [vmem:[#allocation58_spill] sm:$0xff] }
 0x79f   :  { %v4396_v17 = vmul.f32 %v4380_v11, %v10751_v57  ;;  %v4768_v22 = vmul.f32 0.2, %v4752_v48  ;;  %v4535_v18 = vmax.f32 %v14073_v54, 0.0  ;;  %v3959_v7 = vmul.f32 %v10768_v2, %v3939_v21  ;;  %v14082_v11 = vld [vmem:[#allocation71_spill] sm:$0xff] }
 0x7a0   :  { %v4163_v58 = vmul.f32 0.2, %v14070_v61  ;;  %v4365_v35 = vmul.f32 0.2, %v14072_v3  ;;  %v4582_v16 = vadd.f32 %v4566_v37, %v4534_v50  ;;  %v14074_v39 = vmax.f32 %v14069_v12, 0.0 }
 0x7a1   :  { %v4412_v24 = vadd.f32 %v4396_v17, %v4194_v33  ;;  %v14075_v8 = vmax.f32 %v14071_v56, 0.0  ;;  %v4784_v52 = vadd.f32 %v4768_v22, %v4736_v23  ;;  %v4551_v4 = vmin.f32 %v14073_v54, 0.0  ;;  %v14083_v23 = vld [vmem:[#allocation96_spill] sm:$0xff]  ;;  %v14085_v56 = vld [vmem:[#allocation69_spill] sm:$0xff] }
 0x7a2   :  { %v4179_v38 = vadd.f32 %v4163_v58, %v14074_v39  ;;  %v4737_v20 = vmax.f32 %v14076_v51, 0.0  ;;  %v4753_v36 = vmin.f32 %v14076_v51, 0.0  ;;  %v3975_v13 = vadd.f32 %v3959_v7, %v3769_v47  ;;  %v14087_v54 = vld [vmem:[#allocation76_spill] sm:$0xff] }
 0x7a3   :  { %v4381_v10 = vadd.f32 %v4365_v35, %v14075_v8  ;;  %v4598_v30 = vmul.f32 %v4582_v16, %v10764_v62  ;;  %v4800_v14 = vmul.f32 %v4784_v52, %v10768_v2  ;;  %v4567_v9 = vmul.f32 0.2, %v4551_v4 }
 0x7a4   :  { %v4195_v1 = vmul.f32 %v4179_v38, %v10747_v43  ;;  %v4769_v63 = vmul.f32 0.2, %v4753_v36  ;;  %v3276_v6 = vmax.f32 %v14077_v46, 0.0  ;;  %3998 = vadd.xlane.f32.xlu1 %v3975_v13  ;;  %v14078_v41 = vmin.f32 %v14077_v46, 0.0  ;;  %v14088_v36 = vld [vmem:[#allocation80_spill] sm:$0xff] }
 0x7a5   :  { %v4397_v28 = vmul.f32 %v4381_v10, %v10751_v57  ;;  %v4614_v45 = vadd.f32 %v4598_v30, %v4412_v24  ;;  %v3482_v50 = vmax.f32 %v14079_v29, 0.0  ;;  %v4583_v60 = vadd.f32 %v4567_v9, %v4535_v18 }
 0x7a6   :  { %v3308_v32 = vmul.f32 0.2, %v14078_v41  ;;  %v4785_v31 = vadd.f32 %v4769_v63, %v4737_v20  ;;  %v14080_v59 = vmin.f32 %v14079_v29, 0.0  ;;  %v3688_v5 = vmax.f32 %v14081_v40, 0.0 }
 0x7a7   :  { %v4413_v27 = vadd.f32 %v4397_v28, %v4195_v1  ;;  %v4816_v0 = vadd.f32 %v4800_v14, %v4614_v45  ;;  %v3704_v44 = vmin.f32 %v14081_v40, 0.0  ;;  %v3878_v55 = vadd.f32 %v14082_v11, %v10695_v25 }
 0x7a8   :  { %v3514_v34 = vmul.f32 0.2, %v14080_v59  ;;  %v3324_v53 = vadd.f32 %v3308_v32, %v3276_v6  ;;  %v4599_v33 = vmul.f32 %v4583_v60, %v10764_v62  ;;  %v4801_v49 = vmul.f32 %v4785_v31, %v10768_v2  ;;  %v14092_v31 = vld [vmem:[#allocation52_spill] sm:$0xff] }
 0x7a9   :  { %v3277_v26 = vmax.f32 %v14083_v23, 0.0  ;;  %4840 = vadd.xlane.f32.xlu0 %v4816_v0  ;;  %v3720_v17 = vmul.f32 0.2, %v3704_v44  ;;  %v3894_v48 = vmax.f32 %v3878_v55, 0.0  ;;  %v3910_v21 = vmin.f32 %v3878_v55, 0.0  ;;  %v14093_v44 = vld [vmem:[#allocation60_spill] sm:$0xff] }
 0x7aa   :  { %v3530_v15 = vadd.f32 %v3514_v34, %v3482_v50  ;;  %v3344_v19 = vmul.f32 %v10747_v43, %v3324_v53  ;;  %v4615_v37 = vadd.f32 %v4599_v33, %v4413_v27  ;;  %v14084_v61 = vmin.f32 %v14083_v23, 0.0  ;;  %v14090_v27 = vld [vmem:[#allocation59_spill] sm:$0xff]  ;;  %v14094_v55 = vld [vmem:[#allocation104_spill] sm:$0xff] }
 0x7ab   :  { %v3483_v3 = vmax.f32 %v14085_v56, 0.0  ;;  %v3736_v35 = vadd.f32 %v3720_v17, %v3688_v5  ;;  %v3926_v47 = vmul.f32 0.2, %v3910_v21  ;;  %v14086_v24 = vmin.f32 %v14085_v56, 0.0  ;;  %v14096_v17 = vld [vmem:[#allocation75_spill] sm:$0xff] }
 0x7ac   :  { %v3550_v12 = vmul.f32 %v10751_v57, %v3530_v15  ;;  %v3309_v58 = vmul.f32 0.2, %v14084_v61  ;;  %v3689_v18 = vmax.f32 %v14087_v54, 0.0  ;;  %v4817_v7 = vadd.f32 %v4801_v49, %v4615_v37 }
 0x7ad   :  { %v3515_v22 = vmul.f32 0.2, %v14086_v24  ;;  %v3705_v38 = vmin.f32 %v14087_v54, 0.0  ;;  %v3756_v8 = vmul.f32 %v10764_v62, %v3736_v35  ;;  %v3942_v10 = vadd.f32 %v3926_v47, %v3894_v48  ;;  %v14098_v47 = vld [vmem:[#allocation66_spill] sm:$0xff] }
 0x7ae   :  { %v3566_v16 = vadd.f32 %v3550_v12, %v3344_v19  ;;  %v3325_v39 = vadd.f32 %v3309_v58, %v3277_v26  ;;  %v3879_v4 = vadd.f32 %v14082_v11, %v10699_v42  ;;  %4842 = vadd.xlane.f32.xlu1 %v4817_v7  ;;  %v3278_v13 = vmax.f32 %v14088_v36, 0.0 }
 0x7af   :  { %v3531_v52 = vadd.f32 %v3515_v22, %v3483_v3  ;;  %v3721_v20 = vmul.f32 0.2, %v3705_v38  ;;  %v14089_v30 = vmin.f32 %v14088_v36, 0.0  ;;  %v3962_v14 = vmul.f32 %v10768_v2, %v3942_v10 }
 0x7b0   :  { %v3345_v51 = vmul.f32 %v10747_v43, %v3325_v39  ;;  %v3772_v28 = vadd.f32 %v3756_v8, %v3566_v16  ;;  %v3895_v63 = vmax.f32 %v3879_v4, 0.0  ;;  %v3911_v6 = vmin.f32 %v3879_v4, 0.0  ;;  %v14099_v4 = vld [vmem:[#allocation110_spill] sm:$0xff] }
 0x7b1   :  { %v3310_v1 = vmul.f32 0.2, %v14089_v30  ;;  %v3551_v9 = vmul.f32 %v10751_v57, %v3531_v52  ;;  %v3737_v46 = vadd.f32 %v3721_v20, %v3689_v18  ;;  %v3484_v41 = vmax.f32 %v14090_v27, 0.0 }
 0x7b2   :  { %v3978_v32 = vadd.f32 %v3962_v14, %v3772_v28  ;;  %v14091_v50 = vmin.f32 %v14090_v27, 0.0  ;;  %v3690_v59 = vmax.f32 %v14092_v31, 0.0  ;;  %v3927_v40 = vmul.f32 0.2, %v3911_v6 }
 0x7b3   :  { %v3326_v45 = vadd.f32 %v3310_v1, %v3278_v13  ;;  %v3567_v29 = vadd.f32 %v3551_v9, %v3345_v51  ;;  %v3757_v34 = vmul.f32 %v10764_v62, %v3737_v46  ;;  %v3706_v0 = vmin.f32 %v14092_v31, 0.0  ;;  %v14101_v46 = vld [vmem:[#allocation122_spill] sm:$0xff] }
 0x7b4   :  { %v3516_v60 = vmul.f32 0.2, %v14091_v50  ;;  %4004 = vadd.xlane.f32.xlu0 %v3978_v32  ;;  %v3880_v11 = vadd.f32 %v14093_v44, %v10695_v25  ;;  %v3279_v33 = vmax.f32 %v14094_v55, 0.0  ;;  %v14095_v49 = vmin.f32 %v14094_v55, 0.0 }
 0x7b5   :  { %v3346_v5 = vmul.f32 %v10747_v43, %v3326_v45  ;;  %v3773_v23 = vadd.f32 %v3757_v34, %v3567_v29  ;;  %v3943_v26 = vadd.f32 %v3927_v40, %v3895_v63  ;;  %v3722_v19 = vmul.f32 0.2, %v3706_v0  ;;  %v14103_v29 = vld [vmem:[#allocation45_spill] sm:$0xff] }
 0x7b6   :  { %v3532_v53 = vadd.f32 %v3516_v60, %v3484_v41  ;;  %v3311_v15 = vmul.f32 0.2, %v14095_v49  ;;  %v3485_v48 = vmax.f32 %v14096_v17, 0.0  ;;  %v3896_v37 = vmax.f32 %v3880_v11, 0.0  ;;  %v14104_v0 = vld [vmem:[#allocation133_spill] sm:$0xff] }
 0x7b7   :  { %v3912_v12 = vmin.f32 %v3880_v11, 0.0  ;;  %v3963_v58 = vmul.f32 %v10768_v2, %v3943_v26  ;;  %v3738_v56 = vadd.f32 %v3722_v19, %v3690_v59  ;;  %v14097_v3 = vmin.f32 %v14096_v17, 0.0 }
 0x7b8   :  { %v3552_v21 = vmul.f32 %v10751_v57, %v3532_v53  ;;  %v3327_v61 = vadd.f32 %v3311_v15, %v3279_v33  ;;  %v3691_v24 = vmax.f32 %v14098_v47, 0.0  ;;  %v3707_v7 = vmin.f32 %v14098_v47, 0.0 }
 0x7b9   :  { %v3517_v35 = vmul.f32 0.2, %v14097_v3  ;;  %v3928_v54 = vmul.f32 0.2, %v3912_v12  ;;  %v3979_v16 = vadd.f32 %v3963_v58, %v3773_v23  ;;  %v3758_v39 = vmul.f32 %v10764_v62, %v3738_v56  ;;  %v14107_v23 = vld [vmem:[#allocation123_spill] sm:$0xff]  ;;  %v14109_v56 = vld [vmem:[#allocation64_spill] sm:$0xff] }
 0x7ba   :  { %v3568_v22 = vadd.f32 %v3552_v21, %v3346_v5  ;;  %v3347_v18 = vmul.f32 %v10747_v43, %v3327_v61  ;;  %v3881_v8 = vadd.f32 %v14093_v44, %v10699_v42  ;;  %v3723_v52 = vmul.f32 0.2, %v3707_v7  ;;  %v14105_v44 = vld [vmem:[#allocation91_spill] sm:$0xff] }
 0x7bb   :  { %v3533_v38 = vadd.f32 %v3517_v35, %v3485_v48  ;;  %v3944_v10 = vadd.f32 %v3928_v54, %v3896_v37  ;;  %v4128_v51 = vmax.f32 %v14099_v4, 0.0  ;;  %v14100_v20 = vmin.f32 %v14099_v4, 0.0  ;;  %4006 = vadd.xlane.f32.xlu1 %v3979_v16 }
 0x7bc   :  { %v3774_v13 = vadd.f32 %v3758_v39, %v3568_v22  ;;  %v3897_v1 = vmax.f32 %v3881_v8, 0.0  ;;  %v3913_v28 = vmin.f32 %v3881_v8, 0.0  ;;  %v3739_v9 = vadd.f32 %v3723_v52, %v3691_v24  ;;  %v14110_v8 = vld [vmem:[#allocation88_spill] sm:$0xff] }
 0x7bd   :  { %v4160_v36 = vmul.f32 0.2, %v14100_v20  ;;  %v3553_v30 = vmul.f32 %v10751_v57, %v3533_v38  ;;  %v3964_v14 = vmul.f32 %v10768_v2, %v3944_v10  ;;  %v4330_v6 = vmax.f32 %v14101_v46, 0.0 }
 0x7be   :  { %v3929_v27 = vmul.f32 0.2, %v3913_v28  ;;  %v14102_v41 = vmin.f32 %v14101_v46, 0.0  ;;  %v4532_v50 = vmax.f32 %v14103_v29, 0.0  ;;  %v3759_v31 = vmul.f32 %v10764_v62, %v3739_v9 }
 0x7bf   :  { %v4176_v63 = vadd.f32 %v4160_v36, %v4128_v51  ;;  %v3569_v45 = vadd.f32 %v3553_v30, %v3347_v18  ;;  %v3980_v60 = vadd.f32 %v3964_v14, %v3774_v13  ;;  %v4548_v34 = vmin.f32 %v14103_v29, 0.0  ;;  %v14112_v14 = vld [vmem:[#allocation125_spill] sm:$0xff] }
 0x7c0   :  { %v4362_v32 = vmul.f32 0.2, %v14102_v41  ;;  %v3945_v40 = vadd.f32 %v3929_v27, %v3897_v1  ;;  %v4718_v53 = vadd.f32 %v14104_v0, %v10695_v25  ;;  %v4129_v11 = vmax.f32 %v14105_v44, 0.0  ;;  %v14114_v27 = vld [vmem:[#allocation43_spill] sm:$0xff] }
 0x7c1   :  { %v4192_v59 = vmul.f32 %v4176_v63, %v10747_v43  ;;  %4008 = vadd.xlane.f32.xlu0 %v3980_v60  ;;  %v3775_v55 = vadd.f32 %v3759_v31, %v3569_v45  ;;  %v4564_v33 = vmul.f32 0.2, %v4548_v34  ;;  %v14106_v49 = vmin.f32 %v14105_v44, 0.0  ;;  %v14115_v34 = vld [vmem:[#allocation134_spill] sm:$0xff] }
 0x7c2   :  { %v4378_v5 = vadd.f32 %v4362_v32, %v4330_v6  ;;  %v4331_v26 = vmax.f32 %v14107_v23, 0.0  ;;  %v3965_v19 = vmul.f32 %v10768_v2, %v3945_v40  ;;  %v4734_v48 = vmax.f32 %v4718_v53, 0.0 }
 0x7c3   :  { %v4161_v15 = vmul.f32 0.2, %v14106_v49  ;;  %v4750_v21 = vmin.f32 %v4718_v53, 0.0  ;;  %v4580_v37 = vadd.f32 %v4564_v33, %v4532_v50  ;;  %v14108_v61 = vmin.f32 %v14107_v23, 0.0  ;;  %v14118_v33 = vld [vmem:[#allocation126_spill] sm:$0xff] }
 0x7c4   :  { %v4394_v17 = vmul.f32 %v4378_v5, %v10751_v57  ;;  %v4533_v3 = vmax.f32 %v14109_v56, 0.0  ;;  %v3981_v35 = vadd.f32 %v3965_v19, %v3775_v55  ;;  %v4549_v22 = vmin.f32 %v14109_v56, 0.0  ;;  %v14116_v5 = vld [vmem:[#allocation111_spill] sm:$0xff] }
 0x7c5   :  { %v4177_v12 = vadd.f32 %v4161_v15, %v4129_v11  ;;  %v4363_v58 = vmul.f32 0.2, %v14108_v61  ;;  %v4766_v24 = vmul.f32 0.2, %v4750_v21  ;;  %v4596_v54 = vmul.f32 %v4580_v37, %v10764_v62 }
 0x7c6   :  { %v4410_v47 = vadd.f32 %v4394_v17, %v4192_v59  ;;  %v4719_v16 = vadd.f32 %v14104_v0, %v10699_v42  ;;  %4010 = vadd.xlane.f32.xlu1 %v3981_v35  ;;  %v4565_v38 = vmul.f32 0.2, %v4549_v22  ;;  %v4132_v10 = vmax.f32 %v14110_v8, 0.0 }
 0x7c7   :  { %v4193_v18 = vmul.f32 %v4177_v12, %v10747_v43  ;;  %v4379_v7 = vadd.f32 %v4363_v58, %v4331_v26  ;;  %v4782_v39 = vadd.f32 %v4766_v24, %v4734_v48  ;;  %v14111_v52 = vmin.f32 %v14110_v8, 0.0  ;;  %v14120_v12 = vld [vmem:[#allocation46_spill] sm:$0xff] }
 0x7c8   :  { %v4612_v51 = vadd.f32 %v4596_v54, %v4410_v47  ;;  %v4735_v36 = vmax.f32 %v4719_v16, 0.0  ;;  %v4751_v13 = vmin.f32 %v4719_v16, 0.0  ;;  %v4581_v1 = vadd.f32 %v4565_v38, %v4533_v3  ;;  %v14121_v16 = vld [vmem:[#allocation89_spill] sm:$0xff] }
 0x7c9   :  { %v4164_v4 = vmul.f32 0.2, %v14111_v52  ;;  %v4395_v20 = vmul.f32 %v4379_v7, %v10751_v57  ;;  %v4798_v30 = vmul.f32 %v4782_v39, %v10768_v2  ;;  %v4334_v9 = vmax.f32 %v14112_v14, 0.0  ;;  %v14124_v52 = vld [vmem:[#allocation131_spill] sm:$0xff] }
 0x7ca   :  { %v4767_v46 = vmul.f32 0.2, %v4751_v13  ;;  %v14113_v6 = vmin.f32 %v14112_v14, 0.0  ;;  %v4536_v41 = vmax.f32 %v14114_v27, 0.0  ;;  %v4597_v29 = vmul.f32 %v4581_v1, %v10764_v62 }
 0x7cb   :  { %v4180_v28 = vadd.f32 %v4164_v4, %v4132_v10  ;;  %v4411_v63 = vadd.f32 %v4395_v20, %v4193_v18  ;;  %v4814_v32 = vadd.f32 %v4798_v30, %v4612_v51  ;;  %v4552_v60 = vmin.f32 %v14114_v27, 0.0  ;;  %v14123_v10 = vld [vmem:[#allocation40_spill] sm:$0xff] }
 0x7cc   :  { %v4366_v45 = vmul.f32 0.2, %v14113_v6  ;;  %v4783_v31 = vadd.f32 %v4767_v46, %v4735_v36  ;;  %v4722_v40 = vadd.f32 %v14115_v34, %v10695_v25  ;;  %v4133_v0 = vmax.f32 %v14116_v5, 0.0  ;;  %v14126_v46 = vld [vmem:[#allocation127_spill] sm:$0xff] }
 0x7cd   :  { %v4196_v50 = vmul.f32 %v4180_v28, %v10747_v43  ;;  %4836 = vadd.xlane.f32.xlu0 %v4814_v32  ;;  %v4613_v53 = vadd.f32 %v4597_v29, %v4411_v63  ;;  %v4568_v44 = vmul.f32 0.2, %v4552_v60  ;;  %v14117_v11 = vmin.f32 %v14116_v5, 0.0  ;;  %v14128_v29 = vld [vmem:[#allocation81_spill] sm:$0xff] }
 0x7ce   :  { %v4382_v59 = vadd.f32 %v4366_v45, %v4334_v9  ;;  %v4335_v49 = vmax.f32 %v14118_v33, 0.0  ;;  %v4799_v15 = vmul.f32 %v4783_v31, %v10768_v2  ;;  %v4738_v26 = vmax.f32 %v4722_v40, 0.0 }
 0x7cf   :  { %v4165_v55 = vmul.f32 0.2, %v14117_v11  ;;  %v4754_v19 = vmin.f32 %v4722_v40, 0.0  ;;  %v4584_v17 = vadd.f32 %v4568_v44, %v4536_v41  ;;  %v14119_v21 = vmin.f32 %v14118_v33, 0.0 }
 0x7d0   :  { %v4398_v23 = vmul.f32 %v4382_v59, %v10751_v57  ;;  %v4537_v61 = vmax.f32 %v14120_v12, 0.0  ;;  %v4815_v58 = vadd.f32 %v4799_v15, %v4613_v53  ;;  %v4553_v35 = vmin.f32 %v14120_v12, 0.0  ;;  %v14129_v53 = vld [vmem:[#allocation112_spill] sm:$0xff] }
 0x7d1   :  { %v4181_v48 = vadd.f32 %v4165_v55, %v4133_v0  ;;  %v4367_v37 = vmul.f32 0.2, %v14119_v21  ;;  %v4770_v3 = vmul.f32 0.2, %v4754_v19  ;;  %v4600_v47 = vmul.f32 %v4584_v17, %v10764_v62 }
 0x7d2   :  { %v4414_v56 = vadd.f32 %v4398_v23, %v4196_v50  ;;  %v4723_v54 = vadd.f32 %v14115_v34, %v10699_v42  ;;  %4838 = vadd.xlane.f32.xlu1 %v4815_v58  ;;  %v4569_v7 = vmul.f32 0.2, %v4553_v35  ;;  %v4134_v39 = vmax.f32 %v14121_v16, 0.0  ;;  %v14131_v23 = vld [vmem:[#allocation128_spill] sm:$0xff] }
 0x7d3   :  { %v4197_v24 = vmul.f32 %v4181_v48, %v10747_v43  ;;  %v4383_v22 = vadd.f32 %v4367_v37, %v4335_v49  ;;  %v4786_v18 = vadd.f32 %v4770_v3, %v4738_v26  ;;  %v14122_v38 = vmin.f32 %v14121_v16, 0.0  ;;  %v14134_v16 = vld [vmem:[#allocation97_spill] sm:$0xff] }
 0x7d4   :  { %v14125_v4 = vcombine.high %v14124_v52, %v14124_v52  ;;  %v4616_v20 = vadd.f32 %v4600_v47, %v4414_v56  ;;  %v4755_v13 = vmin.f32 %v4723_v54, 0.0  ;;  %v4585_v1 = vadd.f32 %v4569_v7, %v4537_v61  ;;  %v14133_v56 = vld [vmem:[#allocation101_spill] sm:$0xff] }
 0x7d5   :  { %v4166_v8 = vmul.f32 0.2, %v14122_v38  ;;  %v4399_v36 = vmul.f32 %v4383_v22, %v10751_v57  ;;  %v4802_v30 = vmul.f32 %v4786_v18, %v10768_v2  ;;  %v4739_v28 = vmax.f32 %v4723_v54, 0.0 }
 0x7d6   :  { %v4699_v51 = vrot.slane %v14125_v4, %v14123_v10  ;;  %v4771_v63 = vmul.f32 0.2, %v4755_v13  ;;  %v4336_v6 = vmax.f32 %v14126_v46, 0.0  ;;  %v14127_v45 = vmin.f32 %v14126_v46, 0.0 }
 0x7d7   :  { %v4182_v14 = vadd.f32 %v4166_v8, %v4134_v39  ;;  %v4415_v9 = vadd.f32 %v4399_v36, %v4197_v24  ;;  %v4818_v41 = vadd.f32 %v4802_v30, %v4616_v20  ;;  %v4601_v32 = vmul.f32 %v4585_v1, %v10764_v62 }
 0x7d8   :  { %v4368_v27 = vmul.f32 0.2, %v14127_v45  ;;  %v4538_v50 = vmax.f32 %v14128_v29, 0.0  ;;  %v4554_v60 = vmin.f32 %v14128_v29, 0.0  ;;  %v4787_v31 = vadd.f32 %v4771_v63, %v4739_v28  ;;  %v14135_v28 = vld [vmem:[#allocation55_spill] sm:$0xff]  ;;  %v14136_v45 = vld [vmem:[#allocation44_spill] sm:$0xff] }
 0x7d9   :  { %v4198_v59 = vmul.f32 %v4182_v14, %v10747_v43  ;;  %v4724_v40 = vadd.f32 %v4699_v51, %v10695_v25  ;;  %4844 = vadd.xlane.f32.xlu0 %v4818_v41  ;;  %v4617_v5 = vadd.f32 %v4601_v32, %v4415_v9  ;;  %v4135_v44 = vmax.f32 %v14129_v53, 0.0 }
 0x7da   :  { %v4384_v34 = vadd.f32 %v4368_v27, %v4336_v6  ;;  %v4570_v0 = vmul.f32 0.2, %v4554_v60  ;;  %v14130_v11 = vmin.f32 %v14129_v53, 0.0  ;;  %v4803_v33 = vmul.f32 %v4787_v31, %v10768_v2 }
 0x7db   :  { %v4756_v15 = vmin.f32 %v4724_v40, 0.0  ;;  %v4337_v26 = vmax.f32 %v14131_v23, 0.0  ;;  %v4740_v17 = vmax.f32 %v4724_v40, 0.0  ;;  %v14132_v21 = vmin.f32 %v14131_v23, 0.0 }
 0x7dc   :  { %v4167_v55 = vmul.f32 0.2, %v14130_v11  ;;  %v4400_v49 = vmul.f32 %v4384_v34, %v10751_v57  ;;  %v4586_v19 = vadd.f32 %v4570_v0, %v4538_v50  ;;  %v4819_v12 = vadd.f32 %v4803_v33, %v4617_v5  ;;  %v14137_v50 = vld [vmem:[#allocation77_spill] sm:$0xff]  ;;  %v14138_v34 = vld [vmem:[#allocation116_spill] sm:$0xff] }
 0x7dd   :  { %v4369_v37 = vmul.f32 0.2, %v14132_v21  ;;  %v4772_v58 = vmul.f32 0.2, %v4756_v15  ;;  %v4555_v3 = vmin.f32 %v14133_v56, 0.0  ;;  %v4725_v22 = vadd.f32 %v4699_v51, %v10699_v42  ;;  %v14139_v15 = vld [vmem:[#allocation70_spill] sm:$0xff] }
 0x7de   :  { %v4183_v48 = vadd.f32 %v4167_v55, %v4135_v44  ;;  %v4416_v61 = vadd.f32 %v4400_v49, %v4198_v59  ;;  %v4602_v35 = vmul.f32 %v4586_v19, %v10764_v62  ;;  %4846 = vadd.xlane.f32.xlu1 %v4819_v12  ;;  %v4539_v18 = vmax.f32 %v14133_v56, 0.0  ;;  %v14140_v12 = vld [vmem:[#allocation83_spill] sm:$0xff] }
 0x7df   :  { %v4385_v24 = vadd.f32 %v4369_v37, %v4337_v26  ;;  %v4788_v54 = vadd.f32 %v4772_v58, %v4740_v17  ;;  %v4571_v7 = vmul.f32 0.2, %v4555_v3  ;;  %v3296_v39 = vmin.f32 %v14134_v16, 0.0 }
 0x7e0   :  { %v4199_v47 = vmul.f32 %v4183_v48, %v10747_v43  ;;  %v4618_v38 = vadd.f32 %v4602_v35, %v4416_v61  ;;  %v4757_v52 = vmin.f32 %v4725_v22, 0.0  ;;  %v3280_v4 = vmax.f32 %v14134_v16, 0.0  ;;  %v14142_v16 = vld [vmem:[#allocation132_spill] sm:$0xff] }
 0x7e1   :  { %v4401_v8 = vmul.f32 %v4385_v24, %v10751_v57  ;;  %v4804_v20 = vmul.f32 %v4788_v54, %v10768_v2  ;;  %v4587_v36 = vadd.f32 %v4571_v7, %v4539_v18  ;;  %v4741_v13 = vmax.f32 %v4725_v22, 0.0  ;;  %v14141_v18 = vld [vmem:[#allocation92_spill] sm:$0xff] }
 0x7e2   :  { %v3312_v30 = vmul.f32 0.2, %v3296_v39  ;;  %v4773_v51 = vmul.f32 0.2, %v4757_v52  ;;  %v3486_v14 = vmax.f32 %v14135_v28, 0.0  ;;  %v3502_v9 = vmin.f32 %v14135_v28, 0.0 }
 0x7e3   :  { %v4417_v1 = vadd.f32 %v4401_v8, %v4199_v47  ;;  %v4820_v63 = vadd.f32 %v4804_v20, %v4618_v38  ;;  %v4603_v46 = vmul.f32 %v4587_v36, %v10764_v62  ;;  %v3708_v27 = vmin.f32 %v14136_v45, 0.0 }
 0x7e4   :  { %v3328_v6 = vadd.f32 %v3312_v30, %v3280_v4  ;;  %v4789_v41 = vadd.f32 %v4773_v51, %v4741_v13  ;;  %v3518_v32 = vmul.f32 0.2, %v3502_v9  ;;  %v3692_v29 = vmax.f32 %v14136_v45, 0.0  ;;  %v14145_v45 = vld [vmem:[#allocation94_spill] sm:$0xff] }
 0x7e5   :  { %v3882_v60 = vadd.f32 %v14137_v50, %v10695_v25  ;;  %4848 = vadd.xlane.f32.xlu0 %v4820_v63  ;;  %v4619_v31 = vadd.f32 %v4603_v46, %v4417_v1  ;;  %v3724_v59 = vmul.f32 0.2, %v3708_v27  ;;  %v3281_v40 = vmax.f32 %v14138_v34, 0.0 }
 0x7e6   :  { %v3297_v5 = vmin.f32 %v14138_v34, 0.0  ;;  %v4805_v0 = vmul.f32 %v4789_v41, %v10768_v2  ;;  %v3348_v53 = vmul.f32 %v10747_v43, %v3328_v6  ;;  %v3534_v44 = vadd.f32 %v3518_v32, %v3486_v14  ;;  %v14144_v14 = vld [vmem:[#allocation129_spill] sm:$0xff]  ;;  %v14146_v34 = vld [vmem:[#allocation120_spill] sm:$0xff] }
 0x7e7   :  { %v3914_v11 = vmin.f32 %v3882_v60, 0.0  ;;  %v3740_v55 = vadd.f32 %v3724_v59, %v3692_v29  ;;  %v3898_v33 = vmax.f32 %v3882_v60, 0.0  ;;  %v3503_v23 = vmin.f32 %v14139_v15, 0.0 }
 0x7e8   :  { %v3313_v49 = vmul.f32 0.2, %v3297_v5  ;;  %v4821_v26 = vadd.f32 %v4805_v0, %v4619_v31  ;;  %v3554_v19 = vmul.f32 %v10751_v57, %v3534_v44  ;;  %v3487_v48 = vmax.f32 %v14139_v15, 0.0 }
 0x7e9   :  { %v3930_v17 = vmul.f32 0.2, %v3914_v11  ;;  %v3519_v37 = vmul.f32 0.2, %v3503_v23  ;;  %v3693_v61 = vmax.f32 %v14140_v12, 0.0  ;;  %v3709_v58 = vmin.f32 %v14140_v12, 0.0 }
 0x7ea   :  { %v3329_v21 = vadd.f32 %v3313_v49, %v3281_v40  ;;  %4850 = vadd.xlane.f32.xlu1 %v4821_v26  ;;  %v3570_v56 = vadd.f32 %v3554_v19, %v3348_v53  ;;  %v3760_v3 = vmul.f32 %v10764_v62, %v3740_v55  ;;  %v3883_v47 = vadd.f32 %v14137_v50, %v10699_v42  ;;  %v14147_v49 = vld [vmem:[#allocation130_spill] sm:$0xff] }
 0x7eb   :  { %v3946_v35 = vadd.f32 %v3930_v17, %v3898_v33  ;;  %v3535_v22 = vadd.f32 %v3519_v37, %v3487_v48  ;;  %v3725_v54 = vmul.f32 0.2, %v3709_v58  ;;  %v4152_v7 = vmin.f32 %v14141_v18, 0.0  ;;  %v14148_v37 = vld [vmem:[#allocation114_spill] sm:$0xff] }
 0x7ec   :  { %v3349_v24 = vmul.f32 %v10747_v43, %v3329_v21  ;;  %v14143_v39 = vcombine.high %v14142_v16, %v14142_v16  ;;  %v3776_v8 = vadd.f32 %v3760_v3, %v3570_v56  ;;  %v3915_v4 = vmin.f32 %v3883_v47, 0.0 }
 0x7ed   :  { %v3966_v52 = vmul.f32 %v10768_v2, %v3946_v35  ;;  %v3555_v20 = vmul.f32 %v10751_v57, %v3535_v22  ;;  %v3741_v36 = vadd.f32 %v3725_v54, %v3693_v61  ;;  %v4136_v13 = vmax.f32 %v14141_v18, 0.0 }
 0x7ee   :  { %v4703_v38 = vrot.slane %v14143_v39, %v14123_v10  ;;  %v4168_v30 = vmul.f32 0.2, %v4152_v7  ;;  %v3899_v51 = vmax.f32 %v3883_v47, 0.0  ;;  %v3931_v28 = vmul.f32 0.2, %v3915_v4 }
 0x7ef   :  { %v3982_v1 = vadd.f32 %v3966_v52, %v3776_v8  ;;  %v4354_v9 = vmin.f32 %v14144_v14, 0.0  ;;  %v3571_v63 = vadd.f32 %v3555_v20, %v3349_v24  ;;  %v3761_v46 = vmul.f32 %v10764_v62, %v3741_v36 }
 0x7f0   :  { %v4184_v6 = vadd.f32 %v4168_v30, %v4136_v13  ;;  %v4556_v27 = vmin.f32 %v14145_v45, 0.0  ;;  %v3947_v41 = vadd.f32 %v3931_v28, %v3899_v51  ;;  %v4338_v32 = vmax.f32 %v14144_v14, 0.0  ;;  %v3985_v30 = vpop.xlane.xlu0 %3984 }
 0x7f1   :  { %4012 = vadd.xlane.f32.xlu0 %v3982_v1  ;;  %v4370_v29 = vmul.f32 0.2, %v4354_v9  ;;  %v4726_v50 = vadd.f32 %v4703_v38, %v10695_v25  ;;  %v3777_v60 = vadd.f32 %v3761_v46, %v3571_v63  ;;  %v4540_v31 = vmax.f32 %v14145_v45, 0.0  ;;  %v3989_v1 = vpop.xlane.xlu1 %3988 }
 0x7f2   :  { %v4572_v59 = vmul.f32 0.2, %v4556_v27  ;;  %v4153_v40 = vmin.f32 %v14146_v34, 0.0  ;;  %v3967_v5 = vmul.f32 %v10768_v2, %v3947_v41  ;;  %v4200_v0 = vmul.f32 %v4184_v6, %v10747_v43 }
 0x7f3   :  { %v4386_v53 = vadd.f32 %v4370_v29, %v4338_v32  ;;  %v4758_v44 = vmin.f32 %v4726_v50, 0.0  ;;  %v4137_v55 = vmax.f32 %v14146_v34, 0.0  ;;  %v4355_v15 = vmin.f32 %v14147_v49, 0.0 }
 0x7f4   :  { %v4588_v11 = vadd.f32 %v4572_v59, %v4540_v31  ;;  %v4169_v33 = vmul.f32 0.2, %v4153_v40  ;;  %v3983_v23 = vadd.f32 %v3967_v5, %v3777_v60  ;;  %v4742_v26 = vmax.f32 %v4726_v50, 0.0  ;;  %v3987_v51 = vpop.xlane.xlu0 %3986 }
 0x7f5   :  { %v4402_v25 = vmul.f32 %v4386_v53, %v10751_v57  ;;  %v4774_v19 = vmul.f32 0.2, %v4758_v44  ;;  %v4339_v48 = vmax.f32 %v14147_v49, 0.0  ;;  %v4371_v21 = vmul.f32 0.2, %v4355_v15  ;;  %v3991_v28 = vpop.xlane.xlu1 %3990  ;;  %v14149_v44 = vld [vmem:[#allocation67_spill] sm:$0xff] }
 0x7f6   :  { %v4185_v17 = vadd.f32 %v4169_v33, %v4137_v55  ;;  %v4557_v12 = vmin.f32 %v14148_v37, 0.0  ;;  %4014 = vadd.xlane.f32.xlu1 %v3983_v23  ;;  %v4604_v58 = vmul.f32 %v4588_v11, %v10764_v62  ;;  %v4727_v3 = vadd.f32 %v4703_v38, %v10699_v42  ;;  %v14150_v33 = vld [vmem:[#allocation62_spill] sm:$0xff] }
 0x7f7   :  { %v4418_v61 = vadd.f32 %v4402_v25, %v4200_v0  ;;  %v4790_v56 = vadd.f32 %v4774_v19, %v4742_v26  ;;  %v4387_v47 = vadd.f32 %v4371_v21, %v4339_v48  ;;  %v4541_v24 = vmax.f32 %v14148_v37, 0.0 }
 0x7f8   :  { %v4201_v35 = vmul.f32 %v4185_v17, %v10747_v43  ;;  %v4573_v22 = vmul.f32 0.2, %v4557_v12  ;;  %v4759_v7 = vmin.f32 %v4727_v3, 0.0  ;;  %v4743_v52 = vmax.f32 %v4727_v3, 0.0  ;;  %v11853_v14 = vpop.xlane.xlu0 %4824 }
 0x7f9   :  { %v4620_v54 = vadd.f32 %v4604_v58, %v4418_v61  ;;  %v4806_v18 = vmul.f32 %v4790_v56, %v10768_v2  ;;  %v4403_v16 = vmul.f32 %v4387_v47, %v10751_v57  ;;  %v11855_v57 = vpop.xlane.xlu1 %4826  ;;  %v4888_v11 = vrot.slane %v3991_v28, %v14149_v44 }
 0x7fa   :  { %v4589_v39 = vadd.f32 %v4573_v22, %v4541_v24  ;;  %v4775_v4 = vmul.f32 0.2, %v4759_v7  ;;  %v4884_v49 = vrot.slane %v3989_v1, %v14150_v33  ;;  %v4879_v15 = vrot.slane %v3987_v51, %v14149_v44 }
 0x7fb   :  { %v4822_v8 = vadd.f32 %v4806_v18, %v4620_v54  ;;  %v4419_v20 = vadd.f32 %v4403_v16, %v4201_v35  ;;  %v4875_v19 = vrot.slane %v3985_v30, %v14150_v33 }
 0x7fc   :  { %v4605_v36 = vmul.f32 %v4589_v39, %v10764_v62  ;;  %v4791_v42 = vadd.f32 %v4775_v4, %v4743_v52  ;;  %v3993_v9 = vpop.xlane.xlu0 %3992  ;;  %v4889_v17 = vsel %vm2185_vm3, %v4888_v11, %v4884_v49 }
 0x7fd   :  { %4852 = vadd.xlane.f32.xlu0 %v4822_v8  ;;  %v4893_v25 = vrot.slane %v3993_v9, %v14150_v33  ;;  %v4880_v12 = vsel %vm2185_vm3, %v4879_v15, %v4875_v19 }
 0x7fe   :  { %v4621_v43 = vadd.f32 %v4605_v36, %v4419_v20  ;;  %v4807_v38 = vmul.f32 %v4791_v42, %v10768_v2  ;;  %v4944_v56 = vsel %vm2250_vm4, %v4889_v17, %v4880_v12 }
 0x800   :  { %v4823_v13 = vadd.f32 %v4807_v38, %v4621_v43  ;;  %v4975_v43 = vrot.slane %v11855_v57, %v14149_v44 }
 0x801   :  { %v3995_v63 = vpop.xlane.xlu1 %3994 }
 0x802   :  { %4854 = vadd.xlane.f32.xlu1 %v4823_v13  ;;  %v4897_v55 = vrot.slane %v3995_v63, %v14149_v44 }
 0x804   :  { %v4898_v21 = vsel %vm2185_vm3, %v4897_v55, %v4893_v25 }
 0x805   :  { %v4945_v47 = vsel %vm2252_vm5, %v4898_v21, %v4944_v56  ;;  %v14152_v21 = vld [vmem:[#allocation38_spill] sm:$0xff] }
 0x807   :  { %v4001_v46 = vpop.xlane.xlu0 %4000 }
 0x808   :  { %v4911_v22 = vrot.slane %v4001_v46, %v14150_v33  ;;  %v4971_v46 = vrot.slane %v11853_v14, %v14150_v33 }
 0x80d   :  { %v4003_v6 = vpop.xlane.xlu1 %4002 }
 0x80e   :  { %v4915_v3 = vrot.slane %v4003_v6, %v14149_v44 }
 0x810   :  { %v4916_v39 = vsel %vm2185_vm3, %v4915_v3, %v4911_v22 }
 0x813   :  { %v4829_v62 = vpop.xlane.xlu0 %4828 }
 0x814   :  { %v4980_v30 = vrot.slane %v4829_v62, %v14150_v33 }
 0x818   :  { %v4831_v45 = vpop.xlane.xlu1 %4830 }
 0x819   :  { %v4984_v4 = vrot.slane %v4831_v45, %v14149_v44  ;;  %v14151_v45 = vld [vmem:[#allocation37_spill] sm:$0xff] }
 0x81b   :  { %v4985_v57 = vsel %vm2185_vm3, %v4984_v4, %v4980_v30 }
 0x81d   :  { %v4833_v27 = vpop.xlane.xlu0 %4832 }
 0x81e   :  { %v4989_v9 = vrot.slane %v4833_v27, %v14150_v33 }
 0x823   :  { %v4835_v41 = vpop.xlane.xlu1 %4834 }
 0x824   :  { %v4993_v38 = vrot.slane %v4835_v41, %v14149_v44 }
 0x826   :  { %v4994_v62 = vsel %vm2185_vm3, %v4993_v38, %v4989_v9 }
 0x82b   :  { %v3997_v32 = vpop.xlane.xlu0 %3996 }
 0x82c   :  { %v4902_v48 = vrot.slane %v3997_v32, %v14150_v33  ;;  %v4976_v32 = vsel %vm2185_vm3, %v4975_v43, %v4971_v46  ;;  %v14154_v43 = vld [vmem:[#allocation29_spill] sm:$0xff] }
 0x831   :  { %v3999_v2 = vpop.xlane.xlu1 %3998 }
 0x832   :  { %v4906_v23 = vrot.slane %v3999_v2, %v14149_v44 }
 0x834   :  { %v4907_v61 = vsel %vm2185_vm3, %v4906_v23, %v4902_v48 }
 0x835   :  { %v4946_v54 = vsel %vm2254_vm6, %v4907_v61, %v4945_v47 }
 0x836   :  { %v11857_v29 = vpop.xlane.xlu0 %4840  ;;  %v4947_v20 = vsel %vm2256_vm7, %v4916_v39, %v4946_v54 }
 0x83b   :  { %v11859_v50 = vpop.xlane.xlu1 %4842 }
 0x83c   :  { %v5011_v14 = vrot.slane %v11859_v50, %v14149_v44 }
 0x841   :  { %v4005_v60 = vpop.xlane.xlu0 %4004 }
 0x842   :  { %v4920_v24 = vrot.slane %v4005_v60, %v14150_v33 }
 0x848   :  { %v4007_v31 = vpop.xlane.xlu1 %4006 }
 0x849   :  { %v4924_v58 = vrot.slane %v4007_v31, %v14149_v44  ;;  %v5040_v31 = vsel %vm2250_vm4, %v4985_v57, %v4976_v32 }
 0x84b   :  { %v4925_v16 = vsel %vm2185_vm3, %v4924_v58, %v4920_v24 }
 0x84c   :  { %v4948_v13 = vsel %vm2258_vm8, %v4925_v16, %v4947_v20 }
 0x84e   :  { %v4009_v59 = vpop.xlane.xlu0 %4008 }
 0x84f   :  { %v4929_v18 = vrot.slane %v4009_v59, %v14150_v33 }
 0x853   :  { %v4011_v34 = vpop.xlane.xlu1 %4010 }
 0x854   :  { %v4933_v35 = vrot.slane %v4011_v34, %v14149_v44  ;;  %v5041_v34 = vsel %vm2252_vm5, %v4994_v62, %v5040_v31 }
 0x856   :  { %v4934_v8 = vsel %vm2185_vm3, %v4933_v35, %v4929_v18 }
 0x857   :  { %v4949_v1 = vsel %vm2260_vm9, %v4934_v8, %v4948_v13  ;;  %v14155_v13 = vld [vmem:[#allocation31_spill] sm:$0xff] }
 0x85a   :  { %v4837_v40 = vpop.xlane.xlu0 %4836 }
 0x85b   :  { %v4998_v6 = vrot.slane %v4837_v40, %v14150_v33 }
 0x85f   :  { %v4839_v5 = vpop.xlane.xlu1 %4838 }
 0x860   :  { %v5002_v51 = vrot.slane %v4839_v5, %v14149_v44  ;;  %v5007_v5 = vrot.slane %v11857_v29, %v14150_v33 }
 0x862   :  { %v5003_v2 = vsel %vm2185_vm3, %v5002_v51, %v4998_v6  ;;  %v5012_v50 = vsel %vm2185_vm3, %v5011_v14, %v5007_v5 }
 0x866   :  { %v11861_v0 = vpop.xlane.xlu0 %4844 }
 0x867   :  { %v5016_v40 = vrot.slane %v11861_v0, %v14150_v33 }
 0x86b   :  { %v11863_v53 = vpop.xlane.xlu1 %4846 }
 0x86c   :  { %v5020_v27 = vrot.slane %v11863_v53, %v14149_v44  ;;  %v5042_v53 = vsel %vm2254_vm6, %v5003_v2, %v5041_v34 }
 0x86d   :  { %v5043_v25 = vsel %vm2256_vm7, %v5012_v50, %v5042_v53 }
 0x86e   :  { %v5021_v49 = vsel %vm2185_vm3, %v5020_v27, %v5016_v40 }
 0x86f   :  { %v5044_v29 = vsel %vm2258_vm8, %v5021_v49, %v5043_v25 }
 0x872   :  { %v4849_v26 = vpop.xlane.xlu0 %4848 }
 0x873   :  { %v5025_v11 = vrot.slane %v4849_v26, %v14150_v33 }
 0x877   :  { %v4851_v37 = vpop.xlane.xlu1 %4850 }
 0x878   :  { %v5029_v59 = vrot.slane %v4851_v37, %v14149_v44 }
 0x87a   :  { %v5030_v15 = vsel %vm2185_vm3, %v5029_v59, %v5025_v11 }
 0x87b   :  { %v5045_v17 = vsel %vm2260_vm9, %v5030_v15, %v5044_v29 }
 0x87e   :  { %v4013_v7 = vpop.xlane.xlu0 %4012 }
 0x87f   :  { %v4938_v36 = vrot.slane %v4013_v7, %v14150_v33 }
 0x883   :  { %v4015_v52 = vpop.xlane.xlu1 %4014 }
 0x884   :  { %v4942_v42 = vrot.slane %v4015_v52, %v14149_v44 }
 0x886   :  { %v4943_v28 = vsel %vm2185_vm3, %v4942_v42, %v4938_v36  ;;  %v14153_v36 = vld [vmem:[#allocation39_spill] sm:$0xff] }
 0x887   :  { %v4950_v63 = vsel %vm2262_vm10, %v4943_v28, %v4949_v1  ;;  %v5079_v42 = vsub.s32 7, %v14153_v36  ;;  %v14156_v1 = vld [vmem:[#allocation30_spill] sm:$0xff]  ;;  %v14157_v28 = vld [vmem:[#allocation32_spill] sm:$0xff] }
 0x888   :  { %v5048_v41 = vadd.f32 %v4950_v63, %v14151_v45 }
 0x889   :  { %v5080_v38 = vrot.slane %v14154_v43, %v5079_v42  ;;  %v5088_v30 = vrot.slane %v14155_v13, %v5079_v42  ;;  %v5084_v51 = vrot.slane %v14156_v1, %v5079_v42  ;;  %v5092_v9 = vrot.slane %v14157_v28, %v5079_v42 }
 0x88a   :  { %v5050_v60 = vsel %vm2363_vm11, %v5048_v41, -inf  ;;  %v4853_v55 = vpop.xlane.xlu0 %4852 }
 0x88b   :  { %5051 = vmax.xlane.f32.xlu0 %v5050_v60  ;;  %v5034_v19 = vrot.slane %v4853_v55, %v14150_v33 }
 0x88f   :  { %v4855_v23 = vpop.xlane.xlu1 %4854 }
 0x890   :  { %v5038_v0 = vrot.slane %v4855_v23, %v14149_v44 }
 0x892   :  { %v5039_v26 = vsel %vm2185_vm3, %v5038_v0, %v5034_v19 }
 0x893   :  { %v5046_v48 = vsel %vm2262_vm10, %v5039_v26, %v5045_v17 }
 0x894   :  { %v5049_v37 = vadd.f32 %v5046_v48, %v14152_v21 }
 0x896   :  { %v5053_v12 = vsel %vm2363_vm11, %v5049_v37, -inf }
 0x897   :  { %5054 = vmax.xlane.f32.xlu1 %v5053_v12 }
 0x918   :  { %v5052_v61 = vpop.xlane.xlu0 %5051 }
 0x919   :  { %v5056_v58 = vsub.f32 %v5048_v41, %v5052_v61 }
 0x91b   :  { %v5058_v56 = vmul.f32 1.442695, %v5056_v58 }
 0x91d   :  { %9202 = vpow2.f32 %v5058_v56 }
 0x924   :  { %v5055_v3 = vpop.xlane.xlu1 %5054 }
 0x925   :  { %v5057_v35 = vsub.f32 %v5049_v37, %v5055_v3 }
 0x927   :  { %v9203_v47 = vpop.eup %9202  ;;  %v5060_v24 = vmul.f32 1.442695, %v5057_v35 }
 0x928   :  { %v5062_v22 = vsel %vm2363_vm11, %v9203_v47, 0.0 }
 0x929   :  { %9204 = vpow2.f32 %v5060_v24  ;;  %5063 = vadd.xlane.f32.xlu0 %v5062_v22 }
 0x933   :  { %v9205_v54 = vpop.eup %9204 }
 0x934   :  { %v5065_v18 = vsel %vm2363_vm11, %v9205_v54, 0.0 }
 0x935   :  { %5066 = vadd.xlane.f32.xlu1 %v5065_v18 }
 0x9b6   :  { %v5064_v7 = vpop.xlane.xlu0 %5063 }
 0x9b7   :  { %9206 = vrcp.f32 %v5064_v7 }
 0x9c1   :  { %v9207_v39 = vpop.eup %9206 }
 0x9c2   :  { %v5067_v16 = vpop.xlane.xlu1 %5066  ;;  %v5069_v52 = vmul.f32 %v9207_v39, %v9203_v47 }
 0x9c3   :  { %9208 = vrcp.f32 %v5067_v16 }
 0x9cd   :  { %v9209_v8 = vpop.eup %9208 }
 0x9ce   :  { %v5071_v4 = vmul.f32 %v9209_v8, %v9205_v54 }
 0x9d0   :  { %v5072_v20 = vpack.c.bf16 %v5071_v4, %v5069_v52 }
 0x9d2   :  { %9060 = vmatmul.mubr.msk.bf16.vlgmr.msra.gmra.mrb[20].mxu0 %vm2363_vm11, %v5072_v20  ;;  %9061 = vmatmul.mubr.msk.bf16.vlgmr.msra.gmra.mrb[20].mxu1 %vm2363_vm11, %v5072_v20 }
 0xaa5   :  { %v5130_v63 = vpop.f32.mrb[20].mxu0  ;;  %v5173_v46 = vpop.f32.mrb[20].mxu1 }
 0xaa6   :  { %v5131_v57 = vadd.f32 %v5130_v63, %v5080_v38  ;;  %v5174_v6 = vadd.f32 %v5173_v46, %v5088_v30  ;;  %v5132_v41 = vpop.f32.mrb[21].mxu0  ;;  %v5175_v62 = vpop.f32.mrb[21].mxu1 }
 0xaa7   :  { %v5133_v32 = vadd.f32 %v5132_v41, %v5084_v51  ;;  %v5176_v2 = vadd.f32 %v5175_v62, %v5092_v9  ;;  %v5134_v27 = vpop.f32.mrb[22].mxu0  ;;  %v5177_v60 = vpop.f32.mrb[22].mxu1 }
 0xaa8   :  { %9210 = vtanh.f32 %v5131_v57  ;;  %v5135_v31 = vadd.f32 %v5134_v27, %v5080_v38  ;;  %v5136_v14 = vpop.f32.mrb[23].mxu0  ;;  %v5179_v59 = vpop.f32.mrb[23].mxu1  ;;  %v5178_v34 = vadd.f32 %v5177_v60, %v5088_v30 }
 0xaa9   :  { %9212 = vtanh.f32 %v5174_v6  ;;  %v5137_v40 = vadd.f32 %v5136_v14, %v5084_v51  ;;  %v5180_v5 = vadd.f32 %v5179_v59, %v5092_v9 }
 0xaaa   :  { %9214 = vtanh.f32 %v5133_v32 }
 0xaab   :  { %9216 = vtanh.f32 %v5176_v2 }
 0xaac   :  { %9218 = vtanh.f32 %v5135_v31 }
 0xaad   :  { %9220 = vtanh.f32 %v5178_v34 }
 0xaae   :  { %9222 = vtanh.f32 %v5137_v40 }
 0xaaf   :  { %9224 = vtanh.f32 %v5180_v5 }
 0xab2   :  { %v9211_v53 = vpop.eup %9210 }
 0xab3   :  { %v9213_v11 = vpop.eup %9212 }
 0xab4   :  { %v9215_v55 = vpop.eup %9214 }
 0xab5   :  { %v9217_v49 = vpop.eup %9216 }
 0xab6   :  { %v9219_v50 = vpop.eup %9218 }
 0xab7   :  { %v9221_v15 = vpop.eup %9220  ;;  %v11946_v23 = vpack.c.bf16 %v9219_v50, %v9211_v53 }
 0xab8   :  { %v9223_v25 = vpop.eup %9222  ;;  %v11948_v19 = vpack.c.bf16 %v9221_v15, %v9213_v11 }
 0xab9   :  { %v9225_v0 = vpop.eup %9224  ;;  %v11950_v29 = vpack.c.bf16 %v9223_v25, %v9215_v55 }
 0xaba   :  { %v11952_v17 = vpack.c.bf16 %v9225_v0, %v9217_v49 }
 0xabb   :  { %9370 = dma.done.wait [#allocation6 + $0x2], 32768 }
 0xabc   :  { %9371 = vsyncadd [#allocation6 + $0x2], 4294934528  ;;  %5484 = vmatprep.mubr.bf16.mxu0 %v11950_v29  ;;  %5570 = vmatprep.mubr.bf16.mxu1 %v11950_v29  ;;  %v5197_v26 = vld [vmem:[#allocation4 + $0x8] sm:$0xff]  ;;  %v5199_v48 = vld [vmem:[#allocation4 + $0x18] sm:$0xff] }
 0xabd   :  { %v5196_v37 = vld [vmem:[#allocation4] sm:$0xff]  ;;  %5452 = vmatprep.subr.bf16.mxu0 %v5197_v26  ;;  %5538 = vmatprep.subr.bf16.mxu1 %v5199_v48  ;;  %v5198_v12 = vld [vmem:[#allocation4 + $0x10] sm:$0xff]  ;;  %v5205_v61 = vld [vmem:[#allocation4 + $0x48] sm:$0xff] }
 0xabe   :  { %v5207_v58 = vld [vmem:[#allocation4 + $0x58] sm:$0xff]  ;;  %5453 = vmatpush1.bf16.msra.mxu0 %v5196_v37  ;;  %5539 = vmatpush1.bf16.msra.mxu1 %v5198_v12  ;;  %v5204_v56 = vld [vmem:[#allocation4 + $0x40] sm:$0xff]  ;;  %v5206_v3 = vld [vmem:[#allocation4 + $0x50] sm:$0xff] }
 0xabf   :  { %5454 = vmatprep.subr.bf16.mxu0 %v5205_v61  ;;  %5540 = vmatprep.subr.bf16.mxu1 %v5207_v58  ;;  %v5213_v35 = vld [vmem:[#allocation4 + $0x88] sm:$0xff]  ;;  %v5215_v47 = vld [vmem:[#allocation4 + $0x98] sm:$0xff]  ;;  %v5212_v24 = vld [vmem:[#allocation4 + $0x80] sm:$0xff] }
 0xac0   :  { %v5214_v22 = vld [vmem:[#allocation4 + $0x90] sm:$0xff]  ;;  %v5221_v54 = vld [vmem:[#allocation4 + $0xc8] sm:$0xff]  ;;  %v5223_v18 = vld [vmem:[#allocation4 + $0xd8] sm:$0xff] }
 0xac1   :  { %v5220_v7 = vld [vmem:[#allocation4 + $0xc0] sm:$0xff]  ;;  %v5222_v16 = vld [vmem:[#allocation4 + $0xd0] sm:$0xff]  ;;  %v5229_v39 = vld [vmem:[#allocation4 + $0x108] sm:$0xff] }
 0xac2   :  { %5455 = vmatpush1.bf16.msra.mxu0 %v5204_v56  ;;  %5541 = vmatpush1.bf16.msra.mxu1 %v5206_v3  ;;  %v5231_v8 = vld [vmem:[#allocation4 + $0x118] sm:$0xff]  ;;  %v5228_v52 = vld [vmem:[#allocation4 + $0x100] sm:$0xff]  ;;  %v5230_v4 = vld [vmem:[#allocation4 + $0x110] sm:$0xff] }
 0xac3   :  { %5456 = vmatprep.subr.bf16.mxu0 %v5213_v35  ;;  %5542 = vmatprep.subr.bf16.mxu1 %v5215_v47  ;;  %v5237_v20 = vld [vmem:[#allocation4 + $0x148] sm:$0xff]  ;;  %v5239_v36 = vld [vmem:[#allocation4 + $0x158] sm:$0xff]  ;;  %v5236_v42 = vld [vmem:[#allocation4 + $0x140] sm:$0xff] }
 0xac4   :  { %v5238_v43 = vld [vmem:[#allocation4 + $0x150] sm:$0xff]  ;;  %v5245_v38 = vld [vmem:[#allocation4 + $0x188] sm:$0xff]  ;;  %v5247_v13 = vld [vmem:[#allocation4 + $0x198] sm:$0xff] }
 0xac5   :  { %v5244_v30 = vld [vmem:[#allocation4 + $0x180] sm:$0xff]  ;;  %v5246_v1 = vld [vmem:[#allocation4 + $0x190] sm:$0xff]  ;;  %v5253_v51 = vld [vmem:[#allocation4 + $0x1c8] sm:$0xff] }
 0xac6   :  { %5457 = vmatpush1.bf16.msra.mxu0 %v5212_v24  ;;  %5543 = vmatpush1.bf16.msra.mxu1 %v5214_v22  ;;  %v5255_v28 = vld [vmem:[#allocation4 + $0x1d8] sm:$0xff]  ;;  %v5252_v9 = vld [vmem:[#allocation4 + $0x1c0] sm:$0xff]  ;;  %v5254_v63 = vld [vmem:[#allocation4 + $0x1d0] sm:$0xff] }
 0xac7   :  { %5458 = vmatprep.subr.bf16.mxu0 %v5221_v54  ;;  %5544 = vmatprep.subr.bf16.mxu1 %v5223_v18  ;;  %v5261_v46 = vld [vmem:[#allocation4 + $0x208] sm:$0xff]  ;;  %v5263_v57 = vld [vmem:[#allocation4 + $0x218] sm:$0xff]  ;;  %v5260_v6 = vld [vmem:[#allocation4 + $0x200] sm:$0xff] }
 0xac8   :  { %v5262_v41 = vld [vmem:[#allocation4 + $0x210] sm:$0xff]  ;;  %v5269_v62 = vld [vmem:[#allocation4 + $0x248] sm:$0xff]  ;;  %v5271_v32 = vld [vmem:[#allocation4 + $0x258] sm:$0xff] }
 0xac9   :  { %v5268_v2 = vld [vmem:[#allocation4 + $0x240] sm:$0xff]  ;;  %v5270_v27 = vld [vmem:[#allocation4 + $0x250] sm:$0xff]  ;;  %v5277_v60 = vld [vmem:[#allocation4 + $0x288] sm:$0xff] }
 0xaca   :  { %5459 = vmatpush1.bf16.msra.mxu0 %v5220_v7  ;;  %5545 = vmatpush1.bf16.msra.mxu1 %v5222_v16  ;;  %v5279_v31 = vld [vmem:[#allocation4 + $0x298] sm:$0xff]  ;;  %v5276_v14 = vld [vmem:[#allocation4 + $0x280] sm:$0xff]  ;;  %v5278_v59 = vld [vmem:[#allocation4 + $0x290] sm:$0xff] }
 0xacb   :  { %5460 = vmatprep.subr.bf16.mxu0 %v5229_v39  ;;  %5546 = vmatprep.subr.bf16.mxu1 %v5231_v8  ;;  %v5285_v34 = vld [vmem:[#allocation4 + $0x2c8] sm:$0xff]  ;;  %v5287_v40 = vld [vmem:[#allocation4 + $0x2d8] sm:$0xff]  ;;  %v5284_v5 = vld [vmem:[#allocation4 + $0x2c0] sm:$0xff] }
 0xacc   :  { %v5286_v53 = vld [vmem:[#allocation4 + $0x2d0] sm:$0xff]  ;;  %v5293_v11 = vld [vmem:[#allocation4 + $0x308] sm:$0xff]  ;;  %v5295_v55 = vld [vmem:[#allocation4 + $0x318] sm:$0xff] }
 0xacd   :  { %v5292_v49 = vld [vmem:[#allocation4 + $0x300] sm:$0xff]  ;;  %v5294_v50 = vld [vmem:[#allocation4 + $0x310] sm:$0xff]  ;;  %v5301_v15 = vld [vmem:[#allocation4 + $0x348] sm:$0xff] }
 0xace   :  { %5461 = vmatpush1.bf16.msra.mxu0 %v5228_v52  ;;  %5547 = vmatpush1.bf16.msra.mxu1 %v5230_v4  ;;  %v5303_v25 = vld [vmem:[#allocation4 + $0x358] sm:$0xff]  ;;  %v5300_v0 = vld [vmem:[#allocation4 + $0x340] sm:$0xff]  ;;  %v5302_v26 = vld [vmem:[#allocation4 + $0x350] sm:$0xff] }
 0xacf   :  { %5462 = vmatprep.subr.bf16.mxu0 %v5237_v20  ;;  %5548 = vmatprep.subr.bf16.mxu1 %v5239_v36  ;;  %v5309_v48 = vld [vmem:[#allocation4 + $0x388] sm:$0xff]  ;;  %v5311_v37 = vld [vmem:[#allocation4 + $0x398] sm:$0xff]  ;;  %v5308_v12 = vld [vmem:[#allocation4 + $0x380] sm:$0xff] }
 0xad0   :  { %v5310_v61 = vld [vmem:[#allocation4 + $0x390] sm:$0xff]  ;;  %v5317_v58 = vld [vmem:[#allocation4 + $0x3c8] sm:$0xff]  ;;  %v5319_v56 = vld [vmem:[#allocation4 + $0x3d8] sm:$0xff] }
 0xad1   :  { %v5316_v3 = vld [vmem:[#allocation4 + $0x3c0] sm:$0xff]  ;;  %v5318_v35 = vld [vmem:[#allocation4 + $0x3d0] sm:$0xff]  ;;  %v5325_v47 = vld [vmem:[#allocation4 + $0x408] sm:$0xff] }
 0xad2   :  { %5463 = vmatpush1.bf16.msra.mxu0 %v5236_v42  ;;  %5549 = vmatpush1.bf16.msra.mxu1 %v5238_v43  ;;  %v5327_v24 = vld [vmem:[#allocation4 + $0x418] sm:$0xff]  ;;  %v5324_v22 = vld [vmem:[#allocation4 + $0x400] sm:$0xff]  ;;  %v5326_v54 = vld [vmem:[#allocation4 + $0x410] sm:$0xff] }
 0xad3   :  { %5464 = vmatprep.subr.bf16.mxu0 %v5245_v38  ;;  %5550 = vmatprep.subr.bf16.mxu1 %v5247_v13  ;;  %v5333_v18 = vld [vmem:[#allocation4 + $0x448] sm:$0xff]  ;;  %v5335_v7 = vld [vmem:[#allocation4 + $0x458] sm:$0xff]  ;;  %v5332_v16 = vld [vmem:[#allocation4 + $0x440] sm:$0xff] }
 0xad4   :  { %v5334_v39 = vld [vmem:[#allocation4 + $0x450] sm:$0xff]  ;;  %v5341_v8 = vld [vmem:[#allocation4 + $0x488] sm:$0xff]  ;;  %v5343_v52 = vld [vmem:[#allocation4 + $0x498] sm:$0xff] }
 0xad5   :  { %v5340_v4 = vld [vmem:[#allocation4 + $0x480] sm:$0xff]  ;;  %v5342_v20 = vld [vmem:[#allocation4 + $0x490] sm:$0xff]  ;;  %v5349_v36 = vld [vmem:[#allocation4 + $0x4c8] sm:$0xff] }
 0xad6   :  { %5465 = vmatpush1.bf16.msra.mxu0 %v5244_v30  ;;  %5551 = vmatpush1.bf16.msra.mxu1 %v5246_v1  ;;  %v5351_v42 = vld [vmem:[#allocation4 + $0x4d8] sm:$0xff]  ;;  %v5348_v43 = vld [vmem:[#allocation4 + $0x4c0] sm:$0xff]  ;;  %v5350_v38 = vld [vmem:[#allocation4 + $0x4d0] sm:$0xff] }
 0xad7   :  { %5466 = vmatprep.subr.bf16.mxu0 %v5253_v51  ;;  %5552 = vmatprep.subr.bf16.mxu1 %v5255_v28  ;;  %v5357_v13 = vld [vmem:[#allocation4 + $0x508] sm:$0xff]  ;;  %v5359_v30 = vld [vmem:[#allocation4 + $0x518] sm:$0xff]  ;;  %v5356_v1 = vld [vmem:[#allocation4 + $0x500] sm:$0xff] }
 0xad8   :  { %v5358_v51 = vld [vmem:[#allocation4 + $0x510] sm:$0xff]  ;;  %v5365_v28 = vld [vmem:[#allocation4 + $0x548] sm:$0xff] }
 0xada   :  { %5467 = vmatpush1.bf16.msra.mxu0 %v5252_v9  ;;  %5553 = vmatpush1.bf16.msra.mxu1 %v5254_v63  ;;  %v5367_v9 = vld [vmem:[#allocation4 + $0x558] sm:$0xff]  ;;  %v5364_v63 = vld [vmem:[#allocation4 + $0x540] sm:$0xff] }
 0xadb   :  { %5468 = vmatprep.subr.bf16.mxu0 %v5261_v46  ;;  %5554 = vmatprep.subr.bf16.mxu1 %v5263_v57  ;;  %v5366_v46 = vld [vmem:[#allocation4 + $0x550] sm:$0xff]  ;;  %v5373_v57 = vld [vmem:[#allocation4 + $0x588] sm:$0xff] }
 0xade   :  { %5469 = vmatpush1.bf16.msra.mxu0 %v5260_v6  ;;  %5555 = vmatpush1.bf16.msra.mxu1 %v5262_v41  ;;  %v5375_v6 = vld [vmem:[#allocation4 + $0x598] sm:$0xff]  ;;  %v5372_v41 = vld [vmem:[#allocation4 + $0x580] sm:$0xff] }
 0xadf   :  { %5470 = vmatprep.subr.bf16.mxu0 %v5269_v62  ;;  %5556 = vmatprep.subr.bf16.mxu1 %v5271_v32  ;;  %v5374_v62 = vld [vmem:[#allocation4 + $0x590] sm:$0xff]  ;;  %v5381_v32 = vld [vmem:[#allocation4 + $0x5c8] sm:$0xff] }
 0xae2   :  { %5471 = vmatpush1.bf16.msra.mxu0 %v5268_v2  ;;  %5557 = vmatpush1.bf16.msra.mxu1 %v5270_v27  ;;  %v5383_v2 = vld [vmem:[#allocation4 + $0x5d8] sm:$0xff]  ;;  %v5380_v27 = vld [vmem:[#allocation4 + $0x5c0] sm:$0xff] }
 0xae3   :  { %5472 = vmatprep.subr.bf16.mxu0 %v5277_v60  ;;  %5558 = vmatprep.subr.bf16.mxu1 %v5279_v31  ;;  %v5382_v60 = vld [vmem:[#allocation4 + $0x5d0] sm:$0xff]  ;;  %v5389_v31 = vld [vmem:[#allocation4 + $0x608] sm:$0xff] }
 0xae6   :  { %5473 = vmatpush1.bf16.msra.mxu0 %v5276_v14  ;;  %5559 = vmatpush1.bf16.msra.mxu1 %v5278_v59  ;;  %v5391_v14 = vld [vmem:[#allocation4 + $0x618] sm:$0xff]  ;;  %v5388_v59 = vld [vmem:[#allocation4 + $0x600] sm:$0xff] }
 0xae7   :  { %5474 = vmatprep.subr.bf16.mxu0 %v5285_v34  ;;  %5560 = vmatprep.subr.bf16.mxu1 %v5287_v40  ;;  %v5390_v34 = vld [vmem:[#allocation4 + $0x610] sm:$0xff]  ;;  %v5397_v40 = vld [vmem:[#allocation4 + $0x648] sm:$0xff] }
 0xaea   :  { %5475 = vmatpush1.bf16.msra.mxu0 %v5284_v5  ;;  %5561 = vmatpush1.bf16.msra.mxu1 %v5286_v53  ;;  %v5399_v5 = vld [vmem:[#allocation4 + $0x658] sm:$0xff]  ;;  %v5396_v53 = vld [vmem:[#allocation4 + $0x640] sm:$0xff] }
 0xaeb   :  { %5476 = vmatprep.subr.bf16.mxu0 %v5293_v11  ;;  %5562 = vmatprep.subr.bf16.mxu1 %v5295_v55  ;;  %v5398_v11 = vld [vmem:[#allocation4 + $0x650] sm:$0xff]  ;;  %v5405_v55 = vld [vmem:[#allocation4 + $0x688] sm:$0xff] }
 0xaee   :  { %5477 = vmatpush1.bf16.msra.mxu0 %v5292_v49  ;;  %5563 = vmatpush1.bf16.msra.mxu1 %v5294_v50  ;;  %v5407_v49 = vld [vmem:[#allocation4 + $0x698] sm:$0xff]  ;;  %v5404_v50 = vld [vmem:[#allocation4 + $0x680] sm:$0xff] }
 0xaef   :  { %5478 = vmatprep.subr.bf16.mxu0 %v5301_v15  ;;  %5564 = vmatprep.subr.bf16.mxu1 %v5303_v25  ;;  %v5406_v15 = vld [vmem:[#allocation4 + $0x690] sm:$0xff]  ;;  %v5413_v25 = vld [vmem:[#allocation4 + $0x6c8] sm:$0xff] }
 0xaf2   :  { %5479 = vmatpush1.bf16.msra.mxu0 %v5300_v0  ;;  %5565 = vmatpush1.bf16.msra.mxu1 %v5302_v26  ;;  %v5415_v0 = vld [vmem:[#allocation4 + $0x6d8] sm:$0xff]  ;;  %v5412_v26 = vld [vmem:[#allocation4 + $0x6c0] sm:$0xff] }
 0xaf3   :  { %5480 = vmatprep.subr.bf16.mxu0 %v5309_v48  ;;  %5566 = vmatprep.subr.bf16.mxu1 %v5311_v37  ;;  %v5414_v48 = vld [vmem:[#allocation4 + $0x6d0] sm:$0xff]  ;;  %v5421_v37 = vld [vmem:[#allocation4 + $0x708] sm:$0xff] }
 0xaf6   :  { %5481 = vmatpush1.bf16.msra.mxu0 %v5308_v12  ;;  %5567 = vmatpush1.bf16.msra.mxu1 %v5310_v61  ;;  %v5423_v12 = vld [vmem:[#allocation4 + $0x718] sm:$0xff]  ;;  %v5420_v61 = vld [vmem:[#allocation4 + $0x700] sm:$0xff] }
 0xaf7   :  { %5482 = vmatprep.subr.bf16.mxu0 %v5317_v58  ;;  %5568 = vmatprep.subr.bf16.mxu1 %v5319_v56  ;;  %v5422_v58 = vld [vmem:[#allocation4 + $0x710] sm:$0xff]  ;;  %v5429_v56 = vld [vmem:[#allocation4 + $0x748] sm:$0xff] }
 0xafa   :  { %5483 = vmatpush1.bf16.msra.mxu0 %v5316_v3  ;;  %5569 = vmatpush1.bf16.msra.mxu1 %v5318_v35  ;;  %v5431_v3 = vld [vmem:[#allocation4 + $0x758] sm:$0xff]  ;;  %v5428_v35 = vld [vmem:[#allocation4 + $0x740] sm:$0xff] }
 0xafb   :  { %5495 = vmatprep.subr.bf16.mxu0 %v5325_v47  ;;  %5581 = vmatprep.subr.bf16.mxu1 %v5327_v24  ;;  %v5430_v47 = vld [vmem:[#allocation4 + $0x750] sm:$0xff]  ;;  %v5437_v24 = vld [vmem:[#allocation4 + $0x788] sm:$0xff] }
 0xafd   :  { %5485 = vmatmul.mubr.bf16.vlgmr.msra.gmra.mrb[24].mxu0 %v11946_v23  ;;  %5571 = vmatmul.mubr.bf16.vlgmr.msra.gmra.mrb[24].mxu1 %v11946_v23 }
 0xafe   :  { %5496 = vmatpush1.bf16.msra.mxu0 %v5324_v22  ;;  %5582 = vmatpush1.bf16.msra.mxu1 %v5326_v54  ;;  %v5439_v22 = vld [vmem:[#allocation4 + $0x798] sm:$0xff]  ;;  %v5436_v54 = vld [vmem:[#allocation4 + $0x780] sm:$0xff] }
 0xaff   :  { %5497 = vmatprep.subr.bf16.mxu0 %v5333_v18  ;;  %5583 = vmatprep.subr.bf16.mxu1 %v5335_v7  ;;  %v5438_v18 = vld [vmem:[#allocation4 + $0x790] sm:$0xff]  ;;  %v5445_v7 = vld [vmem:[#allocation4 + $0x7c8] sm:$0xff] }
 0xb00   :  { %5527 = vmatprep.mubr.bf16.mxu0 %v11952_v17  ;;  %5613 = vmatprep.mubr.bf16.mxu1 %v11952_v17 }
 0xb02   :  { %5498 = vmatpush1.bf16.msra.mxu0 %v5332_v16  ;;  %5584 = vmatpush1.bf16.msra.mxu1 %v5334_v39  ;;  %v5447_v16 = vld [vmem:[#allocation4 + $0x7d8] sm:$0xff]  ;;  %v5444_v39 = vld [vmem:[#allocation4 + $0x7c0] sm:$0xff] }
 0xb03   :  { %5499 = vmatprep.subr.bf16.mxu0 %v5341_v8  ;;  %5585 = vmatprep.subr.bf16.mxu1 %v5343_v52  ;;  %v5446_v8 = vld [vmem:[#allocation4 + $0x7d0] sm:$0xff]  ;;  %v5201_v52 = vld [vmem:[#allocation4 + $0x28] sm:$0xff] }
 0xb06   :  { %5500 = vmatpush1.bf16.msra.mxu0 %v5340_v4  ;;  %5586 = vmatpush1.bf16.msra.mxu1 %v5342_v20  ;;  %v5203_v4 = vld [vmem:[#allocation4 + $0x38] sm:$0xff]  ;;  %v5200_v20 = vld [vmem:[#allocation4 + $0x20] sm:$0xff] }
 0xb07   :  { %5501 = vmatprep.subr.bf16.mxu0 %v5349_v36  ;;  %5587 = vmatprep.subr.bf16.mxu1 %v5351_v42  ;;  %v5202_v36 = vld [vmem:[#allocation4 + $0x30] sm:$0xff]  ;;  %v5209_v42 = vld [vmem:[#allocation4 + $0x68] sm:$0xff] }
 0xb0a   :  { %5502 = vmatpush1.bf16.msra.mxu0 %v5348_v43  ;;  %5588 = vmatpush1.bf16.msra.mxu1 %v5350_v38  ;;  %v5211_v43 = vld [vmem:[#allocation4 + $0x78] sm:$0xff]  ;;  %v5208_v38 = vld [vmem:[#allocation4 + $0x60] sm:$0xff] }
 0xb0b   :  { %5503 = vmatprep.subr.bf16.mxu0 %v5357_v13  ;;  %5589 = vmatprep.subr.bf16.mxu1 %v5359_v30  ;;  %v5210_v13 = vld [vmem:[#allocation4 + $0x70] sm:$0xff]  ;;  %v5217_v30 = vld [vmem:[#allocation4 + $0xa8] sm:$0xff] }
 0xb0e   :  { %5504 = vmatpush1.bf16.msra.mxu0 %v5356_v1  ;;  %5590 = vmatpush1.bf16.msra.mxu1 %v5358_v51  ;;  %v5219_v1 = vld [vmem:[#allocation4 + $0xb8] sm:$0xff]  ;;  %v5216_v51 = vld [vmem:[#allocation4 + $0xa0] sm:$0xff] }
 0xb0f   :  { %5505 = vmatprep.subr.bf16.mxu0 %v5365_v28  ;;  %5591 = vmatprep.subr.bf16.mxu1 %v5367_v9  ;;  %v5218_v28 = vld [vmem:[#allocation4 + $0xb0] sm:$0xff]  ;;  %v5225_v9 = vld [vmem:[#allocation4 + $0xe8] sm:$0xff] }
 0xb12   :  { %5506 = vmatpush1.bf16.msra.mxu0 %v5364_v63  ;;  %5592 = vmatpush1.bf16.msra.mxu1 %v5366_v46  ;;  %v5227_v63 = vld [vmem:[#allocation4 + $0xf8] sm:$0xff]  ;;  %v5224_v46 = vld [vmem:[#allocation4 + $0xe0] sm:$0xff] }
 0xb13   :  { %5507 = vmatprep.subr.bf16.mxu0 %v5373_v57  ;;  %5593 = vmatprep.subr.bf16.mxu1 %v5375_v6  ;;  %v5226_v57 = vld [vmem:[#allocation4 + $0xf0] sm:$0xff]  ;;  %v5233_v6 = vld [vmem:[#allocation4 + $0x128] sm:$0xff] }
 0xb16   :  { %5508 = vmatpush1.bf16.msra.mxu0 %v5372_v41  ;;  %5594 = vmatpush1.bf16.msra.mxu1 %v5374_v62  ;;  %v5235_v41 = vld [vmem:[#allocation4 + $0x138] sm:$0xff]  ;;  %v5234_v62 = vld [vmem:[#allocation4 + $0x130] sm:$0xff] }
 0xb17   :  { %5509 = vmatprep.subr.bf16.mxu0 %v5381_v32  ;;  %5595 = vmatprep.subr.bf16.mxu1 %v5383_v2  ;;  %v5241_v32 = vld [vmem:[#allocation4 + $0x168] sm:$0xff]  ;;  %v5243_v2 = vld [vmem:[#allocation4 + $0x178] sm:$0xff] }
 0xb1a   :  { %5510 = vmatpush1.bf16.msra.mxu0 %v5380_v27  ;;  %5596 = vmatpush1.bf16.msra.mxu1 %v5382_v60  ;;  %v5240_v27 = vld [vmem:[#allocation4 + $0x160] sm:$0xff]  ;;  %v5242_v60 = vld [vmem:[#allocation4 + $0x170] sm:$0xff] }
 0xb1b   :  { %5511 = vmatprep.subr.bf16.mxu0 %v5389_v31  ;;  %5597 = vmatprep.subr.bf16.mxu1 %v5391_v14  ;;  %v5249_v31 = vld [vmem:[#allocation4 + $0x1a8] sm:$0xff]  ;;  %v5251_v14 = vld [vmem:[#allocation4 + $0x1b8] sm:$0xff] }
 0xb1e   :  { %5512 = vmatpush1.bf16.msra.mxu0 %v5388_v59  ;;  %5598 = vmatpush1.bf16.msra.mxu1 %v5390_v34  ;;  %v5248_v59 = vld [vmem:[#allocation4 + $0x1a0] sm:$0xff]  ;;  %v5250_v34 = vld [vmem:[#allocation4 + $0x1b0] sm:$0xff] }
 0xb1f   :  { %5513 = vmatprep.subr.bf16.mxu0 %v5397_v40  ;;  %5599 = vmatprep.subr.bf16.mxu1 %v5399_v5  ;;  %v5257_v40 = vld [vmem:[#allocation4 + $0x1e8] sm:$0xff]  ;;  %v5259_v5 = vld [vmem:[#allocation4 + $0x1f8] sm:$0xff] }
 0xb22   :  { %5514 = vmatpush1.bf16.msra.mxu0 %v5396_v53  ;;  %5600 = vmatpush1.bf16.msra.mxu1 %v5398_v11  ;;  %v5256_v53 = vld [vmem:[#allocation4 + $0x1e0] sm:$0xff]  ;;  %v5258_v11 = vld [vmem:[#allocation4 + $0x1f0] sm:$0xff] }
 0xb23   :  { %5515 = vmatprep.subr.bf16.mxu0 %v5405_v55  ;;  %5601 = vmatprep.subr.bf16.mxu1 %v5407_v49  ;;  %v5265_v55 = vld [vmem:[#allocation4 + $0x228] sm:$0xff]  ;;  %v5267_v49 = vld [vmem:[#allocation4 + $0x238] sm:$0xff] }
 0xb26   :  { %5516 = vmatpush1.bf16.msra.mxu0 %v5404_v50  ;;  %5602 = vmatpush1.bf16.msra.mxu1 %v5406_v15  ;;  %v5264_v50 = vld [vmem:[#allocation4 + $0x220] sm:$0xff]  ;;  %v5266_v15 = vld [vmem:[#allocation4 + $0x230] sm:$0xff] }
 0xb27   :  { %5517 = vmatprep.subr.bf16.mxu0 %v5413_v25  ;;  %5603 = vmatprep.subr.bf16.mxu1 %v5415_v0  ;;  %v5273_v25 = vld [vmem:[#allocation4 + $0x268] sm:$0xff]  ;;  %v5275_v0 = vld [vmem:[#allocation4 + $0x278] sm:$0xff] }
 0xb2a   :  { %5518 = vmatpush1.bf16.msra.mxu0 %v5412_v26  ;;  %5604 = vmatpush1.bf16.msra.mxu1 %v5414_v48  ;;  %v5272_v26 = vld [vmem:[#allocation4 + $0x260] sm:$0xff]  ;;  %v5274_v48 = vld [vmem:[#allocation4 + $0x270] sm:$0xff] }
 0xb2b   :  { %5519 = vmatprep.subr.bf16.mxu0 %v5421_v37  ;;  %5605 = vmatprep.subr.bf16.mxu1 %v5423_v12  ;;  %v5281_v37 = vld [vmem:[#allocation4 + $0x2a8] sm:$0xff]  ;;  %v5283_v12 = vld [vmem:[#allocation4 + $0x2b8] sm:$0xff] }
 0xb2e   :  { %5520 = vmatpush1.bf16.msra.mxu0 %v5420_v61  ;;  %5606 = vmatpush1.bf16.msra.mxu1 %v5422_v58  ;;  %v5280_v61 = vld [vmem:[#allocation4 + $0x2a0] sm:$0xff]  ;;  %v5282_v58 = vld [vmem:[#allocation4 + $0x2b0] sm:$0xff] }
 0xb2f   :  { %5521 = vmatprep.subr.bf16.mxu0 %v5429_v56  ;;  %5607 = vmatprep.subr.bf16.mxu1 %v5431_v3  ;;  %v5289_v56 = vld [vmem:[#allocation4 + $0x2e8] sm:$0xff]  ;;  %v5291_v3 = vld [vmem:[#allocation4 + $0x2f8] sm:$0xff] }
 0xb32   :  { %5522 = vmatpush1.bf16.msra.mxu0 %v5428_v35  ;;  %5608 = vmatpush1.bf16.msra.mxu1 %v5430_v47  ;;  %v5288_v35 = vld [vmem:[#allocation4 + $0x2e0] sm:$0xff]  ;;  %v5290_v47 = vld [vmem:[#allocation4 + $0x2f0] sm:$0xff] }
 0xb33   :  { %5523 = vmatprep.subr.bf16.mxu0 %v5437_v24  ;;  %5609 = vmatprep.subr.bf16.mxu1 %v5439_v22  ;;  %v5297_v24 = vld [vmem:[#allocation4 + $0x328] sm:$0xff]  ;;  %v5299_v22 = vld [vmem:[#allocation4 + $0x338] sm:$0xff] }
 0xb36   :  { %5524 = vmatpush1.bf16.msra.mxu0 %v5436_v54  ;;  %5610 = vmatpush1.bf16.msra.mxu1 %v5438_v18  ;;  %v5296_v54 = vld [vmem:[#allocation4 + $0x320] sm:$0xff]  ;;  %v5298_v18 = vld [vmem:[#allocation4 + $0x330] sm:$0xff] }
 0xb37   :  { %5525 = vmatprep.subr.bf16.mxu0 %v5445_v7  ;;  %5611 = vmatprep.subr.bf16.mxu1 %v5447_v16  ;;  %v5305_v7 = vld [vmem:[#allocation4 + $0x368] sm:$0xff]  ;;  %v5307_v16 = vld [vmem:[#allocation4 + $0x378] sm:$0xff] }
 0xb3a   :  { %5526 = vmatpush1.bf16.msra.mxu0 %v5444_v39  ;;  %5612 = vmatpush1.bf16.msra.mxu1 %v5446_v8  ;;  %v5304_v39 = vld [vmem:[#allocation4 + $0x360] sm:$0xff]  ;;  %v5306_v8 = vld [vmem:[#allocation4 + $0x370] sm:$0xff] }
 0xb3b   :  { %5624 = vmatprep.subr.bf16.mxu0 %v5201_v52  ;;  %5710 = vmatprep.subr.bf16.mxu1 %v5203_v4  ;;  %v5313_v52 = vld [vmem:[#allocation4 + $0x3a8] sm:$0xff]  ;;  %v5315_v4 = vld [vmem:[#allocation4 + $0x3b8] sm:$0xff] }
 0xb3d   :  { %5528 = vmatmul.mubr.bf16.vlgmr.msra.gmra.mrb[24].mxu0 %v11948_v19  ;;  %5614 = vmatmul.mubr.bf16.vlgmr.msra.gmra.mrb[24].mxu1 %v11948_v19 }
 0xb3e   :  { %5625 = vmatpush1.bf16.msra.mxu0 %v5200_v20  ;;  %5711 = vmatpush1.bf16.msra.mxu1 %v5202_v36  ;;  %v5312_v20 = vld [vmem:[#allocation4 + $0x3a0] sm:$0xff]  ;;  %v5314_v36 = vld [vmem:[#allocation4 + $0x3b0] sm:$0xff] }
 0xb3f   :  { %5626 = vmatprep.subr.bf16.mxu0 %v5209_v42  ;;  %5712 = vmatprep.subr.bf16.mxu1 %v5211_v43  ;;  %v5321_v42 = vld [vmem:[#allocation4 + $0x3e8] sm:$0xff]  ;;  %v5323_v43 = vld [vmem:[#allocation4 + $0x3f8] sm:$0xff] }
 0xb40   :  { %5656 = vmatprep.mubr.bf16.mxu0 %v11950_v29  ;;  %5742 = vmatprep.mubr.bf16.mxu1 %v11950_v29  ;;  %v5232_v29 = vld [vmem:[#allocation4 + $0x120] sm:$0xff] }
 0xb42   :  { %5627 = vmatpush1.bf16.msra.mxu0 %v5208_v38  ;;  %5713 = vmatpush1.bf16.msra.mxu1 %v5210_v13  ;;  %v5320_v38 = vld [vmem:[#allocation4 + $0x3e0] sm:$0xff]  ;;  %v5322_v13 = vld [vmem:[#allocation4 + $0x3f0] sm:$0xff] }
 0xb43   :  { %5628 = vmatprep.subr.bf16.mxu0 %v5217_v30  ;;  %5714 = vmatprep.subr.bf16.mxu1 %v5219_v1  ;;  %v5329_v30 = vld [vmem:[#allocation4 + $0x428] sm:$0xff]  ;;  %v5331_v1 = vld [vmem:[#allocation4 + $0x438] sm:$0xff] }
 0xb46   :  { %5629 = vmatpush1.bf16.msra.mxu0 %v5216_v51  ;;  %5715 = vmatpush1.bf16.msra.mxu1 %v5218_v28  ;;  %v5328_v51 = vld [vmem:[#allocation4 + $0x420] sm:$0xff]  ;;  %v5330_v28 = vld [vmem:[#allocation4 + $0x430] sm:$0xff] }
 0xb47   :  { %5630 = vmatprep.subr.bf16.mxu0 %v5225_v9  ;;  %5716 = vmatprep.subr.bf16.mxu1 %v5227_v63  ;;  %v5337_v9 = vld [vmem:[#allocation4 + $0x468] sm:$0xff]  ;;  %v5339_v63 = vld [vmem:[#allocation4 + $0x478] sm:$0xff] }
 0xb4a   :  { %5631 = vmatpush1.bf16.msra.mxu0 %v5224_v46  ;;  %5717 = vmatpush1.bf16.msra.mxu1 %v5226_v57  ;;  %v5336_v46 = vld [vmem:[#allocation4 + $0x460] sm:$0xff]  ;;  %v5338_v57 = vld [vmem:[#allocation4 + $0x470] sm:$0xff] }
 0xb4b   :  { %5632 = vmatprep.subr.bf16.mxu0 %v5233_v6  ;;  %5718 = vmatprep.subr.bf16.mxu1 %v5235_v41  ;;  %v5345_v6 = vld [vmem:[#allocation4 + $0x4a8] sm:$0xff]  ;;  %v5347_v41 = vld [vmem:[#allocation4 + $0x4b8] sm:$0xff] }
 0xb4e   :  { %5633 = vmatpush1.bf16.msra.mxu0 %v5232_v29  ;;  %5719 = vmatpush1.bf16.msra.mxu1 %v5234_v62  ;;  %v5344_v29 = vld [vmem:[#allocation4 + $0x4a0] sm:$0xff]  ;;  %v5346_v62 = vld [vmem:[#allocation4 + $0x4b0] sm:$0xff] }
 0xb4f   :  { %5634 = vmatprep.subr.bf16.mxu0 %v5241_v32  ;;  %5720 = vmatprep.subr.bf16.mxu1 %v5243_v2  ;;  %v5353_v32 = vld [vmem:[#allocation4 + $0x4e8] sm:$0xff]  ;;  %v5352_v2 = vld [vmem:[#allocation4 + $0x4e0] sm:$0xff] }
 0xb52   :  { %5635 = vmatpush1.bf16.msra.mxu0 %v5240_v27  ;;  %5721 = vmatpush1.bf16.msra.mxu1 %v5242_v60  ;;  %v5354_v27 = vld [vmem:[#allocation4 + $0x4f0] sm:$0xff]  ;;  %v5361_v60 = vld [vmem:[#allocation4 + $0x528] sm:$0xff] }
 0xb53   :  { %5636 = vmatprep.subr.bf16.mxu0 %v5249_v31  ;;  %5722 = vmatprep.subr.bf16.mxu1 %v5251_v14  ;;  %v5363_v31 = vld [vmem:[#allocation4 + $0x538] sm:$0xff]  ;;  %v5362_v14 = vld [vmem:[#allocation4 + $0x530] sm:$0xff] }
 0xb56   :  { %5637 = vmatpush1.bf16.msra.mxu0 %v5248_v59  ;;  %5723 = vmatpush1.bf16.msra.mxu1 %v5250_v34  ;;  %v5369_v59 = vld [vmem:[#allocation4 + $0x568] sm:$0xff]  ;;  %v5371_v34 = vld [vmem:[#allocation4 + $0x578] sm:$0xff] }
 0xb57   :  { %5638 = vmatprep.subr.bf16.mxu0 %v5257_v40  ;;  %5724 = vmatprep.subr.bf16.mxu1 %v5259_v5  ;;  %v5368_v40 = vld [vmem:[#allocation4 + $0x560] sm:$0xff]  ;;  %v5370_v5 = vld [vmem:[#allocation4 + $0x570] sm:$0xff] }
 0xb5a   :  { %5639 = vmatpush1.bf16.msra.mxu0 %v5256_v53  ;;  %5725 = vmatpush1.bf16.msra.mxu1 %v5258_v11  ;;  %v5377_v53 = vld [vmem:[#allocation4 + $0x5a8] sm:$0xff]  ;;  %v5379_v11 = vld [vmem:[#allocation4 + $0x5b8] sm:$0xff] }
 0xb5b   :  { %5640 = vmatprep.subr.bf16.mxu0 %v5265_v55  ;;  %5726 = vmatprep.subr.bf16.mxu1 %v5267_v49  ;;  %v5376_v55 = vld [vmem:[#allocation4 + $0x5a0] sm:$0xff]  ;;  %v5378_v49 = vld [vmem:[#allocation4 + $0x5b0] sm:$0xff] }
 0xb5e   :  { %5641 = vmatpush1.bf16.msra.mxu0 %v5264_v50  ;;  %5727 = vmatpush1.bf16.msra.mxu1 %v5266_v15  ;;  %v5385_v50 = vld [vmem:[#allocation4 + $0x5e8] sm:$0xff]  ;;  %v5387_v15 = vld [vmem:[#allocation4 + $0x5f8] sm:$0xff] }
 0xb5f   :  { %5642 = vmatprep.subr.bf16.mxu0 %v5273_v25  ;;  %5728 = vmatprep.subr.bf16.mxu1 %v5275_v0  ;;  %v5384_v25 = vld [vmem:[#allocation4 + $0x5e0] sm:$0xff]  ;;  %v5386_v0 = vld [vmem:[#allocation4 + $0x5f0] sm:$0xff] }
 0xb62   :  { %5643 = vmatpush1.bf16.msra.mxu0 %v5272_v26  ;;  %5729 = vmatpush1.bf16.msra.mxu1 %v5274_v48  ;;  %v5393_v26 = vld [vmem:[#allocation4 + $0x628] sm:$0xff]  ;;  %v5395_v48 = vld [vmem:[#allocation4 + $0x638] sm:$0xff] }
 0xb63   :  { %5644 = vmatprep.subr.bf16.mxu0 %v5281_v37  ;;  %5730 = vmatprep.subr.bf16.mxu1 %v5283_v12  ;;  %v5392_v37 = vld [vmem:[#allocation4 + $0x620] sm:$0xff]  ;;  %v5394_v12 = vld [vmem:[#allocation4 + $0x630] sm:$0xff] }
 0xb66   :  { %5645 = vmatpush1.bf16.msra.mxu0 %v5280_v61  ;;  %5731 = vmatpush1.bf16.msra.mxu1 %v5282_v58  ;;  %v5401_v61 = vld [vmem:[#allocation4 + $0x668] sm:$0xff]  ;;  %v5403_v58 = vld [vmem:[#allocation4 + $0x678] sm:$0xff] }
 0xb67   :  { %5646 = vmatprep.subr.bf16.mxu0 %v5289_v56  ;;  %5732 = vmatprep.subr.bf16.mxu1 %v5291_v3  ;;  %v5400_v56 = vld [vmem:[#allocation4 + $0x660] sm:$0xff]  ;;  %v5402_v3 = vld [vmem:[#allocation4 + $0x670] sm:$0xff] }
 0xb6a   :  { %5647 = vmatpush1.bf16.msra.mxu0 %v5288_v35  ;;  %5733 = vmatpush1.bf16.msra.mxu1 %v5290_v47  ;;  %v5409_v35 = vld [vmem:[#allocation4 + $0x6a8] sm:$0xff]  ;;  %v5411_v47 = vld [vmem:[#allocation4 + $0x6b8] sm:$0xff] }
 0xb6b   :  { %5648 = vmatprep.subr.bf16.mxu0 %v5297_v24  ;;  %5734 = vmatprep.subr.bf16.mxu1 %v5299_v22  ;;  %v5408_v24 = vld [vmem:[#allocation4 + $0x6a0] sm:$0xff]  ;;  %v5410_v22 = vld [vmem:[#allocation4 + $0x6b0] sm:$0xff] }
 0xb6e   :  { %5649 = vmatpush1.bf16.msra.mxu0 %v5296_v54  ;;  %5735 = vmatpush1.bf16.msra.mxu1 %v5298_v18  ;;  %v5417_v54 = vld [vmem:[#allocation4 + $0x6e8] sm:$0xff]  ;;  %v5419_v18 = vld [vmem:[#allocation4 + $0x6f8] sm:$0xff] }
 0xb6f   :  { %5650 = vmatprep.subr.bf16.mxu0 %v5305_v7  ;;  %5736 = vmatprep.subr.bf16.mxu1 %v5307_v16  ;;  %v5416_v7 = vld [vmem:[#allocation4 + $0x6e0] sm:$0xff]  ;;  %v5418_v16 = vld [vmem:[#allocation4 + $0x6f0] sm:$0xff] }
 0xb72   :  { %5651 = vmatpush1.bf16.msra.mxu0 %v5304_v39  ;;  %5737 = vmatpush1.bf16.msra.mxu1 %v5306_v8  ;;  %v5425_v39 = vld [vmem:[#allocation4 + $0x728] sm:$0xff]  ;;  %v5427_v8 = vld [vmem:[#allocation4 + $0x738] sm:$0xff] }
 0xb73   :  { %5652 = vmatprep.subr.bf16.mxu0 %v5313_v52  ;;  %5738 = vmatprep.subr.bf16.mxu1 %v5315_v4  ;;  %v5424_v52 = vld [vmem:[#allocation4 + $0x720] sm:$0xff]  ;;  %v5426_v4 = vld [vmem:[#allocation4 + $0x730] sm:$0xff] }
 0xb76   :  { %5653 = vmatpush1.bf16.msra.mxu0 %v5312_v20  ;;  %5739 = vmatpush1.bf16.msra.mxu1 %v5314_v36  ;;  %v5433_v20 = vld [vmem:[#allocation4 + $0x768] sm:$0xff]  ;;  %v5435_v36 = vld [vmem:[#allocation4 + $0x778] sm:$0xff] }
 0xb77   :  { %5654 = vmatprep.subr.bf16.mxu0 %v5321_v42  ;;  %5740 = vmatprep.subr.bf16.mxu1 %v5323_v43  ;;  %v5432_v42 = vld [vmem:[#allocation4 + $0x760] sm:$0xff]  ;;  %v5434_v43 = vld [vmem:[#allocation4 + $0x770] sm:$0xff] }
 0xb7a   :  { %5655 = vmatpush1.bf16.msra.mxu0 %v5320_v38  ;;  %5741 = vmatpush1.bf16.msra.mxu1 %v5322_v13  ;;  %v5441_v38 = vld [vmem:[#allocation4 + $0x7a8] sm:$0xff]  ;;  %v5443_v13 = vld [vmem:[#allocation4 + $0x7b8] sm:$0xff] }
 0xb7b   :  { %5667 = vmatprep.subr.bf16.mxu0 %v5329_v30  ;;  %5753 = vmatprep.subr.bf16.mxu1 %v5331_v1  ;;  %v5440_v30 = vld [vmem:[#allocation4 + $0x7a0] sm:$0xff]  ;;  %v5442_v1 = vld [vmem:[#allocation4 + $0x7b0] sm:$0xff] }
 0xb7d   :  { %5657 = vmatmul.mubr.bf16.vlgmr.msra.gmra.mrb[28].mxu0 %v11946_v23  ;;  %5743 = vmatmul.mubr.bf16.vlgmr.msra.gmra.mrb[28].mxu1 %v11946_v23  ;;  %v5355_v23 = vld [vmem:[#allocation4 + $0x4f8] sm:$0xff] }
 0xb7e   :  { %5668 = vmatpush1.bf16.msra.mxu0 %v5328_v51  ;;  %5754 = vmatpush1.bf16.msra.mxu1 %v5330_v28  ;;  %v5449_v51 = vld [vmem:[#allocation4 + $0x7e8] sm:$0xff]  ;;  %v5451_v28 = vld [vmem:[#allocation4 + $0x7f8] sm:$0xff] }
 0xb7f   :  { %5669 = vmatprep.subr.bf16.mxu0 %v5337_v9  ;;  %5755 = vmatprep.subr.bf16.mxu1 %v5339_v63  ;;  %v5448_v9 = vld [vmem:[#allocation4 + $0x7e0] sm:$0xff]  ;;  %v5450_v63 = vld [vmem:[#allocation4 + $0x7f0] sm:$0xff] }
 0xb80   :  { %5699 = vmatprep.mubr.bf16.mxu0 %v11952_v17  ;;  %5785 = vmatprep.mubr.bf16.mxu1 %v11952_v17  ;;  %v5360_v17 = vld [vmem:[#allocation4 + $0x520] sm:$0xff] }
 0xb82   :  { %5670 = vmatpush1.bf16.msra.mxu0 %v5336_v46  ;;  %5756 = vmatpush1.bf16.msra.mxu1 %v5338_v57  ;;  %v14158_v46 = vmov 0  }
 0xb83   :  { %5671 = vmatprep.subr.bf16.mxu0 %v5345_v6  ;;  %5757 = vmatprep.subr.bf16.mxu1 %v5347_v41  ;;  %v14159_v41 = vld [vmem:[#allocation34_spill] sm:$0xff] }
 0xb86   :  { %5672 = vmatpush1.bf16.msra.mxu0 %v5344_v29  ;;  %5758 = vmatpush1.bf16.msra.mxu1 %v5346_v62  ;;  %v5803_v29 = vrot.slane %v14159_v41, %v14123_v10  ;;  %v14160_v62 = vld [vmem:[#allocation36_spill] sm:$0xff] }
 0xb87   :  { %5673 = vmatprep.subr.bf16.mxu0 %v5353_v32  ;;  %5759 = vmatprep.subr.bf16.mxu1 %v5355_v23  ;;  %v5811_v32 = vrot.slane %v14160_v62, %v14123_v10  ;;  %v14161_v23 = vld [vmem:[#allocation33_spill] sm:$0xff] }
 0xb8a   :  { %5674 = vmatpush1.bf16.msra.mxu0 %v5352_v2  ;;  %5760 = vmatpush1.bf16.msra.mxu1 %v5354_v27  ;;  %v5799_v2 = vrot.slane %v14161_v23, %v14123_v10  ;;  %v14162_v27 = vld [vmem:[#allocation35_spill] sm:$0xff] }
 0xb8b   :  { %5675 = vmatprep.subr.bf16.mxu0 %v5361_v60  ;;  %5761 = vmatprep.subr.bf16.mxu1 %v5363_v31  ;;  %v5807_v60 = vrot.slane %v14162_v27, %v14123_v10 }
 0xb8e   :  { %5676 = vmatpush1.bf16.msra.mxu0 %v5360_v17  ;;  %5762 = vmatpush1.bf16.msra.mxu1 %v5362_v14 }
 0xb8f   :  { %5677 = vmatprep.subr.bf16.mxu0 %v5369_v59  ;;  %5763 = vmatprep.subr.bf16.mxu1 %v5371_v34 }
 0xb92   :  { %5678 = vmatpush1.bf16.msra.mxu0 %v5368_v40  ;;  %5764 = vmatpush1.bf16.msra.mxu1 %v5370_v5 }
 0xb93   :  { %5679 = vmatprep.subr.bf16.mxu0 %v5377_v53  ;;  %5765 = vmatprep.subr.bf16.mxu1 %v5379_v11 }
 0xb96   :  { %5680 = vmatpush1.bf16.msra.mxu0 %v5376_v55  ;;  %5766 = vmatpush1.bf16.msra.mxu1 %v5378_v49 }
 0xb97   :  { %5681 = vmatprep.subr.bf16.mxu0 %v5385_v50  ;;  %5767 = vmatprep.subr.bf16.mxu1 %v5387_v15 }
 0xb9a   :  { %5682 = vmatpush1.bf16.msra.mxu0 %v5384_v25  ;;  %5768 = vmatpush1.bf16.msra.mxu1 %v5386_v0 }
 0xb9b   :  { %5683 = vmatprep.subr.bf16.mxu0 %v5393_v26  ;;  %5769 = vmatprep.subr.bf16.mxu1 %v5395_v48 }
 0xb9e   :  { %5684 = vmatpush1.bf16.msra.mxu0 %v5392_v37  ;;  %5770 = vmatpush1.bf16.msra.mxu1 %v5394_v12  ;;  %v14163_v37 = vld [vmem:[#allocation42_spill] sm:$0xff] }
 0xb9f   :  { %5685 = vmatprep.subr.bf16.mxu0 %v5401_v61  ;;  %5771 = vmatprep.subr.bf16.mxu1 %v5403_v58  ;;  %v12006_v12 = vrot.slane %v14161_v23, %v14163_v37  ;;  %v12010_v61 = vrot.slane %v14162_v27, %v14163_v37  ;;  %v12014_v58 = vrot.slane %v14159_v41, %v14163_v37 }
 0xba2   :  { %5686 = vmatpush1.bf16.msra.mxu0 %v5400_v56  ;;  %5772 = vmatpush1.bf16.msra.mxu1 %v5402_v3  ;;  %v12018_v56 = vrot.slane %v14160_v62, %v14163_v37 }
 0xba3   :  { %5687 = vmatprep.subr.bf16.mxu0 %v5409_v35  ;;  %5773 = vmatprep.subr.bf16.mxu1 %v5411_v47 }
 0xba6   :  { %5688 = vmatpush1.bf16.msra.mxu0 %v5408_v24  ;;  %5774 = vmatpush1.bf16.msra.mxu1 %v5410_v22 }
 0xba7   :  { %5689 = vmatprep.subr.bf16.mxu0 %v5417_v54  ;;  %5775 = vmatprep.subr.bf16.mxu1 %v5419_v18 }
 0xbaa   :  { %5690 = vmatpush1.bf16.msra.mxu0 %v5416_v7  ;;  %5776 = vmatpush1.bf16.msra.mxu1 %v5418_v16 }
 0xbab   :  { %5691 = vmatprep.subr.bf16.mxu0 %v5425_v39  ;;  %5777 = vmatprep.subr.bf16.mxu1 %v5427_v8  ;;  %v14164_v8 = vld [vmem:[#allocation47_spill] sm:$0xff] }
 0xbae   :  { %5692 = vmatpush1.bf16.msra.mxu0 %v5424_v52  ;;  %5778 = vmatpush1.bf16.msra.mxu1 %v5426_v4  ;;  %v12032_v52 = vrot.slane %v14161_v23, %v14164_v8  ;;  %v12036_v4 = vrot.slane %v14159_v41, %v14164_v8 }
 0xbaf   :  { %5693 = vmatprep.subr.bf16.mxu0 %v5433_v20  ;;  %5779 = vmatprep.subr.bf16.mxu1 %v5435_v36  ;;  %v14165_v36 = vld [vmem:[#allocation49_spill] sm:$0xff] }
 0xbb2   :  { %5694 = vmatpush1.bf16.msra.mxu0 %v5432_v42  ;;  %5780 = vmatpush1.bf16.msra.mxu1 %v5434_v43 }
 0xbb3   :  { %5695 = vmatprep.subr.bf16.mxu0 %v5441_v38  ;;  %5781 = vmatprep.subr.bf16.mxu1 %v5443_v13 }
 0xbb6   :  { %5696 = vmatpush1.bf16.msra.mxu0 %v5440_v30  ;;  %5782 = vmatpush1.bf16.msra.mxu1 %v5442_v1 }
 0xbb7   :  { %5697 = vmatprep.subr.bf16.mxu0 %v5449_v51  ;;  %5783 = vmatprep.subr.bf16.mxu1 %v5451_v28  ;;  %v12049_v28 = vrot.slane %v14162_v27, %v14164_v8 }
 0xbba   :  { %5698 = vmatpush1.bf16.msra.mxu0 %v5448_v9  ;;  %5784 = vmatpush1.bf16.msra.mxu1 %v5450_v63  ;;  %v12053_v9 = vrot.slane %v14160_v62, %v14164_v8 }
 0xbbd   :  { %5700 = vmatmul.mubr.bf16.vlgmr.msra.gmra.mrb[28].mxu0 %v11948_v19  ;;  %5786 = vmatmul.mubr.bf16.vlgmr.msra.gmra.mrb[28].mxu1 %v11948_v19 }
 0xbbe   :  { %7812 = vmatprep.mubr.bf16.mxu0 %v14158_v46  ;;  %7855 = vmatprep.mubr.bf16.mxu1 %v14158_v46 }
 0xc10   :  { %v5529_v57 = vpop.f32.mrb[24].mxu0  ;;  %v5615_v6 = vpop.f32.mrb[24].mxu1 }
 0xc11   :  { %v5531_v31 = vpop.f32.mrb[25].mxu0  ;;  %v5617_v19 = vpop.f32.mrb[25].mxu1  ;;  %v11992_v50 = vadd.f32 %v5799_v2, %v5529_v57  ;;  %v11994_v15 = vadd.f32 %v5807_v60, %v5615_v6 }
 0xc12   :  { %v5533_v17 = vpop.f32.mrb[26].mxu0  ;;  %v5619_v14 = vpop.f32.mrb[26].mxu1  ;;  %v11984_v53 = vadd.f32 %v5803_v29, %v5531_v31  ;;  %v11986_v11 = vadd.f32 %v5811_v32, %v5617_v19 }
 0xc13   :  { %v11980_v59 = vadd.f32 %v5799_v2, %v5533_v17  ;;  %v11982_v34 = vadd.f32 %v5807_v60, %v5619_v14  ;;  %v5535_v40 = vpop.f32.mrb[27].mxu0  ;;  %v5621_v5 = vpop.f32.mrb[27].mxu1 }
 0xc14   :  { %v11988_v55 = vadd.f32 %v5803_v29, %v5535_v40  ;;  %v11990_v49 = vadd.f32 %v5811_v32, %v5621_v5 }
 0xc15   :  { %v7757_v26 = vpack.c.bf16 %v11980_v59, %v11992_v50  ;;  %v7759_v48 = vpack.c.bf16 %v11982_v34, %v11994_v15 }
 0xc16   :  { %v7758_v25 = vpack.c.bf16 %v11988_v55, %v11984_v53  ;;  %v7760_v0 = vpack.c.bf16 %v11990_v49, %v11986_v11 }
 0xc18   :  { %7780 = vmatprep.subr.bf16.mxu0 %v7758_v25  ;;  %7823 = vmatprep.subr.bf16.mxu1 %v7760_v0 }
 0xc19   :  { %7781 = vmatpush1.bf16.msra.mxu0 %v7757_v26  ;;  %7824 = vmatpush1.bf16.msra.mxu1 %v7759_v48 }
 0xc90   :  { %v5701_v3 = vpop.f32.mrb[28].mxu0  ;;  %v5787_v35 = vpop.f32.mrb[28].mxu1 }
 0xc91   :  { %v5836_v47 = vadd.f32 %v12006_v12, %v5701_v3  ;;  %v5838_v24 = vadd.f32 %v12010_v61, %v5787_v35  ;;  %v5703_v22 = vpop.f32.mrb[29].mxu0  ;;  %v5789_v54 = vpop.f32.mrb[29].mxu1 }
 0xc92   :  { %v5837_v18 = vadd.f32 %v12014_v58, %v5703_v22  ;;  %v12024_v7 = vadd.f32 %v12018_v56, %v5789_v54  ;;  %v12026_v16 = vpop.f32.mrb[30].mxu0  ;;  %v12028_v39 = vpop.f32.mrb[30].mxu1 }
 0xc93   :  { %v5845_v20 = vcombine.high %v5836_v47, %v5836_v47  ;;  %v5852_v42 = vrot.slane %v5836_v47, %v14165_v36  ;;  %v6257_v43 = vcombine.high %v5838_v24, %v5838_v24  ;;  %v6264_v38 = vrot.slane %v5838_v24, %v14165_v36  ;;  %v12040_v13 = vpop.f32.mrb[31].mxu0  ;;  %v12042_v30 = vpop.f32.mrb[31].mxu1 }
 0xc94   :  { %v6051_v1 = vcombine.high %v5837_v18, %v5837_v18  ;;  %v12045_v51 = vrot.slane %v5837_v18, %v14165_v36  ;;  %v12065_v60 = vrot.slane %v12024_v7, %v14165_v36 }
 0xc95   :  { %v5859_v63 = vrot.slane %v5845_v20, %v14165_v36  ;;  %v5860_v46 = vcombine.high %v5852_v42, %v5852_v42  ;;  %v5868_v57 = vrot.slane %v5852_v42, %v14165_v36  ;;  %v6271_v6 = vrot.slane %v6257_v43, %v14165_v36 }
 0xc96   :  { %v6272_v29 = vcombine.high %v6264_v38, %v6264_v38  ;;  %v12059_v32 = vrot.slane %v6264_v38, %v14165_v36  ;;  %v12071_v25 = vrot.slane %v6051_v1, %v14165_v36 }
 0xc97   :  { %v5861_v31 = vcombine.high %v5859_v63, %v5859_v63  ;;  %v5875_v19 = vrot.slane %v5859_v63, %v14165_v36  ;;  %v5882_v17 = vrot.slane %v5860_v46, %v14165_v36  ;;  %v5890_v14 = vcombine.high %v5868_v57, %v5868_v57 }
 0xc98   :  { %v5897_v40 = vrot.slane %v5868_v57, %v14123_v10  ;;  %v6273_v5 = vcombine.high %v6271_v6, %v6271_v6  ;;  %v6287_v24 = vrot.slane %v6271_v6, %v14165_v36  ;;  %v6294_v22 = vrot.slane %v6272_v29, %v14165_v36 }
 0xc99   :  { %v5889_v26 = vrot.slane %v5861_v31, %v14165_v36  ;;  %v5891_v48 = vcombine.high %v5875_v19, %v5875_v19  ;;  %v5892_v37 = vcombine.high %v5882_v17, %v5882_v17  ;;  %v5901_v3 = vrot.slane %v5882_v17, %v14123_v10 }
 0xc9a   :  { %v5905_v35 = vrot.slane %v5890_v14, %v14123_v10  ;;  %v5913_v47 = vrot.slane %v5875_v19, %v14123_v10  ;;  %v12085_v42 = vadd.f32 %v5897_v40, %v11992_v50  ;;  %v12088_v43 = vadd.f32 %v5897_v40, %v11980_v59 }
 0xc9b   :  { %v5893_v54 = vcombine.high %v5889_v26, %v5889_v26  ;;  %v5909_v18 = vrot.slane %v5892_v37, %v14123_v10  ;;  %v5917_v8 = vrot.slane %v5889_v26, %v14123_v10  ;;  %v5921_v20 = vrot.slane %v5891_v48, %v14123_v10 }
 0xc9c   :  { %v12091_v38 = vadd.f32 %v5901_v3, %v11980_v59  ;;  %v12094_v1 = vadd.f32 %v5905_v35, %v11992_v50  ;;  %v12098_v46 = vadd.f32 %v5901_v3, %v11992_v50  ;;  %v12101_v57 = vadd.f32 %v5905_v35, %v11980_v59 }
 0xc9d   :  { %v5925_v63 = vrot.slane %v5893_v54, %v14123_v10  ;;  %v12104_v6 = vadd.f32 %v5913_v47, %v11992_v50  ;;  %v12107_v29 = vadd.f32 %v5909_v18, %v11992_v50  ;;  %v12110_v31 = vadd.f32 %v5909_v18, %v11980_v59 }
 0xc9e   :  { %14166 = vst [vmem:[#allocation106_spill] sm:$0xff] %v12101_v57  ;;  %v12113_v19 = vadd.f32 %v5913_v47, %v11980_v59  ;;  %v12116_v17 = vadd.f32 %v5917_v8, %v11992_v50  ;;  %v12119_v14 = vadd.f32 %v5917_v8, %v11980_v59  ;;  %v12122_v40 = vadd.f32 %v5921_v20, %v11992_v50 }
 0xc9f   :  { %14167 = vst [vmem:[#allocation82_spill] sm:$0xff] %v12104_v6  ;;  %14168 = vst [vmem:[#allocation57_spill] sm:$0xff] %v12107_v29  ;;  %v12125_v26 = vadd.f32 %v5921_v20, %v11980_v59  ;;  %v12128_v48 = vadd.f32 %v5925_v63, %v11992_v50  ;;  %v12131_v37 = vadd.f32 %v5925_v63, %v11980_v59  ;;  %v5967_v20 = vmin.f32 %v12088_v43, 0.0 }
 0xca0   :  { %14169 = vst [vmem:[#allocation78_spill] sm:$0xff] %v12110_v31  ;;  %14170 = vst [vmem:[#allocation99_spill] sm:$0xff] %v12113_v19  ;;  %v6301_v2 = vrot.slane %v6273_v5, %v14165_v36  ;;  %v6302_v0 = vcombine.high %v12059_v32, %v12059_v32  ;;  %v6303_v63 = vcombine.high %v6287_v24, %v6287_v24 }
 0xca1   :  { %14171 = vst [vmem:[#allocation105_spill] sm:$0xff] %v12116_v17  ;;  %14172 = vst [vmem:[#allocation72_spill] sm:$0xff] %v12119_v14  ;;  %v6304_v41 = vcombine.high %v6294_v22, %v6294_v22  ;;  %v6309_v35 = vrot.slane %v12059_v32, %v14123_v10  ;;  %v6313_v3 = vrot.slane %v6294_v22, %v14123_v10  ;;  %v12160_v5 = vmul.f32 0.2, %v5967_v20 }
 0xca2   :  { %14173 = vst [vmem:[#allocation102_spill] sm:$0xff] %v12122_v40  ;;  %14174 = vst [vmem:[#allocation107_spill] sm:$0xff] %v12125_v26  ;;  %v6305_v47 = vcombine.high %v6301_v2, %v6301_v2  ;;  %v6317_v54 = vrot.slane %v6302_v0, %v14123_v10  ;;  %v6325_v18 = vrot.slane %v6287_v24, %v14123_v10 }
 0xca3   :  { %14175 = vst [vmem:[#allocation65_spill] sm:$0xff] %v12128_v48  ;;  %14176 = vst [vmem:[#allocation85_spill] sm:$0xff] %v12131_v37  ;;  %v6329_v8 = vrot.slane %v6301_v2, %v14123_v10  ;;  %v6321_v27 = vrot.slane %v6304_v41, %v14123_v10  ;;  %v6333_v23 = vrot.slane %v6303_v63, %v14123_v10 }
 0xca4   :  { %v6337_v21 = vrot.slane %v6305_v47, %v14123_v10  ;;  %v12166_v32 = vadd.f32 %v6309_v35, %v11994_v15  ;;  %v12169_v22 = vadd.f32 %v6309_v35, %v11982_v34  ;;  %v12172_v0 = vadd.f32 %v6313_v3, %v11994_v15 }
 0xca5   :  { %v12175_v2 = vadd.f32 %v6313_v3, %v11982_v34  ;;  %v12178_v24 = vadd.f32 %v6317_v54, %v11994_v15  ;;  %v12181_v41 = vadd.f32 %v6317_v54, %v11982_v34  ;;  %v12184_v47 = vadd.f32 %v6321_v27, %v11994_v15 }
 0xca6   :  { %v12187_v20 = vadd.f32 %v6321_v27, %v11982_v34  ;;  %v12190_v35 = vadd.f32 %v6325_v18, %v11994_v15  ;;  %v12193_v63 = vadd.f32 %v6325_v18, %v11982_v34  ;;  %v12196_v3 = vadd.f32 %v6329_v8, %v11994_v15 }
 0xca7   :  { %14177 = vst [vmem:[#allocation79_spill] sm:$0xff] %v12178_v24  ;;  %14178 = vst [vmem:[#allocation100_spill] sm:$0xff] %v12181_v41  ;;  %v12199_v62 = vadd.f32 %v6329_v8, %v11982_v34  ;;  %v12202_v54 = vadd.f32 %v6333_v23, %v11994_v15  ;;  %v12205_v45 = vadd.f32 %v6333_v23, %v11982_v34 }
 0xca8   :  { %14179 = vst [vmem:[#allocation41_spill] sm:$0xff] %v12184_v47  ;;  %14180 = vst [vmem:[#allocation108_spill] sm:$0xff] %v12187_v20  ;;  %v6067_v27 = vcombine.high %v12071_v25, %v12071_v25  ;;  %v12210_v33 = vadd.f32 %v6337_v21, %v11994_v15  ;;  %v6074_v18 = vrot.slane %v12045_v51, %v14165_v36 }
 0xca9   :  { %14181 = vst [vmem:[#allocation93_spill] sm:$0xff] %v12190_v35  ;;  %14182 = vst [vmem:[#allocation90_spill] sm:$0xff] %v12193_v63  ;;  %v6081_v44 = vrot.slane %v12071_v25, %v14165_v36  ;;  %v14188_v8 = vcombine.high %v12045_v51, %v12045_v51  ;;  %v12221_v23 = vadd.f32 %v6337_v21, %v11982_v34 }
 0xcaa   :  { %14183 = vst [vmem:[#allocation119_spill] sm:$0xff] %v12196_v3  ;;  %14184 = vst [vmem:[#allocation113_spill] sm:$0xff] %v12199_v62  ;;  %v6095_v48 = vrot.slane %v6067_v27, %v14165_v36  ;;  %v6478_v26 = vcombine.high %v12065_v60, %v12065_v60  ;;  %v6103_v62 = vrot.slane %v6074_v18, %v14123_v10 }
 0xcab   :  { %14185 = vst [vmem:[#allocation86_spill] sm:$0xff] %v12202_v54  ;;  %14186 = vst [vmem:[#allocation48_spill] sm:$0xff] %v12205_v45  ;;  %v6088_v37 = vrot.slane %v14188_v8, %v14165_v36  ;;  %v6096_v54 = vcombine.high %v6074_v18, %v6074_v18  ;;  %v6097_v25 = vcombine.high %v6081_v44, %v6081_v44 }
 0xcac   :  { %14187 = vst [vmem:[#allocation109_spill] sm:$0xff] %v12210_v33  ;;  %14189 = vst [vmem:[#allocation50_spill] sm:$0xff] %v12221_v23  ;;  %v14190_v33 = vcombine.high %v12024_v7, %v12024_v7  ;;  %v6099_v51 = vcombine.high %v6095_v48, %v6095_v48  ;;  %v6119_v21 = vrot.slane %v6081_v44, %v14123_v10 }
 0xcad   :  { %v6098_v40 = vcombine.high %v6088_v37, %v6088_v37  ;;  %v6107_v8 = vrot.slane %v6088_v37, %v14123_v10  ;;  %v6486_v27 = vrot.slane %v12065_v60, %v14165_v36  ;;  %v6111_v23 = vrot.slane %v6096_v54, %v14123_v10 }
 0xcae   :  { %v6477_v45 = vrot.slane %v14190_v33, %v14165_v36  ;;  %v6123_v7 = vrot.slane %v6095_v48, %v14123_v10  ;;  %v6127_v14 = vrot.slane %v6097_v25, %v14123_v10  ;;  %v6131_v3 = vrot.slane %v6099_v51, %v14123_v10 }
 0xcaf   :  { %v6115_v33 = vrot.slane %v6098_v40, %v14123_v10  ;;  %v12241_v18 = vadd.f32 %v6103_v62, %v11988_v55  ;;  %v12244_v37 = vadd.f32 %v6107_v8, %v11988_v55  ;;  %v5840_v44 = vadd.f32 %v12006_v12, %v12026_v16 }
 0xcb0   :  { %v12249_v60 = vadd.f32 %v6103_v62, %v11984_v53  ;;  %v12252_v40 = vadd.f32 %v6107_v8, %v11984_v53  ;;  %v12255_v48 = vadd.f32 %v6111_v23, %v11984_v53  ;;  %v12258_v54 = vadd.f32 %v6111_v23, %v11988_v55 }
 0xcb1   :  { %v12261_v25 = vadd.f32 %v6115_v33, %v11984_v53  ;;  %v12264_v51 = vadd.f32 %v6115_v33, %v11988_v55  ;;  %v12267_v12 = vadd.f32 %v6119_v21, %v11984_v53  ;;  %v12270_v62 = vadd.f32 %v6119_v21, %v11988_v55 }
 0xcb2   :  { %14191 = vst [vmem:[#allocation95_spill] sm:$0xff] %v12255_v48  ;;  %14192 = vst [vmem:[#allocation117_spill] sm:$0xff] %v12258_v54  ;;  %v12273_v16 = vadd.f32 %v6123_v7, %v11984_v53  ;;  %v12276_v8 = vadd.f32 %v6123_v7, %v11988_v55  ;;  %v12279_v23 = vadd.f32 %v6127_v14, %v11984_v53 }
 0xcb3   :  { %14193 = vst [vmem:[#allocation98_spill] sm:$0xff] %v12261_v25  ;;  %14194 = vst [vmem:[#allocation56_spill] sm:$0xff] %v12264_v51  ;;  %v12282_v17 = vadd.f32 %v6127_v14, %v11988_v55  ;;  %v12285_v33 = vadd.f32 %v6131_v3, %v11984_v53  ;;  %v12288_v20 = vadd.f32 %v6131_v3, %v11988_v55  ;;  %v6173_v14 = vmin.f32 %v12241_v18, 0.0 }
 0xcb4   :  { %14195 = vst [vmem:[#allocation115_spill] sm:$0xff] %v12267_v12  ;;  %14196 = vst [vmem:[#allocation84_spill] sm:$0xff] %v12270_v62  ;;  %v6479_v35 = vcombine.high %v6477_v45, %v6477_v45  ;;  %v6493_v19 = vrot.slane %v6477_v45, %v14165_v36  ;;  %v6508_v3 = vcombine.high %v6486_v27, %v6486_v27 }
 0xcb5   :  { %14197 = vst [vmem:[#allocation51_spill] sm:$0xff] %v12273_v16  ;;  %14198 = vst [vmem:[#allocation87_spill] sm:$0xff] %v12276_v8  ;;  %v12310_v21 = vrot.slane %v6486_v27, %v14123_v10  ;;  %v6701_v47 = vcombine.high %v5840_v44, %v5840_v44  ;;  %v6708_v7 = vrot.slane %v5840_v44, %v14165_v36 }
 0xcb6   :  { %14199 = vst [vmem:[#allocation121_spill] sm:$0xff] %v12279_v23  ;;  %14200 = vst [vmem:[#allocation61_spill] sm:$0xff] %v12282_v17  ;;  %v6507_v31 = vrot.slane %v6479_v35, %v14165_v36  ;;  %v5842_v29 = vadd.f32 %v12010_v61, %v12028_v39  ;;  %v6509_v63 = vcombine.high %v6493_v19, %v6493_v19  ;;  %v12321_v23 = vmul.f32 0.2, %v6173_v14 }
 0xcb7   :  { %14201 = vst [vmem:[#allocation135_spill] sm:$0xff] %v12285_v33  ;;  %14202 = vst [vmem:[#allocation118_spill] sm:$0xff] %v12288_v20  ;;  %v6500_v33 = vrot.slane %v6478_v26, %v14165_v36  ;;  %v6523_v45 = vrot.slane %v6508_v3, %v14123_v10  ;;  %v6531_v35 = vrot.slane %v6493_v19, %v14123_v10 }
 0xcb8   :  { %v6511_v27 = vcombine.high %v6507_v31, %v6507_v31  ;;  %v12328_v44 = vrot.slane %v6507_v31, %v14123_v10  ;;  %v12331_v61 = vrot.slane %v6509_v63, %v14123_v10  ;;  %v12335_v39 = vadd.f32 %v12310_v21, %v11990_v49 }
 0xcb9   :  { %v6510_v8 = vcombine.high %v6500_v33, %v6500_v33  ;;  %v12317_v20 = vrot.slane %v6500_v33, %v14123_v10  ;;  %v12345_v19 = vadd.f32 %v6523_v45, %v11986_v11  ;;  %v12348_v31 = vadd.f32 %v6523_v45, %v11990_v49 }
 0xcba   :  { %14204 = vst [vmem:[#allocation73_spill] sm:$0xff] %v12328_v44  ;;  %14205 = vst [vmem:[#allocation136_spill] sm:$0xff] %v12331_v61  ;;  %v12338_v33 = vrot.slane %v6511_v27, %v14123_v10  ;;  %v6715_v63 = vrot.slane %v6701_v47, %v14165_v36  ;;  %v6724_v3 = vrot.slane %v6708_v7, %v14165_v36 }
 0xcbb   :  { %v12325_v16 = vrot.slane %v6510_v8, %v14123_v10  ;;  %v12342_v14 = vadd.f32 %v12317_v20, %v11990_v49  ;;  %14207 = vst [vmem:[#allocation54_spill] sm:$0xff] %v12345_v19  ;;  %14208 = vst [vmem:[#allocation58_spill] sm:$0xff] %v12348_v31  ;;  %v6716_v8 = vcombine.high %v6708_v7, %v6708_v7 }
 0xcbc   :  { %14206 = vst [vmem:[#allocation103_spill] sm:$0xff] %v12338_v33  ;;  %v7105_v26 = vcombine.high %v5842_v29, %v5842_v29  ;;  %v12353_v17 = vadd.f32 %v6531_v35, %v11986_v11  ;;  %v12356_v27 = vadd.f32 %v6531_v35, %v11990_v49  ;;  %v12359_v33 = vrot.slane %v5842_v29, %v14165_v36 }
 0xcbd   :  { %14203 = vst [vmem:[#allocation124_spill] sm:$0xff] %v12325_v16  ;;  %v12363_v61 = vadd.f32 %v12014_v58, %v12040_v13  ;;  %v6717_v45 = vcombine.high %v6715_v63, %v6715_v63  ;;  %v6731_v47 = vrot.slane %v6715_v63, %v14165_v36  ;;  %v6738_v44 = vrot.slane %v6716_v8, %v14165_v36 }
 0xcbe   :  { %14209 = vst [vmem:[#allocation71_spill] sm:$0xff] %v12353_v17  ;;  %14210 = vst [vmem:[#allocation96_spill] sm:$0xff] %v12356_v27  ;;  %v6746_v7 = vcombine.high %v6724_v3, %v6724_v3  ;;  %v6753_v51 = vrot.slane %v6724_v3, %v14123_v10  ;;  %v7119_v16 = vrot.slane %v7105_v26, %v14165_v36 }
 0xcbf   :  { %v12371_v35 = vadd.f32 %v12018_v56, %v12042_v30  ;;  %v6745_v25 = vrot.slane %v6717_v45, %v14165_v36  ;;  %v6747_v58 = vcombine.high %v6731_v47, %v6731_v47  ;;  %v6748_v13 = vcombine.high %v6738_v44, %v6738_v44 }
 0xcc0   :  { %v6757_v27 = vrot.slane %v6738_v44, %v14123_v10  ;;  %v6761_v63 = vrot.slane %v6746_v7, %v14123_v10  ;;  %v6769_v8 = vrot.slane %v6731_v47, %v14123_v10  ;;  %v7120_v3 = vcombine.high %v12359_v33, %v12359_v33 }
 0xcc1   :  { %v7128_v26 = vrot.slane %v12359_v33, %v14165_v36  ;;  %v6749_v56 = vcombine.high %v6745_v25, %v6745_v25  ;;  %v6765_v30 = vrot.slane %v6748_v13, %v14123_v10  ;;  %v6773_v29 = vrot.slane %v6745_v25, %v14123_v10 }
 0xcc2   :  { %v6777_v45 = vrot.slane %v6747_v58, %v14123_v10  ;;  %v12386_v62 = vadd.f32 %v6753_v51, %v11992_v50  ;;  %v12389_v44 = vadd.f32 %v6753_v51, %v11980_v59  ;;  %v12392_v47 = vadd.f32 %v6757_v27, %v11992_v50 }
 0xcc3   :  { %v12395_v7 = vadd.f32 %v6757_v27, %v11980_v59  ;;  %v6781_v33 = vrot.slane %v6749_v56, %v14123_v10  ;;  %v12399_v13 = vadd.f32 %v6761_v63, %v11992_v50  ;;  %v12402_v25 = vadd.f32 %v6761_v63, %v11980_v59 }
 0xcc4   :  { %14211 = vst [vmem:[#allocation69_spill] sm:$0xff] %v12392_v47  ;;  %v12405_v58 = vadd.f32 %v6769_v8, %v11992_v50  ;;  %v12408_v51 = vadd.f32 %v6765_v30, %v11992_v50  ;;  %v12411_v17 = vadd.f32 %v6765_v30, %v11980_v59  ;;  %v12414_v27 = vadd.f32 %v6769_v8, %v11980_v59 }
 0xcc5   :  { %14212 = vst [vmem:[#allocation76_spill] sm:$0xff] %v12395_v7  ;;  %14213 = vst [vmem:[#allocation80_spill] sm:$0xff] %v12399_v13  ;;  %v12417_v56 = vadd.f32 %v6773_v29, %v11992_v50  ;;  %v12420_v12 = vadd.f32 %v6773_v29, %v11980_v59  ;;  %v12423_v63 = vadd.f32 %v6777_v45, %v11992_v50 }
 0xcc6   :  { %14214 = vst [vmem:[#allocation59_spill] sm:$0xff] %v12402_v25  ;;  %14215 = vst [vmem:[#allocation52_spill] sm:$0xff] %v12405_v58  ;;  %v12426_v6 = vadd.f32 %v6777_v45, %v11980_v59  ;;  %v12429_v31 = vadd.f32 %v6781_v33, %v11992_v50  ;;  %v12432_v30 = vadd.f32 %v6781_v33, %v11980_v59  ;;  %v6823_v59 = vmin.f32 %v12389_v44, 0.0 }
 0xcc7   :  { %14216 = vst [vmem:[#allocation60_spill] sm:$0xff] %v12408_v51  ;;  %14217 = vst [vmem:[#allocation104_spill] sm:$0xff] %v12411_v17  ;;  %v7121_v7 = vcombine.high %v7119_v16, %v7119_v16  ;;  %v7135_v54 = vrot.slane %v7119_v16, %v14165_v36  ;;  %v7142_v29 = vrot.slane %v7120_v3, %v14165_v36 }
 0xcc8   :  { %14218 = vst [vmem:[#allocation75_spill] sm:$0xff] %v12414_v27  ;;  %14219 = vst [vmem:[#allocation66_spill] sm:$0xff] %v12417_v56  ;;  %v7150_v57 = vcombine.high %v7128_v26, %v7128_v26  ;;  %v7157_v19 = vrot.slane %v7128_v26, %v14123_v10  ;;  %v12461_v45 = vmul.f32 0.2, %v6823_v59 }
 0xcc9   :  { %14220 = vst [vmem:[#allocation110_spill] sm:$0xff] %v12420_v12  ;;  %14221 = vst [vmem:[#allocation122_spill] sm:$0xff] %v12423_v63  ;;  %v7149_v8 = vrot.slane %v7121_v7, %v14165_v36  ;;  %v7151_v33 = vcombine.high %v7135_v54, %v7135_v54  ;;  %v7152_v50 = vcombine.high %v7142_v29, %v7142_v29 }
 0xcca   :  { %14222 = vst [vmem:[#allocation45_spill] sm:$0xff] %v12426_v6  ;;  %14223 = vst [vmem:[#allocation133_spill] sm:$0xff] %v12429_v31  ;;  %v6822_v31 = vmin.f32 %v12386_v62, 0.0  ;;  %v7161_v41 = vrot.slane %v7142_v29, %v14123_v10  ;;  %v7165_v16 = vrot.slane %v7150_v57, %v14123_v10  ;;  %v7173_v3 = vrot.slane %v7135_v54, %v14123_v10 }
 0xccb   :  { %14224 = vst [vmem:[#allocation91_spill] sm:$0xff] %v12432_v30  ;;  %v6903_v30 = vcombine.high %v12363_v61, %v12363_v61  ;;  %v7153_v6 = vcombine.high %v7149_v8, %v7149_v8  ;;  %v7177_v26 = vrot.slane %v7149_v8, %v14123_v10  ;;  %v7169_v59 = vrot.slane %v7152_v50, %v14123_v10 }
 0xccc   :  { %v12459_v17 = vmul.f32 0.2, %v6822_v31  ;;  %v6910_v31 = vrot.slane %v12363_v61, %v14165_v36  ;;  %v7181_v7 = vrot.slane %v7151_v33, %v14123_v10  ;;  %v12475_v63 = vadd.f32 %v7157_v19, %v11994_v15 }
 0xccd   :  { %v7307_v29 = vcombine.high %v12371_v35, %v12371_v35  ;;  %v7185_v57 = vrot.slane %v7153_v6, %v14123_v10  ;;  %v12481_v12 = vadd.f32 %v7157_v19, %v11982_v34  ;;  %v12484_v54 = vadd.f32 %v7161_v41, %v11994_v15 }
 0xcce   :  { %v12487_v61 = vadd.f32 %v7161_v41, %v11982_v34  ;;  %v12490_v8 = vadd.f32 %v7165_v16, %v11994_v15  ;;  %v12493_v50 = vadd.f32 %v7165_v16, %v11982_v34  ;;  %v12496_v33 = vadd.f32 %v7169_v59, %v11994_v15 }
 0xccf   :  { %14225 = vst [vmem:[#allocation123_spill] sm:$0xff] %v12484_v54  ;;  %v12499_v6 = vadd.f32 %v7169_v59, %v11982_v34  ;;  %v12502_v19 = vadd.f32 %v7173_v3, %v11994_v15  ;;  %v12505_v56 = vadd.f32 %v7173_v3, %v11982_v34  ;;  %v12508_v41 = vadd.f32 %v7177_v26, %v11994_v15 }
 0xcd0   :  { %14226 = vst [vmem:[#allocation64_spill] sm:$0xff] %v12487_v61  ;;  %14227 = vst [vmem:[#allocation88_spill] sm:$0xff] %v12490_v8  ;;  %v12511_v51 = vadd.f32 %v7177_v26, %v11982_v34  ;;  %v12514_v16 = vadd.f32 %v7181_v7, %v11994_v15  ;;  %v6917_v59 = vrot.slane %v6903_v30, %v14165_v36 }
 0xcd1   :  { %14228 = vst [vmem:[#allocation125_spill] sm:$0xff] %v12493_v50  ;;  %14229 = vst [vmem:[#allocation43_spill] sm:$0xff] %v12496_v33  ;;  %v12517_v33 = vadd.f32 %v7181_v7, %v11982_v34  ;;  %v12521_v27 = vadd.f32 %v7185_v57, %v11994_v15  ;;  %v6926_v3 = vrot.slane %v6910_v31, %v14165_v36 }
 0xcd2   :  { %14230 = vst [vmem:[#allocation134_spill] sm:$0xff] %v12499_v6  ;;  %14231 = vst [vmem:[#allocation111_spill] sm:$0xff] %v12502_v19  ;;  %v6918_v6 = vcombine.high %v6910_v31, %v6910_v31  ;;  %v12529_v26 = vrot.slane %v7307_v29, %v14165_v36  ;;  %v6919_v7 = vcombine.high %v6917_v59, %v6917_v59  ;;  %v5966_v31 = vmin.f32 %v12085_v42, 0.0 }
 0xcd3   :  { %14232 = vst [vmem:[#allocation126_spill] sm:$0xff] %v12505_v56  ;;  %14233 = vst [vmem:[#allocation46_spill] sm:$0xff] %v12508_v41  ;;  %v12526_v41 = vrot.slane %v12371_v35, %v14165_v36  ;;  %v6955_v15 = vrot.slane %v6926_v3, %v14123_v10 }
 0xcd4   :  { %14234 = vst [vmem:[#allocation89_spill] sm:$0xff] %v12511_v51  ;;  %14235 = vst [vmem:[#allocation131_spill] sm:$0xff] %v12514_v16  ;;  %v12532_v16 = vadd.f32 %v7185_v57, %v11982_v34  ;;  %v6940_v30 = vrot.slane %v6918_v6, %v14165_v36  ;;  %v6948_v51 = vcombine.high %v6926_v3, %v6926_v3  ;;  %v5982_v54 = vmul.f32 0.2, %v5966_v31 }
 0xcd5   :  { %14236 = vst [vmem:[#allocation127_spill] sm:$0xff] %v12517_v33  ;;  %14237 = vst [vmem:[#allocation81_spill] sm:$0xff] %v12521_v27  ;;  %v6933_v33 = vrot.slane %v6917_v59, %v14165_v36  ;;  %v6947_v35 = vrot.slane %v6919_v7, %v14165_v36  ;;  %v7322_v6 = vcombine.high %v12526_v41, %v12526_v41 }
 0xcd6   :  { %14238 = vst [vmem:[#allocation112_spill] sm:$0xff] %v12532_v16  ;;  %v6950_v29 = vcombine.high %v6940_v30, %v6940_v30  ;;  %v6959_v19 = vrot.slane %v6940_v30, %v14123_v10  ;;  %v6963_v34 = vrot.slane %v6948_v51, %v14123_v10  ;;  %v7323_v59 = vcombine.high %v12529_v26, %v12529_v26 }
 0xcd7   :  { %v6949_v56 = vcombine.high %v6933_v33, %v6933_v33  ;;  %v6971_v57 = vrot.slane %v6933_v33, %v14123_v10  ;;  %v6951_v3 = vcombine.high %v6947_v35, %v6947_v35  ;;  %v6975_v27 = vrot.slane %v6947_v35, %v14123_v10 }
 0xcd8   :  { %v6967_v16 = vrot.slane %v6950_v29, %v14123_v10  ;;  %v12551_v58 = vadd.f32 %v6955_v15, %v11984_v53  ;;  %v12554_v51 = vadd.f32 %v6955_v15, %v11988_v55  ;;  %v12557_v33 = vadd.f32 %v6959_v19, %v11984_v53 }
 0xcd9   :  { %v6979_v7 = vrot.slane %v6949_v56, %v14123_v10  ;;  %v12560_v30 = vadd.f32 %v6959_v19, %v11988_v55  ;;  %v6983_v50 = vrot.slane %v6951_v3, %v14123_v10  ;;  %v12564_v29 = vadd.f32 %v6963_v34, %v11984_v53 }
 0xcda   :  { %v12567_v35 = vadd.f32 %v6963_v34, %v11988_v55  ;;  %v12570_v56 = vadd.f32 %v6971_v57, %v11984_v53  ;;  %v12573_v15 = vadd.f32 %v6967_v16, %v11984_v53  ;;  %v12576_v25 = vadd.f32 %v6967_v16, %v11988_v55 }
 0xcdb   :  { %v12579_v19 = vadd.f32 %v6971_v57, %v11988_v55  ;;  %v12582_v3 = vadd.f32 %v6975_v27, %v11984_v53  ;;  %v12585_v8 = vadd.f32 %v6975_v27, %v11988_v55  ;;  %v12588_v34 = vadd.f32 %v6979_v7, %v11984_v53 }
 0xcdc   :  { %14239 = vst [vmem:[#allocation128_spill] sm:$0xff] %v12570_v56  ;;  %14240 = vst [vmem:[#allocation101_spill] sm:$0xff] %v12573_v15  ;;  %v12591_v13 = vadd.f32 %v6979_v7, %v11988_v55  ;;  %v12594_v61 = vadd.f32 %v6983_v50, %v11984_v53  ;;  %v12597_v16 = vadd.f32 %v6983_v50, %v11988_v55  ;;  %v7025_v55 = vmin.f32 %v12554_v51, 0.0 }
 0xcdd   :  { %14241 = vst [vmem:[#allocation97_spill] sm:$0xff] %v12576_v25  ;;  %14242 = vst [vmem:[#allocation55_spill] sm:$0xff] %v12579_v19  ;;  %v7330_v47 = vrot.slane %v12526_v41, %v14165_v36  ;;  %v12627_v48 = vrot.slane %v12529_v26, %v14165_v36  ;;  %v7344_v24 = vrot.slane %v7322_v6, %v14165_v36  ;;  %v14256_v25 = vmax.f32 %v12249_v60, 0.0 }
 0xcde   :  { %14243 = vst [vmem:[#allocation44_spill] sm:$0xff] %v12582_v3  ;;  %14244 = vst [vmem:[#allocation77_spill] sm:$0xff] %v12585_v8  ;;  %v12631_v53 = vrot.slane %v7323_v59, %v14165_v36  ;;  %v12633_v57 = vmul.f32 0.2, %v7025_v55  ;;  %v6378_v8 = vmin.f32 %v12166_v32, 0.0 }
 0xcdf   :  { %14245 = vst [vmem:[#allocation116_spill] sm:$0xff] %v12588_v34  ;;  %14246 = vst [vmem:[#allocation70_spill] sm:$0xff] %v12591_v13  ;;  %v7359_v50 = vrot.slane %v7330_v47, %v14123_v10  ;;  %v7354_v7 = vcombine.high %v7344_v24, %v7344_v24  ;;  %v7363_v41 = vrot.slane %v7344_v24, %v14123_v10  ;;  %v6362_v13 = vmax.f32 %v12166_v32, 0.0 }
 0xce0   :  { %14247 = vst [vmem:[#allocation83_spill] sm:$0xff] %v12594_v61  ;;  %14248 = vst [vmem:[#allocation92_spill] sm:$0xff] %v12597_v16  ;;  %v7024_v61 = vmin.f32 %v12551_v58, 0.0  ;;  %v7352_v16 = vcombine.high %v7330_v47, %v7330_v47  ;;  %v7375_v59 = vrot.slane %v12627_v48, %v14123_v10  ;;  %v12651_v24 = vrot.slane %v12631_v53, %v14123_v10 }
 0xce1   :  { %14249 = vst [vmem:[#allocation132_spill] sm:$0xff] %v12627_v48  ;;  %14250 = vst [vmem:[#allocation129_spill] sm:$0xff] %v12631_v53  ;;  %v12647_v47 = vrot.slane %v7354_v7, %v14123_v10  ;;  %v12654_v31 = vadd.f32 %v7359_v50, %v11986_v11  ;;  %v12657_v55 = vadd.f32 %v7359_v50, %v11990_v49  ;;  %v14255_v50 = vmax.f32 %v12085_v42, 0.0 }
 0xce2   :  { %v12623_v27 = vmul.f32 0.2, %v7024_v61  ;;  %v6172_v61 = vmin.f32 %v12249_v60, 0.0  ;;  %v7367_v6 = vrot.slane %v7352_v16, %v14123_v10  ;;  %14252 = vst [vmem:[#allocation120_spill] sm:$0xff] %v12651_v24  ;;  %v12660_v36 = vadd.f32 %v7363_v41, %v11986_v11 }
 0xce3   :  { %14251 = vst [vmem:[#allocation94_spill] sm:$0xff] %v12647_v47  ;;  %v12663_v16 = vadd.f32 %v7363_v41, %v11990_v49  ;;  %v12672_v53 = vadd.f32 %v7375_v59, %v11986_v11  ;;  %v12675_v34 = vadd.f32 %v7375_v59, %v11990_v49  ;;  %v5998_v48 = vadd.f32 %v5982_v54, %v14255_v50 }
 0xce4   :  { %v12666_v26 = vadd.f32 %v7367_v6, %v11986_v11  ;;  %v12669_v7 = vadd.f32 %v7367_v6, %v11990_v49  ;;  %v6188_v10 = vmul.f32 0.2, %v6172_v61  ;;  %v6552_v41 = vadd.f32 %v12310_v21, %v11986_v11 }
 0xce5   :  { %14253 = vst [vmem:[#allocation130_spill] sm:$0xff] %v12672_v53  ;;  %14254 = vst [vmem:[#allocation114_spill] sm:$0xff] %v12675_v34  ;;  %v5952_v24 = vmax.f32 %v12098_v46, 0.0  ;;  %v5968_v6 = vmin.f32 %v12098_v46, 0.0  ;;  %v6018_v3 = vmul.f32 %v12032_v52, %v5998_v48  ;;  %v6158_v59 = vmax.f32 %v12252_v40, 0.0 }
 0xce6   :  { %v6204_v47 = vadd.f32 %v6188_v10, %v14256_v25  ;;  %v6174_v42 = vmin.f32 %v12252_v40, 0.0  ;;  %v6394_v54 = vmul.f32 0.2, %v6378_v8  ;;  %v6568_v61 = vmax.f32 %v6552_v41, 0.0 }
 0xce7   :  { %v6584_v50 = vmin.f32 %v6552_v41, 0.0  ;;  %v5984_v32 = vmul.f32 0.2, %v5968_v6  ;;  %v6364_v34 = vmax.f32 %v12172_v0, 0.0  ;;  %v6380_v46 = vmin.f32 %v12172_v0, 0.0 }
 0xce8   :  { %v6224_v15 = vmul.f32 %v12036_v4, %v6204_v47  ;;  %v6190_v21 = vmul.f32 0.2, %v6174_v42  ;;  %v6410_v19 = vadd.f32 %v6394_v54, %v6362_v13  ;;  %v6554_v10 = vadd.f32 %v12317_v20, %v11986_v11 }
 0xce9   :  { %v6600_v48 = vmul.f32 0.2, %v6584_v50  ;;  %v6000_v53 = vadd.f32 %v5984_v32, %v5952_v24  ;;  %v6396_v40 = vmul.f32 0.2, %v6380_v46  ;;  %v14257_v8 = vmax.f32 %v12088_v43, 0.0 }
 0xcea   :  { %v6240_v60 = vadd.f32 %v6224_v15, %v6018_v3  ;;  %v6206_v25 = vadd.f32 %v6190_v21, %v6158_v59  ;;  %v6430_v47 = vmul.f32 %v12049_v28, %v6410_v19  ;;  %v6570_v56 = vmax.f32 %v6554_v10, 0.0 }
 0xceb   :  { %v5999_v41 = vadd.f32 %v12160_v5, %v14257_v8  ;;  %v6616_v6 = vadd.f32 %v6600_v48, %v6568_v61  ;;  %v6020_v42 = vmul.f32 %v12032_v52, %v6000_v53  ;;  %v6412_v13 = vadd.f32 %v6396_v40, %v6364_v34 }
 0xcec   :  { %v6226_v0 = vmul.f32 %v12036_v4, %v6206_v25  ;;  %v6586_v24 = vmin.f32 %v6554_v10, 0.0  ;;  %v6446_v20 = vadd.f32 %v6430_v47, %v6240_v60  ;;  %v14258_v3 = vmax.f32 %v12241_v18, 0.0 }
 0xced   :  { %v6019_v54 = vmul.f32 %v12032_v52, %v5999_v41  ;;  %v6636_v15 = vmul.f32 %v12053_v9, %v6616_v6  ;;  %v6363_v5 = vmax.f32 %v12169_v22, 0.0  ;;  %v6432_v59 = vmul.f32 %v12049_v28, %v6412_v13 }
 0xcee   :  { %v6205_v43 = vadd.f32 %v12321_v23, %v14258_v3  ;;  %v6242_v19 = vadd.f32 %v6226_v0, %v6020_v42  ;;  %v6602_v53 = vmul.f32 0.2, %v6586_v24  ;;  %v6379_v61 = vmin.f32 %v12169_v22, 0.0 }
 0xcef   :  { %v6652_v50 = vadd.f32 %v6636_v15, %v6446_v20  ;;  %v6569_v32 = vmax.f32 %v12335_v39, 0.0  ;;  %v6585_v21 = vmin.f32 %v12335_v39, 0.0  ;;  %v14259_v23 = vmin.f32 %v12091_v38, 0.0 }
 0xcf0   :  { %v6225_v34 = vmul.f32 %v12036_v4, %v6205_v43  ;;  %v6448_v46 = vadd.f32 %v6432_v59, %v6242_v19  ;;  %v6618_v48 = vadd.f32 %v6602_v53, %v6570_v56  ;;  %v6395_v18 = vmul.f32 0.2, %v6379_v61 }
 0xcf1   :  { %v5985_v10 = vmul.f32 0.2, %v14259_v23  ;;  %6668 = vadd.xlane.f32.xlu0 %v6652_v50  ;;  %v6601_v25 = vmul.f32 0.2, %v6585_v21  ;;  %v14260_v40 = vmin.f32 %v12244_v37, 0.0  ;;  %v6365_v22 = vmax.f32 %v12175_v2, 0.0 }
 0xcf2   :  { %v6241_v60 = vadd.f32 %v6225_v34, %v6019_v54  ;;  %v6638_v41 = vmul.f32 %v12053_v9, %v6618_v48  ;;  %v6411_v47 = vadd.f32 %v6395_v18, %v6363_v5  ;;  %v14261_v6 = vmax.f32 %v12091_v38, 0.0 }
 0xcf3   :  { %v6191_v8 = vmul.f32 0.2, %v14260_v40  ;;  %v6381_v56 = vmin.f32 %v12175_v2, 0.0  ;;  %v6617_v42 = vadd.f32 %v6601_v25, %v6569_v32  ;;  %v14262_v0 = vmax.f32 %v12244_v37, 0.0 }
 0xcf4   :  { %v6001_v39 = vadd.f32 %v5985_v10, %v14261_v6  ;;  %v6571_v24 = vmax.f32 %v12342_v14, 0.0  ;;  %v6587_v54 = vmin.f32 %v12342_v14, 0.0  ;;  %v6654_v20 = vadd.f32 %v6638_v41, %v6448_v46 }
 0xcf5   :  { %v6207_v13 = vadd.f32 %v6191_v8, %v14262_v0  ;;  %v6431_v15 = vmul.f32 %v12049_v28, %v6411_v47  ;;  %v6397_v43 = vmul.f32 0.2, %v6381_v56  ;;  %v6637_v5 = vmul.f32 %v12053_v9, %v6617_v42 }
 0xcf6   :  { %v6021_v3 = vmul.f32 %v12032_v52, %v6001_v39  ;;  %v6603_v19 = vmul.f32 0.2, %v6587_v54  ;;  %v14263_v2 = vmax.f32 %v12386_v62, 0.0  ;;  %6672 = vadd.xlane.f32.xlu1 %v6654_v20  ;;  %v14264_v14 = vmax.f32 %v12551_v58, 0.0  ;;  %v14268_v20 = vld [vmem:[#allocation95_spill] sm:$0xff] }
 0xcf7   :  { %v6227_v38 = vmul.f32 %v12036_v4, %v6207_v13  ;;  %v6447_v59 = vadd.f32 %v6431_v15, %v6241_v60  ;;  %v6413_v53 = vadd.f32 %v6397_v43, %v6365_v22  ;;  %v7210_v50 = vmax.f32 %v12475_v63, 0.0 }
 0xcf8   :  { %v6854_v37 = vadd.f32 %v12459_v17, %v14263_v2  ;;  %v7056_v61 = vadd.f32 %v12623_v27, %v14264_v14  ;;  %v6619_v32 = vadd.f32 %v6603_v19, %v6571_v24  ;;  %v7226_v46 = vmin.f32 %v12475_v63, 0.0 }
 0xcf9   :  { %v6243_v34 = vadd.f32 %v6227_v38, %v6021_v3  ;;  %v6653_v48 = vadd.f32 %v6637_v5, %v6447_v59  ;;  %v6433_v62 = vmul.f32 %v12049_v28, %v6413_v53  ;;  %v7412_v18 = vmax.f32 %v12654_v31, 0.0  ;;  %v14270_v3 = vld [vmem:[#allocation79_spill] sm:$0xff] }
 0xcfa   :  { %v6870_v21 = vmul.f32 %v6854_v37, %v12032_v52  ;;  %v7072_v17 = vmul.f32 %v7056_v61, %v12036_v4  ;;  %v6639_v23 = vmul.f32 %v12053_v9, %v6619_v32  ;;  %v7242_v58 = vmul.f32 0.2, %v7226_v46  ;;  %v14273_v61 = vld [vmem:[#allocation54_spill] sm:$0xff] }
 0xcfb   :  { %v7428_v27 = vmin.f32 %v12654_v31, 0.0  ;;  %v14265_v10 = vmax.f32 %v12389_v44, 0.0  ;;  %6670 = vadd.xlane.f32.xlu0 %v6653_v48  ;;  %v6449_v25 = vadd.f32 %v6433_v62, %v6243_v34  ;;  %v14266_v63 = vmax.f32 %v12554_v51, 0.0 }
 0xcfc   :  { %v7088_v40 = vadd.f32 %v7072_v17, %v6870_v21  ;;  %v7211_v22 = vmax.f32 %v12481_v12, 0.0  ;;  %v7258_v41 = vadd.f32 %v7242_v58, %v7210_v50  ;;  %v7227_v39 = vmin.f32 %v12481_v12, 0.0  ;;  %v14274_v17 = vld [vmem:[#allocation106_spill] sm:$0xff] }
 0xcfd   :  { %v6855_v60 = vadd.f32 %v12461_v45, %v14265_v10  ;;  %v7057_v8 = vadd.f32 %v12633_v57, %v14266_v63  ;;  %v7444_v47 = vmul.f32 0.2, %v7428_v27  ;;  %v6655_v31 = vadd.f32 %v6639_v23, %v6449_v25  ;;  %v14276_v10 = vld [vmem:[#allocation117_spill] sm:$0xff] }
 0xcfe   :  { %v7413_v45 = vmax.f32 %v12657_v55, 0.0  ;;  %v7429_v56 = vmin.f32 %v12657_v55, 0.0  ;;  %v7274_v42 = vmul.f32 %v7258_v41, %v12049_v28  ;;  %v7243_v0 = vmul.f32 0.2, %v7227_v39 }
 0xcff   :  { %v6871_v6 = vmul.f32 %v6855_v60, %v12032_v52  ;;  %v7073_v44 = vmul.f32 %v7057_v8, %v12036_v4  ;;  %v7460_v51 = vadd.f32 %v7444_v47, %v7412_v18  ;;  %v14267_v57 = vmin.f32 %v12094_v1, 0.0  ;;  %6674 = vadd.xlane.f32.xlu1 %v6655_v31 }
 0xd00   :  { %v7445_v54 = vmul.f32 0.2, %v7429_v56  ;;  %v14269_v15 = vmin.f32 %v14268_v20, 0.0  ;;  %v6366_v43 = vmax.f32 %v14270_v3, 0.0  ;;  %v7290_v5 = vadd.f32 %v7274_v42, %v7088_v40  ;;  %v14278_v40 = vld [vmem:[#allocation100_spill] sm:$0xff]  ;;  %v14281_v56 = vld [vmem:[#allocation58_spill] sm:$0xff] }
 0xd01   :  { %v5986_v13 = vmul.f32 0.2, %v14267_v57  ;;  %v7089_v24 = vadd.f32 %v7073_v44, %v6871_v6  ;;  %v7476_v38 = vmul.f32 %v7460_v51, %v12053_v9  ;;  %v7259_v19 = vadd.f32 %v7243_v0, %v7211_v22 }
 0xd02   :  { %v6192_v12 = vmul.f32 0.2, %v14269_v15  ;;  %v14271_v55 = vmax.f32 %v12094_v1, 0.0  ;;  %v7461_v37 = vadd.f32 %v7445_v54, %v7413_v45  ;;  %v14272_v59 = vmax.f32 %v14268_v20, 0.0  ;;  %v14282_v20 = vld [vmem:[#allocation82_spill] sm:$0xff] }
 0xd03   :  { %v6382_v14 = vmin.f32 %v14270_v3, 0.0  ;;  %v6572_v50 = vmax.f32 %v14273_v61, 0.0  ;;  %v7492_v34 = vadd.f32 %v7476_v38, %v7290_v5  ;;  %v7275_v32 = vmul.f32 %v7259_v19, %v12049_v28  ;;  %v14284_v3 = vld [vmem:[#allocation115_spill] sm:$0xff] }
 0xd04   :  { %v6002_v2 = vadd.f32 %v5986_v13, %v14271_v55  ;;  %v6208_v53 = vadd.f32 %v6192_v12, %v14272_v59  ;;  %v6588_v46 = vmin.f32 %v14273_v61, 0.0  ;;  %v7477_v48 = vmul.f32 %v7461_v37, %v12053_v9 }
 0xd05   :  { %v6398_v62 = vmul.f32 0.2, %v6382_v14  ;;  %v14275_v18 = vmin.f32 %v14274_v17, 0.0  ;;  %7508 = vadd.xlane.f32.xlu0 %v7492_v34  ;;  %v7291_v58 = vadd.f32 %v7275_v32, %v7089_v24  ;;  %v14277_v60 = vmin.f32 %v14276_v10, 0.0 }
 0xd06   :  { %v6022_v21 = vmul.f32 %v12032_v52, %v6002_v2  ;;  %v6228_v1 = vmul.f32 %v12036_v4, %v6208_v53  ;;  %v6604_v27 = vmul.f32 0.2, %v6588_v46  ;;  %v6367_v63 = vmax.f32 %v14278_v40, 0.0  ;;  %v14286_v2 = vld [vmem:[#allocation93_spill] sm:$0xff] }
 0xd07   :  { %v5987_v23 = vmul.f32 0.2, %v14275_v18  ;;  %v6193_v25 = vmul.f32 0.2, %v14277_v60  ;;  %v6414_v22 = vadd.f32 %v6398_v62, %v6366_v43  ;;  %v14279_v41 = vmax.f32 %v14274_v17, 0.0 }
 0xd08   :  { %v6244_v8 = vadd.f32 %v6228_v1, %v6022_v21  ;;  %v6383_v6 = vmin.f32 %v14278_v40, 0.0  ;;  %v7493_v39 = vadd.f32 %v7477_v48, %v7291_v58  ;;  %v6620_v31 = vadd.f32 %v6604_v27, %v6572_v50  ;;  %v14289_v48 = vld [vmem:[#allocation71_spill] sm:$0xff]  ;;  %v14292_v40 = vld [vmem:[#allocation84_spill] sm:$0xff] }
 0xd09   :  { %v6003_v47 = vadd.f32 %v5987_v23, %v14279_v41  ;;  %v14280_v44 = vmax.f32 %v14276_v10, 0.0  ;;  %v6573_v42 = vmax.f32 %v14281_v56, 0.0  ;;  %v6434_v51 = vmul.f32 %v12049_v28, %v6414_v22  ;;  %v14290_v10 = vld [vmem:[#allocation99_spill] sm:$0xff] }
 0xd0a   :  { %v6399_v57 = vmul.f32 0.2, %v6383_v6  ;;  %v6589_v13 = vmin.f32 %v14281_v56, 0.0  ;;  %7510 = vadd.xlane.f32.xlu1 %v7493_v39  ;;  %v6640_v24 = vmul.f32 %v12053_v9, %v6620_v31  ;;  %v14283_v15 = vmin.f32 %v14282_v20, 0.0  ;;  %v14294_v6 = vld [vmem:[#allocation90_spill] sm:$0xff] }
 0xd0b   :  { %v6209_v45 = vadd.f32 %v6193_v25, %v14280_v44  ;;  %v6023_v0 = vmul.f32 %v12032_v52, %v6003_v47  ;;  %v14285_v43 = vmin.f32 %v14284_v3, 0.0  ;;  %v6450_v38 = vadd.f32 %v6434_v51, %v6244_v8 }
 0xd0c   :  { %v5990_v12 = vmul.f32 0.2, %v14283_v15  ;;  %v6415_v19 = vadd.f32 %v6399_v57, %v6367_v63  ;;  %v6605_v55 = vmul.f32 0.2, %v6589_v13  ;;  %v6370_v37 = vmax.f32 %v14286_v2, 0.0  ;;  %v14297_v13 = vld [vmem:[#allocation96_spill] sm:$0xff] }
 0xd0d   :  { %v6229_v54 = vmul.f32 %v12036_v4, %v6209_v45  ;;  %v6196_v5 = vmul.f32 0.2, %v14285_v43  ;;  %v14287_v53 = vmax.f32 %v14282_v20, 0.0  ;;  %v14288_v61 = vmax.f32 %v14284_v3, 0.0  ;;  %v14298_v3 = vld [vmem:[#allocation69_spill] sm:$0xff] }
 0xd0e   :  { %v6386_v34 = vmin.f32 %v14286_v2, 0.0  ;;  %v6656_v32 = vadd.f32 %v6640_v24, %v6450_v38  ;;  %v6435_v21 = vmul.f32 %v12049_v28, %v6415_v19  ;;  %v6621_v46 = vadd.f32 %v6605_v55, %v6573_v42 }
 0xd0f   :  { %v6245_v59 = vadd.f32 %v6229_v54, %v6023_v0  ;;  %v6006_v14 = vadd.f32 %v5990_v12, %v14287_v53  ;;  %v6212_v50 = vadd.f32 %v6196_v5, %v14288_v61  ;;  %v6576_v1 = vmax.f32 %v14289_v48, 0.0 }
 0xd10   :  { %v6402_v18 = vmul.f32 0.2, %v6386_v34  ;;  %v6592_v23 = vmin.f32 %v14289_v48, 0.0  ;;  %6676 = vadd.xlane.f32.xlu0 %v6656_v32  ;;  %v6641_v27 = vmul.f32 %v12053_v9, %v6621_v46  ;;  %v14291_v60 = vmin.f32 %v14290_v10, 0.0 }
 0xd11   :  { %v6026_v62 = vmul.f32 %v12032_v52, %v6006_v14  ;;  %v6232_v17 = vmul.f32 %v12036_v4, %v6212_v50  ;;  %v6451_v58 = vadd.f32 %v6435_v21, %v6245_v59  ;;  %v14293_v63 = vmin.f32 %v14292_v40, 0.0  ;;  %v14302_v50 = vld [vmem:[#allocation123_spill] sm:$0xff] }
 0xd12   :  { %v5991_v25 = vmul.f32 0.2, %v14291_v60  ;;  %v6418_v41 = vadd.f32 %v6402_v18, %v6370_v37  ;;  %v6608_v47 = vmul.f32 0.2, %v6592_v23  ;;  %v6371_v39 = vmax.f32 %v14294_v6, 0.0  ;;  %v14304_v60 = vld [vmem:[#allocation76_spill] sm:$0xff] }
 0xd13   :  { %v6197_v8 = vmul.f32 0.2, %v14293_v63  ;;  %v6248_v22 = vadd.f32 %v6232_v17, %v6026_v62  ;;  %v6657_v31 = vadd.f32 %v6641_v27, %v6451_v58  ;;  %v14295_v44 = vmax.f32 %v14290_v10, 0.0 }
 0xd14   :  { %v14296_v56 = vmax.f32 %v14292_v40, 0.0  ;;  %v6387_v51 = vmin.f32 %v14294_v6, 0.0  ;;  %v6438_v0 = vmul.f32 %v12049_v28, %v6418_v41  ;;  %v6624_v57 = vadd.f32 %v6608_v47, %v6576_v1  ;;  %v14307_v41 = vld [vmem:[#allocation64_spill] sm:$0xff] }
 0xd15   :  { %v6007_v45 = vadd.f32 %v5991_v25, %v14295_v44  ;;  %v6577_v24 = vmax.f32 %v14297_v13, 0.0  ;;  %v6593_v54 = vmin.f32 %v14297_v13, 0.0  ;;  %6678 = vadd.xlane.f32.xlu1 %v6657_v31  ;;  %v14299_v43 = vmin.f32 %v14298_v3, 0.0 }
 0xd16   :  { %v6213_v42 = vadd.f32 %v6197_v8, %v14296_v56  ;;  %v6403_v12 = vmul.f32 0.2, %v6387_v51  ;;  %v6454_v38 = vadd.f32 %v6438_v0, %v6248_v22  ;;  %v6644_v19 = vmul.f32 %v12053_v9, %v6624_v57 }
 0xd17   :  { %v6027_v20 = vmul.f32 %v12032_v52, %v6007_v45  ;;  %v6840_v5 = vmul.f32 0.2, %v14299_v43  ;;  %v6609_v55 = vmul.f32 0.2, %v6593_v54  ;;  %v14300_v2 = vmin.f32 %v12557_v33, 0.0 }
 0xd18   :  { %v6233_v15 = vmul.f32 %v12036_v4, %v6213_v42  ;;  %v6419_v53 = vadd.f32 %v6403_v12, %v6371_v39  ;;  %v14301_v14 = vmax.f32 %v14298_v3, 0.0  ;;  %v7212_v34 = vmax.f32 %v14302_v50, 0.0  ;;  %v14310_v12 = vld [vmem:[#allocation80_spill] sm:$0xff] }
 0xd19   :  { %v7042_v37 = vmul.f32 0.2, %v14300_v2  ;;  %v6660_v32 = vadd.f32 %v6644_v19, %v6454_v38  ;;  %v6625_v21 = vadd.f32 %v6609_v55, %v6577_v24  ;;  %v14303_v46 = vmax.f32 %v12557_v33, 0.0  ;;  %v14313_v2 = vld [vmem:[#allocation88_spill] sm:$0xff] }
 0xd1a   :  { %v6249_v59 = vadd.f32 %v6233_v15, %v6027_v20  ;;  %v6856_v61 = vadd.f32 %v6840_v5, %v14301_v14  ;;  %v7228_v1 = vmin.f32 %v14302_v50, 0.0  ;;  %v6439_v62 = vmul.f32 %v12049_v28, %v6419_v53 }
 0xd1b   :  { %v7058_v48 = vadd.f32 %v7042_v37, %v14303_v46  ;;  %v7414_v18 = vmax.f32 %v12660_v36, 0.0  ;;  %v7430_v23 = vmin.f32 %v12660_v36, 0.0  ;;  %6684 = vadd.xlane.f32.xlu0 %v6660_v32  ;;  %v6645_v58 = vmul.f32 %v12053_v9, %v6625_v21 }
 0xd1c   :  { %v6872_v17 = vmul.f32 %v6856_v61, %v12032_v52  ;;  %v7244_v10 = vmul.f32 0.2, %v7228_v1  ;;  %v14305_v25 = vmin.f32 %v14304_v60, 0.0  ;;  %v6455_v40 = vadd.f32 %v6439_v62, %v6249_v59 }
 0xd1d   :  { %v7074_v27 = vmul.f32 %v7058_v48, %v12036_v4  ;;  %v7446_v63 = vmul.f32 0.2, %v7430_v23  ;;  %v14306_v8 = vmin.f32 %v12560_v30, 0.0  ;;  %v7213_v47 = vmax.f32 %v14307_v41, 0.0  ;;  %v14316_v23 = vld [vmem:[#allocation59_spill] sm:$0xff] }
 0xd1e   :  { %v6841_v33 = vmul.f32 0.2, %v14305_v25  ;;  %v7260_v39 = vadd.f32 %v7244_v10, %v7212_v34  ;;  %v14308_v36 = vmax.f32 %v14304_v60, 0.0  ;;  %v7229_v44 = vmin.f32 %v14307_v41, 0.0 }
 0xd1f   :  { %v7043_v22 = vmul.f32 0.2, %v14306_v8  ;;  %v7090_v6 = vadd.f32 %v7074_v27, %v6872_v17  ;;  %v6661_v45 = vadd.f32 %v6645_v58, %v6455_v40  ;;  %v7462_v56 = vadd.f32 %v7446_v63, %v7414_v18  ;;  %v14319_v63 = vld [vmem:[#allocation125_spill] sm:$0xff] }
 0xd20   :  { %v6857_v31 = vadd.f32 %v6841_v33, %v14308_v36  ;;  %v14309_v42 = vmax.f32 %v12560_v30, 0.0  ;;  %v7415_v0 = vmax.f32 %v12663_v16, 0.0  ;;  %v7276_v57 = vmul.f32 %v7260_v39, %v12049_v28 }
 0xd21   :  { %v7245_v24 = vmul.f32 0.2, %v7229_v44  ;;  %v7431_v54 = vmin.f32 %v12663_v16, 0.0  ;;  %6686 = vadd.xlane.f32.xlu1 %v6661_v45  ;;  %v7478_v20 = vmul.f32 %v7462_v56, %v12053_v9  ;;  %v14311_v3 = vmin.f32 %v14310_v12, 0.0 }
 0xd22   :  { %v7059_v51 = vadd.f32 %v7043_v22, %v14309_v42  ;;  %v6873_v13 = vmul.f32 %v6857_v31, %v12032_v52  ;;  %v14312_v30 = vmin.f32 %v12564_v29, 0.0  ;;  %v7292_v38 = vadd.f32 %v7276_v57, %v7090_v6 }
 0xd23   :  { %v6842_v43 = vmul.f32 0.2, %v14311_v3  ;;  %v7261_v19 = vadd.f32 %v7245_v24, %v7213_v47  ;;  %v7447_v55 = vmul.f32 0.2, %v7431_v54  ;;  %v7214_v37 = vmax.f32 %v14313_v2, 0.0  ;;  %v14324_v3 = vld [vmem:[#allocation98_spill] sm:$0xff] }
 0xd24   :  { %v7075_v15 = vmul.f32 %v7059_v51, %v12036_v4  ;;  %v7044_v5 = vmul.f32 0.2, %v14312_v30  ;;  %v14314_v53 = vmax.f32 %v14310_v12, 0.0  ;;  %v14315_v14 = vmax.f32 %v12564_v29, 0.0 }
 0xd25   :  { %v7230_v50 = vmin.f32 %v14313_v2, 0.0  ;;  %v7494_v34 = vadd.f32 %v7478_v20, %v7292_v38  ;;  %v7277_v32 = vmul.f32 %v7261_v19, %v12049_v28  ;;  %v7463_v21 = vadd.f32 %v7447_v55, %v7415_v0  ;;  %v14322_v0 = vld [vmem:[#allocation57_spill] sm:$0xff] }
 0xd26   :  { %v7091_v59 = vadd.f32 %v7075_v15, %v6873_v13  ;;  %v6858_v16 = vadd.f32 %v6842_v43, %v14314_v53  ;;  %v7060_v61 = vadd.f32 %v7044_v5, %v14315_v14  ;;  %v7416_v46 = vmax.f32 %v12666_v26, 0.0  ;;  %v14326_v55 = vld [vmem:[#allocation41_spill] sm:$0xff] }
 0xd27   :  { %v7246_v62 = vmul.f32 0.2, %v7230_v50  ;;  %v7432_v17 = vmin.f32 %v12666_v26, 0.0  ;;  %7512 = vadd.xlane.f32.xlu0 %v7494_v34  ;;  %v7479_v29 = vmul.f32 %v7463_v21, %v12053_v9  ;;  %v14317_v58 = vmin.f32 %v14316_v23, 0.0  ;;  %v14328_v34 = vld [vmem:[#allocation78_spill] sm:$0xff] }
 0xd28   :  { %v6874_v48 = vmul.f32 %v6858_v16, %v12032_v52  ;;  %v7076_v1 = vmul.f32 %v7060_v61, %v12036_v4  ;;  %v7293_v18 = vadd.f32 %v7277_v32, %v7091_v59  ;;  %v14318_v10 = vmin.f32 %v12567_v35, 0.0  ;;  %v14327_v16 = vld [vmem:[#allocation124_spill] sm:$0xff] }
 0xd29   :  { %v6843_v27 = vmul.f32 0.2, %v14317_v58  ;;  %v7262_v33 = vadd.f32 %v7246_v62, %v7214_v37  ;;  %v7448_v40 = vmul.f32 0.2, %v7432_v17  ;;  %v7215_v8 = vmax.f32 %v14319_v63, 0.0 }
 0xd2a   :  { %v7045_v60 = vmul.f32 0.2, %v14318_v10  ;;  %v7092_v25 = vadd.f32 %v7076_v1, %v6874_v48  ;;  %v7495_v22 = vadd.f32 %v7479_v29, %v7293_v18  ;;  %v14320_v41 = vmax.f32 %v14316_v23, 0.0  ;;  %v14330_v23 = vld [vmem:[#allocation56_spill] sm:$0xff] }
 0xd2b   :  { %v14321_v26 = vmax.f32 %v12567_v35, 0.0  ;;  %v7231_v39 = vmin.f32 %v14319_v63, 0.0  ;;  %v7278_v36 = vmul.f32 %v7262_v33, %v12049_v28  ;;  %v7464_v31 = vadd.f32 %v7448_v40, %v7416_v46  ;;  %v14332_v40 = vld [vmem:[#allocation108_spill] sm:$0xff] }
 0xd2c   :  { %v6859_v47 = vadd.f32 %v6843_v27, %v14320_v41  ;;  %v7417_v44 = vmax.f32 %v12669_v7, 0.0  ;;  %v7433_v45 = vmin.f32 %v12669_v7, 0.0  ;;  %7514 = vadd.xlane.f32.xlu1 %v7495_v22  ;;  %v5956_v57 = vmax.f32 %v14322_v0, 0.0 }
 0xd2d   :  { %v7061_v6 = vadd.f32 %v7045_v60, %v14321_v26  ;;  %v7247_v51 = vmul.f32 0.2, %v7231_v39  ;;  %v7294_v13 = vadd.f32 %v7278_v36, %v7092_v25  ;;  %v7480_v35 = vmul.f32 %v7464_v31, %v12053_v9  ;;  %v14333_v39 = vld [vmem:[#allocation52_spill] sm:$0xff] }
 0xd2e   :  { %v6875_v56 = vmul.f32 %v6859_v47, %v12032_v52  ;;  %v7449_v24 = vmul.f32 0.2, %v7433_v45  ;;  %v14323_v54 = vmin.f32 %v14322_v0, 0.0  ;;  %v6162_v43 = vmax.f32 %v14324_v3, 0.0 }
 0xd2f   :  { %v7077_v42 = vmul.f32 %v7061_v6, %v12036_v4  ;;  %v7263_v12 = vadd.f32 %v7247_v51, %v7215_v8  ;;  %v14325_v7 = vmin.f32 %v14324_v3, 0.0  ;;  %v7496_v5 = vadd.f32 %v7480_v35, %v7294_v13 }
 0xd30   :  { %v5988_v20 = vmul.f32 0.2, %v14323_v54  ;;  %v7465_v38 = vadd.f32 %v7449_v24, %v7417_v44  ;;  %v6368_v2 = vmax.f32 %v14326_v55, 0.0  ;;  %v6384_v53 = vmin.f32 %v14326_v55, 0.0  ;;  %v14335_v44 = vld [vmem:[#allocation128_spill] sm:$0xff]  ;;  %v14340_v55 = vld [vmem:[#allocation130_spill] sm:$0xff] }
 0xd31   :  { %v7093_v15 = vadd.f32 %v7077_v42, %v6875_v56  ;;  %v6194_v30 = vmul.f32 0.2, %v14325_v7  ;;  %v7279_v37 = vmul.f32 %v7263_v12, %v12049_v28  ;;  %v6558_v14 = vadd.f32 %v14327_v16, %v11986_v11  ;;  %7516 = vadd.xlane.f32.xlu0 %v7496_v5 }
 0xd32   :  { %v6004_v19 = vadd.f32 %v5988_v20, %v5956_v57  ;;  %v7481_v61 = vmul.f32 %v7465_v38, %v12053_v9  ;;  %v5957_v32 = vmax.f32 %v14328_v34, 0.0  ;;  %v14329_v21 = vmin.f32 %v14328_v34, 0.0  ;;  %v14337_v57 = vld [vmem:[#allocation111_spill] sm:$0xff] }
 0xd33   :  { %v6210_v59 = vadd.f32 %v6194_v30, %v6162_v43  ;;  %v7295_v48 = vadd.f32 %v7279_v37, %v7093_v15  ;;  %v6400_v62 = vmul.f32 0.2, %v6384_v53  ;;  %v6574_v17 = vmax.f32 %v6558_v14, 0.0 }
 0xd34   :  { %v6024_v50 = vmul.f32 %v12032_v52, %v6004_v19  ;;  %v5989_v46 = vmul.f32 0.2, %v14329_v21  ;;  %v6590_v18 = vmin.f32 %v6558_v14, 0.0  ;;  %v6163_v58 = vmax.f32 %v14330_v23, 0.0  ;;  %v14343_v21 = vld [vmem:[#allocation55_spill] sm:$0xff] }
 0xd35   :  { %v6230_v1 = vmul.f32 %v12036_v4, %v6210_v59  ;;  %v14331_v27 = vmin.f32 %v14330_v23, 0.0  ;;  %v7497_v60 = vadd.f32 %v7481_v61, %v7295_v48  ;;  %v6416_v33 = vadd.f32 %v6400_v62, %v6368_v2 }
 0xd36   :  { %v6005_v29 = vadd.f32 %v5989_v46, %v5957_v32  ;;  %v6369_v63 = vmax.f32 %v14332_v40, 0.0  ;;  %v6606_v8 = vmul.f32 0.2, %v6590_v18  ;;  %v6385_v47 = vmin.f32 %v14332_v40, 0.0  ;;  %v14345_v18 = vld [vmem:[#allocation126_spill] sm:$0xff] }
 0xd37   :  { %v6195_v10 = vmul.f32 0.2, %v14331_v27  ;;  %v6246_v25 = vadd.f32 %v6230_v1, %v6024_v50  ;;  %7518 = vadd.xlane.f32.xlu1 %v7497_v60  ;;  %v6436_v26 = vmul.f32 %v12049_v28, %v6416_v33  ;;  %v6559_v6 = vadd.f32 %v14327_v16, %v11990_v49  ;;  %v14341_v50 = vld [vmem:[#allocation75_spill] sm:$0xff] }
 0xd38   :  { %v6025_v22 = vmul.f32 %v12032_v52, %v6005_v29  ;;  %v14334_v36 = vmin.f32 %v14333_v39, 0.0  ;;  %v14336_v45 = vmin.f32 %v14335_v44, 0.0  ;;  %v6622_v42 = vadd.f32 %v6606_v8, %v6574_v17 }
 0xd39   :  { %v6211_v41 = vadd.f32 %v6195_v10, %v6163_v58  ;;  %v6401_v0 = vmul.f32 0.2, %v6385_v47  ;;  %v7218_v13 = vmax.f32 %v14337_v57, 0.0  ;;  %v6452_v35 = vadd.f32 %v6436_v26, %v6246_v25 }
 0xd3a   :  { %v6846_v31 = vmul.f32 0.2, %v14334_v36  ;;  %v7048_v56 = vmul.f32 0.2, %v14336_v45  ;;  %v6575_v24 = vmax.f32 %v6559_v6, 0.0  ;;  %v6591_v54 = vmin.f32 %v6559_v6, 0.0 }
 0xd3b   :  { %v6231_v51 = vmul.f32 %v12036_v4, %v6211_v41  ;;  %v14338_v20 = vmax.f32 %v14333_v39, 0.0  ;;  %v6642_v12 = vmul.f32 %v12053_v9, %v6622_v42  ;;  %v6417_v43 = vadd.f32 %v6401_v0, %v6369_v63  ;;  %v14348_v63 = vld [vmem:[#allocation114_spill] sm:$0xff] }
 0xd3c   :  { %v14339_v7 = vmax.f32 %v14335_v44, 0.0  ;;  %v6607_v5 = vmul.f32 0.2, %v6591_v54  ;;  %v7234_v19 = vmin.f32 %v14337_v57, 0.0  ;;  %v7420_v2 = vmax.f32 %v14340_v55, 0.0  ;;  %v14349_v44 = vld [vmem:[#allocation105_spill] sm:$0xff] }
 0xd3d   :  { %v6862_v15 = vadd.f32 %v6846_v31, %v14338_v20  ;;  %v6247_v3 = vadd.f32 %v6231_v51, %v6025_v22  ;;  %v6658_v37 = vadd.f32 %v6642_v12, %v6452_v35  ;;  %v6437_v59 = vmul.f32 %v12049_v28, %v6417_v43  ;;  %v14351_v57 = vld [vmem:[#allocation51_spill] sm:$0xff] }
 0xd3e   :  { %v7064_v30 = vadd.f32 %v7048_v56, %v14339_v7  ;;  %v7436_v16 = vmin.f32 %v14340_v55, 0.0  ;;  %v6623_v14 = vadd.f32 %v6607_v5, %v6575_v24  ;;  %v7250_v61 = vmul.f32 0.2, %v7234_v19 }
 0xd3f   :  { %v6878_v38 = vmul.f32 %v6862_v15, %v12032_v52  ;;  %v14342_v34 = vmin.f32 %v14341_v50, 0.0  ;;  %v14344_v46 = vmin.f32 %v14343_v21, 0.0  ;;  %6680 = vadd.xlane.f32.xlu0 %v6658_v37  ;;  %v6453_v1 = vadd.f32 %v6437_v59, %v6247_v3  ;;  %v14353_v15 = vld [vmem:[#allocation119_spill] sm:$0xff] }
 0xd40   :  { %v7080_v53 = vmul.f32 %v7064_v30, %v12036_v4  ;;  %v7452_v17 = vmul.f32 0.2, %v7436_v16  ;;  %v7219_v29 = vmax.f32 %v14345_v18, 0.0  ;;  %v6643_v23 = vmul.f32 %v12053_v9, %v6623_v14  ;;  %v14354_v30 = vld [vmem:[#allocation73_spill] sm:$0xff] }
 0xd41   :  { %v6847_v32 = vmul.f32 0.2, %v14342_v34  ;;  %v7049_v48 = vmul.f32 0.2, %v14344_v46  ;;  %v7266_v58 = vadd.f32 %v7250_v61, %v7218_v13  ;;  %v14346_v27 = vmax.f32 %v14341_v50, 0.0 }
 0xd42   :  { %v7096_v62 = vadd.f32 %v7080_v53, %v6878_v38  ;;  %v14347_v60 = vmax.f32 %v14343_v21, 0.0  ;;  %v7468_v33 = vadd.f32 %v7452_v17, %v7420_v2  ;;  %v7235_v40 = vmin.f32 %v14345_v18, 0.0  ;;  %v14355_v2 = vld [vmem:[#allocation72_spill] sm:$0xff]  ;;  %v14357_v21 = vld [vmem:[#allocation87_spill] sm:$0xff]  ;;  %v14359_v18 = vld [vmem:[#allocation113_spill] sm:$0xff] }
 0xd43   :  { %v6863_v10 = vadd.f32 %v6847_v32, %v14346_v27  ;;  %v7421_v8 = vmax.f32 %v14348_v63, 0.0  ;;  %v7437_v22 = vmin.f32 %v14348_v63, 0.0  ;;  %v6659_v41 = vadd.f32 %v6643_v23, %v6453_v1 }
 0xd44   :  { %v7065_v25 = vadd.f32 %v7049_v48, %v14347_v60  ;;  %v7282_v47 = vmul.f32 %v7266_v58, %v12049_v28  ;;  %v7484_v39 = vmul.f32 %v7468_v33, %v12053_v9  ;;  %v7251_v36 = vmul.f32 0.2, %v7235_v40 }
 0xd45   :  { %v6879_v26 = vmul.f32 %v6863_v10, %v12032_v52  ;;  %v7453_v31 = vmul.f32 0.2, %v7437_v22  ;;  %v5960_v45 = vmax.f32 %v14349_v44, 0.0  ;;  %6682 = vadd.xlane.f32.xlu1 %v6659_v41  ;;  %v14350_v51 = vmin.f32 %v14349_v44, 0.0  ;;  %v14360_v22 = vld [vmem:[#allocation102_spill] sm:$0xff] }
 0xd46   :  { %v7081_v6 = vmul.f32 %v7065_v25, %v12036_v4  ;;  %v7298_v56 = vadd.f32 %v7282_v47, %v7096_v62  ;;  %v6166_v13 = vmax.f32 %v14351_v57, 0.0  ;;  %v7267_v35 = vadd.f32 %v7251_v36, %v7219_v29 }
 0xd47   :  { %v5992_v0 = vmul.f32 0.2, %v14350_v51  ;;  %v7469_v24 = vadd.f32 %v7453_v31, %v7421_v8  ;;  %v14352_v54 = vmin.f32 %v14351_v57, 0.0  ;;  %v6372_v12 = vmax.f32 %v14353_v15, 0.0 }
 0xd48   :  { %v7097_v42 = vadd.f32 %v7081_v6, %v6879_v26  ;;  %v7500_v3 = vadd.f32 %v7484_v39, %v7298_v56  ;;  %v6388_v7 = vmin.f32 %v14353_v15, 0.0  ;;  %v6562_v5 = vadd.f32 %v14354_v30, %v11986_v11 }
 0xd49   :  { %v6198_v20 = vmul.f32 0.2, %v14352_v54  ;;  %v6008_v43 = vadd.f32 %v5992_v0, %v5960_v45  ;;  %v7283_v38 = vmul.f32 %v7267_v35, %v12049_v28  ;;  %v7485_v19 = vmul.f32 %v7469_v24, %v12053_v9  ;;  %v14364_v24 = vld [vmem:[#allocation86_spill] sm:$0xff] }
 0xd4a   :  { %v5961_v37 = vmax.f32 %v14355_v2, 0.0  ;;  %7524 = vadd.xlane.f32.xlu0 %v7500_v3  ;;  %v6404_v53 = vmul.f32 0.2, %v6388_v7  ;;  %v6578_v16 = vmax.f32 %v6562_v5, 0.0  ;;  %v6594_v14 = vmin.f32 %v6562_v5, 0.0  ;;  %v14365_v7 = vld [vmem:[#allocation136_spill] sm:$0xff] }
 0xd4b   :  { %v6214_v55 = vadd.f32 %v6198_v20, %v6166_v13  ;;  %v6028_v59 = vmul.f32 %v12032_v52, %v6008_v43  ;;  %v7299_v61 = vadd.f32 %v7283_v38, %v7097_v42  ;;  %v14356_v34 = vmin.f32 %v14355_v2, 0.0  ;;  %v14362_v42 = vld [vmem:[#allocation121_spill] sm:$0xff]  ;;  %v14366_v5 = vld [vmem:[#allocation107_spill] sm:$0xff] }
 0xd4c   :  { %v6167_v46 = vmax.f32 %v14357_v21, 0.0  ;;  %v6420_v48 = vadd.f32 %v6404_v53, %v6372_v12  ;;  %v6610_v1 = vmul.f32 0.2, %v6594_v14  ;;  %v14358_v62 = vmin.f32 %v14357_v21, 0.0  ;;  %v14368_v53 = vld [vmem:[#allocation61_spill] sm:$0xff] }
 0xd4d   :  { %v6234_v50 = vmul.f32 %v12036_v4, %v6214_v55  ;;  %v5993_v32 = vmul.f32 0.2, %v14356_v34  ;;  %v6373_v29 = vmax.f32 %v14359_v18, 0.0  ;;  %v7501_v23 = vadd.f32 %v7485_v19, %v7299_v61 }
 0xd4e   :  { %v6199_v17 = vmul.f32 0.2, %v14358_v62  ;;  %v6389_v10 = vmin.f32 %v14359_v18, 0.0  ;;  %v6440_v60 = vmul.f32 %v12049_v28, %v6420_v48  ;;  %v6626_v25 = vadd.f32 %v6610_v1, %v6578_v16  ;;  %v14370_v1 = vld [vmem:[#allocation48_spill] sm:$0xff] }
 0xd4f   :  { %v6250_v58 = vadd.f32 %v6234_v50, %v6028_v59  ;;  %v6009_v27 = vadd.f32 %v5993_v32, %v5961_v37  ;;  %v6563_v40 = vadd.f32 %v14354_v30, %v11990_v49  ;;  %7526 = vadd.xlane.f32.xlu1 %v7501_v23  ;;  %v5962_v41 = vmax.f32 %v14360_v22, 0.0 }
 0xd50   :  { %v6215_v33 = vadd.f32 %v6199_v17, %v6167_v46  ;;  %v6405_v8 = vmul.f32 0.2, %v6389_v10  ;;  %v14361_v47 = vmin.f32 %v14360_v22, 0.0  ;;  %v6646_v39 = vmul.f32 %v12053_v9, %v6626_v25 }
 0xd51   :  { %v6029_v63 = vmul.f32 %v12032_v52, %v6009_v27  ;;  %v6456_v6 = vadd.f32 %v6440_v60, %v6250_v58  ;;  %v6579_v31 = vmax.f32 %v6563_v40, 0.0  ;;  %v6595_v45 = vmin.f32 %v6563_v40, 0.0  ;;  %v14371_v40 = vld [vmem:[#allocation60_spill] sm:$0xff] }
 0xd52   :  { %v5994_v26 = vmul.f32 0.2, %v14361_v47  ;;  %v6235_v36 = vmul.f32 %v12036_v4, %v6215_v33  ;;  %v6421_v44 = vadd.f32 %v6405_v8, %v6373_v29  ;;  %v6168_v51 = vmax.f32 %v14362_v42, 0.0 }
 0xd53   :  { %v6662_v0 = vadd.f32 %v6646_v39, %v6456_v6  ;;  %v14363_v13 = vmin.f32 %v14362_v42, 0.0  ;;  %v6374_v54 = vmax.f32 %v14364_v24, 0.0  ;;  %v6611_v15 = vmul.f32 0.2, %v6595_v45 }
 0xd54   :  { %v6010_v56 = vadd.f32 %v5994_v26, %v5962_v41  ;;  %v6251_v57 = vadd.f32 %v6235_v36, %v6029_v63  ;;  %v6441_v20 = vmul.f32 %v12049_v28, %v6421_v44  ;;  %v6390_v3 = vmin.f32 %v14364_v24, 0.0  ;;  %v14373_v44 = vld [vmem:[#allocation101_spill] sm:$0xff] }
 0xd55   :  { %v6200_v35 = vmul.f32 0.2, %v14363_v13  ;;  %6688 = vadd.xlane.f32.xlu0 %v6662_v0  ;;  %v6564_v30 = vadd.f32 %v14365_v7, %v11986_v11  ;;  %v5963_v38 = vmax.f32 %v14366_v5, 0.0  ;;  %v14367_v19 = vmin.f32 %v14366_v5, 0.0 }
 0xd56   :  { %v6030_v12 = vmul.f32 %v12032_v52, %v6010_v56  ;;  %v6457_v2 = vadd.f32 %v6441_v20, %v6251_v57  ;;  %v6627_v37 = vadd.f32 %v6611_v15, %v6579_v31  ;;  %v6406_v59 = vmul.f32 0.2, %v6390_v3  ;;  %v14375_v57 = vld [vmem:[#allocation43_spill] sm:$0xff]  ;;  %v14376_v3 = vld [vmem:[#allocation94_spill] sm:$0xff] }
 0xd57   :  { %v6216_v43 = vadd.f32 %v6200_v35, %v6168_v51  ;;  %v5995_v55 = vmul.f32 0.2, %v14367_v19  ;;  %v6169_v16 = vmax.f32 %v14368_v53, 0.0  ;;  %v6580_v61 = vmax.f32 %v6564_v30, 0.0 }
 0xd58   :  { %v6596_v50 = vmin.f32 %v6564_v30, 0.0  ;;  %v6647_v32 = vmul.f32 %v12053_v9, %v6627_v37  ;;  %v6422_v21 = vadd.f32 %v6406_v59, %v6374_v54  ;;  %v14369_v46 = vmin.f32 %v14368_v53, 0.0 }
 0xd59   :  { %v6236_v14 = vmul.f32 %v12036_v4, %v6216_v43  ;;  %v6011_v34 = vadd.f32 %v5995_v55, %v5963_v38  ;;  %v6375_v62 = vmax.f32 %v14370_v1, 0.0  ;;  %v6391_v23 = vmin.f32 %v14370_v1, 0.0 }
 0xd5a   :  { %v6201_v48 = vmul.f32 0.2, %v14369_v46  ;;  %v6612_v18 = vmul.f32 0.2, %v6596_v50  ;;  %v6663_v58 = vadd.f32 %v6647_v32, %v6457_v2  ;;  %v6442_v27 = vmul.f32 %v12049_v28, %v6422_v21  ;;  %v14379_v2 = vld [vmem:[#allocation97_spill] sm:$0xff]  ;;  %v14381_v21 = vld [vmem:[#allocation134_spill] sm:$0xff] }
 0xd5b   :  { %v6252_v17 = vadd.f32 %v6236_v14, %v6030_v12  ;;  %v6031_v29 = vmul.f32 %v12032_v52, %v6011_v34  ;;  %v6565_v60 = vadd.f32 %v14365_v7, %v11990_v49  ;;  %v6407_v33 = vmul.f32 0.2, %v6391_v23  ;;  %v14377_v7 = vld [vmem:[#allocation104_spill] sm:$0xff] }
 0xd5c   :  { %v6217_v10 = vadd.f32 %v6201_v48, %v6169_v16  ;;  %v6628_v25 = vadd.f32 %v6612_v18, %v6580_v61  ;;  %v6812_v63 = vmax.f32 %v14371_v40, 0.0  ;;  %v14372_v8 = vmin.f32 %v14371_v40, 0.0  ;;  %6690 = vadd.xlane.f32.xlu1 %v6663_v58 }
 0xd5d   :  { %v6458_v41 = vadd.f32 %v6442_v27, %v6252_v17  ;;  %v6581_v26 = vmax.f32 %v6565_v60, 0.0  ;;  %v6597_v6 = vmin.f32 %v6565_v60, 0.0  ;;  %v6423_v36 = vadd.f32 %v6407_v33, %v6375_v62  ;;  %v14382_v60 = vld [vmem:[#allocation66_spill] sm:$0xff] }
 0xd5e   :  { %v6844_v22 = vmul.f32 0.2, %v14372_v8  ;;  %v6237_v47 = vmul.f32 %v12036_v4, %v6217_v10  ;;  %v6648_v39 = vmul.f32 %v12053_v9, %v6628_v25  ;;  %v7014_v45 = vmax.f32 %v14373_v44, 0.0 }
 0xd5f   :  { %v6613_v42 = vmul.f32 0.2, %v6597_v6  ;;  %v14374_v51 = vmin.f32 %v14373_v44, 0.0  ;;  %v7216_v13 = vmax.f32 %v14375_v57, 0.0  ;;  %v6443_v24 = vmul.f32 %v12049_v28, %v6423_v36 }
 0xd60   :  { %v6860_v31 = vadd.f32 %v6844_v22, %v6812_v63  ;;  %v6253_v56 = vadd.f32 %v6237_v47, %v6031_v29  ;;  %v6664_v35 = vadd.f32 %v6648_v39, %v6458_v41  ;;  %v7232_v20 = vmin.f32 %v14375_v57, 0.0  ;;  %v14384_v39 = vld [vmem:[#allocation44_spill] sm:$0xff] }
 0xd61   :  { %v7046_v0 = vmul.f32 0.2, %v14374_v51  ;;  %v6629_v15 = vadd.f32 %v6613_v42, %v6581_v26  ;;  %v7402_v43 = vadd.f32 %v14376_v3, %v11986_v11  ;;  %v6813_v30 = vmax.f32 %v14377_v7, 0.0  ;;  %v14386_v42 = vld [vmem:[#allocation46_spill] sm:$0xff] }
 0xd62   :  { %v6876_v54 = vmul.f32 %v6860_v31, %v12032_v52  ;;  %6692 = vadd.xlane.f32.xlu0 %v6664_v35  ;;  %v6459_v5 = vadd.f32 %v6443_v24, %v6253_v56  ;;  %v7248_v38 = vmul.f32 0.2, %v7232_v20  ;;  %v14378_v19 = vmin.f32 %v14377_v7, 0.0  ;;  %v14387_v20 = vld [vmem:[#allocation120_spill] sm:$0xff] }
 0xd63   :  { %v7062_v12 = vadd.f32 %v7046_v0, %v7014_v45  ;;  %v7015_v37 = vmax.f32 %v14379_v2, 0.0  ;;  %v6649_v59 = vmul.f32 %v12053_v9, %v6629_v15  ;;  %v7418_v16 = vmax.f32 %v7402_v43, 0.0 }
 0xd64   :  { %v6845_v55 = vmul.f32 0.2, %v14378_v19  ;;  %v7434_v14 = vmin.f32 %v7402_v43, 0.0  ;;  %v7264_v61 = vadd.f32 %v7248_v38, %v7216_v13  ;;  %v14380_v34 = vmin.f32 %v14379_v2, 0.0  ;;  %v14390_v38 = vld [vmem:[#allocation77_spill] sm:$0xff] }
 0xd65   :  { %v7078_v53 = vmul.f32 %v7062_v12, %v12036_v4  ;;  %v7217_v46 = vmax.f32 %v14381_v21, 0.0  ;;  %v6665_v48 = vadd.f32 %v6649_v59, %v6459_v5  ;;  %v7233_v17 = vmin.f32 %v14381_v21, 0.0  ;;  %v14388_v12 = vld [vmem:[#allocation110_spill] sm:$0xff] }
 0xd66   :  { %v6861_v50 = vadd.f32 %v6845_v55, %v6813_v30  ;;  %v7047_v32 = vmul.f32 0.2, %v14380_v34  ;;  %v7450_v62 = vmul.f32 0.2, %v7434_v14  ;;  %v7280_v18 = vmul.f32 %v7264_v61, %v12049_v28 }
 0xd67   :  { %v7094_v1 = vadd.f32 %v7078_v53, %v6876_v54  ;;  %v7403_v58 = vadd.f32 %v14376_v3, %v11990_v49  ;;  %6694 = vadd.xlane.f32.xlu1 %v6665_v48  ;;  %v7249_v10 = vmul.f32 0.2, %v7233_v17  ;;  %v6816_v25 = vmax.f32 %v14382_v60, 0.0 }
 0xd68   :  { %v6877_v29 = vmul.f32 %v6861_v50, %v12032_v52  ;;  %v7063_v23 = vadd.f32 %v7047_v32, %v7015_v37  ;;  %v7466_v27 = vadd.f32 %v7450_v62, %v7418_v16  ;;  %v14383_v33 = vmin.f32 %v14382_v60, 0.0  ;;  %v14392_v50 = vld [vmem:[#allocation89_spill] sm:$0xff] }
 0xd69   :  { %v7296_v63 = vadd.f32 %v7280_v18, %v7094_v1  ;;  %v7419_v22 = vmax.f32 %v7403_v58, 0.0  ;;  %v7435_v41 = vmin.f32 %v7403_v58, 0.0  ;;  %v7265_v26 = vadd.f32 %v7249_v10, %v7217_v46  ;;  %v14393_v58 = vld [vmem:[#allocation122_spill] sm:$0xff] }
 0xd6a   :  { %v6848_v40 = vmul.f32 0.2, %v14383_v33  ;;  %v7079_v8 = vmul.f32 %v7063_v23, %v12036_v4  ;;  %v7482_v47 = vmul.f32 %v7466_v27, %v12053_v9  ;;  %v7018_v36 = vmax.f32 %v14384_v39, 0.0  ;;  %v14396_v33 = vld [vmem:[#allocation132_spill] sm:$0xff] }
 0xd6b   :  { %v7451_v44 = vmul.f32 0.2, %v7435_v41  ;;  %v14385_v45 = vmin.f32 %v14384_v39, 0.0  ;;  %v7220_v51 = vmax.f32 %v14386_v42, 0.0  ;;  %v7281_v57 = vmul.f32 %v7265_v26, %v12049_v28 }
 0xd6c   :  { %v6864_v6 = vadd.f32 %v6848_v40, %v6816_v25  ;;  %v7095_v31 = vadd.f32 %v7079_v8, %v6877_v29  ;;  %v7498_v0 = vadd.f32 %v7482_v47, %v7296_v63  ;;  %v7236_v35 = vmin.f32 %v14386_v42, 0.0  ;;  %v14395_v25 = vld [vmem:[#allocation40_spill] sm:$0xff] }
 0xd6d   :  { %v7050_v56 = vmul.f32 0.2, %v14385_v45  ;;  %v7467_v24 = vadd.f32 %v7451_v44, %v7419_v22  ;;  %v7406_v15 = vadd.f32 %v14387_v20, %v11986_v11  ;;  %v6817_v3 = vmax.f32 %v14388_v12, 0.0  ;;  %v14398_v44 = vld [vmem:[#allocation116_spill] sm:$0xff] }
 0xd6e   :  { %v6880_v13 = vmul.f32 %v6864_v6, %v12032_v52  ;;  %7520 = vadd.xlane.f32.xlu0 %v7498_v0  ;;  %v7297_v43 = vadd.f32 %v7281_v57, %v7095_v31  ;;  %v7252_v7 = vmul.f32 0.2, %v7236_v35  ;;  %v14389_v30 = vmin.f32 %v14388_v12, 0.0  ;;  %v14400_v57 = vld [vmem:[#allocation131_spill] sm:$0xff] }
 0xd6f   :  { %v7066_v54 = vadd.f32 %v7050_v56, %v7018_v36  ;;  %v7019_v19 = vmax.f32 %v14390_v38, 0.0  ;;  %v7483_v55 = vmul.f32 %v7467_v24, %v12053_v9  ;;  %v7422_v37 = vmax.f32 %v7406_v15, 0.0 }
 0xd70   :  { %v6849_v5 = vmul.f32 0.2, %v14389_v30  ;;  %v7438_v59 = vmin.f32 %v7406_v15, 0.0  ;;  %v7268_v53 = vadd.f32 %v7252_v7, %v7220_v51  ;;  %v14391_v14 = vmin.f32 %v14390_v38, 0.0 }
 0xd71   :  { %v7082_v2 = vmul.f32 %v7066_v54, %v12036_v4  ;;  %v7221_v34 = vmax.f32 %v14392_v50, 0.0  ;;  %v7499_v32 = vadd.f32 %v7483_v55, %v7297_v43  ;;  %v7237_v48 = vmin.f32 %v14392_v50, 0.0  ;;  %v14401_v43 = vld [vmem:[#allocation45_spill] sm:$0xff] }
 0xd72   :  { %v6865_v16 = vadd.f32 %v6849_v5, %v6817_v3  ;;  %v7051_v61 = vmul.f32 0.2, %v14391_v14  ;;  %v7454_v46 = vmul.f32 0.2, %v7438_v59  ;;  %v7284_v1 = vmul.f32 %v7268_v53, %v12049_v28 }
 0xd73   :  { %v7098_v21 = vadd.f32 %v7082_v2, %v6880_v13  ;;  %v7407_v18 = vadd.f32 %v14387_v20, %v11990_v49  ;;  %7522 = vadd.xlane.f32.xlu1 %v7499_v32  ;;  %v7253_v23 = vmul.f32 0.2, %v7237_v48  ;;  %v6818_v27 = vmax.f32 %v14393_v58, 0.0  ;;  %v14403_v2 = vld [vmem:[#allocation70_spill] sm:$0xff] }
 0xd74   :  { %v6881_v62 = vmul.f32 %v6865_v16, %v12032_v52  ;;  %v7067_v17 = vadd.f32 %v7051_v61, %v7019_v19  ;;  %v7470_v29 = vadd.f32 %v7454_v46, %v7422_v37  ;;  %v14394_v10 = vmin.f32 %v14393_v58, 0.0  ;;  %v14406_v58 = vld [vmem:[#allocation65_spill] sm:$0xff] }
 0xd75   :  { %v14397_v40 = vcombine.high %v14396_v33, %v14396_v33  ;;  %v7300_v8 = vadd.f32 %v7284_v1, %v7098_v21  ;;  %v7439_v41 = vmin.f32 %v7407_v18, 0.0  ;;  %v7269_v26 = vadd.f32 %v7253_v23, %v7221_v34  ;;  %v14405_v21 = vld [vmem:[#allocation127_spill] sm:$0xff] }
 0xd76   :  { %v6850_v60 = vmul.f32 0.2, %v14394_v10  ;;  %v7083_v22 = vmul.f32 %v7067_v17, %v12036_v4  ;;  %v7486_v47 = vmul.f32 %v7470_v29, %v12053_v9  ;;  %v7423_v6 = vmax.f32 %v7407_v18, 0.0 }
 0xd77   :  { %v7383_v63 = vrot.slane %v14397_v40, %v14395_v25  ;;  %v7455_v31 = vmul.f32 0.2, %v7439_v41  ;;  %v7020_v45 = vmax.f32 %v14398_v44, 0.0  ;;  %v14399_v56 = vmin.f32 %v14398_v44, 0.0 }
 0xd78   :  { %v6866_v39 = vadd.f32 %v6850_v60, %v6818_v27  ;;  %v7099_v36 = vadd.f32 %v7083_v22, %v6881_v62  ;;  %v7502_v51 = vadd.f32 %v7486_v47, %v7300_v8  ;;  %v7285_v0 = vmul.f32 %v7269_v26, %v12049_v28 }
 0xd79   :  { %v7052_v42 = vmul.f32 0.2, %v14399_v56  ;;  %v7222_v13 = vmax.f32 %v14400_v57, 0.0  ;;  %v7238_v35 = vmin.f32 %v14400_v57, 0.0  ;;  %v7471_v24 = vadd.f32 %v7455_v31, %v7423_v6  ;;  %v14407_v6 = vld [vmem:[#allocation135_spill] sm:$0xff]  ;;  %v14408_v56 = vld [vmem:[#allocation109_spill] sm:$0xff] }
 0xd7a   :  { %v6882_v54 = vmul.f32 %v6866_v39, %v12032_v52  ;;  %v7408_v15 = vadd.f32 %v7383_v63, %v11986_v11  ;;  %7528 = vadd.xlane.f32.xlu0 %v7502_v51  ;;  %v7301_v12 = vadd.f32 %v7285_v0, %v7099_v36  ;;  %v6819_v7 = vmax.f32 %v14401_v43, 0.0 }
 0xd7b   :  { %v7068_v20 = vadd.f32 %v7052_v42, %v7020_v45  ;;  %v7254_v3 = vmul.f32 0.2, %v7238_v35  ;;  %v14402_v30 = vmin.f32 %v14401_v43, 0.0  ;;  %v7487_v38 = vmul.f32 %v7471_v24, %v12053_v9 }
 0xd7c   :  { %v7440_v55 = vmin.f32 %v7408_v15, 0.0  ;;  %v7021_v37 = vmax.f32 %v14403_v2, 0.0  ;;  %v7424_v53 = vmax.f32 %v7408_v15, 0.0  ;;  %v14404_v14 = vmin.f32 %v14403_v2, 0.0 }
 0xd7d   :  { %v6851_v5 = vmul.f32 0.2, %v14402_v30  ;;  %v7084_v19 = vmul.f32 %v7068_v20, %v12036_v4  ;;  %v7270_v59 = vadd.f32 %v7254_v3, %v7222_v13  ;;  %v7503_v50 = vadd.f32 %v7487_v38, %v7301_v12  ;;  %v14409_v13 = vld [vmem:[#allocation103_spill] sm:$0xff]  ;;  %v14410_v20 = vld [vmem:[#allocation85_spill] sm:$0xff] }
 0xd7e   :  { %v7053_v61 = vmul.f32 0.2, %v14404_v14  ;;  %v7456_v32 = vmul.f32 0.2, %v7440_v55  ;;  %v7239_v46 = vmin.f32 %v14405_v21, 0.0  ;;  %v7409_v17 = vadd.f32 %v7383_v63, %v11990_v49  ;;  %v14411_v55 = vld [vmem:[#allocation118_spill] sm:$0xff] }
 0xd7f   :  { %v6867_v16 = vadd.f32 %v6851_v5, %v6819_v7  ;;  %v7100_v34 = vadd.f32 %v7084_v19, %v6882_v54  ;;  %v7286_v48 = vmul.f32 %v7270_v59, %v12049_v28  ;;  %7530 = vadd.xlane.f32.xlu1 %v7503_v50  ;;  %v7223_v29 = vmax.f32 %v14405_v21, 0.0  ;;  %v14412_v50 = vld [vmem:[#allocation50_spill] sm:$0xff] }
 0xd80   :  { %v7069_v62 = vadd.f32 %v7053_v61, %v7021_v37  ;;  %v7472_v18 = vadd.f32 %v7456_v32, %v7424_v53  ;;  %v7255_v23 = vmul.f32 0.2, %v7239_v46  ;;  %v5980_v27 = vmin.f32 %v14406_v58, 0.0 }
 0xd81   :  { %v6883_v1 = vmul.f32 %v6867_v16, %v12032_v52  ;;  %v7302_v10 = vadd.f32 %v7286_v48, %v7100_v34  ;;  %v7441_v33 = vmin.f32 %v7409_v17, 0.0  ;;  %v5964_v40 = vmax.f32 %v14406_v58, 0.0  ;;  %v14414_v58 = vld [vmem:[#allocation129_spill] sm:$0xff] }
 0xd82   :  { %v7085_v60 = vmul.f32 %v7069_v62, %v12036_v4  ;;  %v7488_v8 = vmul.f32 %v7472_v18, %v12053_v9  ;;  %v7271_v22 = vadd.f32 %v7255_v23, %v7223_v29  ;;  %v7425_v41 = vmax.f32 %v7409_v17, 0.0  ;;  %v14413_v29 = vld [vmem:[#allocation133_spill] sm:$0xff] }
 0xd83   :  { %v5996_v47 = vmul.f32 0.2, %v5980_v27  ;;  %v7457_v63 = vmul.f32 0.2, %v7441_v33  ;;  %v6170_v39 = vmax.f32 %v14407_v6, 0.0  ;;  %v6186_v36 = vmin.f32 %v14407_v6, 0.0 }
 0xd84   :  { %v7101_v26 = vadd.f32 %v7085_v60, %v6883_v1  ;;  %v7504_v31 = vadd.f32 %v7488_v8, %v7302_v10  ;;  %v7287_v44 = vmul.f32 %v7271_v22, %v12049_v28  ;;  %v6392_v42 = vmin.f32 %v14408_v56, 0.0 }
 0xd85   :  { %v6012_v45 = vadd.f32 %v5996_v47, %v5964_v40  ;;  %v7473_v51 = vadd.f32 %v7457_v63, %v7425_v41  ;;  %v6202_v0 = vmul.f32 0.2, %v6186_v36  ;;  %v6376_v57 = vmax.f32 %v14408_v56, 0.0 }
 0xd86   :  { %v6566_v35 = vadd.f32 %v14409_v13, %v11986_v11  ;;  %7532 = vadd.xlane.f32.xlu0 %v7504_v31  ;;  %v7303_v24 = vadd.f32 %v7287_v44, %v7101_v26  ;;  %v6408_v54 = vmul.f32 0.2, %v6392_v42  ;;  %v5965_v15 = vmax.f32 %v14410_v20, 0.0 }
 0xd87   :  { %v5981_v12 = vmin.f32 %v14410_v20, 0.0  ;;  %v7489_v3 = vmul.f32 %v7473_v51, %v12053_v9  ;;  %v6032_v43 = vmul.f32 %v12032_v52, %v6012_v45  ;;  %v6218_v7 = vadd.f32 %v6202_v0, %v6170_v39  ;;  %v14416_v39 = vld [vmem:[#allocation83_spill] sm:$0xff] }
 0xd88   :  { %v6598_v30 = vmin.f32 %v6566_v35, 0.0  ;;  %v6424_v5 = vadd.f32 %v6408_v54, %v6376_v57  ;;  %v6582_v38 = vmax.f32 %v6566_v35, 0.0  ;;  %v6187_v2 = vmin.f32 %v14411_v55, 0.0  ;;  %v14418_v54 = vld [vmem:[#allocation91_spill] sm:$0xff] }
 0xd89   :  { %v5997_v19 = vmul.f32 0.2, %v5981_v12  ;;  %v7505_v37 = vadd.f32 %v7489_v3, %v7303_v24  ;;  %v6238_v59 = vmul.f32 %v12036_v4, %v6218_v7  ;;  %v6171_v16 = vmax.f32 %v14411_v55, 0.0 }
 0xd8a   :  { %v6614_v53 = vmul.f32 0.2, %v6598_v30  ;;  %v6203_v61 = vmul.f32 0.2, %v6187_v2  ;;  %v6377_v34 = vmax.f32 %v14412_v50, 0.0  ;;  %v6393_v32 = vmin.f32 %v14412_v50, 0.0 }
 0xd8b   :  { %v6013_v14 = vadd.f32 %v5997_v19, %v5965_v15  ;;  %7534 = vadd.xlane.f32.xlu1 %v7505_v37  ;;  %v6254_v21 = vadd.f32 %v6238_v59, %v6032_v43  ;;  %v6444_v46 = vmul.f32 %v12049_v28, %v6424_v5  ;;  %v6567_v1 = vadd.f32 %v14409_v13, %v11990_v49 }
 0xd8c   :  { %v6630_v48 = vadd.f32 %v6614_v53, %v6582_v38  ;;  %v6219_v17 = vadd.f32 %v6203_v61, %v6171_v16  ;;  %v6409_v18 = vmul.f32 0.2, %v6393_v32  ;;  %v6836_v23 = vmin.f32 %v14413_v29, 0.0  ;;  %v14419_v38 = vld [vmem:[#allocation92_spill] sm:$0xff] }
 0xd8d   :  { %v6033_v62 = vmul.f32 %v12032_v52, %v6013_v14  ;;  %v14415_v27 = vcombine.high %v14414_v58, %v14414_v58  ;;  %v6460_v60 = vadd.f32 %v6444_v46, %v6254_v21  ;;  %v6599_v40 = vmin.f32 %v6567_v1, 0.0  ;;  %v14420_v14 = vld [vmem:[#allocation112_spill] sm:$0xff] }
 0xd8e   :  { %v6650_v33 = vmul.f32 %v12053_v9, %v6630_v48  ;;  %v6239_v8 = vmul.f32 %v12036_v4, %v6219_v17  ;;  %v6425_v22 = vadd.f32 %v6409_v18, %v6377_v34  ;;  %v6820_v41 = vmax.f32 %v14413_v29, 0.0 }
 0xd8f   :  { %v7387_v10 = vrot.slane %v14415_v27, %v14395_v25  ;;  %v6852_v47 = vmul.f32 0.2, %v6836_v23  ;;  %v6583_v63 = vmax.f32 %v6567_v1, 0.0  ;;  %v6615_v6 = vmul.f32 0.2, %v6599_v40  ;;  %v14417_v25 = vld [vmem:[#allocation81_spill] sm:$0xff] }
 0xd90   :  { %v6666_v26 = vadd.f32 %v6650_v33, %v6460_v60  ;;  %v7038_v36 = vmin.f32 %v14416_v39, 0.0  ;;  %v6255_v31 = vadd.f32 %v6239_v8, %v6033_v62  ;;  %v6445_v44 = vmul.f32 %v12049_v28, %v6425_v22 }
 0xd91   :  { %v6868_v45 = vadd.f32 %v6852_v47, %v6820_v41  ;;  %v7240_v56 = vmin.f32 %v14417_v25, 0.0  ;;  %v6631_v42 = vadd.f32 %v6615_v6, %v6583_v63  ;;  %v7022_v51 = vmax.f32 %v14416_v39, 0.0  ;;  %v6669_v41 = vpop.xlane.xlu0 %6668  ;;  %v6673_v47 = vpop.xlane.xlu1 %6672 }
 0xd92   :  { %6696 = vadd.xlane.f32.xlu0 %v6666_v26  ;;  %v7054_v0 = vmul.f32 0.2, %v7038_v36  ;;  %v7410_v57 = vadd.f32 %v7387_v10, %v11986_v11  ;;  %v6461_v13 = vadd.f32 %v6445_v44, %v6255_v31  ;;  %v7224_v35 = vmax.f32 %v14417_v25, 0.0 }
 0xd93   :  { %v7256_v24 = vmul.f32 0.2, %v7240_v56  ;;  %v6837_v20 = vmin.f32 %v14418_v54, 0.0  ;;  %v6651_v15 = vmul.f32 %v12053_v9, %v6631_v42  ;;  %v6884_v12 = vmul.f32 %v6868_v45, %v12032_v52 }
 0xd94   :  { %v7070_v3 = vadd.f32 %v7054_v0, %v7022_v51  ;;  %v7442_v43 = vmin.f32 %v7410_v57, 0.0  ;;  %v6821_v30 = vmax.f32 %v14418_v54, 0.0  ;;  %v7039_v19 = vmin.f32 %v14419_v38, 0.0 }
 0xd95   :  { %v7272_v7 = vadd.f32 %v7256_v24, %v7224_v35  ;;  %v6853_v5 = vmul.f32 0.2, %v6837_v20  ;;  %v6667_v55 = vadd.f32 %v6651_v15, %v6461_v13  ;;  %v7426_v2 = vmax.f32 %v7410_v57, 0.0  ;;  %v6671_v26 = vpop.xlane.xlu0 %6670  ;;  %v6675_v63 = vpop.xlane.xlu1 %6674 }
 0xd96   :  { %v7086_v11 = vmul.f32 %v7070_v3, %v12036_v4  ;;  %v7458_v37 = vmul.f32 0.2, %v7442_v43  ;;  %v7023_v53 = vmax.f32 %v14419_v38, 0.0  ;;  %v7055_v16 = vmul.f32 0.2, %v7039_v19  ;;  %v14421_v3 = vld [vmem:[#allocation67_spill] sm:$0xff] }
 0xd97   :  { %v6869_v59 = vadd.f32 %v6853_v5, %v6821_v30  ;;  %v7241_v61 = vmin.f32 %v14420_v14, 0.0  ;;  %6698 = vadd.xlane.f32.xlu1 %v6667_v55  ;;  %v7288_v34 = vmul.f32 %v7272_v7, %v12049_v28  ;;  %v7411_v21 = vadd.f32 %v7387_v10, %v11990_v49  ;;  %v14422_v30 = vld [vmem:[#allocation62_spill] sm:$0xff] }
 0xd98   :  { %v7102_v50 = vadd.f32 %v7086_v11, %v6884_v12  ;;  %v7474_v32 = vadd.f32 %v7458_v37, %v7426_v2  ;;  %v7071_v48 = vadd.f32 %v7055_v16, %v7023_v53  ;;  %v7225_v1 = vmax.f32 %v14420_v14, 0.0 }
 0xd99   :  { %v6885_v46 = vmul.f32 %v6869_v59, %v12032_v52  ;;  %v7257_v62 = vmul.f32 0.2, %v7241_v61  ;;  %v7443_v29 = vmin.f32 %v7411_v21, 0.0  ;;  %v7427_v60 = vmax.f32 %v7411_v21, 0.0  ;;  %v13138_v6 = vpop.xlane.xlu0 %7508 }
 0xd9a   :  { %v7304_v17 = vadd.f32 %v7288_v34, %v7102_v50  ;;  %v7490_v18 = vmul.f32 %v7474_v32, %v12053_v9  ;;  %v7087_v23 = vmul.f32 %v7071_v48, %v12036_v4  ;;  %v13140_v4 = vpop.xlane.xlu1 %7510  ;;  %v7572_v43 = vrot.slane %v6675_v63, %v14421_v3 }
 0xd9b   :  { %v7273_v58 = vadd.f32 %v7257_v62, %v7225_v1  ;;  %v7459_v33 = vmul.f32 0.2, %v7443_v29  ;;  %v7568_v5 = vrot.slane %v6673_v47, %v14422_v30  ;;  %v7563_v38 = vrot.slane %v6671_v26, %v14421_v3 }
 0xd9c   :  { %v7506_v27 = vadd.f32 %v7490_v18, %v7304_v17  ;;  %v7103_v40 = vadd.f32 %v7087_v23, %v6885_v46  ;;  %v7559_v2 = vrot.slane %v6669_v41, %v14422_v30 }
 0xd9d   :  { %v7289_v8 = vmul.f32 %v7273_v58, %v12049_v28  ;;  %v7475_v49 = vadd.f32 %v7459_v33, %v7427_v60  ;;  %v6677_v39 = vpop.xlane.xlu0 %6676  ;;  %v7573_v37 = vsel %vm2185_vm3, %v7572_v43, %v7568_v5 }
 0xd9e   :  { %7536 = vadd.xlane.f32.xlu0 %v7506_v27  ;;  %v7577_v55 = vrot.slane %v6677_v39, %v14422_v30  ;;  %v7564_v14 = vsel %vm2185_vm3, %v7563_v38, %v7559_v2 }
 0xd9f   :  { %v7305_v52 = vadd.f32 %v7289_v8, %v7103_v40  ;;  %v7491_v10 = vmul.f32 %v7475_v49, %v12053_v9  ;;  %v7628_v34 = vsel %vm2250_vm4, %v7573_v37, %v7564_v14  ;;  %v7659_v49 = vrot.slane %v13140_v4, %v14421_v3 }
 0xda1   :  { %v7507_v22 = vadd.f32 %v7491_v10, %v7305_v52 }
 0xda2   :  { %v6679_v36 = vpop.xlane.xlu1 %6678 }
 0xda3   :  { %7538 = vadd.xlane.f32.xlu1 %v7507_v22  ;;  %v7581_v7 = vrot.slane %v6679_v36, %v14421_v3  ;;  %v7655_v36 = vrot.slane %v13138_v6, %v14422_v30 }
 0xda5   :  { %v7582_v53 = vsel %vm2185_vm3, %v7581_v7, %v7577_v55 }
 0xda6   :  { %v7629_v46 = vsel %vm2252_vm5, %v7582_v53, %v7628_v34 }
 0xda8   :  { %v6685_v31 = vpop.xlane.xlu0 %6684 }
 0xda9   :  { %v7595_v1 = vrot.slane %v6685_v31, %v14422_v30 }
 0xdae   :  { %v6687_v44 = vpop.xlane.xlu1 %6686 }
 0xdaf   :  { %v7599_v32 = vrot.slane %v6687_v44, %v14421_v3  ;;  %v14423_v44 = vld [vmem:[#allocation37_spill] sm:$0xff] }
 0xdb1   :  { %v7600_v23 = vsel %vm2185_vm3, %v7599_v32, %v7595_v1 }
 0xdb4   :  { %v7513_v28 = vpop.xlane.xlu0 %7512 }
 0xdb5   :  { %v7664_v22 = vrot.slane %v7513_v28, %v14422_v30 }
 0xdb9   :  { %v7515_v45 = vpop.xlane.xlu1 %7514 }
 0xdba   :  { %v7668_v60 = vrot.slane %v7515_v45, %v14421_v3 }
 0xdbc   :  { %v7669_v4 = vsel %vm2185_vm3, %v7668_v60, %v7664_v22  ;;  %v14426_v60 = vld [vmem:[#allocation33_spill] sm:$0xff] }
 0xdbe   :  { %v7517_v25 = vpop.xlane.xlu0 %7516 }
 0xdbf   :  { %v7673_v63 = vrot.slane %v7517_v25, %v14422_v30 }
 0xdc4   :  { %v7519_v56 = vpop.xlane.xlu1 %7518 }
 0xdc5   :  { %v7677_v52 = vrot.slane %v7519_v56, %v14421_v3  ;;  %v7660_v56 = vsel %vm2185_vm3, %v7659_v49, %v7655_v36  ;;  %v14428_v49 = vld [vmem:[#allocation34_spill] sm:$0xff] }
 0xdc7   :  { %v7678_v28 = vsel %vm2185_vm3, %v7677_v52, %v7673_v63 }
 0xdcc   :  { %v6681_v42 = vpop.xlane.xlu0 %6680 }
 0xdcd   :  { %v7586_v59 = vrot.slane %v6681_v42, %v14422_v30 }
 0xdd2   :  { %v6683_v9 = vpop.xlane.xlu1 %6682 }
 0xdd3   :  { %v7590_v19 = vrot.slane %v6683_v9, %v14421_v3 }
 0xdd5   :  { %v7591_v61 = vsel %vm2185_vm3, %v7590_v19, %v7586_v59  ;;  %v14424_v59 = vld [vmem:[#allocation38_spill] sm:$0xff] }
 0xdd6   :  { %v7630_v62 = vsel %vm2254_vm6, %v7591_v61, %v7629_v46 }
 0xdd7   :  { %v13142_v51 = vpop.xlane.xlu0 %7524  ;;  %v7631_v33 = vsel %vm2256_vm7, %v7600_v23, %v7630_v62 }
 0xddc   :  { %v13144_v0 = vpop.xlane.xlu1 %7526 }
 0xddd   :  { %v7695_v6 = vrot.slane %v13144_v0, %v14421_v3 }
 0xde2   :  { %v6689_v57 = vpop.xlane.xlu0 %6688 }
 0xde3   :  { %v7604_v48 = vrot.slane %v6689_v57, %v14422_v30  ;;  %v7724_v57 = vsel %vm2250_vm4, %v7669_v4, %v7660_v56 }
 0xde9   :  { %v6691_v13 = vpop.xlane.xlu1 %6690 }
 0xdea   :  { %v7608_v50 = vrot.slane %v6691_v13, %v14421_v3 }
 0xdec   :  { %v7609_v29 = vsel %vm2185_vm3, %v7608_v50, %v7604_v48 }
 0xded   :  { %v7632_v10 = vsel %vm2258_vm8, %v7609_v29, %v7631_v33 }
 0xdef   :  { %v6693_v35 = vpop.xlane.xlu0 %6692 }
 0xdf0   :  { %v7613_v17 = vrot.slane %v6693_v35, %v14422_v30  ;;  %v7725_v35 = vsel %vm2252_vm5, %v7678_v28, %v7724_v57 }
 0xdf4   :  { %v6695_v24 = vpop.xlane.xlu1 %6694 }
 0xdf5   :  { %v7617_v21 = vrot.slane %v6695_v24, %v14421_v3 }
 0xdf7   :  { %v7618_v58 = vsel %vm2185_vm3, %v7617_v21, %v7613_v17 }
 0xdf8   :  { %v7633_v41 = vsel %vm2260_vm9, %v7618_v58, %v7632_v10  ;;  %v14429_v10 = vld [vmem:[#allocation36_spill] sm:$0xff] }
 0xdfb   :  { %v7521_v54 = vpop.xlane.xlu0 %7520 }
 0xdfc   :  { %v7682_v31 = vrot.slane %v7521_v54, %v14422_v30  ;;  %v7691_v54 = vrot.slane %v13142_v51, %v14422_v30 }
 0xdfe   :  { %v7696_v0 = vsel %vm2185_vm3, %v7695_v6, %v7691_v54 }
 0xe00   :  { %v7523_v20 = vpop.xlane.xlu1 %7522 }
 0xe01   :  { %v7686_v47 = vrot.slane %v7523_v20, %v14421_v3 }
 0xe03   :  { %v7687_v42 = vsel %vm2185_vm3, %v7686_v47, %v7682_v31 }
 0xe04   :  { %v7726_v20 = vsel %vm2254_vm6, %v7687_v42, %v7725_v35 }
 0xe05   :  { %v7727_v19 = vsel %vm2256_vm7, %v7696_v0, %v7726_v20 }
 0xe07   :  { %v13146_v15 = vpop.xlane.xlu0 %7528 }
 0xe08   :  { %v7700_v24 = vrot.slane %v13146_v15, %v14422_v30 }
 0xe0c   :  { %v13148_v12 = vpop.xlane.xlu1 %7530 }
 0xe0d   :  { %v7704_v25 = vrot.slane %v13148_v12, %v14421_v3 }
 0xe0f   :  { %v7705_v7 = vsel %vm2185_vm3, %v7704_v25, %v7700_v24 }
 0xe10   :  { %v7728_v51 = vsel %vm2258_vm8, %v7705_v7, %v7727_v19 }
 0xe13   :  { %v7533_v11 = vpop.xlane.xlu0 %7532 }
 0xe14   :  { %v7709_v12 = vrot.slane %v7533_v11, %v14422_v30 }
 0xe18   :  { %v7535_v16 = vpop.xlane.xlu1 %7534 }
 0xe19   :  { %v7713_v13 = vrot.slane %v7535_v16, %v14421_v3 }
 0xe1b   :  { %v7714_v5 = vsel %vm2185_vm3, %v7713_v13, %v7709_v12 }
 0xe1c   :  { %v7729_v2 = vsel %vm2260_vm9, %v7714_v5, %v7728_v51 }
 0xe1f   :  { %v6697_v18 = vpop.xlane.xlu0 %6696 }
 0xe20   :  { %v7622_v40 = vrot.slane %v6697_v18, %v14422_v30 }
 0xe24   :  { %v6699_v27 = vpop.xlane.xlu1 %6698 }
 0xe25   :  { %v7626_v8 = vrot.slane %v6699_v27, %v14421_v3  ;;  %v14425_v27 = vld [vmem:[#allocation74_spill] sm:$0xff] }
 0xe26   :  { %v7764_v33 = vrot.slane %v14426_v60, %v14425_v27  ;;  %v7768_v52 = vrot.slane %v14428_v49, %v14425_v27  ;;  %v7776_v22 = vrot.slane %v14429_v10, %v14425_v27 }
 0xe27   :  { %v7627_v26 = vsel %vm2185_vm3, %v7626_v8, %v7622_v40  ;;  %v14427_v40 = vld [vmem:[#allocation35_spill] sm:$0xff] }
 0xe28   :  { %v7634_v39 = vsel %vm2262_vm10, %v7627_v26, %v7633_v41  ;;  %v7772_v8 = vrot.slane %v14427_v40, %v14425_v27 }
 0xe29   :  { %v7732_v45 = vadd.f32 %v7634_v39, %v14423_v44 }
 0xe2b   :  { %v7734_v9 = vsel %vm2363_vm11, %v7732_v45, -inf  ;;  %v7537_v43 = vpop.xlane.xlu0 %7536 }
 0xe2c   :  { %7735 = vmax.xlane.f32.xlu0 %v7734_v9  ;;  %v7718_v55 = vrot.slane %v7537_v43, %v14422_v30 }
 0xe30   :  { %v7539_v38 = vpop.xlane.xlu1 %7538 }
 0xe31   :  { %v7722_v15 = vrot.slane %v7539_v38, %v14421_v3 }
 0xe33   :  { %v7723_v11 = vsel %vm2185_vm3, %v7722_v15, %v7718_v55 }
 0xe34   :  { %v7730_v37 = vsel %vm2262_vm10, %v7723_v11, %v7729_v2 }
 0xe35   :  { %v7733_v53 = vadd.f32 %v7730_v37, %v14424_v59 }
 0xe37   :  { %v7737_v16 = vsel %vm2363_vm11, %v7733_v53, -inf }
 0xe38   :  { %7738 = vmax.xlane.f32.xlu1 %v7737_v16 }
 0xeb9   :  { %v7736_v14 = vpop.xlane.xlu0 %7735 }
 0xeba   :  { %v7740_v61 = vsub.f32 %v7732_v45, %v7736_v14 }
 0xebc   :  { %v7742_v50 = vmul.f32 1.442695, %v7740_v61 }
 0xebe   :  { %9226 = vpow2.f32 %v7742_v50 }
 0xec5   :  { %v7739_v30 = vpop.xlane.xlu1 %7738 }
 0xec6   :  { %v7741_v34 = vsub.f32 %v7733_v53, %v7739_v30 }
 0xec8   :  { %v9227_v3 = vpop.eup %9226  ;;  %v7744_v32 = vmul.f32 1.442695, %v7741_v34 }
 0xec9   :  { %v7746_v21 = vsel %vm2363_vm11, %v9227_v3, 0.0 }
 0xeca   :  { %9228 = vpow2.f32 %v7744_v32  ;;  %7747 = vadd.xlane.f32.xlu0 %v7746_v21 }
 0xed4   :  { %v9229_v46 = vpop.eup %9228 }
 0xed5   :  { %v7749_v48 = vsel %vm2363_vm11, %v9229_v46, 0.0 }
 0xed6   :  { %7750 = vadd.xlane.f32.xlu1 %v7749_v48 }
 0xf57   :  { %v7748_v1 = vpop.xlane.xlu0 %7747 }
 0xf58   :  { %9230 = vrcp.f32 %v7748_v1 }
 0xf62   :  { %v9231_v17 = vpop.eup %9230 }
 0xf63   :  { %v7751_v62 = vpop.xlane.xlu1 %7750  ;;  %v7753_v29 = vmul.f32 %v9231_v17, %v9227_v3 }
 0xf64   :  { %9232 = vrcp.f32 %v7751_v62 }
 0xf6e   :  { %v9233_v18 = vpop.eup %9232 }
 0xf6f   :  { %v7755_v23 = vmul.f32 %v9233_v18, %v9229_v46 }
 0xf71   :  { %v7756_v58 = vpack.c.bf16 %v7755_v23, %v7753_v29 }
 0xf73   :  { %9062 = vmatmul.mubr.msk.bf16.vlgmr.msra.gmra.mrb[32].mxu0 %vm2363_vm11, %v7756_v58  ;;  %9063 = vmatmul.mubr.msk.bf16.vlgmr.msra.gmra.mrb[32].mxu1 %vm2363_vm11, %v7756_v58 }
0x1046   :  { %v7814_v41 = vpop.f32.mrb[32].mxu0  ;;  %v7857_v47 = vpop.f32.mrb[32].mxu1 }
0x1047   :  { %v7815_v26 = vadd.f32 %v7814_v41, %v7764_v33  ;;  %v7858_v63 = vadd.f32 %v7857_v47, %v7772_v8  ;;  %v7816_v39 = vpop.f32.mrb[33].mxu0  ;;  %v7859_v36 = vpop.f32.mrb[33].mxu1 }
0x1048   :  { %v7817_v4 = vadd.f32 %v7816_v39, %v7768_v52  ;;  %v7860_v31 = vadd.f32 %v7859_v36, %v7776_v22  ;;  %v7818_v44 = vpop.f32.mrb[34].mxu0  ;;  %v7861_v45 = vpop.f32.mrb[34].mxu1 }
0x1049   :  { %9234 = vtanh.f32 %v7815_v26  ;;  %v7819_v28 = vadd.f32 %v7818_v44, %v7764_v33  ;;  %v7820_v56 = vpop.f32.mrb[35].mxu0  ;;  %v7863_v42 = vpop.f32.mrb[35].mxu1  ;;  %v7862_v25 = vadd.f32 %v7861_v45, %v7772_v8 }
0x104a   :  { %9236 = vtanh.f32 %v7858_v63  ;;  %v7821_v9 = vadd.f32 %v7820_v56, %v7768_v52  ;;  %v7864_v57 = vadd.f32 %v7863_v42, %v7776_v22 }
0x104b   :  { %9238 = vtanh.f32 %v7817_v4 }
0x104c   :  { %9240 = vtanh.f32 %v7860_v31 }
0x104d   :  { %9242 = vtanh.f32 %v7819_v28 }
0x104e   :  { %9244 = vtanh.f32 %v7862_v25 }
0x104f   :  { %9246 = vtanh.f32 %v7821_v9 }
0x1050   :  { %9248 = vtanh.f32 %v7864_v57 }
0x1053   :  { %v9235_v6 = vpop.eup %9234 }
0x1054   :  { %v9237_v13 = vpop.eup %9236 }
0x1055   :  { %v9239_v35 = vpop.eup %9238 }
0x1056   :  { %v9241_v24 = vpop.eup %9240 }
0x1057   :  { %v9243_v54 = vpop.eup %9242 }
0x1058   :  { %v9245_v20 = vpop.eup %9244  ;;  %v13234_v12 = vpack.c.bf16 %v9243_v54, %v9235_v6 }
0x1059   :  { %v9247_v43 = vpop.eup %9246  ;;  %v13236_v7 = vpack.c.bf16 %v9245_v20, %v9237_v13 }
0x105a   :  { %v9249_v0 = vpop.eup %9248  ;;  %v7875_v5 = vpack.c.bf16 %v9247_v43, %v9239_v35 }
0x105b   :  { %v13238_v38 = vpack.c.bf16 %v9249_v0, %v9241_v24 }
0x105c   :  { %9372 = dma.done.wait [#allocation6 + $0x3], 49152 }
0x105d   :  { %9373 = vsyncadd [#allocation6 + $0x3], 4294918144  ;;  %8057 = vmatprep.mubr.bf16.mxu0 %v7875_v5  ;;  %8143 = vmatprep.mubr.bf16.mxu1 %v7875_v5  ;;  %v7882_v19 = vld [vmem:[#allocation5 + $0x8] sm:$0xff]  ;;  %v7884_v55 = vld [vmem:[#allocation5 + $0x18] sm:$0xff]  ;;  %s9405_s6 = smov [#allocation13]  }
0x105e   :  { %v7881_v15 = vld [vmem:[#allocation5] sm:$0xff]  ;;  %8025 = vmatprep.subr.bf16.mxu0 %v7882_v19  ;;  %8111 = vmatprep.subr.bf16.mxu1 %v7884_v55  ;;  %v7883_v51 = vld [vmem:[#allocation5 + $0x10] sm:$0xff]  ;;  %v7886_v2 = vld [vmem:[#allocation5 + $0x68] sm:$0xff]  ;;  %s9006_s13 = sshll.u32 %s9405_s6, 4  ;;  %s9007_s13 = int_to_ptr.vmem [resolvable:$true] %s9006_s13 }
0x105f   :  { %v7888_v11 = vld [vmem:[#allocation5 + $0x78] sm:$0xff]  ;;  %8026 = vmatpush1.bf16.msra.mxu0 %v7881_v15  ;;  %8112 = vmatpush1.bf16.msra.mxu1 %v7883_v51  ;;  %v7885_v37 = vld [vmem:[#allocation5 + $0x60] sm:$0xff]  ;;  %v7887_v59 = vld [vmem:[#allocation5 + $0x70] sm:$0xff]  ;;  %s9340_s22 = scalar_lea.vmem %s9007_s13, 1024  ;;  %p9345_p11 = scmp.lt.s32.totalorder %s9007_s13, %s9007_s13 }
0x1060   :  { %8027 = vmatprep.subr.bf16.mxu0 %v7886_v2  ;;  %8113 = vmatprep.subr.bf16.mxu1 %v7888_v11  ;;  %v7890_v53 = vld [vmem:[#allocation5 + $0xc8] sm:$0xff]  ;;  %v7892_v16 = vld [vmem:[#allocation5 + $0xd8] sm:$0xff]  ;;  %v7889_v14 = vld [vmem:[#allocation5 + $0xc0] sm:$0xff]  ;;  %p9341_p10 = scmp.ne.s32.totalorder %s9007_s13, %s9340_s22  ;;  %p9346_p12 = scmp.lt.s32.totalorder %s9340_s22, %s9340_s22 }
0x1061   :  { %v7891_v61 = vld [vmem:[#allocation5 + $0xd0] sm:$0xff]  ;;  %v7894_v50 = vld [vmem:[#allocation5 + $0x128] sm:$0xff]  ;;  %v7896_v30 = vld [vmem:[#allocation5 + $0x138] sm:$0xff] }
0x1062   :  { %v7893_v34 = vld [vmem:[#allocation5 + $0x120] sm:$0xff]  ;;  %v7895_v3 = vld [vmem:[#allocation5 + $0x130] sm:$0xff]  ;;  %v7898_v32 = vld [vmem:[#allocation5 + $0x188] sm:$0xff]  ;;  %p9347_p13 = por %p9346_p12, %p9345_p11 }
0x1063   :  { %8028 = vmatpush1.bf16.msra.mxu0 %v7885_v37  ;;  %8114 = vmatpush1.bf16.msra.mxu1 %v7887_v59  ;;  %v7900_v21 = vld [vmem:[#allocation5 + $0x198] sm:$0xff]  ;;  %v7897_v46 = vld [vmem:[#allocation5 + $0x180] sm:$0xff]  ;;  %v7899_v48 = vld [vmem:[#allocation5 + $0x190] sm:$0xff] }
0x1064   :  { %8029 = vmatprep.subr.bf16.mxu0 %v7890_v53  ;;  %8115 = vmatprep.subr.bf16.mxu1 %v7892_v16  ;;  %v7902_v1 = vld [vmem:[#allocation5 + $0x1e8] sm:$0xff]  ;;  %v7904_v62 = vld [vmem:[#allocation5 + $0x1f8] sm:$0xff]  ;;  %v7901_v17 = vld [vmem:[#allocation5 + $0x1e0] sm:$0xff]  ;;  %p9348_p0 = pnand %p9347_p13, %p9341_p10 }
0x1065   :  { %v7903_v18 = vld [vmem:[#allocation5 + $0x1f0] sm:$0xff]  ;;  %v7906_v29 = vld [vmem:[#allocation5 + $0x248] sm:$0xff]  ;;  %v7908_v23 = vld [vmem:[#allocation5 + $0x258] sm:$0xff] }
0x1066   :  { %v7905_v58 = vld [vmem:[#allocation5 + $0x240] sm:$0xff]  ;;  %v7907_v27 = vld [vmem:[#allocation5 + $0x250] sm:$0xff]  ;;  %v7910_v33 = vld [vmem:[#allocation5 + $0x2a8] sm:$0xff] }
0x1067   :  { %8030 = vmatpush1.bf16.msra.mxu0 %v7889_v14  ;;  %8116 = vmatpush1.bf16.msra.mxu1 %v7891_v61  ;;  %v7912_v8 = vld [vmem:[#allocation5 + $0x2b8] sm:$0xff]  ;;  %v7909_v52 = vld [vmem:[#allocation5 + $0x2a0] sm:$0xff]  ;;  %v7911_v22 = vld [vmem:[#allocation5 + $0x2b0] sm:$0xff] }
0x1068   :  { %8031 = vmatprep.subr.bf16.mxu0 %v7894_v50  ;;  %8117 = vmatprep.subr.bf16.mxu1 %v7896_v30  ;;  %v7914_v41 = vld [vmem:[#allocation5 + $0x308] sm:$0xff]  ;;  %v7916_v47 = vld [vmem:[#allocation5 + $0x318] sm:$0xff]  ;;  %v7913_v26 = vld [vmem:[#allocation5 + $0x300] sm:$0xff] }
0x1069   :  { %v7915_v63 = vld [vmem:[#allocation5 + $0x310] sm:$0xff]  ;;  %v7918_v39 = vld [vmem:[#allocation5 + $0x368] sm:$0xff]  ;;  %v7920_v36 = vld [vmem:[#allocation5 + $0x378] sm:$0xff] }
0x106a   :  { %v7917_v4 = vld [vmem:[#allocation5 + $0x360] sm:$0xff]  ;;  %v7919_v31 = vld [vmem:[#allocation5 + $0x370] sm:$0xff]  ;;  %v7922_v44 = vld [vmem:[#allocation5 + $0x3c8] sm:$0xff] }
0x106b   :  { %8032 = vmatpush1.bf16.msra.mxu0 %v7893_v34  ;;  %8118 = vmatpush1.bf16.msra.mxu1 %v7895_v3  ;;  %v7924_v45 = vld [vmem:[#allocation5 + $0x3d8] sm:$0xff]  ;;  %v7921_v28 = vld [vmem:[#allocation5 + $0x3c0] sm:$0xff]  ;;  %v7923_v56 = vld [vmem:[#allocation5 + $0x3d0] sm:$0xff] }
0x106c   :  { %8033 = vmatprep.subr.bf16.mxu0 %v7898_v32  ;;  %8119 = vmatprep.subr.bf16.mxu1 %v7900_v21  ;;  %v7926_v42 = vld [vmem:[#allocation5 + $0x428] sm:$0xff]  ;;  %v7928_v25 = vld [vmem:[#allocation5 + $0x438] sm:$0xff]  ;;  %v7925_v9 = vld [vmem:[#allocation5 + $0x420] sm:$0xff] }
0x106d   :  { %v7927_v57 = vld [vmem:[#allocation5 + $0x430] sm:$0xff]  ;;  %v7930_v6 = vld [vmem:[#allocation5 + $0x488] sm:$0xff]  ;;  %v7932_v13 = vld [vmem:[#allocation5 + $0x498] sm:$0xff] }
0x106e   :  { %v7929_v35 = vld [vmem:[#allocation5 + $0x480] sm:$0xff]  ;;  %v7931_v24 = vld [vmem:[#allocation5 + $0x490] sm:$0xff]  ;;  %v7934_v54 = vld [vmem:[#allocation5 + $0x4e8] sm:$0xff] }
0x106f   :  { %8034 = vmatpush1.bf16.msra.mxu0 %v7897_v46  ;;  %8120 = vmatpush1.bf16.msra.mxu1 %v7899_v48  ;;  %v7936_v20 = vld [vmem:[#allocation5 + $0x4f8] sm:$0xff]  ;;  %v7933_v43 = vld [vmem:[#allocation5 + $0x4e0] sm:$0xff]  ;;  %v7935_v0 = vld [vmem:[#allocation5 + $0x4f0] sm:$0xff] }
0x1070   :  { %8035 = vmatprep.subr.bf16.mxu0 %v7902_v1  ;;  %8121 = vmatprep.subr.bf16.mxu1 %v7904_v62  ;;  %v7938_v5 = vld [vmem:[#allocation5 + $0x548] sm:$0xff]  ;;  %v7940_v19 = vld [vmem:[#allocation5 + $0x558] sm:$0xff]  ;;  %v7937_v55 = vld [vmem:[#allocation5 + $0x540] sm:$0xff] }
0x1071   :  { %v7939_v15 = vld [vmem:[#allocation5 + $0x550] sm:$0xff]  ;;  %v7942_v51 = vld [vmem:[#allocation5 + $0x5a8] sm:$0xff]  ;;  %v7944_v2 = vld [vmem:[#allocation5 + $0x5b8] sm:$0xff] }
0x1072   :  { %v7941_v11 = vld [vmem:[#allocation5 + $0x5a0] sm:$0xff]  ;;  %v7943_v37 = vld [vmem:[#allocation5 + $0x5b0] sm:$0xff]  ;;  %v7946_v59 = vld [vmem:[#allocation5 + $0x608] sm:$0xff] }
0x1073   :  { %8036 = vmatpush1.bf16.msra.mxu0 %v7901_v17  ;;  %8122 = vmatpush1.bf16.msra.mxu1 %v7903_v18  ;;  %v7948_v53 = vld [vmem:[#allocation5 + $0x618] sm:$0xff]  ;;  %v7945_v16 = vld [vmem:[#allocation5 + $0x600] sm:$0xff]  ;;  %v7947_v14 = vld [vmem:[#allocation5 + $0x610] sm:$0xff] }
0x1074   :  { %8037 = vmatprep.subr.bf16.mxu0 %v7906_v29  ;;  %8123 = vmatprep.subr.bf16.mxu1 %v7908_v23  ;;  %v7950_v61 = vld [vmem:[#allocation5 + $0x668] sm:$0xff]  ;;  %v7952_v50 = vld [vmem:[#allocation5 + $0x678] sm:$0xff]  ;;  %v7949_v30 = vld [vmem:[#allocation5 + $0x660] sm:$0xff] }
0x1075   :  { %v7951_v34 = vld [vmem:[#allocation5 + $0x670] sm:$0xff]  ;;  %v7954_v3 = vld [vmem:[#allocation5 + $0x6c8] sm:$0xff]  ;;  %v7956_v32 = vld [vmem:[#allocation5 + $0x6d8] sm:$0xff] }
0x1076   :  { %v7953_v21 = vld [vmem:[#allocation5 + $0x6c0] sm:$0xff]  ;;  %v7955_v46 = vld [vmem:[#allocation5 + $0x6d0] sm:$0xff]  ;;  %v7958_v48 = vld [vmem:[#allocation5 + $0x728] sm:$0xff] }
0x1077   :  { %8038 = vmatpush1.bf16.msra.mxu0 %v7905_v58  ;;  %8124 = vmatpush1.bf16.msra.mxu1 %v7907_v27  ;;  %v7957_v1 = vld [vmem:[#allocation5 + $0x720] sm:$0xff]  ;;  %v7959_v62 = vld [vmem:[#allocation5 + $0x730] sm:$0xff]  ;;  %v7962_v17 = vld [vmem:[#allocation5 + $0x788] sm:$0xff] }
0x1078   :  { %8039 = vmatprep.subr.bf16.mxu0 %v7910_v33  ;;  %8125 = vmatprep.subr.bf16.mxu1 %v7912_v8  ;;  %v7964_v18 = vld [vmem:[#allocation5 + $0x798] sm:$0xff]  ;;  %v7963_v29 = vld [vmem:[#allocation5 + $0x790] sm:$0xff]  ;;  %v7966_v23 = vld [vmem:[#allocation5 + $0x7e8] sm:$0xff] }
0x1079   :  { %v7968_v58 = vld [vmem:[#allocation5 + $0x7f8] sm:$0xff]  ;;  %v7965_v27 = vld [vmem:[#allocation5 + $0x7e0] sm:$0xff]  ;;  %v7967_v33 = vld [vmem:[#allocation5 + $0x7f0] sm:$0xff] }
0x107a   :  { %v7970_v8 = vld [vmem:[#allocation5 + $0x848] sm:$0xff] }
0x107b   :  { %8040 = vmatpush1.bf16.msra.mxu0 %v7909_v52  ;;  %8126 = vmatpush1.bf16.msra.mxu1 %v7911_v22  ;;  %v7972_v52 = vld [vmem:[#allocation5 + $0x858] sm:$0xff]  ;;  %v7969_v22 = vld [vmem:[#allocation5 + $0x840] sm:$0xff] }
0x107c   :  { %8041 = vmatprep.subr.bf16.mxu0 %v7914_v41  ;;  %8127 = vmatprep.subr.bf16.mxu1 %v7916_v47  ;;  %v7971_v41 = vld [vmem:[#allocation5 + $0x850] sm:$0xff]  ;;  %v7974_v47 = vld [vmem:[#allocation5 + $0x8a8] sm:$0xff] }
0x107f   :  { %8042 = vmatpush1.bf16.msra.mxu0 %v7913_v26  ;;  %8128 = vmatpush1.bf16.msra.mxu1 %v7915_v63  ;;  %v7976_v26 = vld [vmem:[#allocation5 + $0x8b8] sm:$0xff]  ;;  %v7973_v63 = vld [vmem:[#allocation5 + $0x8a0] sm:$0xff] }
0x1080   :  { %8043 = vmatprep.subr.bf16.mxu0 %v7918_v39  ;;  %8129 = vmatprep.subr.bf16.mxu1 %v7920_v36  ;;  %v7975_v39 = vld [vmem:[#allocation5 + $0x8b0] sm:$0xff]  ;;  %v7978_v36 = vld [vmem:[#allocation5 + $0x908] sm:$0xff] }
0x1083   :  { %8044 = vmatpush1.bf16.msra.mxu0 %v7917_v4  ;;  %8130 = vmatpush1.bf16.msra.mxu1 %v7919_v31  ;;  %v7980_v4 = vld [vmem:[#allocation5 + $0x918] sm:$0xff]  ;;  %v7977_v31 = vld [vmem:[#allocation5 + $0x900] sm:$0xff] }
0x1084   :  { %8045 = vmatprep.subr.bf16.mxu0 %v7922_v44  ;;  %8131 = vmatprep.subr.bf16.mxu1 %v7924_v45  ;;  %v7979_v44 = vld [vmem:[#allocation5 + $0x910] sm:$0xff]  ;;  %v7982_v45 = vld [vmem:[#allocation5 + $0x968] sm:$0xff] }
0x1087   :  { %8046 = vmatpush1.bf16.msra.mxu0 %v7921_v28  ;;  %8132 = vmatpush1.bf16.msra.mxu1 %v7923_v56  ;;  %v7984_v28 = vld [vmem:[#allocation5 + $0x978] sm:$0xff]  ;;  %v7981_v56 = vld [vmem:[#allocation5 + $0x960] sm:$0xff] }
0x1088   :  { %8047 = vmatprep.subr.bf16.mxu0 %v7926_v42  ;;  %8133 = vmatprep.subr.bf16.mxu1 %v7928_v25  ;;  %v7983_v42 = vld [vmem:[#allocation5 + $0x970] sm:$0xff]  ;;  %v7986_v25 = vld [vmem:[#allocation5 + $0x9c8] sm:$0xff] }
0x108b   :  { %8048 = vmatpush1.bf16.msra.mxu0 %v7925_v9  ;;  %8134 = vmatpush1.bf16.msra.mxu1 %v7927_v57  ;;  %v7988_v9 = vld [vmem:[#allocation5 + $0x9d8] sm:$0xff]  ;;  %v7985_v57 = vld [vmem:[#allocation5 + $0x9c0] sm:$0xff] }
0x108c   :  { %8049 = vmatprep.subr.bf16.mxu0 %v7930_v6  ;;  %8135 = vmatprep.subr.bf16.mxu1 %v7932_v13  ;;  %v7987_v6 = vld [vmem:[#allocation5 + $0x9d0] sm:$0xff]  ;;  %v7990_v13 = vld [vmem:[#allocation5 + $0xa28] sm:$0xff] }
0x108f   :  { %8050 = vmatpush1.bf16.msra.mxu0 %v7929_v35  ;;  %8136 = vmatpush1.bf16.msra.mxu1 %v7931_v24  ;;  %v7992_v35 = vld [vmem:[#allocation5 + $0xa38] sm:$0xff]  ;;  %v7989_v24 = vld [vmem:[#allocation5 + $0xa20] sm:$0xff] }
0x1090   :  { %8051 = vmatprep.subr.bf16.mxu0 %v7934_v54  ;;  %8137 = vmatprep.subr.bf16.mxu1 %v7936_v20  ;;  %v7991_v54 = vld [vmem:[#allocation5 + $0xa30] sm:$0xff]  ;;  %v7994_v20 = vld [vmem:[#allocation5 + $0xa88] sm:$0xff] }
0x1093   :  { %8052 = vmatpush1.bf16.msra.mxu0 %v7933_v43  ;;  %8138 = vmatpush1.bf16.msra.mxu1 %v7935_v0  ;;  %v7996_v43 = vld [vmem:[#allocation5 + $0xa98] sm:$0xff]  ;;  %v7993_v0 = vld [vmem:[#allocation5 + $0xa80] sm:$0xff] }
0x1094   :  { %8053 = vmatprep.subr.bf16.mxu0 %v7938_v5  ;;  %8139 = vmatprep.subr.bf16.mxu1 %v7940_v19  ;;  %v7995_v5 = vld [vmem:[#allocation5 + $0xa90] sm:$0xff]  ;;  %v7998_v19 = vld [vmem:[#allocation5 + $0xae8] sm:$0xff] }
0x1097   :  { %8054 = vmatpush1.bf16.msra.mxu0 %v7937_v55  ;;  %8140 = vmatpush1.bf16.msra.mxu1 %v7939_v15  ;;  %v8000_v55 = vld [vmem:[#allocation5 + $0xaf8] sm:$0xff]  ;;  %v7997_v15 = vld [vmem:[#allocation5 + $0xae0] sm:$0xff] }
0x1098   :  { %8055 = vmatprep.subr.bf16.mxu0 %v7942_v51  ;;  %8141 = vmatprep.subr.bf16.mxu1 %v7944_v2  ;;  %v7999_v51 = vld [vmem:[#allocation5 + $0xaf0] sm:$0xff]  ;;  %v8002_v2 = vld [vmem:[#allocation5 + $0xb48] sm:$0xff] }
0x109b   :  { %8056 = vmatpush1.bf16.msra.mxu0 %v7941_v11  ;;  %8142 = vmatpush1.bf16.msra.mxu1 %v7943_v37  ;;  %v8004_v11 = vld [vmem:[#allocation5 + $0xb58] sm:$0xff]  ;;  %v8001_v37 = vld [vmem:[#allocation5 + $0xb40] sm:$0xff] }
0x109c   :  { %8068 = vmatprep.subr.bf16.mxu0 %v7946_v59  ;;  %8154 = vmatprep.subr.bf16.mxu1 %v7948_v53  ;;  %v8003_v59 = vld [vmem:[#allocation5 + $0xb50] sm:$0xff]  ;;  %v8006_v53 = vld [vmem:[#allocation5 + $0xba8] sm:$0xff] }
0x109e   :  { %8058 = vmatmul.mubr.bf16.vlgmr.msra.gmra.mrb[36].mxu0 %v13234_v12  ;;  %8144 = vmatmul.mubr.bf16.vlgmr.msra.gmra.mrb[36].mxu1 %v13234_v12  ;;  %v7960_v12 = vld [vmem:[#allocation5 + $0x738] sm:$0xff] }
0x109f   :  { %8069 = vmatpush1.bf16.msra.mxu0 %v7945_v16  ;;  %8155 = vmatpush1.bf16.msra.mxu1 %v7947_v14  ;;  %v8008_v16 = vld [vmem:[#allocation5 + $0xbb8] sm:$0xff]  ;;  %v8005_v14 = vld [vmem:[#allocation5 + $0xba0] sm:$0xff] }
0x10a0   :  { %8070 = vmatprep.subr.bf16.mxu0 %v7950_v61  ;;  %8156 = vmatprep.subr.bf16.mxu1 %v7952_v50  ;;  %v8007_v61 = vld [vmem:[#allocation5 + $0xbb0] sm:$0xff]  ;;  %v8234_v50 = vld [vmem:[#allocation5 + $0x28] sm:$0xff] }
0x10a1   :  { %8100 = vmatprep.mubr.bf16.mxu0 %v13238_v38  ;;  %8186 = vmatprep.mubr.bf16.mxu1 %v13238_v38  ;;  %v7961_v38 = vld [vmem:[#allocation5 + $0x780] sm:$0xff] }
0x10a3   :  { %8071 = vmatpush1.bf16.msra.mxu0 %v7949_v30  ;;  %8157 = vmatpush1.bf16.msra.mxu1 %v7951_v34  ;;  %v8236_v30 = vld [vmem:[#allocation5 + $0x38] sm:$0xff]  ;;  %v8233_v34 = vld [vmem:[#allocation5 + $0x20] sm:$0xff] }
0x10a4   :  { %8072 = vmatprep.subr.bf16.mxu0 %v7954_v3  ;;  %8158 = vmatprep.subr.bf16.mxu1 %v7956_v32  ;;  %v8235_v3 = vld [vmem:[#allocation5 + $0x30] sm:$0xff]  ;;  %v8238_v32 = vld [vmem:[#allocation5 + $0x88] sm:$0xff] }
0x10a7   :  { %8073 = vmatpush1.bf16.msra.mxu0 %v7953_v21  ;;  %8159 = vmatpush1.bf16.msra.mxu1 %v7955_v46  ;;  %v8240_v21 = vld [vmem:[#allocation5 + $0x98] sm:$0xff]  ;;  %v8237_v46 = vld [vmem:[#allocation5 + $0x80] sm:$0xff] }
0x10a8   :  { %8074 = vmatprep.subr.bf16.mxu0 %v7958_v48  ;;  %8160 = vmatprep.subr.bf16.mxu1 %v7960_v12  ;;  %v8239_v48 = vld [vmem:[#allocation5 + $0x90] sm:$0xff]  ;;  %v8242_v12 = vld [vmem:[#allocation5 + $0xe8] sm:$0xff] }
0x10ab   :  { %8075 = vmatpush1.bf16.msra.mxu0 %v7957_v1  ;;  %8161 = vmatpush1.bf16.msra.mxu1 %v7959_v62  ;;  %v8244_v1 = vld [vmem:[#allocation5 + $0xf8] sm:$0xff]  ;;  %v8241_v62 = vld [vmem:[#allocation5 + $0xe0] sm:$0xff] }
0x10ac   :  { %8076 = vmatprep.subr.bf16.mxu0 %v7962_v17  ;;  %8162 = vmatprep.subr.bf16.mxu1 %v7964_v18  ;;  %v8243_v17 = vld [vmem:[#allocation5 + $0xf0] sm:$0xff]  ;;  %v8246_v18 = vld [vmem:[#allocation5 + $0x148] sm:$0xff] }
0x10af   :  { %8077 = vmatpush1.bf16.msra.mxu0 %v7961_v38  ;;  %8163 = vmatpush1.bf16.msra.mxu1 %v7963_v29  ;;  %v8248_v38 = vld [vmem:[#allocation5 + $0x158] sm:$0xff]  ;;  %v8247_v29 = vld [vmem:[#allocation5 + $0x150] sm:$0xff] }
0x10b0   :  { %8078 = vmatprep.subr.bf16.mxu0 %v7966_v23  ;;  %8164 = vmatprep.subr.bf16.mxu1 %v7968_v58  ;;  %v8250_v23 = vld [vmem:[#allocation5 + $0x1a8] sm:$0xff]  ;;  %v8252_v58 = vld [vmem:[#allocation5 + $0x1b8] sm:$0xff] }
0x10b3   :  { %8079 = vmatpush1.bf16.msra.mxu0 %v7965_v27  ;;  %8165 = vmatpush1.bf16.msra.mxu1 %v7967_v33  ;;  %v8249_v27 = vld [vmem:[#allocation5 + $0x1a0] sm:$0xff]  ;;  %v8251_v33 = vld [vmem:[#allocation5 + $0x1b0] sm:$0xff] }
0x10b4   :  { %8080 = vmatprep.subr.bf16.mxu0 %v7970_v8  ;;  %8166 = vmatprep.subr.bf16.mxu1 %v7972_v52  ;;  %v8254_v8 = vld [vmem:[#allocation5 + $0x208] sm:$0xff]  ;;  %v8256_v52 = vld [vmem:[#allocation5 + $0x218] sm:$0xff] }
0x10b7   :  { %8081 = vmatpush1.bf16.msra.mxu0 %v7969_v22  ;;  %8167 = vmatpush1.bf16.msra.mxu1 %v7971_v41  ;;  %v8253_v22 = vld [vmem:[#allocation5 + $0x200] sm:$0xff]  ;;  %v8255_v41 = vld [vmem:[#allocation5 + $0x210] sm:$0xff] }
0x10b8   :  { %8082 = vmatprep.subr.bf16.mxu0 %v7974_v47  ;;  %8168 = vmatprep.subr.bf16.mxu1 %v7976_v26  ;;  %v8258_v47 = vld [vmem:[#allocation5 + $0x268] sm:$0xff]  ;;  %v8260_v26 = vld [vmem:[#allocation5 + $0x278] sm:$0xff] }
0x10bb   :  { %8083 = vmatpush1.bf16.msra.mxu0 %v7973_v63  ;;  %8169 = vmatpush1.bf16.msra.mxu1 %v7975_v39  ;;  %v8257_v63 = vld [vmem:[#allocation5 + $0x260] sm:$0xff]  ;;  %v8259_v39 = vld [vmem:[#allocation5 + $0x270] sm:$0xff] }
0x10bc   :  { %8084 = vmatprep.subr.bf16.mxu0 %v7978_v36  ;;  %8170 = vmatprep.subr.bf16.mxu1 %v7980_v4  ;;  %v8262_v36 = vld [vmem:[#allocation5 + $0x2c8] sm:$0xff]  ;;  %v8264_v4 = vld [vmem:[#allocation5 + $0x2d8] sm:$0xff] }
0x10bf   :  { %8085 = vmatpush1.bf16.msra.mxu0 %v7977_v31  ;;  %8171 = vmatpush1.bf16.msra.mxu1 %v7979_v44  ;;  %v8261_v31 = vld [vmem:[#allocation5 + $0x2c0] sm:$0xff]  ;;  %v8263_v44 = vld [vmem:[#allocation5 + $0x2d0] sm:$0xff] }
0x10c0   :  { %8086 = vmatprep.subr.bf16.mxu0 %v7982_v45  ;;  %8172 = vmatprep.subr.bf16.mxu1 %v7984_v28  ;;  %v8266_v45 = vld [vmem:[#allocation5 + $0x328] sm:$0xff]  ;;  %v8268_v28 = vld [vmem:[#allocation5 + $0x338] sm:$0xff] }
0x10c3   :  { %8087 = vmatpush1.bf16.msra.mxu0 %v7981_v56  ;;  %8173 = vmatpush1.bf16.msra.mxu1 %v7983_v42  ;;  %v8265_v56 = vld [vmem:[#allocation5 + $0x320] sm:$0xff]  ;;  %v8267_v42 = vld [vmem:[#allocation5 + $0x330] sm:$0xff] }
0x10c4   :  { %8088 = vmatprep.subr.bf16.mxu0 %v7986_v25  ;;  %8174 = vmatprep.subr.bf16.mxu1 %v7988_v9  ;;  %v8270_v25 = vld [vmem:[#allocation5 + $0x388] sm:$0xff]  ;;  %v8272_v9 = vld [vmem:[#allocation5 + $0x398] sm:$0xff] }
0x10c7   :  { %8089 = vmatpush1.bf16.msra.mxu0 %v7985_v57  ;;  %8175 = vmatpush1.bf16.msra.mxu1 %v7987_v6  ;;  %v8269_v57 = vld [vmem:[#allocation5 + $0x380] sm:$0xff]  ;;  %v8271_v6 = vld [vmem:[#allocation5 + $0x390] sm:$0xff] }
0x10c8   :  { %8090 = vmatprep.subr.bf16.mxu0 %v7990_v13  ;;  %8176 = vmatprep.subr.bf16.mxu1 %v7992_v35  ;;  %v8274_v13 = vld [vmem:[#allocation5 + $0x3e8] sm:$0xff]  ;;  %v8276_v35 = vld [vmem:[#allocation5 + $0x3f8] sm:$0xff] }
0x10cb   :  { %8091 = vmatpush1.bf16.msra.mxu0 %v7989_v24  ;;  %8177 = vmatpush1.bf16.msra.mxu1 %v7991_v54  ;;  %v8273_v24 = vld [vmem:[#allocation5 + $0x3e0] sm:$0xff]  ;;  %v8275_v54 = vld [vmem:[#allocation5 + $0x3f0] sm:$0xff] }
0x10cc   :  { %8092 = vmatprep.subr.bf16.mxu0 %v7994_v20  ;;  %8178 = vmatprep.subr.bf16.mxu1 %v7996_v43  ;;  %v8278_v20 = vld [vmem:[#allocation5 + $0x448] sm:$0xff]  ;;  %v8280_v43 = vld [vmem:[#allocation5 + $0x458] sm:$0xff] }
0x10cf   :  { %8093 = vmatpush1.bf16.msra.mxu0 %v7993_v0  ;;  %8179 = vmatpush1.bf16.msra.mxu1 %v7995_v5  ;;  %v8277_v0 = vld [vmem:[#allocation5 + $0x440] sm:$0xff]  ;;  %v8279_v5 = vld [vmem:[#allocation5 + $0x450] sm:$0xff] }
0x10d0   :  { %8094 = vmatprep.subr.bf16.mxu0 %v7998_v19  ;;  %8180 = vmatprep.subr.bf16.mxu1 %v8000_v55  ;;  %v8282_v19 = vld [vmem:[#allocation5 + $0x4a8] sm:$0xff]  ;;  %v8284_v55 = vld [vmem:[#allocation5 + $0x4b8] sm:$0xff] }
0x10d3   :  { %8095 = vmatpush1.bf16.msra.mxu0 %v7997_v15  ;;  %8181 = vmatpush1.bf16.msra.mxu1 %v7999_v51  ;;  %v8281_v15 = vld [vmem:[#allocation5 + $0x4a0] sm:$0xff]  ;;  %v8283_v51 = vld [vmem:[#allocation5 + $0x4b0] sm:$0xff] }
0x10d4   :  { %8096 = vmatprep.subr.bf16.mxu0 %v8002_v2  ;;  %8182 = vmatprep.subr.bf16.mxu1 %v8004_v11  ;;  %v8286_v2 = vld [vmem:[#allocation5 + $0x508] sm:$0xff]  ;;  %v8288_v11 = vld [vmem:[#allocation5 + $0x518] sm:$0xff] }
0x10d7   :  { %8097 = vmatpush1.bf16.msra.mxu0 %v8001_v37  ;;  %8183 = vmatpush1.bf16.msra.mxu1 %v8003_v59  ;;  %v8285_v37 = vld [vmem:[#allocation5 + $0x500] sm:$0xff]  ;;  %v8287_v59 = vld [vmem:[#allocation5 + $0x510] sm:$0xff] }
0x10d8   :  { %8098 = vmatprep.subr.bf16.mxu0 %v8006_v53  ;;  %8184 = vmatprep.subr.bf16.mxu1 %v8008_v16  ;;  %v8290_v53 = vld [vmem:[#allocation5 + $0x568] sm:$0xff]  ;;  %v8292_v16 = vld [vmem:[#allocation5 + $0x578] sm:$0xff] }
0x10db   :  { %8099 = vmatpush1.bf16.msra.mxu0 %v8005_v14  ;;  %8185 = vmatpush1.bf16.msra.mxu1 %v8007_v61  ;;  %v8289_v14 = vld [vmem:[#allocation5 + $0x560] sm:$0xff]  ;;  %v8291_v61 = vld [vmem:[#allocation5 + $0x570] sm:$0xff] }
0x10dc   :  { %8377 = vmatprep.subr.bf16.mxu0 %v8234_v50  ;;  %8463 = vmatprep.subr.bf16.mxu1 %v8236_v30  ;;  %v8294_v50 = vld [vmem:[#allocation5 + $0x5c8] sm:$0xff]  ;;  %v8296_v30 = vld [vmem:[#allocation5 + $0x5d8] sm:$0xff] }
0x10de   :  { %8101 = vmatmul.mubr.bf16.vlgmr.msra.gmra.mrb[36].mxu0 %v13236_v7  ;;  %8187 = vmatmul.mubr.bf16.vlgmr.msra.gmra.mrb[36].mxu1 %v13236_v7  ;;  %v8245_v7 = vld [vmem:[#allocation5 + $0x140] sm:$0xff] }
0x10df   :  { %8378 = vmatpush1.bf16.msra.mxu0 %v8233_v34  ;;  %8464 = vmatpush1.bf16.msra.mxu1 %v8235_v3  ;;  %v8293_v34 = vld [vmem:[#allocation5 + $0x5c0] sm:$0xff]  ;;  %v8295_v3 = vld [vmem:[#allocation5 + $0x5d0] sm:$0xff] }
0x10e0   :  { %8379 = vmatprep.subr.bf16.mxu0 %v8238_v32  ;;  %8465 = vmatprep.subr.bf16.mxu1 %v8240_v21  ;;  %v8298_v32 = vld [vmem:[#allocation5 + $0x628] sm:$0xff]  ;;  %v8300_v21 = vld [vmem:[#allocation5 + $0x638] sm:$0xff] }
0x10e3   :  { %8380 = vmatpush1.bf16.msra.mxu0 %v8237_v46  ;;  %8466 = vmatpush1.bf16.msra.mxu1 %v8239_v48  ;;  %v14430_v46 = vld [vmem:[#allocation53_spill] sm:$0xff] }
0x10e4   :  { %8381 = vmatprep.subr.bf16.mxu0 %v8242_v12  ;;  %8467 = vmatprep.subr.bf16.mxu1 %v8244_v1  ;;  %v8012_v48 = vrot.slane %v14426_v60, %v14430_v46  ;;  %v8020_v12 = vrot.slane %v14427_v40, %v14430_v46  ;;  %v8016_v1 = vrot.slane %v14428_v49, %v14430_v46 }
0x10e7   :  { %8382 = vmatpush1.bf16.msra.mxu0 %v8241_v62  ;;  %8468 = vmatpush1.bf16.msra.mxu1 %v8243_v17  ;;  %v8024_v62 = vrot.slane %v14429_v10, %v14430_v46  ;;  %v8304_v46 = vld [vmem:[#allocation5 + $0x698] sm:$0xff] }
0x10e8   :  { %8383 = vmatprep.subr.bf16.mxu0 %v8246_v18  ;;  %8469 = vmatprep.subr.bf16.mxu1 %v8248_v38 }
0x10eb   :  { %8384 = vmatpush1.bf16.msra.mxu0 %v8245_v7  ;;  %8470 = vmatpush1.bf16.msra.mxu1 %v8247_v29 }
0x10ec   :  { %8385 = vmatprep.subr.bf16.mxu0 %v8250_v23  ;;  %8471 = vmatprep.subr.bf16.mxu1 %v8252_v58 }
0x10ef   :  { %8386 = vmatpush1.bf16.msra.mxu0 %v8249_v27  ;;  %8472 = vmatpush1.bf16.msra.mxu1 %v8251_v33 }
0x10f0   :  { %8387 = vmatprep.subr.bf16.mxu0 %v8254_v8  ;;  %8473 = vmatprep.subr.bf16.mxu1 %v8256_v52 }
0x10f3   :  { %8388 = vmatpush1.bf16.msra.mxu0 %v8253_v22  ;;  %8474 = vmatpush1.bf16.msra.mxu1 %v8255_v41 }
0x10f4   :  { %8389 = vmatprep.subr.bf16.mxu0 %v8258_v47  ;;  %8475 = vmatprep.subr.bf16.mxu1 %v8260_v26 }
0x10f7   :  { %8390 = vmatpush1.bf16.msra.mxu0 %v8257_v63  ;;  %8476 = vmatpush1.bf16.msra.mxu1 %v8259_v39 }
0x10f8   :  { %8391 = vmatprep.subr.bf16.mxu0 %v8262_v36  ;;  %8477 = vmatprep.subr.bf16.mxu1 %v8264_v4 }
0x10fb   :  { %8392 = vmatpush1.bf16.msra.mxu0 %v8261_v31  ;;  %8478 = vmatpush1.bf16.msra.mxu1 %v8263_v44 }
0x10fc   :  { %8393 = vmatprep.subr.bf16.mxu0 %v8266_v45  ;;  %8479 = vmatprep.subr.bf16.mxu1 %v8268_v28 }
0x10ff   :  { %8394 = vmatpush1.bf16.msra.mxu0 %v8265_v56  ;;  %8480 = vmatpush1.bf16.msra.mxu1 %v8267_v42 }
0x1100   :  { %8395 = vmatprep.subr.bf16.mxu0 %v8270_v25  ;;  %8481 = vmatprep.subr.bf16.mxu1 %v8272_v9 }
0x1103   :  { %8396 = vmatpush1.bf16.msra.mxu0 %v8269_v57  ;;  %8482 = vmatpush1.bf16.msra.mxu1 %v8271_v6 }
0x1104   :  { %8397 = vmatprep.subr.bf16.mxu0 %v8274_v13  ;;  %8483 = vmatprep.subr.bf16.mxu1 %v8276_v35 }
0x1107   :  { %8398 = vmatpush1.bf16.msra.mxu0 %v8273_v24  ;;  %8484 = vmatpush1.bf16.msra.mxu1 %v8275_v54 }
0x1108   :  { %8399 = vmatprep.subr.bf16.mxu0 %v8278_v20  ;;  %8485 = vmatprep.subr.bf16.mxu1 %v8280_v43 }
0x110b   :  { %8400 = vmatpush1.bf16.msra.mxu0 %v8277_v0  ;;  %8486 = vmatpush1.bf16.msra.mxu1 %v8279_v5 }
0x110c   :  { %8401 = vmatprep.subr.bf16.mxu0 %v8282_v19  ;;  %8487 = vmatprep.subr.bf16.mxu1 %v8284_v55 }
0x110f   :  { %8402 = vmatpush1.bf16.msra.mxu0 %v8281_v15  ;;  %8488 = vmatpush1.bf16.msra.mxu1 %v8283_v51 }
0x1110   :  { %8403 = vmatprep.subr.bf16.mxu0 %v8286_v2  ;;  %8489 = vmatprep.subr.bf16.mxu1 %v8288_v11 }
0x1113   :  { %8404 = vmatpush1.bf16.msra.mxu0 %v8285_v37  ;;  %8490 = vmatpush1.bf16.msra.mxu1 %v8287_v59 }
0x1114   :  { %8405 = vmatprep.subr.bf16.mxu0 %v8290_v53  ;;  %8491 = vmatprep.subr.bf16.mxu1 %v8292_v16 }
0x1117   :  { %8406 = vmatpush1.bf16.msra.mxu0 %v8289_v14  ;;  %8492 = vmatpush1.bf16.msra.mxu1 %v8291_v61 }
0x1118   :  { %8407 = vmatprep.subr.bf16.mxu0 %v8294_v50  ;;  %8493 = vmatprep.subr.bf16.mxu1 %v8296_v30 }
0x111b   :  { %8408 = vmatpush1.bf16.msra.mxu0 %v8293_v34  ;;  %8494 = vmatpush1.bf16.msra.mxu1 %v8295_v3  ;;  %v8297_v34 = vld [vmem:[#allocation5 + $0x620] sm:$0xff]  ;;  %v8299_v3 = vld [vmem:[#allocation5 + $0x630] sm:$0xff] }
0x111c   :  { %8420 = vmatprep.subr.bf16.mxu0 %v8298_v32  ;;  %8506 = vmatprep.subr.bf16.mxu1 %v8300_v21  ;;  %v8302_v21 = vld [vmem:[#allocation5 + $0x688] sm:$0xff] }
0x11b1   :  { %v8102_v17 = vpop.f32.mrb[36].mxu0  ;;  %v8188_v18 = vpop.f32.mrb[36].mxu1 }
0x11b2   :  { %v9068_v38 = vadd.f32 %v8102_v17, %v8012_v48  ;;  %v9072_v7 = vadd.f32 %v8188_v18, %v8020_v12  ;;  %v8104_v29 = vpop.f32.mrb[37].mxu0  ;;  %v8190_v23 = vpop.f32.mrb[37].mxu1  ;;  %v8305_v17 = vld [vmem:[#allocation5 + $0x6e0] sm:$0xff]  ;;  %v8307_v18 = vld [vmem:[#allocation5 + $0x6f0] sm:$0xff] }
0x11b3   :  { %v9069_v58 = vadd.f32 %v8104_v29, %v8016_v1  ;;  %v9073_v27 = vadd.f32 %v8190_v23, %v8024_v62  ;;  %v8106_v33 = vpop.f32.mrb[38].mxu0  ;;  %v8192_v8 = vpop.f32.mrb[38].mxu1  ;;  %v8309_v29 = vld [vmem:[#allocation5 + $0x740] sm:$0xff]  ;;  %v8311_v23 = vld [vmem:[#allocation5 + $0x750] sm:$0xff] }
0x11b4   :  { %v8205_v52 = vmin.f32 %v9068_v38, 0.0  ;;  %v8108_v22 = vpop.f32.mrb[39].mxu0  ;;  %v8194_v41 = vpop.f32.mrb[39].mxu1  ;;  %v8207_v47 = vmin.f32 %v9072_v7, 0.0  ;;  %v9070_v63 = vadd.f32 %v8106_v33, %v8012_v48  ;;  %v9074_v39 = vadd.f32 %v8192_v8, %v8020_v12  ;;  %v8301_v48 = vld [vmem:[#allocation5 + $0x680] sm:$0xff]  ;;  %v8303_v12 = vld [vmem:[#allocation5 + $0x690] sm:$0xff] }
0x11b5   :  { %v8206_v26 = vmin.f32 %v9069_v58, 0.0  ;;  %v8208_v36 = vmin.f32 %v9073_v27, 0.0  ;;  %v9071_v4 = vadd.f32 %v8108_v22, %v8016_v1  ;;  %v9075_v31 = vadd.f32 %v8194_v41, %v8024_v62  ;;  %v8306_v1 = vld [vmem:[#allocation5 + $0x6e8] sm:$0xff]  ;;  %v8308_v62 = vld [vmem:[#allocation5 + $0x6f8] sm:$0xff]  ;;  %v8313_v33 = vld [vmem:[#allocation5 + $0x7a0] sm:$0xff] }
0x11b6   :  { %v8197_v44 = vmax.f32 %v9068_v38, 0.0  ;;  %v8213_v45 = vmul.f32 0.01, %v8205_v52  ;;  %v8199_v28 = vmax.f32 %v9072_v7, 0.0  ;;  %v8209_v56 = vmin.f32 %v9070_v63, 0.0  ;;  %v8310_v38 = vld [vmem:[#allocation5 + $0x748] sm:$0xff] }
0x11b7   :  { %v8215_v42 = vmul.f32 0.01, %v8207_v47  ;;  %v8198_v25 = vmax.f32 %v9069_v58, 0.0  ;;  %v8200_v9 = vmax.f32 %v9073_v27, 0.0  ;;  %v8211_v57 = vmin.f32 %v9074_v39, 0.0  ;;  %v8312_v7 = vld [vmem:[#allocation5 + $0x758] sm:$0xff] }
0x11b8   :  { %v8214_v6 = vmul.f32 0.01, %v8206_v26  ;;  %v8201_v13 = vmax.f32 %v9070_v63, 0.0  ;;  %v8217_v35 = vmul.f32 0.01, %v8209_v56  ;;  %v8210_v24 = vmin.f32 %v9071_v4, 0.0 }
0x11b9   :  { %v8216_v54 = vmul.f32 0.01, %v8208_v36  ;;  %v8203_v20 = vmax.f32 %v9074_v39, 0.0  ;;  %v8219_v43 = vmul.f32 0.01, %v8211_v57  ;;  %v8212_v0 = vmin.f32 %v9075_v31, 0.0 }
0x11ba   :  { %v8221_v5 = vadd.f32 %v8213_v45, %v8197_v44  ;;  %v8225_v19 = vadd.f32 %v8217_v35, %v8201_v13  ;;  %v8202_v55 = vmax.f32 %v9071_v4, 0.0  ;;  %v8218_v15 = vmul.f32 0.01, %v8210_v24  ;;  %v8314_v58 = vld [vmem:[#allocation5 + $0x7a8] sm:$0xff]  ;;  %v8316_v27 = vld [vmem:[#allocation5 + $0x7b8] sm:$0xff]  ;;  %v8315_v8 = vld [vmem:[#allocation5 + $0x7b0] sm:$0xff] }
0x11bb   :  { %v8223_v51 = vadd.f32 %v8215_v42, %v8199_v28  ;;  %v8227_v2 = vadd.f32 %v8219_v43, %v8203_v20  ;;  %v8204_v11 = vmax.f32 %v9075_v31, 0.0  ;;  %v8220_v37 = vmul.f32 0.01, %v8212_v0  ;;  %v8318_v52 = vld [vmem:[#allocation5 + $0x808] sm:$0xff]  ;;  %v8320_v22 = vld [vmem:[#allocation5 + $0x818] sm:$0xff]  ;;  %v8317_v41 = vld [vmem:[#allocation5 + $0x800] sm:$0xff] }
0x11bc   :  { %v8222_v59 = vadd.f32 %v8214_v6, %v8198_v25  ;;  %v8229_v53 = vpack.c.bf16 %v8225_v19, %v8221_v5  ;;  %v8226_v16 = vadd.f32 %v8218_v15, %v8202_v55  ;;  %v8224_v14 = vadd.f32 %v8216_v54, %v8200_v9  ;;  %v8319_v47 = vld [vmem:[#allocation5 + $0x810] sm:$0xff]  ;;  %v8322_v26 = vld [vmem:[#allocation5 + $0x868] sm:$0xff]  ;;  %v8324_v63 = vld [vmem:[#allocation5 + $0x878] sm:$0xff] }
0x11bd   :  { %v13254_v61 = vpack.c.bf16 %v8227_v2, %v8223_v51  ;;  %v8228_v50 = vadd.f32 %v8220_v37, %v8204_v11  ;;  %v8321_v39 = vld [vmem:[#allocation5 + $0x860] sm:$0xff]  ;;  %v8323_v36 = vld [vmem:[#allocation5 + $0x870] sm:$0xff]  ;;  %v8326_v4 = vld [vmem:[#allocation5 + $0x8c8] sm:$0xff] }
0x11be   :  { %v8230_v30 = vpack.c.bf16 %v8226_v16, %v8222_v59  ;;  %v8328_v31 = vld [vmem:[#allocation5 + $0x8d8] sm:$0xff]  ;;  %v8325_v44 = vld [vmem:[#allocation5 + $0x8c0] sm:$0xff]  ;;  %v8327_v45 = vld [vmem:[#allocation5 + $0x8d0] sm:$0xff] }
0x11bf   :  { %v8232_v32 = vpack.c.bf16 %v8228_v50, %v8224_v14  ;;  %v8330_v28 = vld [vmem:[#allocation5 + $0x928] sm:$0xff]  ;;  %v8332_v56 = vld [vmem:[#allocation5 + $0x938] sm:$0xff]  ;;  %v8329_v42 = vld [vmem:[#allocation5 + $0x920] sm:$0xff] }
0x11c0   :  { %8409 = vmatprep.mubr.bf16.mxu0 %v8230_v30  ;;  %8495 = vmatprep.mubr.bf16.mxu1 %v8230_v30  ;;  %v8331_v25 = vld [vmem:[#allocation5 + $0x930] sm:$0xff]  ;;  %v8334_v9 = vld [vmem:[#allocation5 + $0x988] sm:$0xff]  ;;  %v8336_v57 = vld [vmem:[#allocation5 + $0x998] sm:$0xff] }
0x11c1   :  { %8410 = vmatmul.mubr.bf16.vlgmr.msra.gmra.mrb[40].mxu0 %v8229_v53  ;;  %8496 = vmatmul.mubr.bf16.vlgmr.msra.gmra.mrb[40].mxu1 %v8229_v53  ;;  %v8333_v6 = vld [vmem:[#allocation5 + $0x980] sm:$0xff]  ;;  %v8335_v13 = vld [vmem:[#allocation5 + $0x990] sm:$0xff]  ;;  %v8338_v35 = vld [vmem:[#allocation5 + $0x9e8] sm:$0xff] }
0x11c2   :  { %8421 = vmatpush1.bf16.msra.mxu0 %v8297_v34  ;;  %8507 = vmatpush1.bf16.msra.mxu1 %v8299_v3  ;;  %v8340_v24 = vld [vmem:[#allocation5 + $0x9f8] sm:$0xff]  ;;  %v8337_v54 = vld [vmem:[#allocation5 + $0x9e0] sm:$0xff]  ;;  %v8339_v20 = vld [vmem:[#allocation5 + $0x9f0] sm:$0xff] }
0x11c3   :  { %8452 = vmatprep.mubr.bf16.mxu0 %v8232_v32  ;;  %8538 = vmatprep.mubr.bf16.mxu1 %v8232_v32  ;;  %v8342_v43 = vld [vmem:[#allocation5 + $0xa48] sm:$0xff]  ;;  %v8344_v0 = vld [vmem:[#allocation5 + $0xa58] sm:$0xff]  ;;  %v8341_v5 = vld [vmem:[#allocation5 + $0xa40] sm:$0xff] }
0x11c4   :  { %8422 = vmatprep.subr.bf16.mxu0 %v8302_v21  ;;  %8508 = vmatprep.subr.bf16.mxu1 %v8304_v46  ;;  %v8343_v19 = vld [vmem:[#allocation5 + $0xa50] sm:$0xff]  ;;  %v8346_v55 = vld [vmem:[#allocation5 + $0xaa8] sm:$0xff]  ;;  %v8348_v15 = vld [vmem:[#allocation5 + $0xab8] sm:$0xff] }
0x11c5   :  { %v8345_v51 = vld [vmem:[#allocation5 + $0xaa0] sm:$0xff]  ;;  %v8347_v2 = vld [vmem:[#allocation5 + $0xab0] sm:$0xff]  ;;  %v8350_v11 = vld [vmem:[#allocation5 + $0xb08] sm:$0xff] }
0x11c6   :  { %8423 = vmatpush1.bf16.msra.mxu0 %v8301_v48  ;;  %8509 = vmatpush1.bf16.msra.mxu1 %v8303_v12  ;;  %v8352_v37 = vld [vmem:[#allocation5 + $0xb18] sm:$0xff]  ;;  %v8349_v59 = vld [vmem:[#allocation5 + $0xb00] sm:$0xff]  ;;  %v8351_v53 = vld [vmem:[#allocation5 + $0xb10] sm:$0xff] }
0x11c7   :  { %8424 = vmatprep.subr.bf16.mxu0 %v8306_v1  ;;  %8510 = vmatprep.subr.bf16.mxu1 %v8308_v62  ;;  %v8354_v16 = vld [vmem:[#allocation5 + $0xb68] sm:$0xff]  ;;  %v8356_v14 = vld [vmem:[#allocation5 + $0xb78] sm:$0xff]  ;;  %v8353_v50 = vld [vmem:[#allocation5 + $0xb60] sm:$0xff] }
0x11c8   :  { %v8355_v30 = vld [vmem:[#allocation5 + $0xb70] sm:$0xff]  ;;  %v8358_v34 = vld [vmem:[#allocation5 + $0xbc8] sm:$0xff]  ;;  %v8360_v3 = vld [vmem:[#allocation5 + $0xbd8] sm:$0xff] }
0x11c9   :  { %v8357_v32 = vld [vmem:[#allocation5 + $0xbc0] sm:$0xff]  ;;  %v8359_v21 = vld [vmem:[#allocation5 + $0xbd0] sm:$0xff]  ;;  %v8586_v46 = vld [vmem:[#allocation5 + $0x48] sm:$0xff] }
0x11ca   :  { %8425 = vmatpush1.bf16.msra.mxu0 %v8305_v17  ;;  %8511 = vmatpush1.bf16.msra.mxu1 %v8307_v18  ;;  %v8588_v48 = vld [vmem:[#allocation5 + $0x58] sm:$0xff]  ;;  %v8585_v12 = vld [vmem:[#allocation5 + $0x40] sm:$0xff]  ;;  %v8587_v1 = vld [vmem:[#allocation5 + $0x50] sm:$0xff] }
0x11cb   :  { %8426 = vmatprep.subr.bf16.mxu0 %v8310_v38  ;;  %8512 = vmatprep.subr.bf16.mxu1 %v8312_v7  ;;  %v8590_v62 = vld [vmem:[#allocation5 + $0xa8] sm:$0xff]  ;;  %v8592_v17 = vld [vmem:[#allocation5 + $0xb8] sm:$0xff]  ;;  %v8589_v18 = vld [vmem:[#allocation5 + $0xa0] sm:$0xff] }
0x11cc   :  { %v8591_v38 = vld [vmem:[#allocation5 + $0xb0] sm:$0xff]  ;;  %v8594_v7 = vld [vmem:[#allocation5 + $0x108] sm:$0xff] }
0x11ce   :  { %8427 = vmatpush1.bf16.msra.mxu0 %v8309_v29  ;;  %8513 = vmatpush1.bf16.msra.mxu1 %v8311_v23  ;;  %v8596_v29 = vld [vmem:[#allocation5 + $0x118] sm:$0xff]  ;;  %v8593_v23 = vld [vmem:[#allocation5 + $0x100] sm:$0xff] }
0x11cf   :  { %8428 = vmatprep.subr.bf16.mxu0 %v8314_v58  ;;  %8514 = vmatprep.subr.bf16.mxu1 %v8316_v27  ;;  %v8595_v58 = vld [vmem:[#allocation5 + $0x110] sm:$0xff]  ;;  %v8598_v27 = vld [vmem:[#allocation5 + $0x168] sm:$0xff] }
0x11d2   :  { %8429 = vmatpush1.bf16.msra.mxu0 %v8313_v33  ;;  %8515 = vmatpush1.bf16.msra.mxu1 %v8315_v8  ;;  %v8600_v33 = vld [vmem:[#allocation5 + $0x178] sm:$0xff]  ;;  %v8599_v8 = vld [vmem:[#allocation5 + $0x170] sm:$0xff] }
0x11d3   :  { %8430 = vmatprep.subr.bf16.mxu0 %v8318_v52  ;;  %8516 = vmatprep.subr.bf16.mxu1 %v8320_v22  ;;  %v8602_v52 = vld [vmem:[#allocation5 + $0x1c8] sm:$0xff]  ;;  %v8604_v22 = vld [vmem:[#allocation5 + $0x1d8] sm:$0xff] }
0x11d6   :  { %8431 = vmatpush1.bf16.msra.mxu0 %v8317_v41  ;;  %8517 = vmatpush1.bf16.msra.mxu1 %v8319_v47  ;;  %v8601_v41 = vld [vmem:[#allocation5 + $0x1c0] sm:$0xff]  ;;  %v8603_v47 = vld [vmem:[#allocation5 + $0x1d0] sm:$0xff] }
0x11d7   :  { %8432 = vmatprep.subr.bf16.mxu0 %v8322_v26  ;;  %8518 = vmatprep.subr.bf16.mxu1 %v8324_v63  ;;  %v8606_v26 = vld [vmem:[#allocation5 + $0x228] sm:$0xff]  ;;  %v8608_v63 = vld [vmem:[#allocation5 + $0x238] sm:$0xff] }
0x11da   :  { %8433 = vmatpush1.bf16.msra.mxu0 %v8321_v39  ;;  %8519 = vmatpush1.bf16.msra.mxu1 %v8323_v36  ;;  %v8605_v39 = vld [vmem:[#allocation5 + $0x220] sm:$0xff]  ;;  %v8607_v36 = vld [vmem:[#allocation5 + $0x230] sm:$0xff] }
0x11db   :  { %8434 = vmatprep.subr.bf16.mxu0 %v8326_v4  ;;  %8520 = vmatprep.subr.bf16.mxu1 %v8328_v31  ;;  %v8610_v4 = vld [vmem:[#allocation5 + $0x288] sm:$0xff]  ;;  %v8612_v31 = vld [vmem:[#allocation5 + $0x298] sm:$0xff] }
0x11de   :  { %8435 = vmatpush1.bf16.msra.mxu0 %v8325_v44  ;;  %8521 = vmatpush1.bf16.msra.mxu1 %v8327_v45  ;;  %v8609_v44 = vld [vmem:[#allocation5 + $0x280] sm:$0xff]  ;;  %v8611_v45 = vld [vmem:[#allocation5 + $0x290] sm:$0xff] }
0x11df   :  { %8436 = vmatprep.subr.bf16.mxu0 %v8330_v28  ;;  %8522 = vmatprep.subr.bf16.mxu1 %v8332_v56  ;;  %v8614_v28 = vld [vmem:[#allocation5 + $0x2e8] sm:$0xff]  ;;  %v8616_v56 = vld [vmem:[#allocation5 + $0x2f8] sm:$0xff] }
0x11e2   :  { %8437 = vmatpush1.bf16.msra.mxu0 %v8329_v42  ;;  %8523 = vmatpush1.bf16.msra.mxu1 %v8331_v25  ;;  %v8613_v42 = vld [vmem:[#allocation5 + $0x2e0] sm:$0xff]  ;;  %v8615_v25 = vld [vmem:[#allocation5 + $0x2f0] sm:$0xff] }
0x11e3   :  { %8438 = vmatprep.subr.bf16.mxu0 %v8334_v9  ;;  %8524 = vmatprep.subr.bf16.mxu1 %v8336_v57  ;;  %v8618_v9 = vld [vmem:[#allocation5 + $0x348] sm:$0xff]  ;;  %v8620_v57 = vld [vmem:[#allocation5 + $0x358] sm:$0xff] }
0x11e6   :  { %8439 = vmatpush1.bf16.msra.mxu0 %v8333_v6  ;;  %8525 = vmatpush1.bf16.msra.mxu1 %v8335_v13  ;;  %v8617_v6 = vld [vmem:[#allocation5 + $0x340] sm:$0xff]  ;;  %v8619_v13 = vld [vmem:[#allocation5 + $0x350] sm:$0xff] }
0x11e7   :  { %8440 = vmatprep.subr.bf16.mxu0 %v8338_v35  ;;  %8526 = vmatprep.subr.bf16.mxu1 %v8340_v24  ;;  %v8622_v35 = vld [vmem:[#allocation5 + $0x3a8] sm:$0xff]  ;;  %v8624_v24 = vld [vmem:[#allocation5 + $0x3b8] sm:$0xff] }
0x11ea   :  { %8441 = vmatpush1.bf16.msra.mxu0 %v8337_v54  ;;  %8527 = vmatpush1.bf16.msra.mxu1 %v8339_v20  ;;  %v8621_v54 = vld [vmem:[#allocation5 + $0x3a0] sm:$0xff]  ;;  %v8623_v20 = vld [vmem:[#allocation5 + $0x3b0] sm:$0xff] }
0x11eb   :  { %8442 = vmatprep.subr.bf16.mxu0 %v8342_v43  ;;  %8528 = vmatprep.subr.bf16.mxu1 %v8344_v0  ;;  %v8626_v43 = vld [vmem:[#allocation5 + $0x408] sm:$0xff]  ;;  %v8628_v0 = vld [vmem:[#allocation5 + $0x418] sm:$0xff] }
0x11ee   :  { %8443 = vmatpush1.bf16.msra.mxu0 %v8341_v5  ;;  %8529 = vmatpush1.bf16.msra.mxu1 %v8343_v19  ;;  %v8625_v5 = vld [vmem:[#allocation5 + $0x400] sm:$0xff]  ;;  %v8627_v19 = vld [vmem:[#allocation5 + $0x410] sm:$0xff] }
0x11ef   :  { %8444 = vmatprep.subr.bf16.mxu0 %v8346_v55  ;;  %8530 = vmatprep.subr.bf16.mxu1 %v8348_v15  ;;  %v8630_v55 = vld [vmem:[#allocation5 + $0x468] sm:$0xff]  ;;  %v8632_v15 = vld [vmem:[#allocation5 + $0x478] sm:$0xff] }
0x11f2   :  { %8445 = vmatpush1.bf16.msra.mxu0 %v8345_v51  ;;  %8531 = vmatpush1.bf16.msra.mxu1 %v8347_v2  ;;  %v8629_v51 = vld [vmem:[#allocation5 + $0x460] sm:$0xff]  ;;  %v8631_v2 = vld [vmem:[#allocation5 + $0x470] sm:$0xff] }
0x11f3   :  { %8446 = vmatprep.subr.bf16.mxu0 %v8350_v11  ;;  %8532 = vmatprep.subr.bf16.mxu1 %v8352_v37  ;;  %v8634_v11 = vld [vmem:[#allocation5 + $0x4c8] sm:$0xff]  ;;  %v8636_v37 = vld [vmem:[#allocation5 + $0x4d8] sm:$0xff] }
0x11f6   :  { %8447 = vmatpush1.bf16.msra.mxu0 %v8349_v59  ;;  %8533 = vmatpush1.bf16.msra.mxu1 %v8351_v53  ;;  %v8633_v59 = vld [vmem:[#allocation5 + $0x4c0] sm:$0xff]  ;;  %v8635_v53 = vld [vmem:[#allocation5 + $0x4d0] sm:$0xff] }
0x11f7   :  { %8448 = vmatprep.subr.bf16.mxu0 %v8354_v16  ;;  %8534 = vmatprep.subr.bf16.mxu1 %v8356_v14  ;;  %v8638_v16 = vld [vmem:[#allocation5 + $0x528] sm:$0xff]  ;;  %v8640_v14 = vld [vmem:[#allocation5 + $0x538] sm:$0xff] }
0x11fa   :  { %8449 = vmatpush1.bf16.msra.mxu0 %v8353_v50  ;;  %8535 = vmatpush1.bf16.msra.mxu1 %v8355_v30  ;;  %v8637_v50 = vld [vmem:[#allocation5 + $0x520] sm:$0xff]  ;;  %v8639_v30 = vld [vmem:[#allocation5 + $0x530] sm:$0xff] }
0x11fb   :  { %8450 = vmatprep.subr.bf16.mxu0 %v8358_v34  ;;  %8536 = vmatprep.subr.bf16.mxu1 %v8360_v3  ;;  %v8642_v34 = vld [vmem:[#allocation5 + $0x588] sm:$0xff]  ;;  %v8644_v3 = vld [vmem:[#allocation5 + $0x598] sm:$0xff] }
0x11fe   :  { %8451 = vmatpush1.bf16.msra.mxu0 %v8357_v32  ;;  %8537 = vmatpush1.bf16.msra.mxu1 %v8359_v21  ;;  %v8641_v32 = vld [vmem:[#allocation5 + $0x580] sm:$0xff]  ;;  %v8643_v21 = vld [vmem:[#allocation5 + $0x590] sm:$0xff] }
0x11ff   :  { %8729 = vmatprep.subr.bf16.mxu0 %v8586_v46  ;;  %8815 = vmatprep.subr.bf16.mxu1 %v8588_v48  ;;  %v8646_v46 = vld [vmem:[#allocation5 + $0x5e8] sm:$0xff]  ;;  %v8648_v48 = vld [vmem:[#allocation5 + $0x5f8] sm:$0xff] }
0x1201   :  { %8453 = vmatmul.mubr.bf16.vlgmr.msra.gmra.mrb[40].mxu0 %v13254_v61  ;;  %8539 = vmatmul.mubr.bf16.vlgmr.msra.gmra.mrb[40].mxu1 %v13254_v61  ;;  %v8597_v61 = vld [vmem:[#allocation5 + $0x160] sm:$0xff] }
0x1202   :  { %8730 = vmatpush1.bf16.msra.mxu0 %v8585_v12  ;;  %8816 = vmatpush1.bf16.msra.mxu1 %v8587_v1  ;;  %v8645_v12 = vld [vmem:[#allocation5 + $0x5e0] sm:$0xff]  ;;  %v8647_v1 = vld [vmem:[#allocation5 + $0x5f0] sm:$0xff] }
0x1203   :  { %8731 = vmatprep.subr.bf16.mxu0 %v8590_v62  ;;  %8817 = vmatprep.subr.bf16.mxu1 %v8592_v17  ;;  %v8650_v62 = vld [vmem:[#allocation5 + $0x648] sm:$0xff]  ;;  %v8652_v17 = vld [vmem:[#allocation5 + $0x658] sm:$0xff] }
0x1206   :  { %8732 = vmatpush1.bf16.msra.mxu0 %v8589_v18  ;;  %8818 = vmatpush1.bf16.msra.mxu1 %v8591_v38  ;;  %v14431_v18 = vld [vmem:[#allocation68_spill] sm:$0xff] }
0x1207   :  { %8733 = vmatprep.subr.bf16.mxu0 %v8594_v7  ;;  %8819 = vmatprep.subr.bf16.mxu1 %v8596_v29  ;;  %v8364_v38 = vrot.slane %v14426_v60, %v14431_v18  ;;  %v8372_v7 = vrot.slane %v14427_v40, %v14431_v18  ;;  %v8368_v29 = vrot.slane %v14428_v49, %v14431_v18 }
0x120a   :  { %8734 = vmatpush1.bf16.msra.mxu0 %v8593_v23  ;;  %8820 = vmatpush1.bf16.msra.mxu1 %v8595_v58  ;;  %v8376_v23 = vrot.slane %v14429_v10, %v14431_v18  ;;  %v8656_v18 = vld [vmem:[#allocation5 + $0x6b8] sm:$0xff] }
0x120b   :  { %8735 = vmatprep.subr.bf16.mxu0 %v8598_v27  ;;  %8821 = vmatprep.subr.bf16.mxu1 %v8600_v33 }
0x120e   :  { %8736 = vmatpush1.bf16.msra.mxu0 %v8597_v61  ;;  %8822 = vmatpush1.bf16.msra.mxu1 %v8599_v8 }
0x120f   :  { %8737 = vmatprep.subr.bf16.mxu0 %v8602_v52  ;;  %8823 = vmatprep.subr.bf16.mxu1 %v8604_v22 }
0x1212   :  { %8738 = vmatpush1.bf16.msra.mxu0 %v8601_v41  ;;  %8824 = vmatpush1.bf16.msra.mxu1 %v8603_v47 }
0x1213   :  { %8739 = vmatprep.subr.bf16.mxu0 %v8606_v26  ;;  %8825 = vmatprep.subr.bf16.mxu1 %v8608_v63 }
0x1216   :  { %8740 = vmatpush1.bf16.msra.mxu0 %v8605_v39  ;;  %8826 = vmatpush1.bf16.msra.mxu1 %v8607_v36 }
0x1217   :  { %8741 = vmatprep.subr.bf16.mxu0 %v8610_v4  ;;  %8827 = vmatprep.subr.bf16.mxu1 %v8612_v31 }
0x121a   :  { %8742 = vmatpush1.bf16.msra.mxu0 %v8609_v44  ;;  %8828 = vmatpush1.bf16.msra.mxu1 %v8611_v45 }
0x121b   :  { %8743 = vmatprep.subr.bf16.mxu0 %v8614_v28  ;;  %8829 = vmatprep.subr.bf16.mxu1 %v8616_v56 }
0x121e   :  { %8744 = vmatpush1.bf16.msra.mxu0 %v8613_v42  ;;  %8830 = vmatpush1.bf16.msra.mxu1 %v8615_v25 }
0x121f   :  { %8745 = vmatprep.subr.bf16.mxu0 %v8618_v9  ;;  %8831 = vmatprep.subr.bf16.mxu1 %v8620_v57 }
0x1222   :  { %8746 = vmatpush1.bf16.msra.mxu0 %v8617_v6  ;;  %8832 = vmatpush1.bf16.msra.mxu1 %v8619_v13 }
0x1223   :  { %8747 = vmatprep.subr.bf16.mxu0 %v8622_v35  ;;  %8833 = vmatprep.subr.bf16.mxu1 %v8624_v24 }
0x1226   :  { %8748 = vmatpush1.bf16.msra.mxu0 %v8621_v54  ;;  %8834 = vmatpush1.bf16.msra.mxu1 %v8623_v20 }
0x1227   :  { %8749 = vmatprep.subr.bf16.mxu0 %v8626_v43  ;;  %8835 = vmatprep.subr.bf16.mxu1 %v8628_v0 }
0x122a   :  { %8750 = vmatpush1.bf16.msra.mxu0 %v8625_v5  ;;  %8836 = vmatpush1.bf16.msra.mxu1 %v8627_v19 }
0x122b   :  { %8751 = vmatprep.subr.bf16.mxu0 %v8630_v55  ;;  %8837 = vmatprep.subr.bf16.mxu1 %v8632_v15 }
0x122e   :  { %8752 = vmatpush1.bf16.msra.mxu0 %v8629_v51  ;;  %8838 = vmatpush1.bf16.msra.mxu1 %v8631_v2 }
0x122f   :  { %8753 = vmatprep.subr.bf16.mxu0 %v8634_v11  ;;  %8839 = vmatprep.subr.bf16.mxu1 %v8636_v37 }
0x1232   :  { %8754 = vmatpush1.bf16.msra.mxu0 %v8633_v59  ;;  %8840 = vmatpush1.bf16.msra.mxu1 %v8635_v53 }
0x1233   :  { %8755 = vmatprep.subr.bf16.mxu0 %v8638_v16  ;;  %8841 = vmatprep.subr.bf16.mxu1 %v8640_v14 }
0x1236   :  { %8756 = vmatpush1.bf16.msra.mxu0 %v8637_v50  ;;  %8842 = vmatpush1.bf16.msra.mxu1 %v8639_v30 }
0x1237   :  { %8757 = vmatprep.subr.bf16.mxu0 %v8642_v34  ;;  %8843 = vmatprep.subr.bf16.mxu1 %v8644_v3 }
0x123a   :  { %8758 = vmatpush1.bf16.msra.mxu0 %v8641_v32  ;;  %8844 = vmatpush1.bf16.msra.mxu1 %v8643_v21 }
0x123b   :  { %8759 = vmatprep.subr.bf16.mxu0 %v8646_v46  ;;  %8845 = vmatprep.subr.bf16.mxu1 %v8648_v48 }
0x123e   :  { %8760 = vmatpush1.bf16.msra.mxu0 %v8645_v12  ;;  %8846 = vmatpush1.bf16.msra.mxu1 %v8647_v1  ;;  %v8649_v12 = vld [vmem:[#allocation5 + $0x640] sm:$0xff]  ;;  %v8651_v1 = vld [vmem:[#allocation5 + $0x650] sm:$0xff] }
0x123f   :  { %8772 = vmatprep.subr.bf16.mxu0 %v8650_v62  ;;  %8858 = vmatprep.subr.bf16.mxu1 %v8652_v17  ;;  %v8654_v17 = vld [vmem:[#allocation5 + $0x6a8] sm:$0xff] }
0x12d4   :  { %v8454_v58 = vpop.f32.mrb[40].mxu0  ;;  %v8540_v27 = vpop.f32.mrb[40].mxu1 }
0x12d5   :  { %v9076_v33 = vadd.f32 %v8454_v58, %v8364_v38  ;;  %v9080_v61 = vadd.f32 %v8540_v27, %v8372_v7  ;;  %v8456_v8 = vpop.f32.mrb[41].mxu0  ;;  %v8542_v52 = vpop.f32.mrb[41].mxu1  ;;  %v8657_v58 = vld [vmem:[#allocation5 + $0x700] sm:$0xff]  ;;  %v8659_v27 = vld [vmem:[#allocation5 + $0x710] sm:$0xff] }
0x12d6   :  { %v9077_v22 = vadd.f32 %v8456_v8, %v8368_v29  ;;  %v9081_v41 = vadd.f32 %v8542_v52, %v8376_v23  ;;  %v8458_v47 = vpop.f32.mrb[42].mxu0  ;;  %v8544_v26 = vpop.f32.mrb[42].mxu1  ;;  %v8661_v8 = vld [vmem:[#allocation5 + $0x760] sm:$0xff]  ;;  %v8663_v52 = vld [vmem:[#allocation5 + $0x770] sm:$0xff] }
0x12d7   :  { %v8557_v63 = vmin.f32 %v9076_v33, 0.0  ;;  %v8460_v39 = vpop.f32.mrb[43].mxu0  ;;  %v8546_v36 = vpop.f32.mrb[43].mxu1  ;;  %v8559_v4 = vmin.f32 %v9080_v61, 0.0  ;;  %v9078_v44 = vadd.f32 %v8458_v47, %v8364_v38  ;;  %v9082_v45 = vadd.f32 %v8544_v26, %v8372_v7  ;;  %v8653_v38 = vld [vmem:[#allocation5 + $0x6a0] sm:$0xff]  ;;  %v8655_v7 = vld [vmem:[#allocation5 + $0x6b0] sm:$0xff] }
0x12d8   :  { %v8558_v31 = vmin.f32 %v9077_v22, 0.0  ;;  %v8560_v28 = vmin.f32 %v9081_v41, 0.0  ;;  %v9079_v56 = vadd.f32 %v8460_v39, %v8368_v29  ;;  %v9083_v42 = vadd.f32 %v8546_v36, %v8376_v23  ;;  %v8658_v29 = vld [vmem:[#allocation5 + $0x708] sm:$0xff]  ;;  %v8660_v23 = vld [vmem:[#allocation5 + $0x718] sm:$0xff]  ;;  %v8665_v47 = vld [vmem:[#allocation5 + $0x7c0] sm:$0xff] }
0x12d9   :  { %v8549_v25 = vmax.f32 %v9076_v33, 0.0  ;;  %v8565_v9 = vmul.f32 0.01, %v8557_v63  ;;  %v8551_v57 = vmax.f32 %v9080_v61, 0.0  ;;  %v8561_v6 = vmin.f32 %v9078_v44, 0.0  ;;  %v8662_v33 = vld [vmem:[#allocation5 + $0x768] sm:$0xff] }
0x12da   :  { %v8567_v13 = vmul.f32 0.01, %v8559_v4  ;;  %v8550_v35 = vmax.f32 %v9077_v22, 0.0  ;;  %v8552_v24 = vmax.f32 %v9081_v41, 0.0  ;;  %v8563_v54 = vmin.f32 %v9082_v45, 0.0  ;;  %v8664_v61 = vld [vmem:[#allocation5 + $0x778] sm:$0xff] }
0x12db   :  { %v8566_v20 = vmul.f32 0.01, %v8558_v31  ;;  %v8553_v43 = vmax.f32 %v9078_v44, 0.0  ;;  %v8569_v0 = vmul.f32 0.01, %v8561_v6  ;;  %v8562_v5 = vmin.f32 %v9079_v56, 0.0 }
0x12dc   :  { %v8568_v19 = vmul.f32 0.01, %v8560_v28  ;;  %v8555_v55 = vmax.f32 %v9082_v45, 0.0  ;;  %v8571_v15 = vmul.f32 0.01, %v8563_v54  ;;  %v8564_v51 = vmin.f32 %v9083_v42, 0.0 }
0x12dd   :  { %v8573_v2 = vadd.f32 %v8565_v9, %v8549_v25  ;;  %v8577_v11 = vadd.f32 %v8569_v0, %v8553_v43  ;;  %v8554_v37 = vmax.f32 %v9079_v56, 0.0  ;;  %v8570_v59 = vmul.f32 0.01, %v8562_v5  ;;  %v8666_v22 = vld [vmem:[#allocation5 + $0x7c8] sm:$0xff]  ;;  %v8668_v41 = vld [vmem:[#allocation5 + $0x7d8] sm:$0xff]  ;;  %v8667_v26 = vld [vmem:[#allocation5 + $0x7d0] sm:$0xff] }
0x12de   :  { %v8575_v53 = vadd.f32 %v8567_v13, %v8551_v57  ;;  %v8579_v16 = vadd.f32 %v8571_v15, %v8555_v55  ;;  %v8556_v14 = vmax.f32 %v9083_v42, 0.0  ;;  %v8572_v50 = vmul.f32 0.01, %v8564_v51  ;;  %v8670_v63 = vld [vmem:[#allocation5 + $0x828] sm:$0xff]  ;;  %v8672_v39 = vld [vmem:[#allocation5 + $0x838] sm:$0xff]  ;;  %v8669_v36 = vld [vmem:[#allocation5 + $0x820] sm:$0xff] }
0x12df   :  { %v8574_v30 = vadd.f32 %v8566_v20, %v8550_v35  ;;  %v8581_v34 = vpack.c.bf16 %v8577_v11, %v8573_v2  ;;  %v8578_v3 = vadd.f32 %v8570_v59, %v8554_v37  ;;  %v8576_v32 = vadd.f32 %v8568_v19, %v8552_v24  ;;  %v8671_v4 = vld [vmem:[#allocation5 + $0x830] sm:$0xff]  ;;  %v8674_v31 = vld [vmem:[#allocation5 + $0x888] sm:$0xff]  ;;  %v8676_v44 = vld [vmem:[#allocation5 + $0x898] sm:$0xff] }
0x12e0   :  { %v13266_v21 = vpack.c.bf16 %v8579_v16, %v8575_v53  ;;  %v8580_v46 = vadd.f32 %v8572_v50, %v8556_v14  ;;  %v8673_v45 = vld [vmem:[#allocation5 + $0x880] sm:$0xff]  ;;  %v8675_v28 = vld [vmem:[#allocation5 + $0x890] sm:$0xff]  ;;  %v8678_v56 = vld [vmem:[#allocation5 + $0x8e8] sm:$0xff] }
0x12e1   :  { %v8582_v48 = vpack.c.bf16 %v8578_v3, %v8574_v30  ;;  %v8680_v42 = vld [vmem:[#allocation5 + $0x8f8] sm:$0xff]  ;;  %v8677_v25 = vld [vmem:[#allocation5 + $0x8e0] sm:$0xff]  ;;  %v8679_v9 = vld [vmem:[#allocation5 + $0x8f0] sm:$0xff] }
0x12e2   :  { %v8584_v62 = vpack.c.bf16 %v8580_v46, %v8576_v32  ;;  %v8682_v57 = vld [vmem:[#allocation5 + $0x948] sm:$0xff]  ;;  %v8684_v6 = vld [vmem:[#allocation5 + $0x958] sm:$0xff]  ;;  %v8681_v13 = vld [vmem:[#allocation5 + $0x940] sm:$0xff] }
0x12e3   :  { %8761 = vmatprep.mubr.bf16.mxu0 %v8582_v48  ;;  %8847 = vmatprep.mubr.bf16.mxu1 %v8582_v48  ;;  %v8683_v35 = vld [vmem:[#allocation5 + $0x950] sm:$0xff]  ;;  %v8686_v24 = vld [vmem:[#allocation5 + $0x9a8] sm:$0xff]  ;;  %v8688_v54 = vld [vmem:[#allocation5 + $0x9b8] sm:$0xff] }
0x12e4   :  { %8762 = vmatmul.mubr.bf16.vlgmr.msra.gmra.mrb[44].mxu0 %v8581_v34  ;;  %8848 = vmatmul.mubr.bf16.vlgmr.msra.gmra.mrb[44].mxu1 %v8581_v34  ;;  %v8685_v20 = vld [vmem:[#allocation5 + $0x9a0] sm:$0xff]  ;;  %v8687_v43 = vld [vmem:[#allocation5 + $0x9b0] sm:$0xff]  ;;  %v8690_v0 = vld [vmem:[#allocation5 + $0xa08] sm:$0xff] }
0x12e5   :  { %8773 = vmatpush1.bf16.msra.mxu0 %v8649_v12  ;;  %8859 = vmatpush1.bf16.msra.mxu1 %v8651_v1  ;;  %v8692_v5 = vld [vmem:[#allocation5 + $0xa18] sm:$0xff]  ;;  %v8689_v19 = vld [vmem:[#allocation5 + $0xa00] sm:$0xff]  ;;  %v8691_v55 = vld [vmem:[#allocation5 + $0xa10] sm:$0xff] }
0x12e6   :  { %8804 = vmatprep.mubr.bf16.mxu0 %v8584_v62  ;;  %8890 = vmatprep.mubr.bf16.mxu1 %v8584_v62  ;;  %v8694_v15 = vld [vmem:[#allocation5 + $0xa68] sm:$0xff]  ;;  %v8696_v51 = vld [vmem:[#allocation5 + $0xa78] sm:$0xff]  ;;  %v8693_v2 = vld [vmem:[#allocation5 + $0xa60] sm:$0xff] }
0x12e7   :  { %8774 = vmatprep.subr.bf16.mxu0 %v8654_v17  ;;  %8860 = vmatprep.subr.bf16.mxu1 %v8656_v18  ;;  %v8695_v11 = vld [vmem:[#allocation5 + $0xa70] sm:$0xff]  ;;  %v8698_v37 = vld [vmem:[#allocation5 + $0xac8] sm:$0xff]  ;;  %v8700_v59 = vld [vmem:[#allocation5 + $0xad8] sm:$0xff] }
0x12e8   :  { %v8697_v53 = vld [vmem:[#allocation5 + $0xac0] sm:$0xff]  ;;  %v8699_v16 = vld [vmem:[#allocation5 + $0xad0] sm:$0xff]  ;;  %v8702_v14 = vld [vmem:[#allocation5 + $0xb28] sm:$0xff] }
0x12e9   :  { %8775 = vmatpush1.bf16.msra.mxu0 %v8653_v38  ;;  %8861 = vmatpush1.bf16.msra.mxu1 %v8655_v7  ;;  %v8704_v50 = vld [vmem:[#allocation5 + $0xb38] sm:$0xff]  ;;  %v8701_v30 = vld [vmem:[#allocation5 + $0xb20] sm:$0xff]  ;;  %v8703_v34 = vld [vmem:[#allocation5 + $0xb30] sm:$0xff] }
0x12ea   :  { %8776 = vmatprep.subr.bf16.mxu0 %v8658_v29  ;;  %8862 = vmatprep.subr.bf16.mxu1 %v8660_v23  ;;  %v8706_v3 = vld [vmem:[#allocation5 + $0xb88] sm:$0xff]  ;;  %v8708_v32 = vld [vmem:[#allocation5 + $0xb98] sm:$0xff]  ;;  %v8705_v46 = vld [vmem:[#allocation5 + $0xb80] sm:$0xff] }
0x12eb   :  { %v8707_v48 = vld [vmem:[#allocation5 + $0xb90] sm:$0xff]  ;;  %v8710_v12 = vld [vmem:[#allocation5 + $0xbe8] sm:$0xff]  ;;  %v8712_v1 = vld [vmem:[#allocation5 + $0xbf8] sm:$0xff] }
0x12ec   :  { %v8709_v62 = vld [vmem:[#allocation5 + $0xbe0] sm:$0xff]  ;;  %v8711_v17 = vld [vmem:[#allocation5 + $0xbf0] sm:$0xff] }
0x12ed   :  { %8777 = vmatpush1.bf16.msra.mxu0 %v8657_v58  ;;  %8863 = vmatpush1.bf16.msra.mxu1 %v8659_v27  ;;  %v14432_v18 = vld [vmem:[#allocation63_spill] sm:$0xff] }
0x12ee   :  { %8778 = vmatprep.subr.bf16.mxu0 %v8662_v33  ;;  %8864 = vmatprep.subr.bf16.mxu1 %v8664_v61  ;;  %v8716_v38 = vrot.slane %v14426_v60, %v14432_v18  ;;  %v8724_v7 = vrot.slane %v14427_v40, %v14432_v18  ;;  %v8720_v58 = vrot.slane %v14428_v49, %v14432_v18 }
0x12ef   :  { %v8728_v27 = vrot.slane %v14429_v10, %v14432_v18 }
0x12f1   :  { %8779 = vmatpush1.bf16.msra.mxu0 %v8661_v8  ;;  %8865 = vmatpush1.bf16.msra.mxu1 %v8663_v52 }
0x12f2   :  { %8780 = vmatprep.subr.bf16.mxu0 %v8666_v22  ;;  %8866 = vmatprep.subr.bf16.mxu1 %v8668_v41 }
0x12f5   :  { %8781 = vmatpush1.bf16.msra.mxu0 %v8665_v47  ;;  %8867 = vmatpush1.bf16.msra.mxu1 %v8667_v26 }
0x12f6   :  { %8782 = vmatprep.subr.bf16.mxu0 %v8670_v63  ;;  %8868 = vmatprep.subr.bf16.mxu1 %v8672_v39 }
0x12f9   :  { %8783 = vmatpush1.bf16.msra.mxu0 %v8669_v36  ;;  %8869 = vmatpush1.bf16.msra.mxu1 %v8671_v4 }
0x12fa   :  { %8784 = vmatprep.subr.bf16.mxu0 %v8674_v31  ;;  %8870 = vmatprep.subr.bf16.mxu1 %v8676_v44 }
0x12fd   :  { %8785 = vmatpush1.bf16.msra.mxu0 %v8673_v45  ;;  %8871 = vmatpush1.bf16.msra.mxu1 %v8675_v28 }
0x12fe   :  { %8786 = vmatprep.subr.bf16.mxu0 %v8678_v56  ;;  %8872 = vmatprep.subr.bf16.mxu1 %v8680_v42 }
0x1301   :  { %8787 = vmatpush1.bf16.msra.mxu0 %v8677_v25  ;;  %8873 = vmatpush1.bf16.msra.mxu1 %v8679_v9 }
0x1302   :  { %8788 = vmatprep.subr.bf16.mxu0 %v8682_v57  ;;  %8874 = vmatprep.subr.bf16.mxu1 %v8684_v6 }
0x1305   :  { %8789 = vmatpush1.bf16.msra.mxu0 %v8681_v13  ;;  %8875 = vmatpush1.bf16.msra.mxu1 %v8683_v35 }
0x1306   :  { %8790 = vmatprep.subr.bf16.mxu0 %v8686_v24  ;;  %8876 = vmatprep.subr.bf16.mxu1 %v8688_v54 }
0x1309   :  { %8791 = vmatpush1.bf16.msra.mxu0 %v8685_v20  ;;  %8877 = vmatpush1.bf16.msra.mxu1 %v8687_v43 }
0x130a   :  { %8792 = vmatprep.subr.bf16.mxu0 %v8690_v0  ;;  %8878 = vmatprep.subr.bf16.mxu1 %v8692_v5 }
0x130d   :  { %8793 = vmatpush1.bf16.msra.mxu0 %v8689_v19  ;;  %8879 = vmatpush1.bf16.msra.mxu1 %v8691_v55 }
0x130e   :  { %8794 = vmatprep.subr.bf16.mxu0 %v8694_v15  ;;  %8880 = vmatprep.subr.bf16.mxu1 %v8696_v51 }
0x1311   :  { %8795 = vmatpush1.bf16.msra.mxu0 %v8693_v2  ;;  %8881 = vmatpush1.bf16.msra.mxu1 %v8695_v11 }
0x1312   :  { %8796 = vmatprep.subr.bf16.mxu0 %v8698_v37  ;;  %8882 = vmatprep.subr.bf16.mxu1 %v8700_v59 }
0x1315   :  { %8797 = vmatpush1.bf16.msra.mxu0 %v8697_v53  ;;  %8883 = vmatpush1.bf16.msra.mxu1 %v8699_v16 }
0x1316   :  { %8798 = vmatprep.subr.bf16.mxu0 %v8702_v14  ;;  %8884 = vmatprep.subr.bf16.mxu1 %v8704_v50 }
0x1319   :  { %8799 = vmatpush1.bf16.msra.mxu0 %v8701_v30  ;;  %8885 = vmatpush1.bf16.msra.mxu1 %v8703_v34 }
0x131a   :  { %8800 = vmatprep.subr.bf16.mxu0 %v8706_v3  ;;  %8886 = vmatprep.subr.bf16.mxu1 %v8708_v32 }
0x131d   :  { %8801 = vmatpush1.bf16.msra.mxu0 %v8705_v46  ;;  %8887 = vmatpush1.bf16.msra.mxu1 %v8707_v48 }
0x131e   :  { %8802 = vmatprep.subr.bf16.mxu0 %v8710_v12  ;;  %8888 = vmatprep.subr.bf16.mxu1 %v8712_v1 }
0x1321   :  { %8803 = vmatpush1.bf16.msra.mxu0 %v8709_v62  ;;  %8889 = vmatpush1.bf16.msra.mxu1 %v8711_v17 }
0x1324   :  { %8805 = vmatmul.mubr.bf16.vlgmr.msra.gmra.mrb[44].mxu0 %v13266_v21  ;;  %8891 = vmatmul.mubr.bf16.vlgmr.msra.gmra.mrb[44].mxu1 %v13266_v21 }
0x13f7   :  { %v8806_v29 = vpop.f32.mrb[44].mxu0  ;;  %v8892_v23 = vpop.f32.mrb[44].mxu1 }
0x13f8   :  { %v8808_v33 = vpop.f32.mrb[45].mxu0  ;;  %v8894_v61 = vpop.f32.mrb[45].mxu1  ;;  %v9084_v22 = vadd.f32 %v8806_v29, %v8716_v38  ;;  %v9088_v21 = vadd.f32 %v8892_v23, %v8724_v7 }
0x13f9   :  { %v8810_v8 = vpop.f32.mrb[46].mxu0  ;;  %v8896_v52 = vpop.f32.mrb[46].mxu1  ;;  %v9085_v63 = vadd.f32 %v8808_v33, %v8720_v58  ;;  %v9089_v40 = vadd.f32 %v8894_v61, %v8728_v27 }
0x13fa   :  { %v9086_v41 = vadd.f32 %v8810_v8, %v8716_v38  ;;  %v9090_v47 = vadd.f32 %v8896_v52, %v8724_v7  ;;  %v8812_v60 = vpop.f32.mrb[47].mxu0  ;;  %v8898_v26 = vpop.f32.mrb[47].mxu1 }
0x13fb   :  { %v9087_v39 = vadd.f32 %v8812_v60, %v8720_v58  ;;  %v9091_v36 = vadd.f32 %v8898_v26, %v8728_v27 }
0x13fc   :  { %v8901_v4 = vmax.f32 %v9084_v22, %v9086_v41  ;;  %v8915_v31 = vmax.f32 %v9088_v21, %v9090_v47 }
0x13fd   :  { %v8908_v49 = vmax.f32 %v9085_v63, %v9087_v39  ;;  %v8922_v44 = vmax.f32 %v9089_v40, %v9091_v36 }
0x13fe   :  { %v8902_v45 = vrot.slane %v8901_v4, 4  ;;  %v8916_v10 = vrot.slane %v8915_v31, 4 }
0x13ff   :  { %v8909_v28 = vrot.slane %v8908_v49, 4  ;;  %v8923_v56 = vrot.slane %v8922_v44, 4 }
0x1400   :  { %v8903_v42 = vmax.f32 %v8901_v4, %v8902_v45  ;;  %v8917_v25 = vmax.f32 %v8915_v31, %v8916_v10 }
0x1401   :  { %v8910_v9 = vmax.f32 %v8908_v49, %v8909_v28  ;;  %v8924_v57 = vmax.f32 %v8922_v44, %v8923_v56 }
0x1402   :  { %v8904_v6 = vrot.slane %v8903_v42, 2  ;;  %v8918_v13 = vrot.slane %v8917_v25, 2 }
0x1403   :  { %v8911_v35 = vrot.slane %v8910_v9, 2  ;;  %v8925_v24 = vrot.slane %v8924_v57, 2 }
0x1404   :  { %v8905_v54 = vmax.f32 %v8903_v42, %v8904_v6  ;;  %v8919_v20 = vmax.f32 %v8917_v25, %v8918_v13 }
0x1405   :  { %v8912_v43 = vmax.f32 %v8910_v9, %v8911_v35  ;;  %v8926_v0 = vmax.f32 %v8924_v57, %v8925_v24 }
0x1406   :  { %v8906_v5 = vrot.slane %v8905_v54, 1  ;;  %v8920_v19 = vrot.slane %v8919_v20, 1 }
0x1407   :  { %v8913_v55 = vrot.slane %v8912_v43, 1  ;;  %v8927_v15 = vrot.slane %v8926_v0, 1 }
0x1408   :  { %v8907_v51 = vmax.f32 %v8905_v54, %v8906_v5  ;;  %v8921_v2 = vmax.f32 %v8919_v20, %v8920_v19 }
0x1409   :  { %v8914_v11 = vmax.f32 %v8912_v43, %v8913_v55  ;;  %v8928_v37 = vmax.f32 %v8926_v0, %v8927_v15 }
0x140a   :  { %v8929_v59 = vsub.f32 %v9084_v22, %v8907_v51  ;;  %v8933_v53 = vsub.f32 %v9086_v41, %v8907_v51  ;;  %v8931_v16 = vsub.f32 %v9088_v21, %v8921_v2  ;;  %v8935_v14 = vsub.f32 %v9090_v47, %v8921_v2 }
0x140b   :  { %v8930_v50 = vsub.f32 %v9085_v63, %v8914_v11  ;;  %v8934_v30 = vsub.f32 %v9087_v39, %v8914_v11  ;;  %v8932_v34 = vsub.f32 %v9089_v40, %v8928_v37  ;;  %v8936_v3 = vsub.f32 %v9091_v36, %v8928_v37 }
0x140c   :  { %v8937_v32 = vmul.f32 1.442695, %v8929_v59  ;;  %v8945_v46 = vmul.f32 1.442695, %v8933_v53  ;;  %v8941_v48 = vmul.f32 1.442695, %v8931_v16 }
0x140d   :  { %v8949_v12 = vmul.f32 1.442695, %v8935_v14  ;;  %v8939_v1 = vmul.f32 1.442695, %v8930_v50  ;;  %v8947_v62 = vmul.f32 1.442695, %v8934_v30 }
0x140e   :  { %9250 = vpow2.f32 %v8937_v32  ;;  %v8943_v17 = vmul.f32 1.442695, %v8932_v34  ;;  %v8951_v18 = vmul.f32 1.442695, %v8936_v3 }
0x140f   :  { %9252 = vpow2.f32 %v8945_v46 }
0x1410   :  { %9254 = vpow2.f32 %v8941_v48 }
0x1411   :  { %9256 = vpow2.f32 %v8949_v12 }
0x1412   :  { %9258 = vpow2.f32 %v8939_v1 }
0x1413   :  { %9260 = vpow2.f32 %v8947_v62 }
0x1414   :  { %9262 = vpow2.f32 %v8943_v17 }
0x1415   :  { %9264 = vpow2.f32 %v8951_v18 }
0x1418   :  { %v9251_v38 = vpop.eup %9250 }
0x1419   :  { %v9253_v7 = vpop.eup %9252 }
0x141a   :  { %v9255_v29 = vpop.eup %9254  ;;  %v8953_v23 = vadd.f32 %v9253_v7, %v9251_v38 }
0x141b   :  { %v9257_v58 = vpop.eup %9256 }
0x141c   :  { %v9259_v27 = vpop.eup %9258  ;;  %v8954_v33 = vrot.slane %v8953_v23, 4  ;;  %v8967_v61 = vadd.f32 %v9257_v58, %v9255_v29 }
0x141d   :  { %v9261_v8 = vpop.eup %9260 }
0x141e   :  { %v9263_v52 = vpop.eup %9262  ;;  %v8955_v22 = vadd.f32 %v8954_v33, %v8953_v23  ;;  %v8968_v21 = vrot.slane %v8967_v61, 4  ;;  %v8960_v41 = vadd.f32 %v9261_v8, %v9259_v27 }
0x141f   :  { %v9265_v47 = vpop.eup %9264 }
0x1420   :  { %v8956_v60 = vrot.slane %v8955_v22, 2  ;;  %v8969_v26 = vadd.f32 %v8968_v21, %v8967_v61  ;;  %v8961_v63 = vrot.slane %v8960_v41, 4  ;;  %v8974_v40 = vadd.f32 %v9265_v47, %v9263_v52 }
0x1422   :  { %v8957_v39 = vadd.f32 %v8956_v60, %v8955_v22  ;;  %v8970_v36 = vrot.slane %v8969_v26, 2  ;;  %v8962_v4 = vadd.f32 %v8961_v63, %v8960_v41  ;;  %v8975_v31 = vrot.slane %v8974_v40, 4 }
0x1424   :  { %v8958_v49 = vrot.slane %v8957_v39, 1  ;;  %v8971_v44 = vadd.f32 %v8970_v36, %v8969_v26  ;;  %v8963_v45 = vrot.slane %v8962_v4, 2  ;;  %v8976_v10 = vadd.f32 %v8975_v31, %v8974_v40 }
0x1426   :  { %v8959_v28 = vadd.f32 %v8958_v49, %v8957_v39  ;;  %v8972_v56 = vrot.slane %v8971_v44, 1  ;;  %v8964_v42 = vadd.f32 %v8963_v45, %v8962_v4  ;;  %v8977_v25 = vrot.slane %v8976_v10, 2 }
0x1428   :  { %9266 = vrcp.f32 %v8959_v28  ;;  %v8973_v9 = vadd.f32 %v8972_v56, %v8971_v44  ;;  %v8965_v57 = vrot.slane %v8964_v42, 1  ;;  %v8978_v6 = vadd.f32 %v8977_v25, %v8976_v10 }
0x142a   :  { %9268 = vrcp.f32 %v8973_v9  ;;  %v8966_v13 = vadd.f32 %v8965_v57, %v8964_v42  ;;  %v8979_v35 = vrot.slane %v8978_v6, 1 }
0x142c   :  { %9270 = vrcp.f32 %v8966_v13  ;;  %v8980_v24 = vadd.f32 %v8979_v35, %v8978_v6 }
0x142e   :  { %9272 = vrcp.f32 %v8980_v24 }
0x1432   :  { %v9267_v54 = vpop.eup %9266 }
0x1433   :  { %v8982_v20 = vmul.f32 %v9267_v54, %v9251_v38  ;;  %v8989_v43 = vmul.f32 %v9267_v54, %v9253_v7 }
0x1434   :  { %v9269_v0 = vpop.eup %9268 }
0x1435   :  { %8993 = vst [vmem:[#allocation13] sm:$0xff] %v8982_v20  ;;  %8997 = vst [vmem:[#allocation13 + $0x20] sm:$0xff] %v8989_v43  ;;  %v8986_v5 = vmul.f32 %v9269_v0, %v9255_v29  ;;  %v8991_v19 = vmul.f32 %v9269_v0, %v9257_v58 }
0x1436   :  { %v9271_v55 = vpop.eup %9270 }
0x1437   :  { %8995 = vst [vmem:[#allocation13 + $0x10] sm:$0xff] %v8986_v5  ;;  %8999 = vst [vmem:[#allocation13 + $0x30] sm:$0xff] %v8991_v19  ;;  %v8984_v15 = vmul.f32 %v9271_v55, %v9259_v27  ;;  %v8990_v51 = vmul.f32 %v9271_v55, %v9261_v8 }
0x1438   :  { %v9273_v2 = vpop.eup %9272 }
0x1439   :  { %8994 = vst [vmem:[#allocation13 + $0x8] sm:$0xff] %v8984_v15  ;;  %8998 = vst [vmem:[#allocation13 + $0x28] sm:$0xff] %v8990_v51  ;;  %v8988_v11 = vmul.f32 %v9273_v2, %v9263_v52  ;;  %v8992_v37 = vmul.f32 %v9273_v2, %v9265_v47 }
0x143b   :  { %8996 = vst [vmem:[#allocation13 + $0x18] sm:$0xff] %v8988_v11  ;;  %9000 = vst [vmem:[#allocation13 + $0x38] sm:$0xff] %v8992_v37 }
0x143c   :  { %9351 = shalt.err (!%p9348_p0)
}
0x143d   :  { %s9352_s1 = scalar_lea.hbm %s13300_s7, 1024 }
0x143e   :  { %p9353_p1 = scmp.ne.s32.totalorder %s13300_s7, %s9352_s1  ;;  %p9356_p2 = scmp.lt.u32.totalorder %s9352_s1, %s13300_s7 }
0x1440   :  { %p9358_p3 = pnand %p9356_p2, %p9353_p1 }
0x1442   :  { %9361 = shalt.err (!%p9358_p3)
}
0x1443   :  { %9012 = dma.vmem_to_hbm [thread:$0]  %s9007_s13, 1024, %s13300_s7, [#allocation9], %s9381_s0, %s9381_s0, %s9382_s27  }
0x1444   :  { %9374 = dma.done.wait [#allocation9], 1024  }
0x1445   :  { %9375 = vsyncadd [#allocation9], 4294966272 }
0x1446   :  { %9016 = vsyncpa [#allocation8], 1 }
0x1447   :  { %9017 = vsyncpa [#allocation11], 1 }
0x1448   :  { %9018 = vsyncpa [#allocation9], 1 }
0x1449   :  { %9019 = vsyncmov [#allocation6] }
0x144c   :  { %s9020_s11 = vpop.sfrf %9019 }
0x144d   :  { %p9064_p4 = scmp.ne.s32.totalorder %s9020_s11, 0 }
0x144f   :  { %9024 = shalt.err (%p9064_p4)  }
0x1450   :  { %9026 = vsyncmov [#allocation6 + $0x1] }
0x1453   :  { %s9027_s12 = vpop.sfrf %9026 }
0x1454   :  { %p9065_p5 = scmp.ne.s32.totalorder %s9027_s12, 0 }
0x1456   :  { %9031 = shalt.err (%p9065_p5)  }
0x1457   :  { %9033 = vsyncmov [#allocation6 + $0x2] }
0x145a   :  { %s9034_s15 = vpop.sfrf %9033 }
0x145b   :  { %p9066_p6 = scmp.ne.s32.totalorder %s9034_s15, 0 }
0x145d   :  { %9038 = shalt.err (%p9066_p6)  }
0x145e   :  { %9040 = vsyncmov [#allocation6 + $0x3] }
0x1461   :  { %s9041_s4 = vpop.sfrf %9040 }
0x1462   :  { %p9067_p7 = scmp.ne.s32.totalorder %s9041_s4, 0 }
0x1464   :  { %9045 = shalt.err (%p9067_p7)  }

</bundles_post_ra>
